<compile_context>
chip_gen: v5e
topology: v5e:2x2
jax: 0.10.0
libtpu: 0.0.40
codegen_flags: <defaults>
</compile_context>

<pallas_src>
import jax
import jax.numpy as jnp
from jax.experimental import pallas as pl
from jax.experimental.pallas import tpu as pltpu

EPS = 1e-5


def _f3up_kernel(xp_ref, w1_ref, gamma_ref, beta_ref, w2_ref, out_ref, ypad_ref):
    """xp_ref:  (N, H+2, W+2, 16)  spatially pre-padded input (NHWC)
       w1_ref:  (144, 16)          conv1 weight, row = kh*48 + kw*16 + cin
       gamma_ref/beta_ref: (1, 16) BatchNorm affine parameters
       w2_ref:  (64, 48)           fused deconv block weight,
                                   K blocks = [y | y(i+1,j) | y(i,j+1) | y(i+1,j+1)],
                                   N blocks = [ee | eo | oe | oo] (12 each)
       out_ref: (N, H, W, 48)      the 4 parity planes packed along channels
       ypad_ref: VMEM scratch (N, H+1, W+1, 16), zero halo for the deconv."""
    N, Hp, Wp, Ci = xp_ref.shape
    H, W = Hp - 2, Wp - 2
    C1 = w1_ref.shape[-1]        # 16
    Co = w2_ref.shape[-1]        # 48 = 4 * 12
    M = N * H * W
    f32 = jnp.float32

    # ---- Conv2d(16,16,3,1,1): single im2col matmul, K = 9*16 = 144 ----
    patches = jnp.concatenate(
        [xp_ref[:, kh:kh + H, kw:kw + W, :]
         for kh in range(3) for kw in range(3)],
        axis=-1).reshape(M, 9 * Ci)
    acc = jnp.dot(patches, w1_ref[...], preferred_element_type=f32)   # (M, 16)

    # ---- BatchNorm2d(16): batch stats in one pass, fused scale/shift ----
    inv_m = 1.0 / M
    mean = jnp.sum(acc, axis=0, keepdims=True) * inv_m                # (1, 16)
    var = jnp.sum(acc * acc, axis=0, keepdims=True) * inv_m - mean * mean
    scale = gamma_ref[...] * jax.lax.rsqrt(var + EPS)
    shift = beta_ref[...] - mean * scale
    y = acc * scale + shift

    # ---- ELU(alpha=1) ----
    y = jnp.where(y > 0, y, jnp.exp(jnp.minimum(y, 0.0)) - 1.0)

    # ---- zero-haloed scratch: store ELU output once, slice shifted views ----
    ypad_ref[...] = jnp.zeros((N, H + 1, W + 1, C1), f32)
    ypad_ref[:, 0:H, 0:W, :] = y.reshape(N, H, W, C1)

    # ---- ConvTranspose2d(16,12,3,s=2,p=1,op=1): one fused (M,64)@(64,48) ----
    p2 = jnp.concatenate(
        [ypad_ref[:, 0:H, 0:W, :],            # y[i,   j  ]
         ypad_ref[:, 1:H + 1, 0:W, :],        # y[i+1, j  ]   (0 past edge)
         ypad_ref[:, 0:H, 1:W + 1, :],        # y[i,   j+1]
         ypad_ref[:, 1:H + 1, 1:W + 1, :]],   # y[i+1, j+1]
        axis=-1).reshape(M, 4 * C1)
    out = jnp.dot(p2, w2_ref[...], preferred_element_type=f32)        # (M, 48)
    out_ref[...] = out.reshape(N, H, W, Co)


@jax.jit
def f3_up_forward(x_nchw, w1_hwio, gamma, beta, w2_hwio):
    """x_nchw: (N, 16, H, W); w1_hwio: (3,3,16,16) [kh,kw,cin,cout];
       w2_hwio: (3,3,16,12) [kh,kw,cin,cout] of the ConvTranspose2d weight.
       Returns (N, 12, 2H, 2W)."""
    N, C, H, W = x_nchw.shape
    C1 = w1_hwio.shape[-1]       # 16
    C2 = w2_hwio.shape[-1]       # 12

    x = jnp.transpose(x_nchw, (0, 2, 3, 1)).astype(jnp.float32)        # NHWC
    xp = jnp.pad(x, ((0, 0), (1, 1), (1, 1), (0, 0)))                  # conv1 pad=1
    w1 = w1_hwio.astype(jnp.float32).reshape(9 * C, C1)                # (144, 16)
    g = gamma.reshape(1, C1).astype(jnp.float32)
    b = beta.reshape(1, C1).astype(jnp.float32)

    # Fused deconv block weight (64, 48).
    # K blocks: 0=y[i,j], 1=y[i+1,j], 2=y[i,j+1], 3=y[i+1,j+1]
    # N blocks: 0=out[2i,2j](ee), 1=out[2i,2j+1](eo), 2=out[2i+1,2j](oe), 3=oo
    Wt = w2_hwio.astype(jnp.float32)                                   # (3,3,16,12)
    blk = jnp.zeros((4, 4, C1, C2), jnp.float32)
    blk = blk.at[0, 0].set(Wt[1, 1])                                   # ee
    blk = blk.at[0, 1].set(Wt[1, 2])                                   # eo
    blk = blk.at[2, 1].set(Wt[1, 0])
    blk = blk.at[0, 2].set(Wt[2, 1])                                   # oe
    blk = blk.at[1, 2].set(Wt[0, 1])
    blk = blk.at[0, 3].set(Wt[2, 2])                                   # oo
    blk = blk.at[1, 3].set(Wt[0, 2])
    blk = blk.at[2, 3].set(Wt[2, 0])
    blk = blk.at[3, 3].set(Wt[0, 0])
    w2b = jnp.transpose(blk, (0, 2, 1, 3)).reshape(4 * C1, 4 * C2)     # (64, 48)

    def full_spec(shape):
        return pl.BlockSpec(shape, lambda i, s=shape: (0,) * len(s))

    out48 = pl.pallas_call(
        _f3up_kernel,
        out_shape=jax.ShapeDtypeStruct((N, H, W, 4 * C2), jnp.float32),
        grid=(1,),
        in_specs=[full_spec(xp.shape), full_spec(w1.shape), full_spec(g.shape),
                  full_spec(b.shape), full_spec(w2b.shape)],
        out_specs=full_spec((N, H, W, 4 * C2)),
        scratch_shapes=[pltpu.VMEM((N, H + 1, W + 1, C1), jnp.float32)],
        compiler_params=pltpu.CompilerParams(dimension_semantics=("arbitrary",)),
    )(xp, w1, g, b, w2b)

    # Parity interleave (single reshape + transpose + reshape of plain-JAX glue):
    # channel k = (a*2+b)*12 + c  ->  out[n, c, 2i+a, 2j+b]
    out = out48.reshape(N, H, W, 2, 2, C2)
    out = jnp.transpose(out, (0, 5, 1, 3, 2, 4))                       # (N,C2,H,2,W,2)
    return out.reshape(N, C2, 2 * H, 2 * W)


def f3_up_reference(x_nchw, w1_hwio, gamma, beta, w2_hwio):
    """Pure-JAX reference (lax convs) used only to sanity-check the kernel."""
    x = jnp.transpose(x_nchw, (0, 2, 3, 1)).astype(jnp.float32)
    y = jax.lax.conv_general_dilated(
        x, w1_hwio, window_strides=(1, 1), padding=((1, 1), (1, 1)),
        dimension_numbers=('NHWC', 'HWIO', 'NHWC'))
    mean = jnp.mean(y, axis=(0, 1, 2))
    var = jnp.mean((y - mean) ** 2, axis=(0, 1, 2))
    y = (y - mean) * gamma * jax.lax.rsqrt(var + EPS) + beta
    y = jnp.where(y > 0, y, jnp.exp(jnp.minimum(y, 0.0)) - 1.0)
    # ConvTranspose2d == lhs-dilated conv with the flipped kernel,
    # padding (k-1-p, k-1-p+output_padding) = (1, 2).
    w2_flip = w2_hwio[::-1, ::-1, :, :]
    out = jax.lax.conv_general_dilated(
        y, w2_flip, window_strides=(1, 1), padding=((1, 2), (1, 2)),
        lhs_dilation=(2, 2), dimension_numbers=('NHWC', 'HWIO', 'NHWC'))
    return jnp.transpose(out, (0, 3, 1, 2))


if __name__ == "__main__":
    key = jax.random.PRNGKey(0)
    k1, k2, k3, k4, k5 = jax.random.split(key, 5)

    N, Cin, H, W = 2, 16, 16, 16
    x = jax.random.normal(k1, (N, Cin, H, W), jnp.float32)
    # Deterministic synthetic parameters (shapes from the module's __init__).
    w1 = 0.1 * jax.random.normal(k2, (3, 3, 16, 16), jnp.float32)   # conv1 (HWIO)
    w2 = 0.1 * jax.random.normal(k3, (3, 3, 16, 12), jnp.float32)   # deconv (kh,kw,Cin,Cout)
    gamma = 1.0 + 0.1 * jax.random.normal(k4, (16,), jnp.float32)
    beta = 0.1 * jax.random.normal(k5, (16,), jnp.float32)

    out = f3_up_forward(x, w1, gamma, beta, w2)
    jax.block_until_ready(out)
    assert out.shape == (N, 12, 2 * H, 2 * W), out.shape

    ref = f3_up_reference(x, w1, gamma, beta, w2)
    err = float(jnp.max(jnp.abs(out - ref)))
    assert err < 1e-2, f"max abs err vs reference: {err}"

    print("KERNEL_OK")
</pallas_src>

<mosaic_0001>
module attributes {stable_mosaic.version = 11 : i64} {
  func.func @_f3up_kernel(%arg0: i32, %arg1: memref<2x18x18x16xf32, #tpu.memory_space<vmem>>, %arg2: memref<144x16xf32, #tpu.memory_space<vmem>>, %arg3: memref<1x16xf32, #tpu.memory_space<vmem>>, %arg4: memref<1x16xf32, #tpu.memory_space<vmem>>, %arg5: memref<64x48xf32, #tpu.memory_space<vmem>>, %arg6: memref<2x16x16x48xf32, #tpu.memory_space<vmem>>, %arg7: memref<2x17x17x16xf32, #tpu.memory_space<vmem>>) attributes {dimension_semantics = [#tpu.dimension_semantics<arbitrary>], iteration_bounds = array<i64: 1>, scalar_prefetch = 0 : i64, scratch_operands = 1 : i64, tpu.core_type = #tpu.core_type<tc>, window_params = [{pipeline_mode = #tpu.pipeline_mode<synchronous>, transform_indices = @transform_0, window_bounds = array<i64: 2, 18, 18, 16>}, {pipeline_mode = #tpu.pipeline_mode<synchronous>, transform_indices = @transform_1, window_bounds = array<i64: 144, 16>}, {pipeline_mode = #tpu.pipeline_mode<synchronous>, transform_indices = @transform_2, window_bounds = array<i64: 1, 16>}, {pipeline_mode = #tpu.pipeline_mode<synchronous>, transform_indices = @transform_3, window_bounds = array<i64: 1, 16>}, {pipeline_mode = #tpu.pipeline_mode<synchronous>, transform_indices = @transform_4, window_bounds = array<i64: 64, 48>}, {pipeline_mode = #tpu.pipeline_mode<synchronous>, transform_indices = @transform_5, window_bounds = array<i64: 2, 16, 16, 48>}]} {
    %c0 = arith.constant 0 : index
    %c0_0 = arith.constant 0 : index
    %c0_1 = arith.constant 0 : index
    %c0_2 = arith.constant 0 : index
    %0 = vector.load %arg1[%c0, %c0_0, %c0_1, %c0_2] : memref<2x18x18x16xf32, #tpu.memory_space<vmem>>, vector<2x16x16x16xf32>
    %c0_3 = arith.constant 0 : index
    %c0_4 = arith.constant 0 : index
    %c1 = arith.constant 1 : index
    %c0_5 = arith.constant 0 : index
    %1 = vector.load %arg1[%c0_3, %c0_4, %c1, %c0_5] : memref<2x18x18x16xf32, #tpu.memory_space<vmem>>, vector<2x16x16x16xf32>
    %c0_6 = arith.constant 0 : index
    %c0_7 = arith.constant 0 : index
    %c2 = arith.constant 2 : index
    %c0_8 = arith.constant 0 : index
    %2 = vector.load %arg1[%c0_6, %c0_7, %c2, %c0_8] : memref<2x18x18x16xf32, #tpu.memory_space<vmem>>, vector<2x16x16x16xf32>
    %c0_9 = arith.constant 0 : index
    %c1_10 = arith.constant 1 : index
    %c0_11 = arith.constant 0 : index
    %c0_12 = arith.constant 0 : index
    %3 = vector.load %arg1[%c0_9, %c1_10, %c0_11, %c0_12] : memref<2x18x18x16xf32, #tpu.memory_space<vmem>>, vector<2x16x16x16xf32>
    %c0_13 = arith.constant 0 : index
    %c1_14 = arith.constant 1 : index
    %c1_15 = arith.constant 1 : index
    %c0_16 = arith.constant 0 : index
    %4 = vector.load %arg1[%c0_13, %c1_14, %c1_15, %c0_16] : memref<2x18x18x16xf32, #tpu.memory_space<vmem>>, vector<2x16x16x16xf32>
    %c0_17 = arith.constant 0 : index
    %c1_18 = arith.constant 1 : index
    %c2_19 = arith.constant 2 : index
    %c0_20 = arith.constant 0 : index
    %5 = vector.load %arg1[%c0_17, %c1_18, %c2_19, %c0_20] : memref<2x18x18x16xf32, #tpu.memory_space<vmem>>, vector<2x16x16x16xf32>
    %c0_21 = arith.constant 0 : index
    %c2_22 = arith.constant 2 : index
    %c0_23 = arith.constant 0 : index
    %c0_24 = arith.constant 0 : index
    %6 = vector.load %arg1[%c0_21, %c2_22, %c0_23, %c0_24] : memref<2x18x18x16xf32, #tpu.memory_space<vmem>>, vector<2x16x16x16xf32>
    %c0_25 = arith.constant 0 : index
    %c2_26 = arith.constant 2 : index
    %c1_27 = arith.constant 1 : index
    %c0_28 = arith.constant 0 : index
    %7 = vector.load %arg1[%c0_25, %c2_26, %c1_27, %c0_28] : memref<2x18x18x16xf32, #tpu.memory_space<vmem>>, vector<2x16x16x16xf32>
    %c0_29 = arith.constant 0 : index
    %c2_30 = arith.constant 2 : index
    %c2_31 = arith.constant 2 : index
    %c0_32 = arith.constant 0 : index
    %8 = vector.load %arg1[%c0_29, %c2_30, %c2_31, %c0_32] : memref<2x18x18x16xf32, #tpu.memory_space<vmem>>, vector<2x16x16x16xf32>
    %9 = tpu.concatenate %0, %1, %2, %3, %4, %5, %6, %7, %8 in 3 : vector<2x16x16x16xf32>, vector<2x16x16x16xf32>, vector<2x16x16x16xf32>, vector<2x16x16x16xf32>, vector<2x16x16x16xf32>, vector<2x16x16x16xf32>, vector<2x16x16x16xf32>, vector<2x16x16x16xf32>, vector<2x16x16x16xf32> -> vector<2x16x16x144xf32>
    %10 = vector.shape_cast %9 : vector<2x16x16x144xf32> to vector<512x144xf32>
    %c0_33 = arith.constant 0 : index
    %c0_34 = arith.constant 0 : index
    %11 = vector.load %arg2[%c0_33, %c0_34] : memref<144x16xf32, #tpu.memory_space<vmem>>, vector<144x16xf32>
    %cst = arith.constant dense<0.000000e+00> : vector<512x16xf32>
    %12 = tpu.matmul %10, %11, %cst {dimension_numbers = #tpu.dot_dimension_numbers<[1], [0], [0], [1], [0, 0, 1, 1], [], []>} : vector<512x144xf32>, vector<144x16xf32>, vector<512x16xf32> -> vector<512x16xf32>
    %cst_35 = arith.constant dense<0.000000e+00> : vector<16xf32>
    %13 = vector.multi_reduction <add>, %12, %cst_35 [0] : vector<512x16xf32> to vector<16xf32>
    %14 = vector.shape_cast %13 : vector<16xf32> to vector<1x16xf32>
    %cst_36 = arith.constant 0.001953125 : f32
    %15 = vector.broadcast %cst_36 : f32 to vector<1x16xf32>
    %16 = arith.mulf %14, %15 : vector<1x16xf32>
    %17 = arith.mulf %12, %12 : vector<512x16xf32>
    %cst_37 = arith.constant dense<0.000000e+00> : vector<16xf32>
    %18 = vector.multi_reduction <add>, %17, %cst_37 [0] : vector<512x16xf32> to vector<16xf32>
    %19 = vector.shape_cast %18 : vector<16xf32> to vector<1x16xf32>
    %cst_38 = arith.constant 0.001953125 : f32
    %20 = vector.broadcast %cst_38 : f32 to vector<1x16xf32>
    %21 = arith.mulf %19, %20 : vector<1x16xf32>
    %22 = arith.mulf %16, %16 : vector<1x16xf32>
    %23 = arith.subf %21, %22 : vector<1x16xf32>
    %c0_39 = arith.constant 0 : index
    %c0_40 = arith.constant 0 : index
    %24 = vector.load %arg3[%c0_39, %c0_40] : memref<1x16xf32, #tpu.memory_space<vmem>>, vector<1x16xf32>
    %cst_41 = arith.constant 9.99999974E-6 : f32
    %25 = vector.broadcast %cst_41 : f32 to vector<1x16xf32>
    %26 = arith.addf %23, %25 : vector<1x16xf32>
    %27 = math.rsqrt %26 : vector<1x16xf32>
    %28 = arith.mulf %24, %27 : vector<1x16xf32>
    %c0_42 = arith.constant 0 : index
    %c0_43 = arith.constant 0 : index
    %29 = vector.load %arg4[%c0_42, %c0_43] : memref<1x16xf32, #tpu.memory_space<vmem>>, vector<1x16xf32>
    %30 = arith.mulf %16, %28 : vector<1x16xf32>
    %31 = arith.subf %29, %30 : vector<1x16xf32>
    %32 = vector.broadcast %28 : vector<1x16xf32> to vector<512x16xf32>
    %33 = arith.mulf %12, %32 : vector<512x16xf32>
    %34 = vector.broadcast %31 : vector<1x16xf32> to vector<512x16xf32>
    %35 = arith.addf %33, %34 : vector<512x16xf32>
    %cst_44 = arith.constant 0.000000e+00 : f32
    %36 = vector.broadcast %cst_44 : f32 to vector<512x16xf32>
    %37 = arith.cmpf ogt, %35, %36 : vector<512x16xf32>
    %cst_45 = arith.constant 0.000000e+00 : f32
    %38 = vector.broadcast %cst_45 : f32 to vector<512x16xf32>
    %39 = arith.minimumf %35, %38 : vector<512x16xf32>
    %40 = math.exp %39 : vector<512x16xf32>
    %cst_46 = arith.constant 1.000000e+00 : f32
    %41 = vector.broadcast %cst_46 : f32 to vector<512x16xf32>
    %42 = arith.subf %40, %41 : vector<512x16xf32>
    %43 = arith.select %37, %35, %42 : vector<512x16xi1>, vector<512x16xf32>
    %cst_47 = arith.constant 0.000000e+00 : f32
    %44 = vector.broadcast %cst_47 : f32 to vector<2x17x17x16xf32>
    %c0_48 = arith.constant 0 : index
    %c0_49 = arith.constant 0 : index
    %c0_50 = arith.constant 0 : index
    %c0_51 = arith.constant 0 : index
    %45 = vector.load %arg7[%c0_48, %c0_49, %c0_50, %c0_51] : memref<2x17x17x16xf32, #tpu.memory_space<vmem>>, vector<2x17x17x16xf32>
    tpu.vector_store %arg7[%c0_48, %c0_49, %c0_50, %c0_51], %44 {strides = array<i32>} : memref<2x17x17x16xf32, #tpu.memory_space<vmem>>, vector<2x17x17x16xf32>,
    %46 = vector.shape_cast %43 : vector<512x16xf32> to vector<2x16x16x16xf32>
    %c0_52 = arith.constant 0 : index
    %c0_53 = arith.constant 0 : index
    %c0_54 = arith.constant 0 : index
    %c0_55 = arith.constant 0 : index
    %47 = vector.load %arg7[%c0_52, %c0_53, %c0_54, %c0_55] : memref<2x17x17x16xf32, #tpu.memory_space<vmem>>, vector<2x16x16x16xf32>
    tpu.vector_store %arg7[%c0_52, %c0_53, %c0_54, %c0_55], %46 {strides = array<i32>} : memref<2x17x17x16xf32, #tpu.memory_space<vmem>>, vector<2x16x16x16xf32>,
    %c0_56 = arith.constant 0 : index
    %c0_57 = arith.constant 0 : index
    %c0_58 = arith.constant 0 : index
    %c0_59 = arith.constant 0 : index
    %48 = vector.load %arg7[%c0_56, %c0_57, %c0_58, %c0_59] : memref<2x17x17x16xf32, #tpu.memory_space<vmem>>, vector<2x16x16x16xf32>
    %c0_60 = arith.constant 0 : index
    %c1_61 = arith.constant 1 : index
    %c0_62 = arith.constant 0 : index
    %c0_63 = arith.constant 0 : index
    %49 = vector.load %arg7[%c0_60, %c1_61, %c0_62, %c0_63] : memref<2x17x17x16xf32, #tpu.memory_space<vmem>>, vector<2x16x16x16xf32>
    %c0_64 = arith.constant 0 : index
    %c0_65 = arith.constant 0 : index
    %c1_66 = arith.constant 1 : index
    %c0_67 = arith.constant 0 : index
    %50 = vector.load %arg7[%c0_64, %c0_65, %c1_66, %c0_67] : memref<2x17x17x16xf32, #tpu.memory_space<vmem>>, vector<2x16x16x16xf32>
    %c0_68 = arith.constant 0 : index
    %c1_69 = arith.constant 1 : index
    %c1_70 = arith.constant 1 : index
    %c0_71 = arith.constant 0 : index
    %51 = vector.load %arg7[%c0_68, %c1_69, %c1_70, %c0_71] : memref<2x17x17x16xf32, #tpu.memory_space<vmem>>, vector<2x16x16x16xf32>
    %52 = tpu.concatenate %48, %49, %50, %51 in 3 : vector<2x16x16x16xf32>, vector<2x16x16x16xf32>, vector<2x16x16x16xf32>, vector<2x16x16x16xf32> -> vector<2x16x16x64xf32>
    %53 = vector.shape_cast %52 : vector<2x16x16x64xf32> to vector<512x64xf32>
    %c0_72 = arith.constant 0 : index
    %c0_73 = arith.constant 0 : index
    %54 = vector.load %arg5[%c0_72, %c0_73] : memref<64x48xf32, #tpu.memory_space<vmem>>, vector<64x48xf32>
    %cst_74 = arith.constant dense<0.000000e+00> : vector<512x48xf32>
    %55 = tpu.matmul %53, %54, %cst_74 {dimension_numbers = #tpu.dot_dimension_numbers<[1], [0], [0], [1], [0, 0, 1, 1], [], []>} : vector<512x64xf32>, vector<64x48xf32>, vector<512x48xf32> -> vector<512x48xf32>
    %56 = vector.shape_cast %55 : vector<512x48xf32> to vector<2x16x16x48xf32>
    %c0_75 = arith.constant 0 : index
    %c0_76 = arith.constant 0 : index
    %c0_77 = arith.constant 0 : index
    %c0_78 = arith.constant 0 : index
    %57 = vector.load %arg6[%c0_75, %c0_76, %c0_77, %c0_78] : memref<2x16x16x48xf32, #tpu.memory_space<vmem>>, vector<2x16x16x48xf32>
    tpu.vector_store %arg6[%c0_75, %c0_76, %c0_77, %c0_78], %56 {strides = array<i32>} : memref<2x16x16x48xf32, #tpu.memory_space<vmem>>, vector<2x16x16x48xf32>,
    return
  }
  func.func @transform_0(%arg0: i32) -> (i32, i32, i32, i32) {
    %c0_i32 = arith.constant 0 : i32
    %c0_i32_0 = arith.constant 0 : i32
    %c0_i32_1 = arith.constant 0 : i32
    %c0_i32_2 = arith.constant 0 : i32
    %c0_i32_3 = arith.constant 0 : i32
    return %c0_i32, %c0_i32_0, %c0_i32_1, %c0_i32_2 : i32, i32, i32, i32
  }
  func.func @transform_1(%arg0: i32) -> (i32, i32) {
    %c0_i32 = arith.constant 0 : i32
    %c0_i32_0 = arith.constant 0 : i32
    %c0_i32_1 = arith.constant 0 : i32
    return %c0_i32, %c0_i32_0 : i32, i32
  }
  func.func @transform_2(%arg0: i32) -> (i32, i32) {
    %c0_i32 = arith.constant 0 : i32
    %c0_i32_0 = arith.constant 0 : i32
    %c0_i32_1 = arith.constant 0 : i32
    return %c0_i32, %c0_i32_0 : i32, i32
  }
  func.func @transform_3(%arg0: i32) -> (i32, i32) {
    %c0_i32 = arith.constant 0 : i32
    %c0_i32_0 = arith.constant 0 : i32
    %c0_i32_1 = arith.constant 0 : i32
    return %c0_i32, %c0_i32_0 : i32, i32
  }
  func.func @transform_4(%arg0: i32) -> (i32, i32) {
    %c0_i32 = arith.constant 0 : i32
    %c0_i32_0 = arith.constant 0 : i32
    %c0_i32_1 = arith.constant 0 : i32
    return %c0_i32, %c0_i32_0 : i32, i32
  }
  func.func @transform_5(%arg0: i32) -> (i32, i32, i32, i32) {
    %c0_i32 = arith.constant 0 : i32
    %c0_i32_0 = arith.constant 0 : i32
    %c0_i32_1 = arith.constant 0 : i32
    %c0_i32_2 = arith.constant 0 : i32
    %c0_i32_3 = arith.constant 0 : i32
    return %c0_i32, %c0_i32_0, %c0_i32_1, %c0_i32_2 : i32, i32, i32, i32
  }
}

</mosaic_0001>

<bundles_post_ra>
// kernel: f3_up_forward.1
= control target key start
LH: loop header
LB: loop body
LE: loop exit
PB: predicated region body
PF: predicated region fallthrough
CT: control target
= control target key end

     0   :  { %s8110_s30 = smov 16   ;;  %s8111_s6 = smov 32   ;;  %vm2390_vm0 = vcmask 130048   ;;  %vm2455_vm1 = vcmask 261120   ;;  %vm2520_vm2 = vcmask 392192   ;;  %vm14738_vm3 = vcmask 523264   ;;  %s14569_s0 = inlined_call_operand.vmem [shape: f32[2,18,18,16], index: 0, kind: input, shape index: {}]   ;;  %s14570_s1 = inlined_call_operand.vmem [shape: f32[144,16], index: 1, kind: input, shape index: {}]   ;;  %s14571_s2 = inlined_call_operand.vmem [shape: f32[1,16], index: 2, kind: input, shape index: {}]   ;;  %s14572_s3 = inlined_call_operand.vmem [shape: f32[1,16], index: 3, kind: input, shape index: {}]   ;;  %s14573_s4 = inlined_call_operand.vmem [shape: f32[64,48], index: 4, kind: input, shape index: {}]   ;;  %s14574_s5 = inlined_call_operand.vmem [shape: f32[2,16,16,48], index: 5, kind: output, shape index: {}]  }
   0x1   :  { %v92_v0 = vld [vmem:[%s14569_s0 + $0x61] sm:$0xff]  ;;  %v93_v1 = vld [vmem:[%s14569_s0 + $0x69] sm:$0xff]  ;;  %v88_v2 = vld [vmem:[%s14569_s0 + $0x31] sm:$0xff]  ;;  %s8112_s28 = smov 48   ;;  %s8113_s20 = smov 64   ;;  %vm2650_vm4 = vcmask 654336  }
   0x2   :  { %v6832_v3 = vpack.i.bf16 %v93_v1, %v92_v0  ;;  %v89_v4 = vld [vmem:[%s14569_s0 + $0x39] sm:$0xff]  ;;  %v84_v5 = vld [vmem:[%s14569_s0 + $0x1] sm:$0xff]  ;;  %v85_v6 = vld [vmem:[%s14569_s0 + $0x9] sm:$0xff]  ;;  %s8114_s24 = smov 112   ;;  %s8115_s25 = smov 96   ;;  %vm2715_vm5 = vcmask 785408  }
   0x3   :  { %v6822_v7 = vpack.i.bf16 %v89_v4, %v88_v2  ;;  %v6812_v8 = vpack.i.bf16 %v85_v6, %v84_v5  ;;  %v94_v9 = vld [vmem:[%s14569_s0 + $0x79] sm:$0xff]  ;;  %v95_v10 = vld [vmem:[%s14569_s0 + $0x81] sm:$0xff]  ;;  %v90_v11 = vld [vmem:[%s14569_s0 + $0x49] sm:$0xff]  ;;  %s8116_s26 = smov 80   ;;  %vm2780_vm6 = vcmask 916480  }
   0x4   :  { %6833 = vrot.lane.b32.xlu2 %v6832_v3, %s8110_s30  ;;  %v91_v12 = vld [vmem:[%s14569_s0 + $0x51] sm:$0xff]  ;;  %v86_v13 = vld [vmem:[%s14569_s0 + $0x19] sm:$0xff]  ;;  %v87_v14 = vld [vmem:[%s14569_s0 + $0x21] sm:$0xff]  ;;  %v6837_v15 = vpack.i.bf16 %v95_v10, %v94_v9 }
   0x5   :  { %6823 = vrot.lane.b32.xlu1 %v6822_v7, %s8110_s30  ;;  %6813 = vrot.lane.b32.xlu0 %v6812_v8, %s8110_s30  ;;  %v6827_v16 = vpack.i.bf16 %v91_v12, %v90_v11  ;;  %v6817_v17 = vpack.i.bf16 %v87_v14, %v86_v13  ;;  %v100_v18 = vld [vmem:[%s14569_s0 + $0xc1] sm:$0xff]  ;;  %v101_v19 = vld [vmem:[%s14569_s0 + $0xc9] sm:$0xff] }
   0x6   :  { %v98_v20 = vld [vmem:[%s14569_s0 + $0xa9] sm:$0xff]  ;;  %v99_v21 = vld [vmem:[%s14569_s0 + $0xb1] sm:$0xff]  ;;  %v97_v23 = vld [vmem:[%s14569_s0 + $0x99] sm:$0xff]  ;;  %v6852_v24 = vpack.i.bf16 %v101_v19, %v100_v18 }
   0x7   :  { %v96_v22 = vld [vmem:[%s14569_s0 + $0x91] sm:$0xff]  ;;  %v6847_v25 = vpack.i.bf16 %v99_v21, %v98_v20  ;;  %v106_v27 = vld [vmem:[%s14569_s0 + $0x109] sm:$0xff]  ;;  %v105_v30 = vld [vmem:[%s14569_s0 + $0xf9] sm:$0xff] }
   0x8   :  { %v6842_v26 = vpack.i.bf16 %v97_v23, %v96_v22  ;;  %v107_v28 = vld [vmem:[%s14569_s0 + $0x111] sm:$0xff]  ;;  %v102_v31 = vld [vmem:[%s14569_s0 + $0xd9] sm:$0xff]  ;;  %v103_v32 = vld [vmem:[%s14569_s0 + $0xe1] sm:$0xff] }
   0x9   :  { %v104_v29 = vld [vmem:[%s14569_s0 + $0xf1] sm:$0xff]  ;;  %v6867_v33 = vpack.i.bf16 %v107_v28, %v106_v27  ;;  %v6857_v35 = vpack.i.bf16 %v103_v32, %v102_v31  ;;  %v113_v37 = vld [vmem:[%s14569_s0 + $0x159] sm:$0xff]  ;;  %v111_v39 = vld [vmem:[%s14569_s0 + $0x141] sm:$0xff] }
   0xa   :  { %v6862_v34 = vpack.i.bf16 %v105_v30, %v104_v29  ;;  %v112_v36 = vld [vmem:[%s14569_s0 + $0x151] sm:$0xff]  ;;  %v110_v38 = vld [vmem:[%s14569_s0 + $0x139] sm:$0xff]  ;;  %v108_v40 = vld [vmem:[%s14569_s0 + $0x121] sm:$0xff] }
   0xb   :  { %v109_v41 = vld [vmem:[%s14569_s0 + $0x129] sm:$0xff]  ;;  %v6882_v42 = vpack.i.bf16 %v113_v37, %v112_v36  ;;  %v6877_v43 = vpack.i.bf16 %v111_v39, %v110_v38  ;;  %v119_v46 = vld [vmem:[%s14569_s0 + $0x1d1] sm:$0xff]  ;;  %v117_v48 = vld [vmem:[%s14569_s0 + $0x1b9] sm:$0xff] }
   0xc   :  { %6838 = vrot.lane.b32.xlu2 %v6837_v15, %s8110_s30  ;;  %v6872_v44 = vpack.i.bf16 %v109_v41, %v108_v40  ;;  %v118_v45 = vld [vmem:[%s14569_s0 + $0x1c9] sm:$0xff]  ;;  %v116_v47 = vld [vmem:[%s14569_s0 + $0x1b1] sm:$0xff]  ;;  %v125_v55 = vld [vmem:[%s14569_s0 + $0x219] sm:$0xff] }
   0xd   :  { %6828 = vrot.lane.b32.xlu1 %v6827_v16, %s8110_s30  ;;  %6818 = vrot.lane.b32.xlu0 %v6817_v17, %s8110_s30  ;;  %v114_v49 = vld [vmem:[%s14569_s0 + $0x169] sm:$0xff]  ;;  %v115_v50 = vld [vmem:[%s14569_s0 + $0x171] sm:$0xff]  ;;  %v6897_v51 = vpack.i.bf16 %v119_v46, %v118_v45  ;;  %v6892_v52 = vpack.i.bf16 %v117_v48, %v116_v47 }
   0xe   :  { %v6887_v53 = vpack.i.bf16 %v115_v50, %v114_v49  ;;  %v124_v54 = vld [vmem:[%s14569_s0 + $0x211] sm:$0xff]  ;;  %v122_v56 = vld [vmem:[%s14569_s0 + $0x1f9] sm:$0xff]  ;;  %v123_v57 = vld [vmem:[%s14569_s0 + $0x201] sm:$0xff] }
   0xf   :  { %v120_v58 = vld [vmem:[%s14569_s0 + $0x1e1] sm:$0xff]  ;;  %v121_v59 = vld [vmem:[%s14569_s0 + $0x1e9] sm:$0xff]  ;;  %v6912_v60 = vpack.i.bf16 %v125_v55, %v124_v54  ;;  %v6907_v61 = vpack.i.bf16 %v123_v57, %v122_v56  ;;  %v130_v63 = vld [vmem:[%s14569_s0 + $0x259] sm:$0xff] }
  0x10   :  { %v6902_v62 = vpack.i.bf16 %v121_v59, %v120_v58  ;;  %v131_v0 = vld [vmem:[%s14569_s0 + $0x261] sm:$0xff]  ;;  %v129_v2 = vld [vmem:[%s14569_s0 + $0x249] sm:$0xff]  ;;  %v127_v4 = vld [vmem:[%s14569_s0 + $0x231] sm:$0xff] }
  0x11   :  { %v128_v1 = vld [vmem:[%s14569_s0 + $0x241] sm:$0xff]  ;;  %v126_v3 = vld [vmem:[%s14569_s0 + $0x229] sm:$0xff]  ;;  %v6927_v5 = vpack.i.bf16 %v131_v0, %v130_v63  ;;  %v135_v11 = vld [vmem:[%s14569_s0 + $0x291] sm:$0xff] }
  0x12   :  { %v6922_v6 = vpack.i.bf16 %v129_v2, %v128_v1  ;;  %v6917_v7 = vpack.i.bf16 %v127_v4, %v126_v3  ;;  %v136_v8 = vld [vmem:[%s14569_s0 + $0x2a1] sm:$0xff]  ;;  %v137_v9 = vld [vmem:[%s14569_s0 + $0x2a9] sm:$0xff]  ;;  %v132_v12 = vld [vmem:[%s14569_s0 + $0x271] sm:$0xff] }
  0x13   :  { %v134_v10 = vld [vmem:[%s14569_s0 + $0x289] sm:$0xff]  ;;  %v133_v13 = vld [vmem:[%s14569_s0 + $0x279] sm:$0xff]  ;;  %v6942_v14 = vpack.i.bf16 %v137_v9, %v136_v8  ;;  %v143_v18 = vld [vmem:[%s14569_s0 + $0x2f1] sm:$0xff] }
  0x14   :  { %6853 = vrot.lane.b32.xlu2 %v6852_v24, %s8110_s30  ;;  %v6937_v15 = vpack.i.bf16 %v135_v11, %v134_v10  ;;  %v6932_v16 = vpack.i.bf16 %v133_v13, %v132_v12  ;;  %v142_v17 = vld [vmem:[%s14569_s0 + $0x2e9] sm:$0xff]  ;;  %v140_v19 = vld [vmem:[%s14569_s0 + $0x2d1] sm:$0xff]  ;;  %v141_v20 = vld [vmem:[%s14569_s0 + $0x2d9] sm:$0xff] }
  0x15   :  { %6848 = vrot.lane.b32.xlu1 %v6847_v25, %s8110_s30  ;;  %6843 = vrot.lane.b32.xlu0 %v6842_v26, %s8110_s30  ;;  %v138_v21 = vld [vmem:[%s14569_s0 + $0x2b9] sm:$0xff]  ;;  %v139_v22 = vld [vmem:[%s14569_s0 + $0x2c1] sm:$0xff]  ;;  %v6957_v23 = vpack.i.bf16 %v143_v18, %v142_v17  ;;  %v6952_v24 = vpack.i.bf16 %v141_v20, %v140_v19 }
  0x16   :  { %v6947_v25 = vpack.i.bf16 %v139_v22, %v138_v21  ;;  %v148_v26 = vld [vmem:[%s14569_s0 + $0x2] sm:$0xff]  ;;  %v149_v27 = vld [vmem:[%s14569_s0 + $0xa] sm:$0xff]  ;;  %v146_v28 = vld [vmem:[%s14569_s0 + $0x319] sm:$0xff] }
  0x17   :  { %v147_v29 = vld [vmem:[%s14569_s0 + $0x321] sm:$0xff]  ;;  %v145_v31 = vld [vmem:[%s14569_s0 + $0x309] sm:$0xff]  ;;  %v6972_v32 = vpack.i.bf16 %v149_v27, %v148_v26  ;;  %v8387_v36 = vld [vmem:[%s14569_s0 + $0x52] sm:$0xff] }
  0x18   :  { %v144_v30 = vld [vmem:[%s14569_s0 + $0x301] sm:$0xff]  ;;  %v8392_v37 = vld [vmem:[%s14569_s0 + $0x32] sm:$0xff]  ;;  %v8442_v50 = vld [vmem:[%s14569_s0 + $0x6a] sm:$0xff] }
  0x19   :  { %v8397_v38 = vld [vmem:[%s14569_s0 + $0x3a] sm:$0xff]  ;;  %v151_v40 = vld [vmem:[%s14569_s0 + $0x22] sm:$0xff]  ;;  %v165_v58 = vld [vmem:[%s14569_s0 + $0xca] sm:$0xff] }
  0x1a   :  { %v150_v39 = vld [vmem:[%s14569_s0 + $0x1a] sm:$0xff]  ;;  %v8432_v48 = vld [vmem:[%s14569_s0 + $0x82] sm:$0xff]  ;;  %v8470_v59 = vld [vmem:[%s14569_s0 + $0xaa] sm:$0xff] }
  0x1b   :  { %v8420_v45 = vld [vmem:[%s14569_s0 + $0x9a] sm:$0xff]  ;;  %v8437_v49 = vld [vmem:[%s14569_s0 + $0x62] sm:$0xff]  ;;  %v173_v1 = vld [vmem:[%s14569_s0 + $0x12a] sm:$0xff] }
  0x1c   :  { %6868 = vrot.lane.b32.xlu2 %v6867_v33, %s8110_s30  ;;  %v6967_v33 = vpack.i.bf16 %v147_v29, %v146_v28  ;;  %v8425_v46 = vld [vmem:[%s14569_s0 + $0x7a] sm:$0xff]  ;;  %v167_v55 = vld [vmem:[%s14569_s0 + $0xe2] sm:$0xff]  ;;  %v170_v2 = vld [vmem:[%s14569_s0 + $0x10a] sm:$0xff] }
  0x1d   :  { %6863 = vrot.lane.b32.xlu1 %v6862_v34, %s8110_s30  ;;  %6858 = vrot.lane.b32.xlu0 %v6857_v35, %s8110_s30  ;;  %v6962_v34 = vpack.i.bf16 %v145_v31, %v144_v30  ;;  %v8380_v35 = vld [vmem:[%s14569_s0 + $0x4a] sm:$0xff]  ;;  %v166_v54 = vld [vmem:[%s14569_s0 + $0xda] sm:$0xff] }
  0x1e   :  { %v6987_v41 = vpack.i.bf16 %v8387_v36, %v8380_v35  ;;  %v164_v56 = vld [vmem:[%s14569_s0 + $0xc2] sm:$0xff]  ;;  %v171_v4 = vld [vmem:[%s14569_s0 + $0x112] sm:$0xff]  ;;  %v178_v10 = vld [vmem:[%s14569_s0 + $0x16a] sm:$0xff] }
  0x1f   :  { %v172_v0 = vld [vmem:[%s14569_s0 + $0x122] sm:$0xff]  ;;  %v7027_v8 = vpack.i.bf16 %v171_v4, %v170_v2  ;;  %v179_v11 = vld [vmem:[%s14569_s0 + $0x172] sm:$0xff]  ;;  %v182_v26 = vld [vmem:[%s14569_s0 + $0x1ca] sm:$0xff] }
  0x20   :  { %v176_v12 = vld [vmem:[%s14569_s0 + $0x152] sm:$0xff]  ;;  %v2862_v19 = vld [vmem:[%s14570_s1 + $0x88] sm:$0xff]  ;;  %v7047_v20 = vpack.i.bf16 %v179_v11, %v178_v10  ;;  %v181_v30 = vld [vmem:[%s14569_s0 + $0x1ba] sm:$0xff] }
  0x21   :  { %3278 = vmatpush.msra.mxu1 %v2862_v19  ;;  %v183_v28 = vld [vmem:[%s14569_s0 + $0x1d2] sm:$0xff]  ;;  %v201_v11 = vld [vmem:[%s14569_s0 + $0x2aa] sm:$0xff] }
  0x22   :  { %v180_v29 = vld [vmem:[%s14569_s0 + $0x1b2] sm:$0xff] }
  0x24   :  { %6883 = vrot.lane.b32.xlu2 %v6882_v42, %s8110_s30  ;;  %v6982_v42 = vpack.i.bf16 %v8397_v38, %v8392_v37 }
  0x25   :  { %6878 = vrot.lane.b32.xlu1 %v6877_v43, %s8110_s30  ;;  %6873 = vrot.lane.b32.xlu0 %v6872_v44, %s8110_s30  ;;  %v6977_v43 = vpack.i.bf16 %v151_v40, %v150_v39  ;;  %v8413_v44 = vld [vmem:[%s14569_s0 + $0x92] sm:$0xff]  ;;  %v190_v39 = vld [vmem:[%s14569_s0 + $0x22a] sm:$0xff] }
  0x26   :  { %v191_v40 = vld [vmem:[%s14569_s0 + $0x232] sm:$0xff] }
  0x2c   :  { %6898 = vrot.lane.b32.xlu2 %v6897_v51, %s8110_s30  ;;  %v7002_v51 = vpack.i.bf16 %v8420_v45, %v8413_v44 }
  0x2d   :  { %6893 = vrot.lane.b32.xlu1 %v6892_v52, %s8110_s30  ;;  %6888 = vrot.lane.b32.xlu0 %v6887_v53, %s8110_s30  ;;  %v6997_v52 = vpack.i.bf16 %v8432_v48, %v8425_v46  ;;  %v6992_v53 = vpack.i.bf16 %v8442_v50, %v8437_v49 }
  0x34   :  { %6913 = vrot.lane.b32.xlu2 %v6912_v60, %s8110_s30  ;;  %v163_v60 = vld [vmem:[%s14569_s0 + $0xb2] sm:$0xff] }
  0x35   :  { %6908 = vrot.lane.b32.xlu1 %v6907_v61, %s8110_s30  ;;  %6903 = vrot.lane.b32.xlu0 %v6902_v62, %s8110_s30  ;;  %v7017_v61 = vpack.i.bf16 %v167_v55, %v166_v54  ;;  %v7012_v62 = vpack.i.bf16 %v165_v58, %v164_v56  ;;  %v7007_v63 = vpack.i.bf16 %v163_v60, %v8470_v59  ;;  %v196_v58 = vld [vmem:[%s14569_s0 + $0x272] sm:$0xff]  ;;  %v197_v60 = vld [vmem:[%s14569_s0 + $0x27a] sm:$0xff] }
  0x36   :  { %v7077_v54 = vpack.i.bf16 %v191_v40, %v190_v39  ;;  %v7092_v4 = vpack.i.bf16 %v197_v60, %v196_v58  ;;  %v210_v39 = vld [vmem:[%s14569_s0 + $0x31a] sm:$0xff]  ;;  %v211_v40 = vld [vmem:[%s14569_s0 + $0x322] sm:$0xff] }
  0x37   :  { %v7127_v58 = vpack.i.bf16 %v211_v40, %v210_v39  ;;  %v41_v40 = vld [vmem:[%s14569_s0 + $0xf8] sm:$0xff] }
  0x3c   :  { %6928 = vrot.lane.b32.xlu2 %v6927_v5, %s8110_s30  ;;  %v168_v5 = vld [vmem:[%s14569_s0 + $0xf2] sm:$0xff] }
  0x3d   :  { %6923 = vrot.lane.b32.xlu1 %v6922_v6, %s8110_s30  ;;  %6918 = vrot.lane.b32.xlu0 %v6917_v7, %s8110_s30  ;;  %v169_v6 = vld [vmem:[%s14569_s0 + $0xfa] sm:$0xff]  ;;  %v7032_v7 = vpack.i.bf16 %v173_v1, %v172_v0  ;;  %v193_v0 = vld [vmem:[%s14569_s0 + $0x24a] sm:$0xff] }
  0x3e   :  { %v7022_v9 = vpack.i.bf16 %v169_v6, %v168_v5 }
  0x44   :  { %6943 = vrot.lane.b32.xlu2 %v6942_v14, %s8110_s30  ;;  %v177_v14 = vld [vmem:[%s14569_s0 + $0x15a] sm:$0xff] }
  0x45   :  { %6938 = vrot.lane.b32.xlu1 %v6937_v15, %s8110_s30  ;;  %6933 = vrot.lane.b32.xlu0 %v6932_v16, %s8110_s30  ;;  %v174_v15 = vld [vmem:[%s14569_s0 + $0x13a] sm:$0xff]  ;;  %v175_v16 = vld [vmem:[%s14569_s0 + $0x142] sm:$0xff]  ;;  %v7042_v21 = vpack.i.bf16 %v177_v14, %v176_v12 }
  0x46   :  { %v7037_v22 = vpack.i.bf16 %v175_v16, %v174_v15  ;;  %v199_v12 = vld [vmem:[%s14569_s0 + $0x292] sm:$0xff] }
  0x4c   :  { %6958 = vrot.lane.b32.xlu2 %v6957_v23, %s8110_s30  ;;  %v2861_v23 = vld [vmem:[%s14570_s1 + $0x80] sm:$0xff] }
  0x4d   :  { %6953 = vrot.lane.b32.xlu1 %v6952_v24, %s8110_s30  ;;  %6948 = vrot.lane.b32.xlu0 %v6947_v25, %s8110_s30  ;;  %v184_v24 = vld [vmem:[%s14569_s0 + $0x1e2] sm:$0xff]  ;;  %v185_v25 = vld [vmem:[%s14569_s0 + $0x1ea] sm:$0xff] }
  0x4e   :  { %3279 = vmatpush.msra.mxu1 %v2861_v23  ;;  %v206_v23 = vld [vmem:[%s14569_s0 + $0x2ea] sm:$0xff] }
  0x4f   :  { %6586 = vmatmul.msk.f32.vlgmr.msra.gmra.mxu1 %vm2390_vm0, %v8392_v37  ;;  %v7052_v37 = vpack.i.bf16 %v181_v30, %v180_v29 }
  0x54   :  { %6973 = vrot.lane.b32.xlu2 %v6972_v32, %s8111_s6 }
  0x55   :  { %6968 = vrot.lane.b32.xlu1 %v6967_v33, %s8110_s30  ;;  %6963 = vrot.lane.b32.xlu0 %v6962_v34, %s8110_s30  ;;  %v7062_v33 = vpack.i.bf16 %v185_v25, %v184_v24  ;;  %v7057_v34 = vpack.i.bf16 %v183_v28, %v182_v26  ;;  %v207_v25 = vld [vmem:[%s14569_s0 + $0x2f2] sm:$0xff]  ;;  %v205_v26 = vld [vmem:[%s14569_s0 + $0x2da] sm:$0xff] }
  0x57   :  { %6587 = vmatmul.msk.f32.gmra.mxu1 %vm2390_vm0, %v8397_v38  ;;  %v186_v38 = vld [vmem:[%s14569_s0 + $0x1fa] sm:$0xff] }
  0x5c   :  { %6988 = vrot.lane.b32.xlu2 %v6987_v41, %s8111_s6  ;;  %v188_v41 = vld [vmem:[%s14569_s0 + $0x212] sm:$0xff] }
  0x5d   :  { %6983 = vrot.lane.b32.xlu1 %v6982_v42, %s8111_s6  ;;  %6978 = vrot.lane.b32.xlu0 %v6977_v43, %s8111_s6  ;;  %v189_v43 = vld [vmem:[%s14569_s0 + $0x21a] sm:$0xff] }
  0x5e   :  { %v8427_v47 = vpop.permute.xlu2 %6833  ;;  %v7072_v55 = vpack.i.bf16 %v189_v43, %v188_v41  ;;  %v24_v41 = vld [vmem:[%s14569_s0 + $0x30] sm:$0xff] }
  0x5f   :  { %6588 = vmatmul.msk.f32.gmra.mxu1 %vm2390_vm0, %v8380_v35  ;;  %v192_v35 = vld [vmem:[%s14569_s0 + $0x242] sm:$0xff] }
  0x60   :  { %v7082_v6 = vpack.i.bf16 %v193_v0, %v192_v35  ;;  %v31_v35 = vld [vmem:[%s14569_s0 + $0x80] sm:$0xff] }
  0x64   :  { %7003 = vrot.lane.b32.xlu2 %v7002_v51, %s8111_s6  ;;  %v187_v51 = vld [vmem:[%s14569_s0 + $0x202] sm:$0xff] }
  0x65   :  { %6998 = vrot.lane.b32.xlu1 %v6997_v52, %s8111_s6  ;;  %6993 = vrot.lane.b32.xlu0 %v6992_v53, %s8111_s6  ;;  %v7067_v56 = vpack.i.bf16 %v187_v51, %v186_v38  ;;  %v22_v51 = vld [vmem:[%s14569_s0 + $0x18] sm:$0xff] }
  0x66   :  { %v8462_v57 = vpop.permute.xlu2 %6838 }
  0x67   :  { %6589 = vmatmul.msk.f32.gmra.mxu1 %vm2390_vm0, %v8387_v36  ;;  %v198_v36 = vld [vmem:[%s14569_s0 + $0x28a] sm:$0xff] }
  0x6c   :  { %7018 = vrot.lane.b32.xlu2 %v7017_v61, %s8111_s6  ;;  %v194_v61 = vld [vmem:[%s14569_s0 + $0x25a] sm:$0xff] }
  0x6d   :  { %7013 = vrot.lane.b32.xlu1 %v7012_v62, %s8111_s6  ;;  %7008 = vrot.lane.b32.xlu0 %v7007_v63, %s8111_s6  ;;  %v195_v63 = vld [vmem:[%s14569_s0 + $0x262] sm:$0xff] }
  0x6e   :  { %v8488_v3 = vpop.permute.xlu2 %6853  ;;  %v7087_v5 = vpack.i.bf16 %v195_v63, %v194_v61  ;;  %v28_v61 = vld [vmem:[%s14569_s0 + $0x60] sm:$0xff]  ;;  %v30_v63 = vld [vmem:[%s14569_s0 + $0x78] sm:$0xff] }
  0x6f   :  { %14739 = vst [vmem:[#allocation3_spill] sm:$0xff] %v8488_v3  ;;  %6590 = vmatmul.msk.f32.gmra.mxu1 %vm2390_vm0, %v8437_v49  ;;  %v204_v49 = vld [vmem:[%s14569_s0 + $0x2d2] sm:$0xff] }
  0x74   :  { %7033 = vrot.lane.b32.xlu2 %v7032_v7, %s8111_s6  ;;  %v202_v7 = vld [vmem:[%s14569_s0 + $0x2ba] sm:$0xff] }
  0x75   :  { %7028 = vrot.lane.b32.xlu1 %v7027_v8, %s8111_s6  ;;  %7023 = vrot.lane.b32.xlu0 %v7022_v9, %s8111_s6  ;;  %v203_v8 = vld [vmem:[%s14569_s0 + $0x2c2] sm:$0xff] }
  0x76   :  { %v8511_v13 = vpop.permute.xlu2 %6868  ;;  %v200_v9 = vld [vmem:[%s14569_s0 + $0x2a2] sm:$0xff]  ;;  %v7107_v16 = vpack.i.bf16 %v203_v8, %v202_v7  ;;  %v7152_v7 = vpack.i.bf16 %v31_v35, %v30_v63  ;;  %v46_v63 = vld [vmem:[%s14569_s0 + $0x138] sm:$0xff] }
  0x77   :  { %14740 = vst [vmem:[#allocation4_spill] sm:$0xff] %v8511_v13  ;;  %v8522_v17 = vpop.permute.xlu1 %6823  ;;  %v8524_v18 = vpop.permute.xlu0 %6813  ;;  %v7102_v19 = vpack.i.bf16 %v201_v11, %v200_v9  ;;  %6591 = vmatmul.msk.f32.gmra.mxu1 %vm2390_vm0, %v8442_v50  ;;  %v25_v50 = vld [vmem:[%s14569_s0 + $0x38] sm:$0xff] }
  0x7c   :  { %7048 = vrot.lane.b32.xlu2 %v7047_v20, %s8111_s6  ;;  %v7097_v20 = vpack.i.bf16 %v199_v12, %v198_v36  ;;  %v36_v36 = vld [vmem:[%s14569_s0 + $0xc0] sm:$0xff]  ;;  %v37_v12 = vld [vmem:[%s14569_s0 + $0xc8] sm:$0xff] }
  0x7d   :  { %7043 = vrot.lane.b32.xlu1 %v7042_v21, %s8111_s6  ;;  %7038 = vrot.lane.b32.xlu0 %v7037_v22, %s8111_s6  ;;  %v208_v21 = vld [vmem:[%s14569_s0 + $0x302] sm:$0xff]  ;;  %v209_v22 = vld [vmem:[%s14569_s0 + $0x30a] sm:$0xff] }
  0x7e   :  { %v8546_v27 = vpop.permute.xlu2 %6883  ;;  %v7122_v30 = vpack.i.bf16 %v209_v22, %v208_v21  ;;  %v32_v21 = vld [vmem:[%s14569_s0 + $0x90] sm:$0xff]  ;;  %v33_v22 = vld [vmem:[%s14569_s0 + $0x98] sm:$0xff] }
  0x7f   :  { %14741 = vst [vmem:[#allocation5_spill] sm:$0xff] %v8546_v27  ;;  %v8557_v31 = vpop.permute.xlu1 %6828  ;;  %v8559_v32 = vpop.permute.xlu0 %6818  ;;  %6592 = vmatmul.msk.f32.gmra.mxu1 %vm2390_vm0, %v8425_v46 }
  0x84   :  { %7063 = vrot.lane.b32.xlu2 %v7062_v33, %s8111_s6  ;;  %v7117_v33 = vpack.i.bf16 %v207_v25, %v206_v23  ;;  %v7167_v23 = vpack.i.bf16 %v37_v12, %v36_v36  ;;  %v6232_v12 = vld [vmem:[%s14569_s0 + $0x180] sm:$0xff] }
  0x85   :  { %7058 = vrot.lane.b32.xlu1 %v7057_v34, %s8111_s6  ;;  %7053 = vrot.lane.b32.xlu0 %v7052_v37, %s8111_s6  ;;  %v7112_v34 = vpack.i.bf16 %v205_v26, %v204_v49  ;;  %v7157_v49 = vpack.i.bf16 %v33_v22, %v32_v21 }
  0x86   :  { %v8575_v42 = vpop.permute.xlu2 %6898 }
  0x87   :  { %14742 = vst [vmem:[#allocation6_spill] sm:$0xff] %v8575_v42  ;;  %v8586_v52 = vpop.permute.xlu1 %6848  ;;  %v8588_v53 = vpop.permute.xlu0 %6843  ;;  %6593 = vmatmul.msk.f32.gmra.mxu1 %vm2390_vm0, %v8432_v48  ;;  %v9062_v42 = vld [vmem:[%s14569_s0 + $0xfa] sm:$0xff] }
  0x88   :  { %14743 = vst [vmem:[#allocation7_spill] sm:$0xff] %v8586_v52 }
  0x89   :  { %14744 = vst [vmem:[#allocation8_spill] sm:$0xff] %v8588_v53 }
  0x8c   :  { %7078 = vrot.lane.b32.xlu2 %v7077_v54, %s8111_s6  ;;  %v23_v54 = vld [vmem:[%s14569_s0 + $0x20] sm:$0xff] }
  0x8d   :  { %7073 = vrot.lane.b32.xlu1 %v7072_v55, %s8111_s6  ;;  %7068 = vrot.lane.b32.xlu0 %v7067_v56, %s8111_s6  ;;  %v7137_v55 = vpack.i.bf16 %v25_v50, %v24_v41  ;;  %v7132_v56 = vpack.i.bf16 %v23_v54, %v22_v51  ;;  %v38_v41 = vld [vmem:[%s14569_s0 + $0xd8] sm:$0xff]  ;;  %v39_v50 = vld [vmem:[%s14569_s0 + $0xe0] sm:$0xff] }
  0x8e   :  { %v8604_v62 = vpop.permute.xlu2 %6913 }
  0x8f   :  { %14745 = vst [vmem:[#allocation9_spill] sm:$0xff] %v8604_v62  ;;  %v8615_v1 = vpop.permute.xlu1 %6863  ;;  %v8617_v2 = vpop.permute.xlu0 %6858  ;;  %6594 = vmatmul.msk.f32.gmra.mxu1 %vm2390_vm0, %v8413_v44 }
  0x90   :  { %14746 = vst [vmem:[#allocation10_spill] sm:$0xff] %v8615_v1 }
  0x91   :  { %14747 = vst [vmem:[#allocation11_spill] sm:$0xff] %v8617_v2  ;;  %v9239_v2 = vld [vmem:[%s14569_s0 + $0x12a] sm:$0xff] }
  0x94   :  { %7093 = vrot.lane.b32.xlu2 %v7092_v4, %s8111_s6  ;;  %v29_v4 = vld [vmem:[%s14569_s0 + $0x68] sm:$0xff] }
  0x95   :  { %7088 = vrot.lane.b32.xlu1 %v7087_v5, %s8111_s6  ;;  %7083 = vrot.lane.b32.xlu0 %v7082_v6, %s8111_s6  ;;  %v26_v5 = vld [vmem:[%s14569_s0 + $0x48] sm:$0xff]  ;;  %v27_v6 = vld [vmem:[%s14569_s0 + $0x50] sm:$0xff]  ;;  %v7147_v8 = vpack.i.bf16 %v29_v4, %v28_v61 }
  0x96   :  { %v8633_v10 = vpop.permute.xlu2 %6928  ;;  %v7142_v9 = vpack.i.bf16 %v27_v6, %v26_v5  ;;  %v49_v61 = vld [vmem:[%s14569_s0 + $0x158] sm:$0xff]  ;;  %v47_v4 = vld [vmem:[%s14569_s0 + $0x140] sm:$0xff]  ;;  %v45_v6 = vld [vmem:[%s14569_s0 + $0x128] sm:$0xff] }
  0x97   :  { %v8644_v14 = vpop.permute.xlu1 %6878  ;;  %v8646_v15 = vpop.permute.xlu0 %6873  ;;  %6595 = vmatmul.msk.f32.gmra.mxu1 %vm2390_vm0, %v8420_v45  ;;  %v44_v5 = vld [vmem:[%s14569_s0 + $0x120] sm:$0xff] }
  0x98   :  { %14748 = vst [vmem:[#allocation12_spill] sm:$0xff] %v8644_v14  ;;  %v9156_v14 = vld [vmem:[%s14569_s0 + $0x121] sm:$0xff] }
  0x99   :  { %14749 = vst [vmem:[#allocation13_spill] sm:$0xff] %v8646_v15 }
  0x9c   :  { %7108 = vrot.lane.b32.xlu2 %v7107_v16, %s8111_s6  ;;  %v34_v16 = vld [vmem:[%s14569_s0 + $0xa8] sm:$0xff] }
  0x9d   :  { %7103 = vrot.lane.b32.xlu1 %v7102_v19, %s8111_s6  ;;  %7098 = vrot.lane.b32.xlu0 %v7097_v20, %s8111_s6  ;;  %v35_v20 = vld [vmem:[%s14569_s0 + $0xb0] sm:$0xff] }
  0x9e   :  { %v8662_v24 = vpop.permute.xlu2 %6943  ;;  %v7162_v25 = vpack.i.bf16 %v35_v20, %v34_v16  ;;  %v6233_v16 = vld [vmem:[%s14569_s0 + $0x188] sm:$0xff] }
  0x9f   :  { %14750 = vst [vmem:[#allocation14_spill] sm:$0xff] %v8662_v24  ;;  %v8673_v28 = vpop.permute.xlu1 %6893  ;;  %v8675_v29 = vpop.permute.xlu0 %6888  ;;  %6596 = vmatmul.msk.f32.gmra.mxu1 %vm2390_vm0, %v8470_v59  ;;  %v54_v20 = vld [vmem:[%s14569_s0 + $0x1c8] sm:$0xff]  ;;  %v55_v59 = vld [vmem:[%s14569_s0 + $0x1d0] sm:$0xff] }
  0xa0   :  { %14751 = vst [vmem:[#allocation15_spill] sm:$0xff] %v8673_v28  ;;  %v6312_v24 = vld [vmem:[%s14569_s0 + $0x271] sm:$0xff] }
  0xa1   :  { %14752 = vst [vmem:[#allocation16_spill] sm:$0xff] %v8675_v29 }
  0xa4   :  { %7123 = vrot.lane.b32.xlu2 %v7122_v30, %s8111_s6  ;;  %v42_v30 = vld [vmem:[%s14569_s0 + $0x108] sm:$0xff] }
  0xa5   :  { %7118 = vrot.lane.b32.xlu1 %v7117_v33, %s8111_s6  ;;  %7113 = vrot.lane.b32.xlu0 %v7112_v34, %s8111_s6  ;;  %v43_v33 = vld [vmem:[%s14569_s0 + $0x110] sm:$0xff] }
  0xa6   :  { %v8682_v37 = vpop.permute.xlu2 %6958  ;;  %v40_v34 = vld [vmem:[%s14569_s0 + $0xf0] sm:$0xff]  ;;  %v7182_v51 = vpack.i.bf16 %v43_v33, %v42_v30  ;;  %v7207_v30 = vpack.i.bf16 %v6233_v16, %v6232_v12  ;;  %v67_v12 = vld [vmem:[%s14569_s0 + $0x260] sm:$0xff] }
  0xa7   :  { %14753 = vst [vmem:[#allocation17_spill] sm:$0xff] %v8682_v37  ;;  %v8696_v43 = vpop.permute.xlu1 %6908  ;;  %v8698_v38 = vpop.permute.xlu0 %6903  ;;  %v7177_v54 = vpack.i.bf16 %v41_v40, %v40_v34  ;;  %v8854_v34 = vld [vmem:[%s14569_s0 + $0xb2] sm:$0xff]  ;;  %v64_v16 = vld [vmem:[%s14569_s0 + $0x240] sm:$0xff] }
  0xa8   :  { %14754 = vst [vmem:[#allocation18_spill] sm:$0xff] %v8696_v43  ;;  %6597 = vmatmul.msk.f32.gmra.mxu1 %vm2390_vm0, %v8854_v34  ;;  %v9024_v43 = vld [vmem:[%s14569_s0 + $0xf2] sm:$0xff] }
  0xa9   :  { %14755 = vst [vmem:[#allocation19_spill] sm:$0xff] %v8698_v38 }
  0xac   :  { %7138 = vrot.lane.b32.xlu2 %v7137_v55, %s8112_s28  ;;  %v7172_v55 = vpack.i.bf16 %v39_v50, %v38_v41  ;;  %v60_v41 = vld [vmem:[%s14569_s0 + $0x210] sm:$0xff]  ;;  %v61_v50 = vld [vmem:[%s14569_s0 + $0x218] sm:$0xff] }
  0xad   :  { %7133 = vrot.lane.b32.xlu1 %v7132_v56, %s8112_s28  ;;  %7128 = vrot.lane.b32.xlu0 %v7127_v58, %s8111_s6  ;;  %v48_v58 = vld [vmem:[%s14569_s0 + $0x150] sm:$0xff] }
  0xae   :  { %v8711_v60 = vpop.permute.xlu2 %6973 }
  0xaf   :  { %v8722_v0 = vpop.permute.xlu1 %6923  ;;  %v8724_v46 = vpop.permute.xlu0 %6918 }
  0xb0   :  { %14756 = vst [vmem:[#allocation20_spill] sm:$0xff] %v8722_v0  ;;  %v8990_v0 = vld [vmem:[%s14569_s0 + $0xe2] sm:$0xff] }
  0xb1   :  { %14757 = vst [vmem:[#allocation21_spill] sm:$0xff] %v8724_v46 }
  0xb4   :  { %7153 = vrot.lane.b32.xlu2 %v7152_v7, %s8112_s28  ;;  %v7197_v7 = vpack.i.bf16 %v49_v61, %v48_v58  ;;  %v59_v58 = vld [vmem:[%s14569_s0 + $0x200] sm:$0xff] }
  0xb5   :  { %7148 = vrot.lane.b32.xlu1 %v7147_v8, %s8112_s28  ;;  %7143 = vrot.lane.b32.xlu0 %v7142_v9, %s8112_s28  ;;  %v7192_v8 = vpack.i.bf16 %v47_v4, %v46_v63  ;;  %v7187_v9 = vpack.i.bf16 %v45_v6, %v44_v5  ;;  %v56_v61 = vld [vmem:[%s14569_s0 + $0x1e0] sm:$0xff]  ;;  %v57_v63 = vld [vmem:[%s14569_s0 + $0x1e8] sm:$0xff]  ;;  %v7227_v4 = vpack.i.bf16 %v61_v50, %v60_v41 }
  0xb6   :  { %v8740_v11 = vpop.permute.xlu2 %6988  ;;  %v7217_v6 = vpack.i.bf16 %v57_v63, %v56_v61  ;;  %v8922_v50 = vld [vmem:[%s14569_s0 + $0xca] sm:$0xff] }
  0xb7   :  { %v8751_v19 = vpop.permute.xlu1 %6938  ;;  %v8753_v48 = vpop.permute.xlu0 %6933  ;;  %v73_v61 = vld [vmem:[%s14569_s0 + $0x2a8] sm:$0xff] }
  0xb8   :  { %14758 = vst [vmem:[#allocation22_spill] sm:$0xff] %v8751_v19  ;;  %v70_v63 = vld [vmem:[%s14569_s0 + $0x288] sm:$0xff] }
  0xb9   :  { %14759 = vst [vmem:[#allocation23_spill] sm:$0xff] %v8753_v48  ;;  %v9311_v19 = vld [vmem:[%s14569_s0 + $0x142] sm:$0xff] }
  0xbc   :  { %7168 = vrot.lane.b32.xlu2 %v7167_v23, %s8112_s28  ;;  %v50_v23 = vld [vmem:[%s14569_s0 + $0x168] sm:$0xff] }
  0xbd   :  { %7163 = vrot.lane.b32.xlu1 %v7162_v25, %s8112_s28  ;;  %7158 = vrot.lane.b32.xlu0 %v7157_v49, %s8112_s28  ;;  %v51_v25 = vld [vmem:[%s14569_s0 + $0x170] sm:$0xff]  ;;  %v7212_v49 = vpack.i.bf16 %v55_v59, %v54_v20 }
  0xbe   :  { %v8769_v26 = vpop.permute.xlu2 %7003  ;;  %v7202_v33 = vpack.i.bf16 %v51_v25, %v50_v23  ;;  %v65_v23 = vld [vmem:[%s14569_s0 + $0x248] sm:$0xff] }
  0xbf   :  { %14760 = vst [vmem:[#allocation24_spill] sm:$0xff] %v8769_v26  ;;  %v8780_v39 = vpop.permute.xlu1 %6953  ;;  %v8782_v44 = vpop.permute.xlu0 %6948  ;;  %v62_v25 = vld [vmem:[%s14569_s0 + $0x228] sm:$0xff] }
  0xc0   :  { %14761 = vst [vmem:[#allocation25_spill] sm:$0xff] %v8780_v39  ;;  %v9198_v39 = vld [vmem:[%s14569_s0 + $0x122] sm:$0xff] }
  0xc1   :  { %14762 = vst [vmem:[#allocation26_spill] sm:$0xff] %v8782_v44 }
  0xc4   :  { %7183 = vrot.lane.b32.xlu2 %v7182_v51, %s8112_s28  ;;  %v58_v51 = vld [vmem:[%s14569_s0 + $0x1f8] sm:$0xff] }
  0xc5   :  { %7178 = vrot.lane.b32.xlu1 %v7177_v54, %s8112_s28  ;;  %7173 = vrot.lane.b32.xlu0 %v7172_v55, %s8112_s28  ;;  %v7222_v5 = vpack.i.bf16 %v59_v58, %v58_v51  ;;  %v72_v58 = vld [vmem:[%s14569_s0 + $0x2a0] sm:$0xff] }
  0xc6   :  { %v8798_v56 = vpop.permute.xlu2 %7018 }
  0xc7   :  { %14763 = vst [vmem:[#allocation27_spill] sm:$0xff] %v8798_v56  ;;  %v8809_v35 = vpop.permute.xlu1 %6968  ;;  %v8811_v45 = vpop.permute.xlu0 %6963 }
  0xc8   :  { %14764 = vst [vmem:[#allocation28_spill] sm:$0xff] %v8809_v35 }
  0xc9   :  { %14765 = vst [vmem:[#allocation29_spill] sm:$0xff] %v8811_v45 }
  0xcc   :  { %7198 = vrot.lane.b32.xlu2 %v7197_v7, %s8112_s28  ;;  %v8888_v7 = vld [vmem:[%s14569_s0 + $0xc2] sm:$0xff]  ;;  %v9101_v29 = vpop.f32.mrf.mxu1 }
  0xcd   :  { %7193 = vrot.lane.b32.xlu1 %v7192_v8, %s8112_s28  ;;  %7188 = vrot.lane.b32.xlu0 %v7187_v9, %s8112_s28  ;;  %v66_v9 = vld [vmem:[%s14569_s0 + $0x258] sm:$0xff]  ;;  %14784 = vst [vmem:[#allocation48_spill] sm:$0xff] %v9101_v29 }
  0xce   :  { %v8827_v36 = vpop.permute.xlu2 %7033  ;;  %6598 = vmatmul.msk.f32.gmra.mxu1 %vm2390_vm0, %v8888_v7 }
  0xcf   :  { %14766 = vst [vmem:[#allocation30_spill] sm:$0xff] %v8827_v36  ;;  %v8841_v21 = vpop.permute.xlu1 %6983  ;;  %v8843_v22 = vpop.permute.xlu0 %6978 }
  0xd4   :  { %7213 = vrot.lane.b32.xlu2 %v7212_v49, %s8112_s28  ;;  %v63_v49 = vld [vmem:[%s14569_s0 + $0x230] sm:$0xff]  ;;  %v9158_v36 = vpop.f32.mrf.mxu1 }
  0xd5   :  { %7208 = vrot.lane.b32.xlu1 %v7207_v30, %s8112_s28  ;;  %7203 = vrot.lane.b32.xlu0 %v7202_v33, %s8112_s28  ;;  %v7242_v30 = vpack.i.bf16 %v67_v12, %v66_v9  ;;  %v7237_v33 = vpack.i.bf16 %v65_v23, %v64_v16  ;;  %v7232_v41 = vpack.i.bf16 %v63_v49, %v62_v25  ;;  %v68_v9 = vld [vmem:[%s14569_s0 + $0x270] sm:$0xff]  ;;  %v69_v12 = vld [vmem:[%s14569_s0 + $0x278] sm:$0xff] }
  0xd6   :  { %v8861_v40 = vpop.permute.xlu2 %7048  ;;  %6599 = vmatmul.msk.f32.gmra.mxu1 %vm2390_vm0, %v8922_v50  ;;  %v7257_v16 = vpack.i.bf16 %v73_v61, %v72_v58  ;;  %v7247_v25 = vpack.i.bf16 %v69_v12, %v68_v9  ;;  %v8956_v49 = vld [vmem:[%s14569_s0 + $0xda] sm:$0xff]  ;;  %v76_v58 = vld [vmem:[%s14569_s0 + $0x2d0] sm:$0xff]  ;;  %14787 = vst [vmem:[#allocation51_spill] sm:$0xff] %v9158_v36 }
  0xd7   :  { %14767 = vst [vmem:[#allocation31_spill] sm:$0xff] %v8861_v40  ;;  %v8872_v54 = vpop.permute.xlu1 %6998  ;;  %v8874_v55 = vpop.permute.xlu0 %6993  ;;  %v74_v9 = vld [vmem:[%s14569_s0 + $0x2b8] sm:$0xff]  ;;  %v75_v12 = vld [vmem:[%s14569_s0 + $0x2c0] sm:$0xff] }
  0xdc   :  { %7228 = vrot.lane.b32.xlu2 %v7227_v4, %s8112_s28 }
  0xdd   :  { %7223 = vrot.lane.b32.xlu1 %v7222_v5, %s8112_s28  ;;  %7218 = vrot.lane.b32.xlu0 %v7217_v6, %s8112_s28  ;;  %v71_v6 = vld [vmem:[%s14569_s0 + $0x290] sm:$0xff] }
  0xde   :  { %v8895_v8 = vpop.permute.xlu2 %7063  ;;  %v7252_v23 = vpack.i.bf16 %v71_v6, %v70_v63  ;;  %6600 = vmatmul.msk.f32.gmra.mxu1 %vm2390_vm0, %v8956_v49  ;;  %v77_v6 = vld [vmem:[%s14569_s0 + $0x2d8] sm:$0xff] }
  0xdf   :  { %14768 = vst [vmem:[#allocation32_spill] sm:$0xff] %v8895_v8  ;;  %v8906_v20 = vpop.permute.xlu1 %7013  ;;  %v8908_v59 = vpop.permute.xlu0 %7008  ;;  %v6270_v8 = vld [vmem:[%s14569_s0 + $0x49] sm:$0xff] }
  0xe0   :  { %14769 = vst [vmem:[#allocation33_spill] sm:$0xff] %v8906_v20 }
  0xe1   :  { %14770 = vst [vmem:[#allocation34_spill] sm:$0xff] %v8908_v59 }
  0xe4   :  { %7243 = vrot.lane.b32.xlu2 %v7242_v30, %s8112_s28 }
  0xe5   :  { %7238 = vrot.lane.b32.xlu1 %v7237_v33, %s8112_s28  ;;  %7233 = vrot.lane.b32.xlu0 %v7232_v41, %s8112_s28  ;;  %v78_v33 = vld [vmem:[%s14569_s0 + $0x2e8] sm:$0xff]  ;;  %v79_v41 = vld [vmem:[%s14569_s0 + $0x2f0] sm:$0xff] }
  0xe6   :  { %v8929_v51 = vpop.permute.xlu2 %7078  ;;  %6601 = vmatmul.msk.f32.gmra.mxu1 %vm2390_vm0, %v8990_v0 }
  0xe7   :  { %14771 = vst [vmem:[#allocation35_spill] sm:$0xff] %v8929_v51  ;;  %v8940_v4 = vpop.permute.xlu1 %7028  ;;  %v8942_v5 = vpop.permute.xlu0 %7023 }
  0xe8   :  { %14772 = vst [vmem:[#allocation36_spill] sm:$0xff] %v8940_v4 }
  0xe9   :  { %14773 = vst [vmem:[#allocation37_spill] sm:$0xff] %v8942_v5  ;;  %v9229_v5 = vpop.f32.mrf.mxu1 }
  0xea   :  { %14792 = vst [vmem:[#allocation56_spill] sm:$0xff] %v9229_v5 }
  0xec   :  { %7258 = vrot.lane.b32.xlu2 %v7257_v16, %s8112_s28  ;;  %v7272_v16 = vpack.i.bf16 %v79_v41, %v78_v33  ;;  %v6264_v33 = vld [vmem:[%s14569_s0 + $0x330] sm:$0xff]  ;;  %v6265_v41 = vld [vmem:[%s14569_s0 + $0x338] sm:$0xff] }
  0xed   :  { %7253 = vrot.lane.b32.xlu1 %v7252_v23, %s8112_s28  ;;  %7248 = vrot.lane.b32.xlu0 %v7247_v25, %s8112_s28  ;;  %v7267_v23 = vpack.i.bf16 %v77_v6, %v76_v58  ;;  %v7262_v25 = vpack.i.bf16 %v75_v12, %v74_v9  ;;  %v82_v6 = vld [vmem:[%s14569_s0 + $0x318] sm:$0xff]  ;;  %v7287_v51 = vpack.i.bf16 %v6265_v41, %v6264_v33 }
  0xee   :  { %v8963_v30 = vpop.permute.xlu2 %7093  ;;  %6602 = vmatmul.msk.f32.gmra.mxu1 %vm2390_vm0, %v9024_v43  ;;  %v6271_v33 = vld [vmem:[%s14569_s0 + $0x51] sm:$0xff] }
  0xef   :  { %14774 = vst [vmem:[#allocation38_spill] sm:$0xff] %v8963_v30  ;;  %v8974_v61 = vpop.permute.xlu1 %7043  ;;  %v8976_v63 = vpop.permute.xlu0 %7038  ;;  %v6268_v41 = vld [vmem:[%s14569_s0 + $0x31] sm:$0xff] }
  0xf0   :  { %14775 = vst [vmem:[#allocation39_spill] sm:$0xff] %v8974_v61  ;;  %v9106_v61 = vld [vmem:[%s14569_s0 + $0x10a] sm:$0xff] }
  0xf1   :  { %14776 = vst [vmem:[#allocation40_spill] sm:$0xff] %v8976_v63  ;;  %v9149_v63 = vld [vmem:[%s14569_s0 + $0x112] sm:$0xff] }
  0xf4   :  { %7273 = vrot.lane.b32.xlu2 %v7272_v16, %s8112_s28  ;;  %v83_v16 = vld [vmem:[%s14569_s0 + $0x320] sm:$0xff] }
  0xf5   :  { %7268 = vrot.lane.b32.xlu1 %v7267_v23, %s8112_s28  ;;  %7263 = vrot.lane.b32.xlu0 %v7262_v25, %s8112_s28  ;;  %v80_v23 = vld [vmem:[%s14569_s0 + $0x300] sm:$0xff]  ;;  %v81_v25 = vld [vmem:[%s14569_s0 + $0x308] sm:$0xff]  ;;  %v7282_v46 = vpack.i.bf16 %v83_v16, %v82_v6 }
  0xf6   :  { %v9003_v58 = vpop.permute.xlu2 %7108  ;;  %v7277_v62 = vpack.i.bf16 %v81_v25, %v80_v23  ;;  %v6269_v6 = vld [vmem:[%s14569_s0 + $0x39] sm:$0xff]  ;;  %v9055_v25 = vpack.i.bf16 %v6271_v33, %v6270_v8  ;;  %6603 = vmatmul.msk.f32.gmra.mxu1 %vm2390_vm0, %v9062_v42 }
  0xf7   :  { %14777 = vst [vmem:[#allocation41_spill] sm:$0xff] %v9003_v58  ;;  %v9008_v9 = vpop.permute.xlu1 %7058  ;;  %v9010_v12 = vpop.permute.xlu0 %7053  ;;  %v9057_v38 = vpack.i.bf16 %v6269_v6, %v6268_v41  ;;  %v6277_v8 = vld [vmem:[%s14569_s0 + $0x99] sm:$0xff]  ;;  %v6275_v6 = vld [vmem:[%s14569_s0 + $0x81] sm:$0xff] }
  0xf8   :  { %14778 = vst [vmem:[#allocation42_spill] sm:$0xff] %v9008_v9  ;;  %v6274_v33 = vld [vmem:[%s14569_s0 + $0x79] sm:$0xff] }
  0xf9   :  { %14779 = vst [vmem:[#allocation43_spill] sm:$0xff] %v9010_v12  ;;  %v9097_v28 = vpack.i.bf16 %v6275_v6, %v6274_v33  ;;  %v6281_v6 = vld [vmem:[%s14569_s0 + $0xc9] sm:$0xff] }
  0xfc   :  { %7288 = vrot.lane.b32.xlu2 %v7287_v51, %s8112_s28 }
  0xfd   :  { %7283 = vrot.lane.b32.xlu1 %v7282_v46, %s8112_s28  ;;  %7278 = vrot.lane.b32.xlu0 %v7277_v62, %s8112_s28  ;;  %v6266_v46 = vld [vmem:[%s14569_s0 + $0x19] sm:$0xff]  ;;  %v6267_v62 = vld [vmem:[%s14569_s0 + $0x21] sm:$0xff] }
  0xfe   :  { %v9040_v51 = vpop.permute.xlu2 %7123  ;;  %v7292_v9 = vpack.i.bf16 %v6267_v62, %v6266_v46  ;;  %v6272_v46 = vld [vmem:[%s14569_s0 + $0x61] sm:$0xff]  ;;  %6604 = vmatmul.msk.f32.gmra.mxu1 %vm2390_vm0, %v9106_v61 }
  0xff   :  { %14780 = vst [vmem:[#allocation44_spill] sm:$0xff] %v9040_v51  ;;  %v9051_v16 = vpop.permute.xlu1 %7073  ;;  %v9053_v23 = vpop.permute.xlu0 %7068 }
 0x100   :  { %14781 = vst [vmem:[#allocation45_spill] sm:$0xff] %v9051_v16  ;;  %v6276_v16 = vld [vmem:[%s14569_s0 + $0x91] sm:$0xff] }
 0x101   :  { %14782 = vst [vmem:[#allocation46_spill] sm:$0xff] %v9053_v23  ;;  %v9095_v12 = vpack.i.bf16 %v6277_v8, %v6276_v16  ;;  %v6283_v16 = vld [vmem:[%s14569_s0 + $0xe1] sm:$0xff] }
 0x102   :  { %v6280_v8 = vld [vmem:[%s14569_s0 + $0xc1] sm:$0xff] }
 0x103   :  { %v9142_v51 = vpack.i.bf16 %v6281_v6, %v6280_v8  ;;  %v6287_v6 = vld [vmem:[%s14569_s0 + $0x111] sm:$0xff] }
 0x104   :  { %7303 = vrot.lane.b32.xlu2 %v9055_v25, %s8113_s20 }
 0x105   :  { %7298 = vrot.lane.b32.xlu1 %v9057_v38, %s8113_s20  ;;  %7293 = vrot.lane.b32.xlu0 %v7292_v9, %s8113_s20  ;;  %v6273_v9 = vld [vmem:[%s14569_s0 + $0x69] sm:$0xff] }
 0x106   :  { %v9080_v41 = vpop.permute.xlu2 %7138  ;;  %v9099_v40 = vpack.i.bf16 %v6273_v9, %v6272_v46  ;;  %v6278_v46 = vld [vmem:[%s14569_s0 + $0xa9] sm:$0xff]  ;;  %v6279_v9 = vld [vmem:[%s14569_s0 + $0xb1] sm:$0xff]  ;;  %6605 = vmatmul.msk.f32.gmra.mxu1 %vm2390_vm0, %v9149_v63 }
 0x107   :  { %v9091_v62 = vpop.permute.xlu1 %7088  ;;  %v9093_v23 = vpop.permute.xlu0 %7083  ;;  %v9144_v45 = vpack.i.bf16 %v6279_v9, %v6278_v46  ;;  %v6284_v46 = vld [vmem:[%s14569_s0 + $0xf1] sm:$0xff]  ;;  %v6285_v9 = vld [vmem:[%s14569_s0 + $0xf9] sm:$0xff] }
 0x108   :  { %14783 = vst [vmem:[#allocation47_spill] sm:$0xff] %v9093_v23  ;;  %v6282_v23 = vld [vmem:[%s14569_s0 + $0xd9] sm:$0xff]  ;;  %v9193_v13 = vpack.i.bf16 %v6285_v9, %v6284_v46 }
 0x109   :  { %v9140_v27 = vpack.i.bf16 %v6283_v16, %v6282_v23  ;;  %v9169_v23 = vld [vmem:[%s14569_s0 + $0x129] sm:$0xff]  ;;  %v6293_v46 = vld [vmem:[%s14569_s0 + $0x159] sm:$0xff] }
 0x10a   :  { %v6286_v16 = vld [vmem:[%s14569_s0 + $0x109] sm:$0xff]  ;;  %v7347_v37 = vpack.i.bf16 %v9169_v23, %v9156_v14  ;;  %v9224_v9 = vld [vmem:[%s14569_s0 + $0x139] sm:$0xff] }
 0x10b   :  { %v9191_v4 = vpack.i.bf16 %v6287_v6, %v6286_v16  ;;  %v6295_v16 = vld [vmem:[%s14569_s0 + $0x171] sm:$0xff] }
 0x10c   :  { %7318 = vrot.lane.b32.xlu2 %v9095_v12, %s8113_s20 }
 0x10d   :  { %7313 = vrot.lane.b32.xlu1 %v9097_v28, %s8113_s20  ;;  %7308 = vrot.lane.b32.xlu0 %v9099_v40, %s8113_s20 }
 0x10e   :  { %v9125_v33 = vpop.permute.xlu2 %7153  ;;  %6606 = vmatmul.msk.f32.gmra.mxu1 %vm2390_vm0, %v9198_v39 }
 0x10f   :  { %v9136_v29 = vpop.permute.xlu1 %7103  ;;  %v9138_v35 = vpop.permute.xlu0 %7098 }
 0x110   :  { %14785 = vst [vmem:[#allocation49_spill] sm:$0xff] %v9136_v29  ;;  %v6300_v29 = vld [vmem:[%s14569_s0 + $0x1e1] sm:$0xff] }
 0x111   :  { %14786 = vst [vmem:[#allocation50_spill] sm:$0xff] %v9138_v35  ;;  %v9275_v35 = vld [vmem:[%s14569_s0 + $0x13a] sm:$0xff] }
 0x114   :  { %7333 = vrot.lane.b32.xlu2 %v9140_v27, %s8113_s20 }
 0x115   :  { %7328 = vrot.lane.b32.xlu1 %v9142_v51, %s8113_s20  ;;  %7323 = vrot.lane.b32.xlu0 %v9144_v45, %s8113_s20 }
 0x116   :  { %v9174_v8 = vpop.permute.xlu2 %7168  ;;  %6607 = vmatmul.msk.f32.gmra.mxu1 %vm2390_vm0, %v9239_v2 }
 0x117   :  { %14788 = vst [vmem:[#allocation52_spill] sm:$0xff] %v9174_v8  ;;  %v9185_v36 = vpop.permute.xlu1 %7118  ;;  %v9187_v15 = vpop.permute.xlu0 %7113  ;;  %v6306_v8 = vld [vmem:[%s14569_s0 + $0x229] sm:$0xff] }
 0x118   :  { %14789 = vst [vmem:[#allocation53_spill] sm:$0xff] %v9185_v36  ;;  %v6294_v36 = vld [vmem:[%s14569_s0 + $0x169] sm:$0xff] }
 0x119   :  { %14790 = vst [vmem:[#allocation54_spill] sm:$0xff] %v9187_v15  ;;  %v6291_v15 = vld [vmem:[%s14569_s0 + $0x141] sm:$0xff] }
 0x11a   :  { %v7352_v56 = vpack.i.bf16 %v6291_v15, %v9224_v9  ;;  %v6301_v15 = vld [vmem:[%s14569_s0 + $0x1e9] sm:$0xff] }
 0x11b   :  { %v7377_v5 = vpack.i.bf16 %v6301_v15, %v6300_v29  ;;  %v6307_v29 = vld [vmem:[%s14569_s0 + $0x231] sm:$0xff] }
 0x11c   :  { %7348 = vrot.lane.b32.xlu2 %v7347_v37, %s8113_s20  ;;  %v6292_v37 = vld [vmem:[%s14569_s0 + $0x151] sm:$0xff] }
 0x11d   :  { %7343 = vrot.lane.b32.xlu1 %v9191_v4, %s8113_s20  ;;  %7338 = vrot.lane.b32.xlu0 %v9193_v13, %s8113_s20  ;;  %v7357_v1 = vpack.i.bf16 %v6293_v46, %v6292_v37  ;;  %v6299_v37 = vld [vmem:[%s14569_s0 + $0x1d1] sm:$0xff] }
 0x11e   :  { %v9216_v6 = vpop.permute.xlu2 %7183  ;;  %6608 = vmatmul.msk.f32.gmra.mxu1 %vm2390_vm0, %v9275_v35  ;;  %v6304_v15 = vld [vmem:[%s14569_s0 + $0x211] sm:$0xff] }
 0x11f   :  { %14791 = vst [vmem:[#allocation55_spill] sm:$0xff] %v9216_v6  ;;  %v9231_v58 = vpop.permute.xlu1 %7133  ;;  %v9233_v44 = vpop.permute.xlu0 %7128  ;;  %v7362_v6 = vpack.i.bf16 %v6295_v16, %v6294_v36  ;;  %v6298_v36 = vld [vmem:[%s14569_s0 + $0x1c9] sm:$0xff] }
 0x120   :  { %14793 = vst [vmem:[#allocation57_spill] sm:$0xff] %v9233_v44  ;;  %v9270_v44 = vpop.f32.mrf.mxu1 }
 0x121   :  { %14795 = vst [vmem:[#allocation59_spill] sm:$0xff] %v9270_v44 }
 0x124   :  { %7363 = vrot.lane.b32.xlu2 %v7362_v6, %s8113_s20 }
 0x125   :  { %7358 = vrot.lane.b32.xlu1 %v7357_v1, %s8113_s20  ;;  %7353 = vrot.lane.b32.xlu0 %v7352_v56, %s8113_s20  ;;  %v6296_v1 = vld [vmem:[%s14569_s0 + $0x181] sm:$0xff]  ;;  %v6297_v56 = vld [vmem:[%s14569_s0 + $0x189] sm:$0xff] }
 0x126   :  { %v9255_v16 = vpop.permute.xlu2 %7198  ;;  %v7367_v20 = vpack.i.bf16 %v6297_v56, %v6296_v1  ;;  %v7392_v56 = vpack.i.bf16 %v6307_v29, %v6306_v8  ;;  %6609 = vmatmul.msk.f32.gmra.mxu1 %vm2390_vm0, %v9311_v19  ;;  %v6313_v8 = vld [vmem:[%s14569_s0 + $0x279] sm:$0xff] }
 0x127   :  { %14794 = vst [vmem:[#allocation58_spill] sm:$0xff] %v9255_v16  ;;  %v9266_v6 = vpop.permute.xlu1 %7148  ;;  %v9268_v46 = vpop.permute.xlu0 %7143  ;;  %v7372_v16 = vpack.i.bf16 %v6299_v37, %v6298_v36  ;;  %v6305_v36 = vld [vmem:[%s14569_s0 + $0x219] sm:$0xff] }
 0x128   :  { %v7387_v44 = vpack.i.bf16 %v6305_v36, %v6304_v15  ;;  %v6310_v29 = vld [vmem:[%s14569_s0 + $0x259] sm:$0xff]  ;;  %v6311_v36 = vld [vmem:[%s14569_s0 + $0x261] sm:$0xff] }
 0x12c   :  { %7378 = vrot.lane.b32.xlu2 %v7377_v5, %s8113_s20 }
 0x12d   :  { %7373 = vrot.lane.b32.xlu1 %v7372_v16, %s8113_s20  ;;  %7368 = vrot.lane.b32.xlu0 %v7367_v20, %s8113_s20  ;;  %v6302_v16 = vld [vmem:[%s14569_s0 + $0x1f9] sm:$0xff]  ;;  %v6303_v20 = vld [vmem:[%s14569_s0 + $0x201] sm:$0xff] }
 0x12e   :  { %v9291_v5 = vpop.permute.xlu2 %7213  ;;  %v7382_v59 = vpack.i.bf16 %v6303_v20, %v6302_v16 }
 0x12f   :  { %14796 = vst [vmem:[#allocation60_spill] sm:$0xff] %v9291_v5  ;;  %v9302_v37 = vpop.permute.xlu1 %7163  ;;  %v9304_v1 = vpop.permute.xlu0 %7158 }
 0x130   :  { %14797 = vst [vmem:[#allocation61_spill] sm:$0xff] %v9302_v37  ;;  %v9306_v5 = vpop.f32.mrf.mxu1 }
 0x131   :  { %14798 = vst [vmem:[#allocation62_spill] sm:$0xff] %v9306_v5  ;;  %v7402_v5 = vpack.i.bf16 %v6311_v36, %v6310_v29  ;;  %v6395_v29 = vld [vmem:[%s14569_s0 + $0x38] sm:$0xff] }
 0x132   :  { %v6330_v36 = vld [vmem:[%s14569_s0 + $0x1a] sm:$0xff] }
 0x134   :  { %7393 = vrot.lane.b32.xlu2 %v7392_v56, %s8113_s20  ;;  %v7407_v56 = vpack.i.bf16 %v6313_v8, %v6312_v24  ;;  %v6394_v24 = vld [vmem:[%s14569_s0 + $0x30] sm:$0xff] }
 0x135   :  { %7388 = vrot.lane.b32.xlu1 %v7387_v44, %s8113_s20  ;;  %7383 = vrot.lane.b32.xlu0 %v7382_v59, %s8113_s20  ;;  %v6308_v44 = vld [vmem:[%s14569_s0 + $0x241] sm:$0xff]  ;;  %v6309_v59 = vld [vmem:[%s14569_s0 + $0x249] sm:$0xff] }
 0x136   :  { %v9327_v15 = vpop.permute.xlu2 %7228  ;;  %v7397_v30 = vpack.i.bf16 %v6309_v59, %v6308_v44  ;;  %v7417_v59 = vpack.i.bf16 %v6395_v29, %v6394_v24  ;;  %v6396_v24 = vld [vmem:[%s14569_s0 + $0x48] sm:$0xff] }
 0x137   :  { %14799 = vst [vmem:[#allocation63_spill] sm:$0xff] %v9327_v15  ;;  %v9338_v16 = vpop.permute.xlu1 %7178  ;;  %v9340_v20 = vpop.permute.xlu0 %7173  ;;  %v9345_v15 = vld [vmem:[%s14569_s0 + $0x152] sm:$0xff] }
 0x138   :  { %14800 = vst [vmem:[#allocation64_spill] sm:$0xff] %v9338_v16  ;;  %v9348_v37 = vpop.f32.mrf.mxu1  ;;  %6610 = vmatmul.msk.f32.gmra.mxu1 %vm2390_vm0, %v9345_v15  ;;  %v9437_v16 = vld [vmem:[%s14569_s0 + $0x172] sm:$0xff] }
 0x139   :  { %14801 = vst [vmem:[#allocation65_spill] sm:$0xff] %v9340_v20 }
 0x13a   :  { %14802 = vst [vmem:[#allocation66_spill] sm:$0xff] %v9348_v37  ;;  %v9375_v37 = vld [vmem:[%s14569_s0 + $0x15a] sm:$0xff] }
 0x13c   :  { %7408 = vrot.lane.b32.xlu2 %v7407_v56, %s8113_s20 }
 0x13d   :  { %7403 = vrot.lane.b32.xlu1 %v7402_v5, %s8113_s20  ;;  %7398 = vrot.lane.b32.xlu0 %v7397_v30, %s8113_s20  ;;  %v6331_v5 = vld [vmem:[%s14569_s0 + $0x22] sm:$0xff] }
 0x13e   :  { %v9357_v8 = vpop.permute.xlu2 %7243  ;;  %v7412_v56 = vpack.i.bf16 %v6331_v5, %v6330_v36  ;;  %v6332_v5 = vld [vmem:[%s14569_s0 + $0x32] sm:$0xff] }
 0x13f   :  { %14803 = vst [vmem:[#allocation67_spill] sm:$0xff] %v9357_v8  ;;  %v9368_v44 = vpop.permute.xlu1 %7193  ;;  %v9370_v30 = vpop.permute.xlu0 %7188 }
 0x140   :  { %14804 = vst [vmem:[#allocation68_spill] sm:$0xff] %v9368_v44  ;;  %6611 = vmatmul.msk.f32.gmra.mxu1 %vm2390_vm0, %v9375_v37  ;;  %v9388_v36 = vpop.f32.mrf.mxu1 }
 0x141   :  { %14805 = vst [vmem:[#allocation69_spill] sm:$0xff] %v9370_v30 }
 0x142   :  { %14807 = vst [vmem:[#allocation71_spill] sm:$0xff] %v9388_v36  ;;  %v9406_v36 = vld [vmem:[%s14569_s0 + $0x16a] sm:$0xff] }
 0x144   :  { %7423 = vrot.lane.b32.xlu2 %v9057_v38, %s8114_s24  ;;  %v6397_v38 = vld [vmem:[%s14569_s0 + $0x50] sm:$0xff] }
 0x145   :  { %7418 = vrot.lane.b32.xlu1 %v7417_v59, %s8115_s25  ;;  %7413 = vrot.lane.b32.xlu0 %v7412_v56, %s8116_s26  ;;  %v6333_v59 = vld [vmem:[%s14569_s0 + $0x3a] sm:$0xff]  ;;  %v7432_v44 = vpack.i.bf16 %v6397_v38, %v6396_v24 }
 0x146   :  { %v9386_v29 = vpop.permute.xlu2 %7258  ;;  %v7427_v30 = vpack.i.bf16 %v6333_v59, %v6332_v5  ;;  %v6398_v24 = vld [vmem:[%s14569_s0 + $0x60] sm:$0xff]  ;;  %v6399_v5 = vld [vmem:[%s14569_s0 + $0x68] sm:$0xff] }
 0x147   :  { %14806 = vst [vmem:[#allocation70_spill] sm:$0xff] %v9386_v29  ;;  %v9399_v56 = vpop.permute.xlu1 %7208  ;;  %v9401_v8 = vpop.permute.xlu0 %7203 }
 0x148   :  { %14808 = vst [vmem:[#allocation72_spill] sm:$0xff] %v9399_v56  ;;  %6612 = vmatmul.msk.f32.gmra.mxu1 %vm2390_vm0, %v9406_v36  ;;  %v9432_v56 = vpop.f32.mrf.mxu1 }
 0x149   :  { %14809 = vst [vmem:[#allocation73_spill] sm:$0xff] %v9401_v8  ;;  %v7447_v8 = vpack.i.bf16 %v6399_v5, %v6398_v24  ;;  %v6400_v24 = vld [vmem:[%s14569_s0 + $0x78] sm:$0xff] }
 0x14a   :  { %14813 = vst [vmem:[#allocation77_spill] sm:$0xff] %v9432_v56 }
 0x14c   :  { %7438 = vrot.lane.b32.xlu2 %v9055_v25, %s8114_s24  ;;  %v6334_v25 = vld [vmem:[%s14569_s0 + $0x4a] sm:$0xff] }
 0x14d   :  { %7433 = vrot.lane.b32.xlu1 %v7432_v44, %s8115_s25  ;;  %7428 = vrot.lane.b32.xlu0 %v7427_v30, %s8116_s26  ;;  %v6335_v44 = vld [vmem:[%s14569_s0 + $0x52] sm:$0xff] }
 0x14e   :  { %v9417_v38 = vpop.permute.xlu2 %7273 }
 0x14f   :  { %14810 = vst [vmem:[#allocation74_spill] sm:$0xff] %v9417_v38  ;;  %v9428_v59 = vpop.permute.xlu1 %7223  ;;  %v9430_v30 = vpop.permute.xlu0 %7218  ;;  %v7442_v38 = vpack.i.bf16 %v6335_v44, %v6334_v25  ;;  %v6401_v25 = vld [vmem:[%s14569_s0 + $0x80] sm:$0xff] }
 0x150   :  { %14811 = vst [vmem:[#allocation75_spill] sm:$0xff] %v9428_v59  ;;  %6613 = vmatmul.msk.f32.gmra.mxu1 %vm2390_vm0, %v9437_v16  ;;  %v7462_v56 = vpack.i.bf16 %v6401_v25, %v6400_v24  ;;  %v6402_v24 = vld [vmem:[%s14569_s0 + $0x90] sm:$0xff] }
 0x151   :  { %14812 = vst [vmem:[#allocation76_spill] sm:$0xff] %v9430_v30  ;;  %v9466_v30 = vld [vmem:[%s14569_s0 + $0x182] sm:$0xff] }
 0x154   :  { %7453 = vrot.lane.b32.xlu2 %v9099_v40, %s8114_s24  ;;  %v6336_v40 = vld [vmem:[%s14569_s0 + $0x62] sm:$0xff] }
 0x155   :  { %7448 = vrot.lane.b32.xlu1 %v7447_v8, %s8115_s25  ;;  %7443 = vrot.lane.b32.xlu0 %v7442_v38, %s8116_s26  ;;  %v6337_v8 = vld [vmem:[%s14569_s0 + $0x6a] sm:$0xff] }
 0x156   :  { %v9448_v5 = vpop.permute.xlu2 %7288  ;;  %v7457_v59 = vpack.i.bf16 %v6337_v8, %v6336_v40  ;;  %v6403_v40 = vld [vmem:[%s14569_s0 + $0x98] sm:$0xff] }
 0x157   :  { %14814 = vst [vmem:[#allocation78_spill] sm:$0xff] %v9448_v5  ;;  %v9459_v44 = vpop.permute.xlu1 %7238  ;;  %v9461_v38 = vpop.permute.xlu0 %7233 }
 0x158   :  { %14815 = vst [vmem:[#allocation79_spill] sm:$0xff] %v9459_v44  ;;  %v9468_v5 = vpop.f32.mrf.mxu1  ;;  %6614 = vmatmul.msk.f32.gmra.mxu1 %vm2390_vm0, %v9466_v30 }
 0x159   :  { %14816 = vst [vmem:[#allocation80_spill] sm:$0xff] %v9461_v38  ;;  %v9497_v38 = vld [vmem:[%s14569_s0 + $0x18a] sm:$0xff] }
 0x15a   :  { %14817 = vst [vmem:[#allocation81_spill] sm:$0xff] %v9468_v5  ;;  %v7477_v5 = vpack.i.bf16 %v6403_v40, %v6402_v24  ;;  %v6404_v24 = vld [vmem:[%s14569_s0 + $0xa8] sm:$0xff] }
 0x15c   :  { %7468 = vrot.lane.b32.xlu2 %v9097_v28, %s8114_s24  ;;  %v6338_v28 = vld [vmem:[%s14569_s0 + $0x7a] sm:$0xff] }
 0x15d   :  { %7463 = vrot.lane.b32.xlu1 %v7462_v56, %s8115_s25  ;;  %7458 = vrot.lane.b32.xlu0 %v7457_v59, %s8116_s26  ;;  %v6339_v56 = vld [vmem:[%s14569_s0 + $0x82] sm:$0xff] }
 0x15e   :  { %v9479_v25 = vpop.permute.xlu2 %7303  ;;  %v7472_v44 = vpack.i.bf16 %v6339_v56, %v6338_v28  ;;  %v6405_v28 = vld [vmem:[%s14569_s0 + $0xb0] sm:$0xff] }
 0x15f   :  { %v9490_v8 = vpop.permute.xlu1 %7253  ;;  %v9492_v59 = vpop.permute.xlu0 %7248 }
 0x160   :  { %14818 = vst [vmem:[#allocation82_spill] sm:$0xff] %v9490_v8  ;;  %v9499_v20 = vpop.f32.mrf.mxu1  ;;  %6615 = vmatmul.msk.f32.gmra.mxu1 %vm2390_vm0, %v9497_v38  ;;  %v6552_v8 = vld [vmem:[%s14569_s0 + $0x19a] sm:$0xff] }
 0x161   :  { %14819 = vst [vmem:[#allocation83_spill] sm:$0xff] %v9492_v59 }
 0x162   :  { %14820 = vst [vmem:[#allocation84_spill] sm:$0xff] %v9499_v20  ;;  %v7492_v20 = vpack.i.bf16 %v6405_v28, %v6404_v24  ;;  %v6406_v24 = vld [vmem:[%s14569_s0 + $0xc0] sm:$0xff]  ;;  %v6407_v28 = vld [vmem:[%s14569_s0 + $0xc8] sm:$0xff] }
 0x164   :  { %7483 = vrot.lane.b32.xlu2 %v9095_v12, %s8114_s24  ;;  %v6340_v12 = vld [vmem:[%s14569_s0 + $0x92] sm:$0xff] }
 0x165   :  { %7478 = vrot.lane.b32.xlu1 %v7477_v5, %s8115_s25  ;;  %7473 = vrot.lane.b32.xlu0 %v7472_v44, %s8116_s26  ;;  %v6341_v5 = vld [vmem:[%s14569_s0 + $0x9a] sm:$0xff] }
 0x166   :  { %v9510_v40 = vpop.permute.xlu2 %7318  ;;  %v7487_v29 = vpack.i.bf16 %v6341_v5, %v6340_v12  ;;  %v6553_v5 = vld [vmem:[%s14569_s0 + $0x1a2] sm:$0xff] }
 0x167   :  { %v9521_v56 = vpop.permute.xlu1 %7268  ;;  %v9523_v44 = vpop.permute.xlu0 %7263 }
 0x168   :  { %14821 = vst [vmem:[#allocation85_spill] sm:$0xff] %v9521_v56  ;;  %6616 = vmatmul.msk.f32.gmra.mxu1 %vm2390_vm0, %v6552_v8  ;;  %v9533_v26 = vpop.f32.mrf.mxu1 }
 0x169   :  { %14822 = vst [vmem:[#allocation86_spill] sm:$0xff] %v9523_v44 }
 0x16a   :  { %14823 = vst [vmem:[#allocation87_spill] sm:$0xff] %v9533_v26 }
 0x16c   :  { %7498 = vrot.lane.b32.xlu2 %v9144_v45, %s8114_s24  ;;  %v6342_v45 = vld [vmem:[%s14569_s0 + $0xaa] sm:$0xff] }
 0x16d   :  { %7493 = vrot.lane.b32.xlu1 %v7492_v20, %s8115_s25  ;;  %7488 = vrot.lane.b32.xlu0 %v7487_v29, %s8116_s26  ;;  %v7507_v29 = vpack.i.bf16 %v6407_v28, %v6406_v24  ;;  %v7502_v12 = vpack.i.bf16 %v8854_v34, %v6342_v45  ;;  %v6408_v24 = vld [vmem:[%s14569_s0 + $0xd8] sm:$0xff]  ;;  %v6409_v34 = vld [vmem:[%s14569_s0 + $0xe0] sm:$0xff] }
 0x16e   :  { %v9535_v56 = vpop.permute.xlu2 %7333 }
 0x16f   :  { %14824 = vst [vmem:[#allocation88_spill] sm:$0xff] %v9535_v56  ;;  %v9546_v8 = vpop.permute.xlu1 %7283  ;;  %v9548_v20 = vpop.permute.xlu0 %7278 }
 0x170   :  { %14825 = vst [vmem:[#allocation89_spill] sm:$0xff] %v9546_v8  ;;  %6617 = vmatmul.msk.f32.gmra.mxu1 %vm2390_vm0, %v6553_v5  ;;  %v7522_v5 = vpack.i.bf16 %v6409_v34, %v6408_v24  ;;  %v2860_v24 = vld [vmem:[%s14570_s1 + $0x78] sm:$0xff] }
 0x171   :  { %14826 = vst [vmem:[#allocation90_spill] sm:$0xff] %v9548_v20  ;;  %3055 = vmatpush.msra.mxu0 %v2860_v24  ;;  %6778 = vmatpush.msra.mxu3 %v2860_v24  ;;  %v6555_v24 = vld [vmem:[%s14569_s0 + $0x1ea] sm:$0xff] }
 0x174   :  { %7513 = vrot.lane.b32.xlu2 %v9142_v51, %s8114_s24  ;;  %v9571_v51 = vpop.f32.mrf.mxu1 }
 0x175   :  { %7508 = vrot.lane.b32.xlu1 %v7507_v29, %s8115_s25  ;;  %7503 = vrot.lane.b32.xlu0 %v7502_v12, %s8116_s26  ;;  %14828 = vst [vmem:[#allocation92_spill] sm:$0xff] %v9571_v51  ;;  %v7517_v29 = vpack.i.bf16 %v8922_v50, %v8888_v7  ;;  %v6554_v12 = vld [vmem:[%s14569_s0 + $0x1e2] sm:$0xff]  ;;  %v6410_v7 = vld [vmem:[%s14569_s0 + $0xf0] sm:$0xff]  ;;  %v7532_v51 = vpack.i.bf16 %v8990_v0, %v8956_v49 }
 0x176   :  { %v9559_v26 = vpop.permute.xlu2 %7348  ;;  %v2856_v0 = vld [vmem:[%s14570_s1 + $0x58] sm:$0xff] }
 0x177   :  { %14827 = vst [vmem:[#allocation91_spill] sm:$0xff] %v9559_v26  ;;  %v9567_v28 = vpop.permute.xlu1 %7298  ;;  %v9569_v45 = vpop.permute.xlu0 %7293 }
 0x178   :  { %6618 = vmatmul.msk.f32.gmra.mxu1 %vm2390_vm0, %v6554_v12 }
 0x17c   :  { %7528 = vrot.lane.b32.xlu2 %v9140_v27, %s8114_s24  ;;  %v6411_v27 = vld [vmem:[%s14569_s0 + $0xf8] sm:$0xff]  ;;  %v9606_v8 = vpop.f32.mrf.mxu1 }
 0x17d   :  { %7523 = vrot.lane.b32.xlu1 %v7522_v5, %s8115_s25  ;;  %7518 = vrot.lane.b32.xlu0 %v7517_v29, %s8116_s26  ;;  %v2859_v29 = vld [vmem:[%s14570_s1 + $0x70] sm:$0xff]  ;;  %v7537_v12 = vpack.i.bf16 %v6411_v27, %v6410_v7  ;;  %14830 = vst [vmem:[#allocation94_spill] sm:$0xff] %v9606_v8  ;;  %v2854_v8 = vld [vmem:[%s14570_s1 + $0x48] sm:$0xff] }
 0x17e   :  { %v9586_v34 = vpop.permute.xlu2 %7363  ;;  %3056 = vmatpush.msra.mxu0 %v2859_v29  ;;  %6779 = vmatpush.msra.mxu3 %v2859_v29  ;;  %v2857_v29 = vld [vmem:[%s14570_s1 + $0x60] sm:$0xff] }
 0x17f   :  { %14829 = vst [vmem:[#allocation93_spill] sm:$0xff] %v9586_v34  ;;  %v9594_v50 = vpop.permute.xlu1 %7313  ;;  %v9596_v5 = vpop.permute.xlu0 %7308  ;;  %v2858_v34 = vld [vmem:[%s14570_s1 + $0x68] sm:$0xff] }
 0x180   :  { %3057 = vmatpush.msra.mxu0 %v2858_v34  ;;  %6780 = vmatpush.msra.mxu3 %v2858_v34  ;;  %v6412_v34 = vld [vmem:[%s14569_s0 + $0x108] sm:$0xff] }
 0x181   :  { %6619 = vmatmul.msk.f32.gmra.mxu1 %vm2390_vm0, %v6555_v24  ;;  %v7547_v24 = vpack.i.bf16 %v9062_v42, %v9024_v43  ;;  %v9657_v42 = vld [vmem:[%s14569_s0 + $0x291] sm:$0xff] }
 0x182   :  { %3058 = vmatpush.msra.mxu0 %v2857_v29  ;;  %6781 = vmatpush.msra.mxu3 %v2857_v29  ;;  %v6556_v29 = vld [vmem:[%s14569_s0 + $0x1fa] sm:$0xff] }
 0x183   :  { %v2852_v43 = vld [vmem:[%s14570_s1 + $0x38] sm:$0xff] }
 0x184   :  { %7543 = vrot.lane.b32.xlu2 %v9193_v13, %s8114_s24  ;;  %v6413_v13 = vld [vmem:[%s14569_s0 + $0x110] sm:$0xff]  ;;  %3059 = vmatpush.msra.mxu0 %v2856_v0  ;;  %v9648_v20 = vpop.f32.mrf.mxu1 }
 0x185   :  { %7538 = vrot.lane.b32.xlu1 %v7537_v12, %s8115_s25  ;;  %7533 = vrot.lane.b32.xlu0 %v7532_v51, %s8116_s26  ;;  %v2855_v51 = vld [vmem:[%s14570_s1 + $0x50] sm:$0xff]  ;;  %v7552_v12 = vpack.i.bf16 %v6413_v13, %v6412_v34  ;;  %14834 = vst [vmem:[#allocation98_spill] sm:$0xff] %v9648_v20  ;;  %v9673_v13 = vld [vmem:[%s14569_s0 + $0x27a] sm:$0xff]  ;;  %v7572_v20 = vpack.i.bf16 %v9657_v42, %v9156_v14 }
 0x186   :  { %v9622_v49 = vpop.permute.xlu2 %7378  ;;  %6782 = vmatpush.msra.mxu3 %v2856_v0  ;;  %3060 = vmatpush.msra.mxu0 %v2855_v51  ;;  %v6441_v34 = vld [vmem:[%s14569_s0 + $0x290] sm:$0xff]  ;;  %v7562_v26 = vpack.i.bf16 %v9673_v13, %v9106_v61  ;;  %v9702_v14 = vld [vmem:[%s14569_s0 + $0x2a1] sm:$0xff]  ;;  %v2848_v61 = vld [vmem:[%s14570_s1 + $0x18] sm:$0xff] }
 0x187   :  { %14831 = vst [vmem:[#allocation95_spill] sm:$0xff] %v9622_v49  ;;  %v9630_v7 = vpop.permute.xlu1 %7328  ;;  %v9632_v27 = vpop.permute.xlu0 %7323  ;;  %v2853_v49 = vld [vmem:[%s14570_s1 + $0x40] sm:$0xff] }
 0x188   :  { %14832 = vst [vmem:[#allocation96_spill] sm:$0xff] %v9630_v7  ;;  %6783 = vmatpush.msra.mxu3 %v2855_v51  ;;  %3061 = vmatpush.msra.mxu0 %v2854_v8 }
 0x189   :  { %14833 = vst [vmem:[#allocation97_spill] sm:$0xff] %v9632_v27  ;;  %6620 = vmatmul.msk.f32.gmra.mxu1 %vm2390_vm0, %v6556_v29  ;;  %v2850_v29 = vld [vmem:[%s14570_s1 + $0x28] sm:$0xff]  ;;  %v6559_v27 = vld [vmem:[%s14569_s0 + $0x21a] sm:$0xff] }
 0x18a   :  { %3062 = vmatpush.msra.mxu0 %v2853_v49  ;;  %6784 = vmatpush.msra.mxu3 %v2854_v8  ;;  %v2849_v8 = vld [vmem:[%s14570_s1 + $0x20] sm:$0xff] }
 0x18c   :  { %7558 = vrot.lane.b32.xlu2 %v9191_v4, %s8114_s24  ;;  %v6414_v4 = vld [vmem:[%s14569_s0 + $0x120] sm:$0xff]  ;;  %3063 = vmatpush.msra.mxu0 %v2852_v43 }
 0x18d   :  { %7553 = vrot.lane.b32.xlu1 %v7552_v12, %s8115_s25  ;;  %7548 = vrot.lane.b32.xlu0 %v7547_v24, %s8116_s26  ;;  %v2851_v24 = vld [vmem:[%s14570_s1 + $0x30] sm:$0xff] }
 0x18e   :  { %v9662_v0 = vpop.permute.xlu2 %7393  ;;  %6785 = vmatpush.msra.mxu3 %v2853_v49  ;;  %3064 = vmatpush.msra.mxu0 %v2851_v24  ;;  %v9707_v49 = vpop.f32.mrf.mxu1 }
 0x18f   :  { %14835 = vst [vmem:[#allocation99_spill] sm:$0xff] %v9662_v0  ;;  %v9676_v51 = vpop.permute.xlu1 %7343  ;;  %v9678_v12 = vpop.permute.xlu0 %7338  ;;  %v7567_v0 = vpack.i.bf16 %v6441_v34, %v6414_v4 }
 0x190   :  { %14836 = vst [vmem:[#allocation100_spill] sm:$0xff] %v9676_v51  ;;  %v6557_v51 = vld [vmem:[%s14569_s0 + $0x202] sm:$0xff]  ;;  %6786 = vmatpush.msra.mxu3 %v2852_v43  ;;  %3065 = vmatpush.msra.mxu0 %v2850_v29  ;;  %v9720_v43 = vld [vmem:[%s14569_s0 + $0x28a] sm:$0xff] }
 0x191   :  { %14837 = vst [vmem:[#allocation101_spill] sm:$0xff] %v9678_v12  ;;  %6621 = vmatmul.msk.f32.gmra.mxu1 %vm2390_vm0, %v6557_v51  ;;  %v7587_v12 = vpack.i.bf16 %v9702_v14, %v9169_v23  ;;  %v7577_v44 = vpack.i.bf16 %v9720_v43, %v9149_v63  ;;  %v2846_v51 = vld [vmem:[%s14570_s1 + $0x8] sm:$0xff]  ;;  %v6416_v63 = vld [vmem:[%s14569_s0 + $0x138] sm:$0xff] }
 0x192   :  { %14838 = vst [vmem:[#allocation102_spill] sm:$0xff] %v9707_v49  ;;  %3066 = vmatpush.msra.mxu0 %v2849_v8  ;;  %v2847_v49 = vld [vmem:[%s14570_s1 + $0x10] sm:$0xff]  ;;  %6787 = vmatpush.msra.mxu3 %v2851_v24  ;;  %v2845_v24 = vld [vmem:[%s14570_s1] sm:$0xff]  ;;  %v6443_v23 = vld [vmem:[%s14569_s0 + $0x2a8] sm:$0xff] }
 0x194   :  { %7573 = vrot.lane.b32.xlu2 %v7572_v20, %s8114_s24  ;;  %v6415_v20 = vld [vmem:[%s14569_s0 + $0x128] sm:$0xff]  ;;  %3067 = vmatpush.msra.mxu0 %v2848_v61 }
 0x195   :  { %7568 = vrot.lane.b32.xlu1 %v7567_v0, %s8115_s25  ;;  %7563 = vrot.lane.b32.xlu0 %v7562_v26, %s8116_s26  ;;  %v6442_v26 = vld [vmem:[%s14569_s0 + $0x2a0] sm:$0xff] }
 0x196   :  { %v9709_v4 = vpop.permute.xlu2 %7408  ;;  %v7582_v56 = vpack.i.bf16 %v6442_v26, %v6415_v20  ;;  %6788 = vmatpush.msra.mxu3 %v2850_v29  ;;  %3068 = vmatpush.msra.mxu0 %v2847_v49  ;;  %v9767_v20 = vpop.f32.mrf.mxu1  ;;  %v7602_v26 = vpack.i.bf16 %v6443_v23, %v6416_v63 }
 0x197   :  { %14839 = vst [vmem:[#allocation103_spill] sm:$0xff] %v9709_v4  ;;  %v9723_v0 = vpop.permute.xlu1 %7358  ;;  %v9725_v34 = vpop.permute.xlu0 %7353  ;;  %v6562_v4 = vld [vmem:[%s14569_s0 + $0x242] sm:$0xff] }
 0x198   :  { %14840 = vst [vmem:[#allocation104_spill] sm:$0xff] %v9723_v0  ;;  %v6558_v0 = vld [vmem:[%s14569_s0 + $0x212] sm:$0xff]  ;;  %6789 = vmatpush.msra.mxu3 %v2849_v8  ;;  %3069 = vmatpush.msra.mxu0 %v2846_v51 }
 0x199   :  { %14841 = vst [vmem:[#allocation105_spill] sm:$0xff] %v9725_v34  ;;  %v9757_v8 = vld [vmem:[%s14569_s0 + $0x292] sm:$0xff]  ;;  %6622 = vmatmul.msk.f32.gmra.mxu1 %vm2390_vm0, %v6558_v0  ;;  %v6507_v0 = vld [vmem:[%s14569_s0 + $0x2a9] sm:$0xff] }
 0x19a   :  { %3070 = vmatpush.msra.mxu0 %v2845_v24  ;;  %6790 = vmatpush.msra.mxu3 %v2848_v61  ;;  %14844 = vst [vmem:[#allocation108_spill] sm:$0xff] %v9767_v20  ;;  %v7597_v34 = vpack.i.bf16 %v9757_v8, %v9198_v39  ;;  %v6417_v61 = vld [vmem:[%s14569_s0 + $0x140] sm:$0xff]  ;;  %v6444_v39 = vld [vmem:[%s14569_s0 + $0x2b8] sm:$0xff] }
 0x19b   :  { %v7617_v63 = vpack.i.bf16 %v6444_v39, %v6417_v61  ;;  %v6481_v61 = vld [vmem:[%s14569_s0 + $0x141] sm:$0xff]  ;;  %v9829_v39 = vld [vmem:[%s14569_s0 + $0x2b9] sm:$0xff] }
 0x19c   :  { %7588 = vrot.lane.b32.xlu2 %v7587_v12, %s8114_s24  ;;  %6791 = vmatpush.msra.mxu3 %v2847_v49  ;;  %v9789_v49 = vld [vmem:[%s14569_s0 + $0x2a2] sm:$0xff] }
 0x19d   :  { %7583 = vrot.lane.b32.xlu1 %v7582_v56, %s8115_s25  ;;  %7578 = vrot.lane.b32.xlu0 %v7577_v44, %s8116_s26  ;;  %v6314_v56 = vld [vmem:[%s14569_s0 + $0x289] sm:$0xff]  ;;  %v7612_v23 = vpack.i.bf16 %v9789_v49, %v9239_v2  ;;  %v20_v20 = vld [vmem:[%s14569_s0] sm:$0xff] }
 0x19e   :  { %v9752_v29 = vpop.permute.xlu2 %7423  ;;  %v7592_v7 = vpack.i.bf16 %v9657_v42, %v6314_v56  ;;  %6792 = vmatpush.msra.mxu3 %v2846_v51  ;;  %v8032_v51 = vld [vmem:[%s14570_s1 + $0x88] sm:$0xff]  ;;  %v7607_v56 = vpack.i.bf16 %v6507_v0, %v9224_v9 }
 0x19f   :  { %v9763_v44 = vpop.permute.xlu1 %7373  ;;  %v9765_v12 = vpop.permute.xlu0 %7368  ;;  %v9819_v2 = vld [vmem:[%s14569_s0 + $0x2aa] sm:$0xff] }
 0x1a0   :  { %14842 = vst [vmem:[#allocation106_spill] sm:$0xff] %v9763_v44  ;;  %6793 = vmatpush.msra.mxu3 %v2845_v24  ;;  %v9808_v24 = vpop.f32.mrf.mxu1  ;;  %v7136_v44 = vunpack.i.h.bf16 %v9231_v58 }
 0x1a1   :  { %14843 = vst [vmem:[#allocation107_spill] sm:$0xff] %v9765_v12  ;;  %6623 = vmatmul.msk.f32.gmra.mxu1 %vm2390_vm0, %v6559_v27  ;;  %v8033_v27 = vld [vmem:[%s14570_s1 + $0x80] sm:$0xff]  ;;  %v7425_v12 = vunpack.i.l.bf16 %v9752_v29 }
 0x1a2   :  { %6794 = vmatpush.msrb.mxu3 %v8032_v51  ;;  %14847 = vst [vmem:[#allocation111_spill] sm:$0xff] %v9808_v24  ;;  %v7622_v24 = vpack.i.bf16 %v9829_v39, %v6481_v61 }
 0x1a3   :  { %14848 = vst [vmem:[#allocation112_spill] sm:$0xff] %v9819_v2 }
 0x1a4   :  { %7603 = vrot.lane.b32.xlu2 %v7602_v26, %s8115_s25  ;;  %6795 = vmatpush.msrb.mxu3 %v8033_v27  ;;  %v6560_v26 = vld [vmem:[%s14569_s0 + $0x22a] sm:$0xff]  ;;  %v7627_v27 = vpack.i.bf16 %v6507_v0, %v9702_v14  ;;  %v9855_v14 = vld [vmem:[%s14569_s0 + $0x2ba] sm:$0xff]  ;;  %v6816_v0 = vunpack.i.h.bf16 %v8524_v18 }
 0x1a5   :  { %7598 = vrot.lane.b32.xlu1 %v7597_v34, %s8116_s26  ;;  %7593 = vrot.lane.b32.xlu0 %v7592_v7, %s8113_s20  ;;  %14852 = vst [vmem:[#allocation116_spill] sm:$0xff] %v9855_v14 }
 0x1a6   :  { %v9784_v42 = vpop.permute.xlu2 %7438 }
 0x1a7   :  { %v9795_v7 = vpop.permute.xlu1 %7388  ;;  %v9797_v34 = vpop.permute.xlu0 %7383 }
 0x1a8   :  { %14845 = vst [vmem:[#allocation109_spill] sm:$0xff] %v9795_v7  ;;  %v6975_v7 = vunpack.i.l.bf16 %v8711_v60 }
 0x1a9   :  { %14846 = vst [vmem:[#allocation110_spill] sm:$0xff] %v9797_v34  ;;  %6624 = vmatmul.msk.f32.gmra.mxu1 %vm2390_vm0, %v6560_v26  ;;  %v7135_v26 = vunpack.i.l.bf16 %v9231_v58 }
 0x1ac   :  { %7618 = vrot.lane.b32.xlu2 %v7617_v63, %s8115_s25 }
 0x1ad   :  { %7613 = vrot.lane.b32.xlu1 %v7612_v23, %s8116_s26  ;;  %7608 = vrot.lane.b32.xlu0 %v7607_v56, %s8114_s24  ;;  %v7632_v23 = vpack.i.bf16 %v9819_v2, %v9275_v35  ;;  %v6815_v56 = vunpack.i.l.bf16 %v8524_v18  ;;  %v9849_v35 = vpop.f32.mrf.mxu1 }
 0x1ae   :  { %v9821_v9 = vpop.permute.xlu2 %7453  ;;  %14851 = vst [vmem:[#allocation115_spill] sm:$0xff] %v9849_v35  ;;  %v6482_v35 = vld [vmem:[%s14569_s0 + $0x151] sm:$0xff] }
 0x1af   :  { %v9832_v51 = vpop.permute.xlu1 %7403  ;;  %v9834_v63 = vpop.permute.xlu0 %7398  ;;  %v2391_v61 = vsel %vm2390_vm0, %v20_v20, %v6815_v56  ;;  %v6509_v20 = vld [vmem:[%s14569_s0 + $0x2c1] sm:$0xff] }
 0x1b0   :  { %14849 = vst [vmem:[#allocation113_spill] sm:$0xff] %v9832_v51  ;;  %v6561_v51 = vld [vmem:[%s14569_s0 + $0x232] sm:$0xff]  ;;  %v2456_v34 = vsel %vm2455_vm1, %v2391_v61, %v6975_v7  ;;  %v6445_v56 = vld [vmem:[%s14569_s0 + $0x2c0] sm:$0xff]  ;;  %v21_v61 = vld [vmem:[%s14569_s0 + $0x8] sm:$0xff]  ;;  %v7642_v52 = vpack.i.bf16 %v6509_v20, %v6482_v35 }
 0x1b1   :  { %14850 = vst [vmem:[#allocation114_spill] sm:$0xff] %v9834_v63  ;;  %v7295_v63 = vunpack.i.l.bf16 %v9569_v45  ;;  %6625 = vmatmul.msk.f32.gmra.mxu1 %vm2390_vm0, %v6561_v51 }
 0x1b4   :  { %7633 = vrot.lane.b32.xlu2 %v7632_v23, %s8116_s26  ;;  %v6976_v23 = vunpack.i.h.bf16 %v8711_v60  ;;  %v2521_v60 = vsel %vm2520_vm2, %v2456_v34, %v7135_v26  ;;  %v7296_v26 = vunpack.i.h.bf16 %v9569_v45 }
 0x1b5   :  { %7628 = vrot.lane.b32.xlu1 %v7627_v27, %s8113_s20  ;;  %7623 = vrot.lane.b32.xlu0 %v7622_v24, %s8114_s24  ;;  %v6418_v24 = vld [vmem:[%s14569_s0 + $0x150] sm:$0xff]  ;;  %v7647_v27 = vpack.i.bf16 %v9855_v14, %v9311_v19  ;;  %v2586_v34 = vsel %vm14738_vm3, %v2521_v60, %v7295_v63  ;;  %v2392_v19 = vsel %vm2390_vm0, %v21_v61, %v6816_v0 }
 0x1b6   :  { %v9868_v18 = vpop.permute.xlu2 %7468  ;;  %v7637_v51 = vpack.i.bf16 %v6445_v56, %v6418_v24  ;;  %v2457_v59 = vsel %vm2455_vm1, %v2392_v19, %v6976_v23  ;;  %v6980_v56 = vunpack.i.l.bf16 %v8843_v22  ;;  %v7662_v60 = vpack.i.bf16 %v6509_v20, %v9829_v39  ;;  %v6563_v39 = vld [vmem:[%s14569_s0 + $0x24a] sm:$0xff] }
 0x1b7   :  { %v7419_v58 = vpop.permute.xlu1 %7418  ;;  %v7414_v7 = vpop.permute.xlu0 %7413  ;;  %v2522_v35 = vsel %vm2520_vm2, %v2457_v59, %v7136_v44  ;;  %v6446_v59 = vld [vmem:[%s14569_s0 + $0x2d0] sm:$0xff] }
 0x1b8   :  { %v7420_v48 = vunpack.i.l.bf16 %v7419_v58  ;;  %v7415_v53 = vunpack.i.l.bf16 %v7414_v7  ;;  %v7416_v14 = vunpack.i.h.bf16 %v7414_v7  ;;  %v2587_v44 = vsel %vm14738_vm3, %v2522_v35, %v7296_v26  ;;  %v9954_v35 = vld [vmem:[%s14569_s0 + $0x2d9] sm:$0xff] }
 0x1b9   :  { %6626 = vmatmul.msk.f32.gmra.mxu1 %vm2390_vm0, %v6562_v4  ;;  %v7426_v7 = vunpack.i.h.bf16 %v9752_v29  ;;  %v7300_v4 = vunpack.i.l.bf16 %v9567_v28 }
 0x1ba   :  { %v2651_v3 = vsel %vm2650_vm4, %v2586_v34, %v7415_v53  ;;  %v9904_v53 = vpop.f32.mrf.mxu1  ;;  %v2652_v24 = vsel %vm2650_vm4, %v2587_v44, %v7416_v14  ;;  %v8034_v34 = vld [vmem:[%s14569_s0 + $0x18] sm:$0xff]  ;;  %v6383_v44 = vld [vmem:[%s14569_s0 + $0x2c2] sm:$0xff] }
 0x1bb   :  { %v2716_v2 = vsel %vm2715_vm5, %v2651_v3, %v7420_v48  ;;  %v6483_v3 = vld [vmem:[%s14569_s0 + $0x159] sm:$0xff]  ;;  %14853 = vst [vmem:[#allocation117_spill] sm:$0xff] %v9904_v53  ;;  %v7421_v48 = vunpack.i.h.bf16 %v7419_v58  ;;  %v7140_v58 = vunpack.i.l.bf16 %v9080_v41 }
 0x1bc   :  { %7648 = vrot.lane.b32.xlu2 %v7647_v27, %s8116_s26  ;;  %v2781_v63 = vsel %vm2780_vm6, %v2716_v2, %v7425_v12  ;;  %v9911_v12 = vld [vmem:[%s14569_s0 + $0x2d1] sm:$0xff]  ;;  %v6820_v2 = vunpack.i.l.bf16 %v8559_v32 }
 0x1bd   :  { %7643 = vrot.lane.b32.xlu1 %v7642_v52, %s8114_s24  ;;  %7638 = vrot.lane.b32.xlu0 %v7637_v51, %s8115_s25  ;;  %v6419_v52 = vld [vmem:[%s14569_s0 + $0x158] sm:$0xff]  ;;  %v7657_v27 = vpack.i.bf16 %v9911_v12, %v6483_v3  ;;  %v2717_v51 = vsel %vm2715_vm5, %v2652_v24, %v7421_v48  ;;  %v6821_v24 = vunpack.i.h.bf16 %v8559_v32  ;;  %v7301_v32 = vunpack.i.h.bf16 %v9567_v28 }
 0x1be   :  { %3071 = vmatmul.f32.vlgmr.msra.gmra.mxu0 %v2781_v63  ;;  %v9906_v45 = vpop.permute.xlu2 %7483  ;;  %v7652_v61 = vpack.i.bf16 %v6446_v59, %v6419_v52  ;;  %v2393_v14 = vsel %vm2390_vm0, %v8034_v34, %v6820_v2  ;;  %v2782_v19 = vsel %vm2780_vm6, %v2717_v51, %v7426_v7  ;;  %v6484_v63 = vld [vmem:[%s14569_s0 + $0x169] sm:$0xff]  ;;  %v6447_v59 = vld [vmem:[%s14569_s0 + $0x2d8] sm:$0xff]  ;;  %v6981_v7 = vunpack.i.h.bf16 %v8843_v22 }
 0x1bf   :  { %v9922_v0 = vpop.permute.xlu1 %7433  ;;  %v9924_v23 = vpop.permute.xlu0 %7428  ;;  %v2458_v29 = vsel %vm2455_vm1, %v2393_v14, %v6980_v56  ;;  %v6420_v52 = vld [vmem:[%s14569_s0 + $0x168] sm:$0xff]  ;;  %v7141_v51 = vunpack.i.h.bf16 %v9080_v41  ;;  %v7667_v14 = vpack.i.bf16 %v6383_v44, %v9345_v15  ;;  %v6564_v41 = vld [vmem:[%s14569_s0 + $0x25a] sm:$0xff]  ;;  %v6384_v44 = vld [vmem:[%s14569_s0 + $0x2d2] sm:$0xff] }
 0x1c0   :  { %v7430_v26 = vunpack.i.l.bf16 %v9924_v23  ;;  %v2523_v20 = vsel %vm2520_vm2, %v2458_v29, %v7140_v58  ;;  %v7435_v3 = vunpack.i.l.bf16 %v9922_v0  ;;  %v7672_v34 = vpack.i.bf16 %v6447_v59, %v6420_v52  ;;  %v6421_v52 = vld [vmem:[%s14569_s0 + $0x170] sm:$0xff]  ;;  %v6448_v59 = vld [vmem:[%s14569_s0 + $0x2e8] sm:$0xff] }
 0x1c1   :  { %v2588_v2 = vsel %vm14738_vm3, %v2523_v20, %v7300_v4  ;;  %6627 = vmatmul.msk.f32.gmra.mxu1 %vm2390_vm0, %v6563_v39  ;;  %v7440_v4 = vunpack.i.l.bf16 %v9784_v42  ;;  %v7431_v29 = vunpack.i.h.bf16 %v9924_v23  ;;  %v6485_v23 = vld [vmem:[%s14569_s0 + $0x171] sm:$0xff] }
 0x1c2   :  { %v2653_v58 = vsel %vm2650_vm4, %v2588_v2, %v7430_v26  ;;  %v8035_v26 = vld [vmem:[%s14569_s0 + $0x20] sm:$0xff] }
 0x1c3   :  { %v2718_v39 = vsel %vm2715_vm5, %v2653_v58, %v7435_v3  ;;  %v2394_v22 = vsel %vm2390_vm0, %v8035_v26, %v6821_v24 }
 0x1c4   :  { %7663 = vrot.lane.b32.xlu2 %v7662_v60, %s8113_s20  ;;  %v2459_v20 = vsel %vm2455_vm1, %v2394_v22, %v6981_v7  ;;  %v2783_v28 = vsel %vm2780_vm6, %v2718_v39, %v7440_v4  ;;  %v7145_v4 = vunpack.i.l.bf16 %v9268_v46  ;;  %v7305_v39 = vunpack.i.l.bf16 %v9479_v25 }
 0x1c5   :  { %7658 = vrot.lane.b32.xlu1 %v7657_v27, %s8114_s24  ;;  %7653 = vrot.lane.b32.xlu0 %v7652_v61, %s8115_s25  ;;  %v9977_v27 = vpop.f32.mrf.mxu1  ;;  %v7677_v61 = vpack.i.bf16 %v9954_v35, %v6484_v63  ;;  %v2524_v15 = vsel %vm2520_vm2, %v2459_v20, %v7141_v51  ;;  %v7436_v63 = vunpack.i.h.bf16 %v9922_v0  ;;  %v6825_v0 = vunpack.i.l.bf16 %v8522_v17 }
 0x1c6   :  { %3074 = vmatmul.f32.gmra.mxu0 %v2782_v19  ;;  %v9957_v48 = vpop.permute.xlu2 %7498  ;;  %14854 = vst [vmem:[#allocation118_spill] sm:$0xff] %v9977_v27  ;;  %v10005_v19 = vld [vmem:[%s14569_s0 + $0x2e9] sm:$0xff]  ;;  %v2589_v2 = vsel %vm14738_vm3, %v2524_v15, %v7301_v32  ;;  %v7682_v32 = vpack.i.bf16 %v6384_v44, %v9375_v37  ;;  %v6385_v44 = vld [vmem:[%s14569_s0 + $0x2da] sm:$0xff] }
 0x1c7   :  { %v9971_v56 = vpop.permute.xlu1 %7448  ;;  %v9973_v60 = vpop.permute.xlu0 %7443  ;;  %v2654_v7 = vsel %vm2650_vm4, %v2589_v2, %v7431_v29  ;;  %v7692_v51 = vpack.i.bf16 %v10005_v19, %v6485_v23  ;;  %v8036_v29 = vld [vmem:[%s14569_s0 + $0x30] sm:$0xff]  ;;  %v6422_v23 = vld [vmem:[%s14569_s0 + $0x180] sm:$0xff] }
 0x1c8   :  { %v2719_v22 = vsel %vm2715_vm5, %v2654_v7, %v7436_v63  ;;  %v7445_v20 = vunpack.i.l.bf16 %v9973_v60  ;;  %v6449_v63 = vld [vmem:[%s14569_s0 + $0x2f0] sm:$0xff] }
 0x1c9   :  { %6628 = vmatmul.msk.f32.gmra.mxu1 %vm2390_vm0, %v6564_v41  ;;  %v2395_v41 = vsel %vm2390_vm0, %v8036_v29, %v6825_v0  ;;  %v6826_v0 = vunpack.i.h.bf16 %v8522_v17  ;;  %v7306_v17 = vunpack.i.h.bf16 %v9479_v25 }
 0x1cc   :  { %7678 = vrot.lane.b32.xlu2 %v7677_v61, %s8114_s24  ;;  %v6985_v61 = vunpack.i.l.bf16 %v8841_v21 }
 0x1cd   :  { %7673 = vrot.lane.b32.xlu1 %v7672_v34, %s8115_s25  ;;  %7668 = vrot.lane.b32.xlu0 %v7667_v14, %s8116_s26  ;;  %v7441_v34 = vunpack.i.h.bf16 %v9784_v42  ;;  %v7687_v14 = vpack.i.bf16 %v6448_v59, %v6421_v52  ;;  %v10033_v26 = vpop.f32.mrf.mxu1  ;;  %v6565_v42 = vld [vmem:[%s14569_s0 + $0x262] sm:$0xff]  ;;  %v7450_v52 = vunpack.i.l.bf16 %v9971_v56 }
 0x1ce   :  { %3077 = vmatmul.f32.gmra.mxu0 %v2783_v28  ;;  %v10008_v3 = vpop.permute.xlu2 %7513  ;;  %14855 = vst [vmem:[#allocation119_spill] sm:$0xff] %v10033_v26  ;;  %v2460_v37 = vsel %vm2455_vm1, %v2395_v41, %v6985_v61  ;;  %v8037_v41 = vld [vmem:[%s14569_s0 + $0x38] sm:$0xff] }
 0x1cf   :  { %v10022_v24 = vpop.permute.xlu1 %7463  ;;  %v10024_v58 = vpop.permute.xlu0 %7458  ;;  %v2525_v15 = vsel %vm2520_vm2, %v2460_v37, %v7145_v4  ;;  %v2784_v28 = vsel %vm2780_vm6, %v2719_v22, %v7441_v34  ;;  %v6986_v4 = vunpack.i.h.bf16 %v8841_v21  ;;  %v7707_v34 = vpack.i.bf16 %v6449_v63, %v6422_v23  ;;  %v6486_v23 = vld [vmem:[%s14569_s0 + $0x181] sm:$0xff]  ;;  %v6513_v63 = vld [vmem:[%s14569_s0 + $0x2f1] sm:$0xff] }
 0x1d0   :  { %v2590_v2 = vsel %vm14738_vm3, %v2525_v15, %v7305_v39  ;;  %v7702_v22 = vpack.i.bf16 %v6385_v44, %v9406_v36  ;;  %v7697_v39 = vpack.i.bf16 %v9954_v35, %v9911_v12  ;;  %v2396_v21 = vsel %vm2390_vm0, %v8037_v41, %v6826_v0  ;;  %v6423_v35 = vld [vmem:[%s14569_s0 + $0x188] sm:$0xff] }
 0x1d1   :  { %6629 = vmatmul.msk.f32.gmra.mxu1 %vm2390_vm0, %v6565_v42  ;;  %v2461_v36 = vsel %vm2455_vm1, %v2396_v21, %v6986_v4  ;;  %v7451_v37 = vunpack.i.h.bf16 %v9971_v56  ;;  %v6830_v56 = vunpack.i.l.bf16 %v8557_v31  ;;  %v7460_v21 = vunpack.i.l.bf16 %v10024_v58 }
 0x1d4   :  { %7693 = vrot.lane.b32.xlu2 %v7692_v51, %s8114_s24  ;;  %v2655_v51 = vsel %vm2650_vm4, %v2590_v2, %v7445_v20  ;;  %v7446_v20 = vunpack.i.h.bf16 %v9973_v60  ;;  %v6450_v60 = vld [vmem:[%s14569_s0 + $0x300] sm:$0xff] }
 0x1d5   :  { %7688 = vrot.lane.b32.xlu1 %v7687_v14, %s8115_s25  ;;  %7683 = vrot.lane.b32.xlu0 %v7682_v32, %s8116_s26  ;;  %v7146_v14 = vunpack.i.h.bf16 %v9268_v46  ;;  %v7455_v32 = vunpack.i.l.bf16 %v9821_v9  ;;  %v2720_v29 = vsel %vm2715_vm5, %v2655_v51, %v7450_v52  ;;  %v6566_v46 = vld [vmem:[%s14569_s0 + $0x272] sm:$0xff]  ;;  %v10087_v42 = vpop.f32.mrf.mxu1  ;;  %v6990_v51 = vunpack.i.l.bf16 %v8740_v11 }
 0x1d6   :  { %3080 = vmatmul.f32.gmra.mxu0 %v2784_v28  ;;  %v10057_v59 = vpop.permute.xlu2 %7528  ;;  %14856 = vst [vmem:[#allocation120_spill] sm:$0xff] %v10087_v42  ;;  %v6386_v28 = vld [vmem:[%s14569_s0 + $0x2ea] sm:$0xff]  ;;  %v7722_v4 = vpack.i.bf16 %v6450_v60, %v6423_v35  ;;  %v10151_v60 = vld [vmem:[%s14569_s0 + $0x301] sm:$0xff] }
 0x1d7   :  { %v10065_v7 = vpop.permute.xlu1 %7478  ;;  %v10067_v61 = vpop.permute.xlu0 %7473  ;;  %v2526_v25 = vsel %vm2520_vm2, %v2461_v36, %v7146_v14  ;;  %v2785_v12 = vsel %vm2780_vm6, %v2720_v29, %v7455_v32  ;;  %v7456_v14 = vunpack.i.h.bf16 %v9821_v9  ;;  %v7717_v32 = vpack.i.bf16 %v6386_v28, %v9437_v16  ;;  %v8038_v29 = vld [vmem:[%s14569_s0 + $0x48] sm:$0xff] }
 0x1d8   :  { %v2591_v52 = vsel %vm14738_vm3, %v2526_v25, %v7306_v17  ;;  %v2397_v41 = vsel %vm2390_vm0, %v8038_v29, %v6830_v56  ;;  %v7465_v25 = vunpack.i.l.bf16 %v10022_v24  ;;  %v6487_v35 = vld [vmem:[%s14569_s0 + $0x189] sm:$0xff]  ;;  %v6831_v28 = vunpack.i.h.bf16 %v8557_v31 }
 0x1d9   :  { %6630 = vmatmul.msk.f32.gmra.mxu1 %vm2390_vm0, %v6566_v46  ;;  %v2656_v0 = vsel %vm2650_vm4, %v2591_v52, %v7446_v20  ;;  %v2462_v20 = vsel %vm2455_vm1, %v2397_v41, %v6990_v51  ;;  %v6387_v46 = vld [vmem:[%s14569_s0 + $0x2f2] sm:$0xff]  ;;  %v7311_v31 = vunpack.i.h.bf16 %v9596_v5  ;;  %v6515_v29 = vld [vmem:[%s14569_s0 + $0x309] sm:$0xff] }
 0x1da   :  { %v2721_v17 = vsel %vm2715_vm5, %v2656_v0, %v7451_v37  ;;  %v6991_v0 = vunpack.i.h.bf16 %v8740_v11  ;;  %v7737_v51 = vpack.i.bf16 %v6387_v46, %v9466_v30  ;;  %v7461_v30 = vunpack.i.h.bf16 %v10024_v58  ;;  %v6488_v58 = vld [vmem:[%s14569_s0 + $0x199] sm:$0xff] }
 0x1db   :  { %v2786_v16 = vsel %vm2780_vm6, %v2721_v17, %v7456_v14  ;;  %v7732_v14 = vpack.i.bf16 %v6513_v63, %v10005_v19  ;;  %v6424_v41 = vld [vmem:[%s14569_s0 + $0x198] sm:$0xff] }
 0x1dc   :  { %7708 = vrot.lane.b32.xlu2 %v7707_v34, %s8115_s25  ;;  %v7150_v34 = vunpack.i.l.bf16 %v9266_v6 }
 0x1dd   :  { %7703 = vrot.lane.b32.xlu1 %v7702_v22, %s8116_s26  ;;  %7698 = vrot.lane.b32.xlu0 %v7697_v39, %s8113_s20  ;;  %v7712_v22 = vpack.i.bf16 %v6513_v63, %v6486_v23  ;;  %v7310_v39 = vunpack.i.l.bf16 %v9596_v5  ;;  %v10140_v36 = vpop.f32.mrf.mxu1  ;;  %v6388_v63 = vld [vmem:[%s14569_s0 + $0x302] sm:$0xff] }
 0x1de   :  { %3083 = vmatmul.f32.gmra.mxu0 %v2785_v12  ;;  %v10101_v15 = vpop.permute.xlu2 %7543  ;;  %v2527_v9 = vsel %vm2520_vm2, %v2462_v20, %v7150_v34  ;;  %14857 = vst [vmem:[#allocation121_spill] sm:$0xff] %v10140_v36  ;;  %v7470_v34 = vunpack.i.l.bf16 %v9868_v18 }
 0x1df   :  { %v10115_v44 = vpop.permute.xlu1 %7493  ;;  %v10117_v2 = vpop.permute.xlu0 %7488  ;;  %v2592_v37 = vsel %vm14738_vm3, %v2527_v9, %v7310_v39  ;;  %v7466_v39 = vunpack.i.h.bf16 %v10022_v24  ;;  %v6835_v24 = vunpack.i.l.bf16 %v8427_v47 }
 0x1e0   :  { %v2657_v56 = vsel %vm2650_vm4, %v2592_v37, %v7460_v21  ;;  %v6451_v21 = vld [vmem:[%s14569_s0 + $0x308] sm:$0xff]  ;;  %v7752_v37 = vpack.i.bf16 %v6388_v63, %v9497_v38  ;;  %v6836_v63 = vunpack.i.h.bf16 %v8427_v47 }
 0x1e1   :  { %6631 = vmatmul.msk.f32.gmra.mxu1 %vm2390_vm0, %v9673_v13  ;;  %v7727_v13 = vpack.i.bf16 %v10151_v60, %v6487_v35 }
 0x1e4   :  { %7723 = vrot.lane.b32.xlu2 %v7722_v4, %s8115_s25  ;;  %v7151_v4 = vunpack.i.h.bf16 %v9266_v6 }
 0x1e5   :  { %7718 = vrot.lane.b32.xlu1 %v7717_v32, %s8116_s26  ;;  %7713 = vrot.lane.b32.xlu0 %v7712_v22, %s8114_s24  ;;  %v2722_v32 = vsel %vm2715_vm5, %v2657_v56, %v7465_v25  ;;  %v8039_v22 = vld [vmem:[%s14569_s0 + $0x50] sm:$0xff]  ;;  %v6995_v25 = vunpack.i.l.bf16 %v8874_v55  ;;  %v10209_v35 = vpop.f32.mrf.mxu1  ;;  %v7471_v56 = vunpack.i.h.bf16 %v9868_v18 }
 0x1e6   :  { %3086 = vmatmul.f32.gmra.mxu0 %v2786_v16  ;;  %v10143_v12 = vpop.permute.xlu2 %7558  ;;  %v2398_v11 = vsel %vm2390_vm0, %v8039_v22, %v6831_v28  ;;  %v2787_v5 = vsel %vm2780_vm6, %v2722_v32, %v7470_v34  ;;  %14858 = vst [vmem:[#allocation122_spill] sm:$0xff] %v10209_v35  ;;  %v7155_v28 = vunpack.i.l.bf16 %v9125_v33  ;;  %v8040_v34 = vld [vmem:[%s14569_s0 + $0x60] sm:$0xff]  ;;  %v7480_v22 = vunpack.i.l.bf16 %v10065_v7 }
 0x1e7   :  { %v10157_v23 = vpop.permute.xlu1 %7508  ;;  %v10159_v52 = vpop.permute.xlu0 %7503  ;;  %v2463_v6 = vsel %vm2455_vm1, %v2398_v11, %v6991_v0  ;;  %v7747_v0 = vpack.i.bf16 %v6515_v29, %v6488_v58  ;;  %v6489_v32 = vld [vmem:[%s14569_s0 + $0x1a1] sm:$0xff] }
 0x1e8   :  { %v2528_v19 = vsel %vm2520_vm2, %v2463_v6, %v7151_v4  ;;  %v6425_v6 = vld [vmem:[%s14569_s0 + $0x1a0] sm:$0xff]  ;;  %v7506_v27 = vunpack.i.h.bf16 %v10159_v52 }
 0x1e9   :  { %v2593_v20 = vsel %vm14738_vm3, %v2528_v19, %v7311_v31  ;;  %6632 = vmatmul.msk.f32.gmra.mxu1 %vm2390_vm0, %v9720_v43  ;;  %v7742_v43 = vpack.i.bf16 %v6451_v21, %v6424_v41  ;;  %v6452_v19 = vld [vmem:[%s14569_s0 + $0x318] sm:$0xff]  ;;  %v6996_v21 = vunpack.i.h.bf16 %v8874_v55 }
 0x1ea   :  { %v2658_v46 = vsel %vm2650_vm4, %v2593_v20, %v7461_v30  ;;  %v10236_v30 = vld [vmem:[%s14569_s0 + $0x319] sm:$0xff]  ;;  %v7767_v20 = vpack.i.bf16 %v6515_v29, %v10151_v60  ;;  %v7476_v60 = vunpack.i.h.bf16 %v10067_v61 }
 0x1eb   :  { %v2723_v4 = vsel %vm2715_vm5, %v2658_v46, %v7466_v39  ;;  %v7485_v46 = vunpack.i.l.bf16 %v9906_v45 }
 0x1ec   :  { %7738 = vrot.lane.b32.xlu2 %v7737_v51, %s8116_s26  ;;  %v7315_v51 = vunpack.i.l.bf16 %v9594_v50  ;;  %v2788_v31 = vsel %vm2780_vm6, %v2723_v4, %v7471_v56  ;;  %v8041_v56 = vld [vmem:[%s14569_s0 + $0x68] sm:$0xff] }
 0x1ed   :  { %7733 = vrot.lane.b32.xlu1 %v7732_v14, %s8113_s20  ;;  %7728 = vrot.lane.b32.xlu0 %v7727_v13, %s8114_s24  ;;  %v2399_v14 = vsel %vm2390_vm0, %v8040_v34, %v6835_v24  ;;  %v7475_v13 = vunpack.i.l.bf16 %v10067_v61  ;;  %v7156_v24 = vunpack.i.h.bf16 %v9125_v33  ;;  %v10259_v47 = vpop.f32.mrf.mxu1  ;;  %v2400_v55 = vsel %vm2390_vm0, %v8041_v56, %v6836_v63  ;;  %v10279_v61 = vld [vmem:[%s14569_s0 + $0x321] sm:$0xff] }
 0x1ee   :  { %3089 = vmatmul.f32.gmra.mxu0 %v2787_v5  ;;  %v10188_v17 = vpop.permute.xlu2 %7573  ;;  %v2464_v38 = vsel %vm2455_vm1, %v2399_v14, %v6995_v25  ;;  %v7762_v25 = vpack.i.bf16 %v10236_v30, %v6489_v32  ;;  %14859 = vst [vmem:[#allocation123_spill] sm:$0xff] %v10259_v47  ;;  %v2465_v33 = vsel %vm2455_vm1, %v2400_v55, %v6996_v21  ;;  %v6453_v34 = vld [vmem:[%s14569_s0 + $0x320] sm:$0xff]  ;;  %v6362_v14 = vld [vmem:[%s14569_s0 + $0x1ca] sm:$0xff]  ;;  %v7486_v63 = vunpack.i.h.bf16 %v9906_v45 }
 0x1ef   :  { %v10203_v9 = vpop.permute.xlu1 %7523  ;;  %v10205_v16 = vpop.permute.xlu0 %7518  ;;  %v2529_v18 = vsel %vm2520_vm2, %v2464_v38, %v7155_v28  ;;  %v2530_v29 = vsel %vm2520_vm2, %v2465_v33, %v7156_v24  ;;  %v7091_v21 = vunpack.i.h.bf16 %v9091_v62  ;;  %v6491_v55 = vld [vmem:[%s14569_s0 + $0x1e9] sm:$0xff] }
 0x1f0   :  { %v2594_v5 = vsel %vm14738_vm3, %v2529_v18, %v7315_v51  ;;  %v7481_v51 = vunpack.i.h.bf16 %v10065_v7  ;;  %v6840_v7 = vunpack.i.l.bf16 %v8462_v57 }
 0x1f1   :  { %6633 = vmatmul.msk.f32.gmra.mxu1 %vm2390_vm0, %v9757_v8  ;;  %v2659_v41 = vsel %vm2650_vm4, %v2594_v5, %v7475_v13  ;;  %v7316_v8 = vunpack.i.h.bf16 %v9594_v50  ;;  %v6490_v50 = vld [vmem:[%s14569_s0 + $0x1e1] sm:$0xff]  ;;  %v6389_v13 = vld [vmem:[%s14569_s0 + $0x30a] sm:$0xff]  ;;  %v7160_v5 = vunpack.i.l.bf16 %v9304_v1 }
 0x1f2   :  { %v2724_v28 = vsel %vm2715_vm5, %v2659_v41, %v7480_v22  ;;  %v6931_v22 = vunpack.i.h.bf16 %v8633_v10 }
 0x1f3   :  { %v2595_v38 = vsel %vm14738_vm3, %v2530_v29, %v7316_v8  ;;  %v14862_v29 = vld [vmem:[#allocation103_spill] sm:$0xff] }
 0x1f4   :  { %7753 = vrot.lane.b32.xlu2 %v7752_v37, %s8116_s26  ;;  %v7757_v37 = vpack.i.bf16 %v6452_v19, %v6425_v6  ;;  %v2660_v32 = vsel %vm2650_vm4, %v2595_v38, %v7476_v60  ;;  %v7000_v6 = vunpack.i.l.bf16 %v8872_v54  ;;  %v7782_v19 = vpack.i.bf16 %v10279_v61, %v6490_v50  ;;  %v8043_v60 = vld [vmem:[%s14569_s0 + $0x260] sm:$0xff] }
 0x1f5   :  { %7748 = vrot.lane.b32.xlu1 %v7747_v0, %s8114_s24  ;;  %7743 = vrot.lane.b32.xlu0 %v7742_v43, %s8115_s25  ;;  %v2789_v0 = vsel %vm2780_vm6, %v2724_v28, %v7485_v46  ;;  %v6426_v43 = vld [vmem:[%s14569_s0 + $0x1e0] sm:$0xff]  ;;  %v2725_v24 = vsel %vm2715_vm5, %v2660_v32, %v7481_v51  ;;  %v8042_v46 = vld [vmem:[%s14569_s0 + $0x78] sm:$0xff]  ;;  %v7490_v28 = vunpack.i.l.bf16 %v10117_v2  ;;  %v10320_v56 = vpop.f32.mrf.mxu1  ;;  %v2438_v33 = vsel %vm2390_vm0, %v8043_v60, %v6931_v22 }
 0x1f6   :  { %3092 = vmatmul.f32.gmra.mxu0 %v2788_v31  ;;  %v10231_v11 = vpop.permute.xlu2 %7588  ;;  %v7777_v41 = vpack.i.bf16 %v6453_v34, %v6426_v43  ;;  %v2790_v43 = vsel %vm2780_vm6, %v2725_v24, %v7486_v63  ;;  %v10338_v51 = vld [vmem:[%s14569_s0 + $0x331] sm:$0xff]  ;;  %v6427_v34 = vld [vmem:[%s14569_s0 + $0x1e8] sm:$0xff]  ;;  %v7495_v38 = vunpack.i.l.bf16 %v10115_v44  ;;  %v7161_v63 = vunpack.i.h.bf16 %v9304_v1 }
 0x1f7   :  { %v10248_v58 = vpop.permute.xlu1 %7538  ;;  %v10250_v39 = vpop.permute.xlu0 %7533  ;;  %v6454_v32 = vld [vmem:[%s14569_s0 + $0x330] sm:$0xff] }
 0x1f8   :  { %v6363_v22 = vld [vmem:[%s14569_s0 + $0x1d2] sm:$0xff]  ;;  %v7792_v60 = vpack.i.bf16 %v6454_v32, %v6427_v34 }
 0x1f9   :  { %6634 = vmatmul.msk.f32.gmra.mxu1 %vm2390_vm0, %v9789_v49  ;;  %v7772_v49 = vpack.i.bf16 %v6389_v13, %v6362_v14  ;;  %v6841_v14 = vunpack.i.h.bf16 %v8462_v57  ;;  %v2503_v13 = vsel %vm2455_vm1, %v2438_v33, %v7091_v21  ;;  %v7321_v33 = vunpack.i.h.bf16 %v9510_v40  ;;  %v14864_v32 = vld [vmem:[#allocation3_spill] sm:$0xff] }
 0x1fc   :  { %7768 = vrot.lane.b32.xlu2 %v7767_v20, %s8113_s20  ;;  %v7320_v20 = vunpack.i.l.bf16 %v9510_v40 }
 0x1fd   :  { %7763 = vrot.lane.b32.xlu1 %v7762_v25, %s8114_s24  ;;  %7758 = vrot.lane.b32.xlu0 %v7757_v37, %s8115_s25  ;;  %v2401_v25 = vsel %vm2390_vm0, %v8042_v46, %v6840_v7  ;;  %v14860_v37 = vld [vmem:[#allocation83_spill] sm:$0xff]  ;;  %v7576_v46 = vunpack.i.h.bf16 %v10188_v17 }
 0x1fe   :  { %3095 = vmatmul.f32.gmra.mxu0 %v2789_v0  ;;  %v10285_v4 = vpop.permute.xlu2 %7603  ;;  %v7251_v8 = vunpack.i.h.bf16 %v14860_v37  ;;  %v2466_v45 = vsel %vm2455_vm1, %v2401_v25, %v7000_v6  ;;  %14861 = vst [vmem:[#allocation83_spill] sm:$0xff] %v10320_v56  ;;  %v7411_v0 = vunpack.i.h.bf16 %v14862_v29  ;;  %v6390_v6 = vld [vmem:[%s14569_s0 + $0x31a] sm:$0xff] }
 0x1ff   :  { %v10300_v18 = vpop.permute.xlu1 %7553  ;;  %v10302_v31 = vpop.permute.xlu0 %7548  ;;  %v2531_v50 = vsel %vm2520_vm2, %v2466_v45, %v7160_v5  ;;  %v7001_v5 = vunpack.i.h.bf16 %v8872_v54  ;;  %v7797_v45 = vpack.i.bf16 %v10338_v51, %v6491_v55  ;;  %v7500_v54 = vunpack.i.l.bf16 %v9957_v48 }
 0x200   :  { %v2596_v57 = vsel %vm14738_vm3, %v2531_v50, %v7320_v20  ;;  %v7787_v1 = vpack.i.bf16 %v6390_v6, %v6363_v22  ;;  %v7491_v55 = vunpack.i.h.bf16 %v10117_v2  ;;  %v6428_v2 = vld [vmem:[%s14569_s0 + $0x1f8] sm:$0xff]  ;;  %v6855_v22 = vunpack.i.l.bf16 %v14864_v32 }
 0x201   :  { %v2661_v24 = vsel %vm2650_vm4, %v2596_v57, %v7490_v28  ;;  %v7496_v6 = vunpack.i.h.bf16 %v10115_v44 }
 0x202   :  { %v2726_v50 = vsel %vm2715_vm5, %v2661_v24, %v7495_v38  ;;  %v14866_v24 = vld [vmem:[#allocation7_spill] sm:$0xff] }
 0x203   :  { %v2791_v38 = vsel %vm2780_vm6, %v2726_v50, %v7500_v54 }
 0x204   :  { %7783 = vrot.lane.b32.xlu2 %v7782_v19, %s8114_s24  ;;  %v14863_v19 = vld [vmem:[#allocation112_spill] sm:$0xff] }
 0x205   :  { %7778 = vrot.lane.b32.xlu1 %v7777_v41, %s8115_s25  ;;  %7773 = vrot.lane.b32.xlu0 %v7772_v49, %s8116_s26  ;;  %v2568_v41 = vsel %vm2520_vm2, %v2503_v13, %v7251_v8 }
 0x206   :  { %3098 = vmatmul.f32.gmra.mxu0 %v2790_v43  ;;  %v10346_v7 = vpop.permute.xlu2 %7618  ;;  %6635 = vmatmul.msk.f32.gmra.mxu1 %vm2390_vm0, %v14863_v19  ;;  %v2633_v8 = vsel %vm14738_vm3, %v2568_v41, %v7411_v0  ;;  %v8044_v43 = vld [vmem:[%s14569_s0 + $0x80] sm:$0xff]  ;;  %v10398_v19 = vpop.f32.mrf.mxu1 }
 0x207   :  { %v10363_v49 = vpop.permute.xlu1 %7568  ;;  %v10365_v21 = vpop.permute.xlu0 %7563  ;;  %v2402_v13 = vsel %vm2390_vm0, %v8044_v43, %v6841_v14  ;;  %v6455_v14 = vld [vmem:[%s14569_s0 + $0x338] sm:$0xff]  ;;  %14865 = vst [vmem:[#allocation103_spill] sm:$0xff] %v10398_v19 }
 0x208   :  { %v7571_v25 = vunpack.i.h.bf16 %v10363_v49  ;;  %v7566_v20 = vunpack.i.h.bf16 %v10365_v21  ;;  %v2467_v34 = vsel %vm2455_vm1, %v2402_v13, %v7001_v5  ;;  %v14871_v13 = vld [vmem:[#allocation61_spill] sm:$0xff] }
 0x209   :  { %v2532_v0 = vsel %vm2520_vm2, %v2467_v34, %v7161_v63  ;;  %v6391_v63 = vld [vmem:[%s14569_s0 + $0x322] sm:$0xff]  ;;  %v7501_v34 = vunpack.i.h.bf16 %v9957_v48 }
 0x20a   :  { %v2698_v28 = vsel %vm2650_vm4, %v2633_v8, %v7566_v20  ;;  %v2597_v41 = vsel %vm14738_vm3, %v2532_v0, %v7321_v33  ;;  %v14869_v8 = vld [vmem:[#allocation23_spill] sm:$0xff]  ;;  %v7812_v33 = vpack.i.bf16 %v6455_v14, %v6428_v2  ;;  %v14872_v2 = vld [vmem:[#allocation38_spill] sm:$0xff] }
 0x20b   :  { %v2763_v57 = vsel %vm2715_vm5, %v2698_v28, %v7571_v25  ;;  %v14867_v25 = vld [vmem:[#allocation8_spill] sm:$0xff]  ;;  %v2662_v44 = vsel %vm2650_vm4, %v2597_v41, %v7491_v55  ;;  %v6935_v50 = vunpack.i.l.bf16 %v14869_v8  ;;  %v7802_v55 = vpack.i.bf16 %v10279_v61, %v10236_v30  ;;  %v8048_v61 = vld [vmem:[%s14569_s0 + $0x90] sm:$0xff] }
 0x20c   :  { %7798 = vrot.lane.b32.xlu2 %v7797_v45, %s8114_s24  ;;  %v2828_v40 = vsel %vm2780_vm6, %v2763_v57, %v7576_v46  ;;  %v6850_v46 = vunpack.i.l.bf16 %v14866_v24  ;;  %v6845_v20 = vunpack.i.l.bf16 %v14867_v25  ;;  %v14870_v28 = vld [vmem:[#allocation24_spill] sm:$0xff]  ;;  %v7165_v57 = vunpack.i.l.bf16 %v14871_v13 }
 0x20d   :  { %7793 = vrot.lane.b32.xlu1 %v7792_v60, %s8115_s25  ;;  %7788 = vrot.lane.b32.xlu0 %v7787_v1, %s8116_s26  ;;  %v14868_v60 = vld [vmem:[#allocation116_spill] sm:$0xff]  ;;  %v6846_v1 = vunpack.i.h.bf16 %v14867_v25  ;;  %v7005_v43 = vunpack.i.l.bf16 %v14870_v28  ;;  %v7095_v14 = vunpack.i.l.bf16 %v14872_v2  ;;  %v14873_v25 = vld [vmem:[#allocation97_spill] sm:$0xff]  ;;  %v2727_v48 = vsel %vm2715_vm5, %v2662_v44, %v7496_v6 }
 0x20e   :  { %3101 = vmatmul.f32.gmra.mxu0 %v2791_v38  ;;  %3212 = vmatmul.f32.vlgmr.msra.gmra.mxu3 %v2828_v40  ;;  %v10400_v5 = vpop.permute.xlu2 %7633  ;;  %v8045_v40 = vld [vmem:[%s14569_s0 + $0x1e2] sm:$0xff]  ;;  %v8049_v6 = vld [vmem:[%s14569_s0 + $0x98] sm:$0xff]  ;;  %v7006_v56 = vunpack.i.h.bf16 %v14870_v28 }
 0x20f   :  { %v10408_v45 = vpop.permute.xlu1 %7583  ;;  %v10410_v54 = vpop.permute.xlu0 %7578  ;;  %6636 = vmatmul.msk.f32.gmra.mxu1 %vm2390_vm0, %v14868_v60  ;;  %v7807_v0 = vpack.i.bf16 %v6391_v63, %v8045_v40  ;;  %v8046_v38 = vld [vmem:[%s14569_s0 + $0xc0] sm:$0xff]  ;;  %v7325_v60 = vunpack.i.l.bf16 %v14873_v25  ;;  %v8047_v63 = vld [vmem:[%s14569_s0 + $0xa8] sm:$0xff]  ;;  %v7505_v40 = vunpack.i.l.bf16 %v10159_v52  ;;  %v2404_v44 = vsel %vm2390_vm0, %v8049_v6, %v6846_v1 }
 0x210   :  { %v10429_v41 = vsel %vm2390_vm0, %v8046_v38, %v6855_v22  ;;  %v10439_v30 = vsel %vm2390_vm0, %v8047_v63, %v6850_v46  ;;  %v2403_v22 = vsel %vm2390_vm0, %v8048_v61, %v6845_v20  ;;  %v6936_v38 = vunpack.i.h.bf16 %v14869_v8  ;;  %v14874_v46 = vld [vmem:[#allocation82_spill] sm:$0xff]  ;;  %v8050_v20 = vld [vmem:[%s14569_s0 + $0x270] sm:$0xff]  ;;  %v6429_v8 = vld [vmem:[%s14569_s0 + $0x200] sm:$0xff] }
 0x211   :  { %v2468_v19 = vsel %vm2455_vm1, %v2403_v22, %v7005_v43  ;;  %v7255_v63 = vunpack.i.l.bf16 %v14874_v46  ;;  %v2439_v61 = vsel %vm2390_vm0, %v8050_v20, %v6935_v50  ;;  %v2792_v1 = vsel %vm2780_vm6, %v2727_v48, %v7501_v34  ;;  %v6456_v43 = vld [vmem:[%s14569_s0 + $0x348] sm:$0xff]  ;;  %v10481_v34 = vld [vmem:[%s14569_s0 + $0x339] sm:$0xff] }
 0x212   :  { %v2533_v47 = vsel %vm2520_vm2, %v2468_v19, %v7165_v57  ;;  %v7096_v50 = vunpack.i.h.bf16 %v14872_v2  ;;  %v2504_v28 = vsel %vm2455_vm1, %v2439_v61, %v7095_v14  ;;  %v7510_v19 = vunpack.i.l.bf16 %v10157_v23  ;;  %v6492_v57 = vld [vmem:[%s14569_s0 + $0x1f9] sm:$0xff] }
 0x213   :  { %v7256_v2 = vunpack.i.h.bf16 %v14874_v46  ;;  %v7581_v14 = vunpack.i.h.bf16 %v10410_v54  ;;  %v2569_v20 = vsel %vm2520_vm2, %v2504_v28, %v7255_v63  ;;  %v7586_v61 = vunpack.i.h.bf16 %v10408_v45 }
 0x214   :  { %7813 = vrot.lane.b32.xlu2 %v7812_v33, %s8115_s25  ;;  %v6392_v33 = vld [vmem:[%s14569_s0 + $0x332] sm:$0xff]  ;;  %v7827_v36 = vpack.i.bf16 %v6456_v43, %v6429_v8  ;;  %v7817_v42 = vpack.i.bf16 %v10481_v34, %v6492_v57  ;;  %v2469_v26 = vsel %vm2455_vm1, %v2404_v44, %v7006_v56  ;;  %v14875_v57 = vld [vmem:[#allocation14_spill] sm:$0xff] }
 0x215   :  { %7808 = vrot.lane.b32.xlu1 %v7807_v0, %s8116_s26  ;;  %7803 = vrot.lane.b32.xlu0 %v7802_v55, %s8113_s20  ;;  %v2598_v0 = vsel %vm14738_vm3, %v2533_v47, %v7325_v60  ;;  %v7166_v55 = vunpack.i.h.bf16 %v14871_v13  ;;  %v7515_v47 = vunpack.i.l.bf16 %v10008_v3  ;;  %v7591_v13 = vunpack.i.h.bf16 %v10231_v11  ;;  %v8051_v60 = vld [vmem:[%s14569_s0 + $0x1ea] sm:$0xff]  ;;  %v8052_v8 = vld [vmem:[%s14569_s0 + $0x278] sm:$0xff] }
 0x216   :  { %3104 = vmatmul.f32.gmra.mxu0 %v2792_v1  ;;  %v2663_v6 = vsel %vm2650_vm4, %v2598_v0, %v7505_v40  ;;  %v10492_v1 = vpop.permute.xlu2 %7648  ;;  %v7822_v46 = vpack.i.bf16 %v6392_v33, %v8051_v60  ;;  %v7326_v40 = vunpack.i.h.bf16 %v14873_v25  ;;  %v2440_v43 = vsel %vm2390_vm0, %v8052_v8, %v6936_v38  ;;  %v14876_v44 = vld [vmem:[#allocation22_spill] sm:$0xff] }
 0x217   :  { %v10487_v48 = vpop.permute.xlu1 %7598  ;;  %v7594_v22 = vpop.permute.xlu0 %7593  ;;  %v2728_v28 = vsel %vm2715_vm5, %v2663_v6, %v7510_v19  ;;  %v6945_v60 = vunpack.i.l.bf16 %v14875_v57  ;;  %v2505_v25 = vsel %vm2455_vm1, %v2440_v43, %v7096_v50  ;;  %v2534_v19 = vsel %vm2520_vm2, %v2469_v26, %v7166_v55  ;;  %v6393_v26 = vld [vmem:[%s14569_s0 + $0x33a] sm:$0xff] }
 0x218   :  { %v7595_v35 = vunpack.i.l.bf16 %v7594_v22  ;;  %v7596_v63 = vunpack.i.h.bf16 %v7594_v22  ;;  %v2570_v22 = vsel %vm2520_vm2, %v2505_v25, %v7256_v2  ;;  %v7601_v38 = vunpack.i.h.bf16 %v10487_v48  ;;  %v6493_v55 = vld [vmem:[%s14569_s0 + $0x201] sm:$0xff] }
 0x219   :  { %v2793_v52 = vsel %vm2780_vm6, %v2728_v28, %v7515_v47  ;;  %v7511_v50 = vunpack.i.h.bf16 %v10157_v23  ;;  %v2599_v2 = vsel %vm14738_vm3, %v2534_v19, %v7326_v40  ;;  %v6940_v6 = vunpack.i.l.bf16 %v14876_v44  ;;  %v14878_v47 = vld [vmem:[#allocation52_spill] sm:$0xff] }
 0x21a   :  { %v2634_v0 = vsel %vm14738_vm3, %v2569_v20, %v7595_v35  ;;  %v14877_v20 = vld [vmem:[#allocation34_spill] sm:$0xff]  ;;  %v7170_v23 = vunpack.i.l.bf16 %v14878_v47  ;;  %v2664_v28 = vsel %vm2650_vm4, %v2599_v2, %v7506_v27  ;;  %v7606_v8 = vunpack.i.h.bf16 %v10285_v4  ;;  %v8053_v40 = vld [vmem:[%s14569_s0 + $0x1fa] sm:$0xff]  ;;  %v8054_v27 = vld [vmem:[%s14569_s0 + $0xb0] sm:$0xff] }
 0x21b   :  { %v2699_v33 = vsel %vm2650_vm4, %v2634_v0, %v7581_v14  ;;  %v2635_v14 = vsel %vm14738_vm3, %v2570_v22, %v7596_v63  ;;  %v7516_v0 = vunpack.i.h.bf16 %v10008_v3  ;;  %v7842_v63 = vpack.i.bf16 %v6393_v26, %v8053_v40  ;;  %v14880_v22 = vld [vmem:[#allocation50_spill] sm:$0xff] }
 0x21c   :  { %7828 = vrot.lane.b32.xlu2 %v7827_v36, %s8115_s25  ;;  %v2764_v35 = vsel %vm2715_vm5, %v2699_v33, %v7586_v61  ;;  %v6941_v36 = vunpack.i.h.bf16 %v14876_v44  ;;  %v7010_v61 = vunpack.i.l.bf16 %v14877_v20  ;;  %v7837_v43 = vpack.i.bf16 %v10481_v34, %v10338_v51  ;;  %v14882_v40 = vld [vmem:[#allocation70_spill] sm:$0xff] }
 0x21d   :  { %7823 = vrot.lane.b32.xlu1 %v7822_v46, %s8116_s26  ;;  %7818 = vrot.lane.b32.xlu0 %v7817_v42, %s8114_s24  ;;  %v2829_v56 = vsel %vm2780_vm6, %v2764_v35, %v7591_v13  ;;  %v6520_v42 = vld [vmem:[%s14569_s0 + $0x349] sm:$0xff]  ;;  %v2700_v19 = vsel %vm2650_vm4, %v2635_v14, %v7601_v38  ;;  %v14879_v3 = vunpack.i.h.bf16 %v14866_v24  ;;  %v2729_v51 = vsel %vm2715_vm5, %v2664_v28, %v7511_v50  ;;  %v8055_v38 = vld [vmem:[%s14569_s0 + $0x2a0] sm:$0xff] }
 0x21e   :  { %3107 = vmatmul.f32.gmra.mxu0 %v2793_v52  ;;  %3215 = vmatmul.f32.gmra.mxu3 %v2829_v56  ;;  %v7832_v25 = vpack.i.bf16 %v6520_v42, %v6493_v55  ;;  %v7100_v52 = vunpack.i.l.bf16 %v14880_v22  ;;  %v14881_v56 = vld [vmem:[#allocation96_spill] sm:$0xff]  ;;  %v10561_v44 = vpop.permute.xlu2 %7663  ;;  %v14671_v34 = vmov 0.0   ;;  %v10570_v24 = vsel %vm2390_vm0, %v8055_v38, %v6945_v60  ;;  %v8056_v55 = vld [vmem:[%s14569_s0 + $0x288] sm:$0xff]  ;;  %v8057_v50 = vld [vmem:[%s14569_s0 + $0x290] sm:$0xff] }
 0x21f   :  { %v10537_v13 = vpop.permute.xlu1 %7613  ;;  %v10539_v46 = vpop.permute.xlu0 %7608  ;;  %v10557_v35 = vsel %vm2390_vm0, %v8054_v27, %v14879_v3  ;;  %v7330_v26 = vunpack.i.l.bf16 %v14881_v56  ;;  %4341 = vst.msk [vmem:[#allocation2] sm:$0xff] %vm2390_vm0, %v14671_v34  ;;  %v2441_v42 = vsel %vm2390_vm0, %v8056_v55, %v6940_v6  ;;  %v2442_v2 = vsel %vm2390_vm0, %v8057_v50, %v6941_v36  ;;  %v8059_v50 = vld [vmem:[%s14569_s0 + $0x212] sm:$0xff] }
 0x220   :  { %v7611_v33 = vunpack.i.h.bf16 %v10539_v46  ;;  %v7520_v14 = vunpack.i.l.bf16 %v10205_v16  ;;  %4342 = vst.msk [vmem:[#allocation2 + $0x8] sm:$0xff] %vm2390_vm0, %v14671_v34  ;;  %v7011_v60 = vunpack.i.h.bf16 %v14877_v20  ;;  %v2470_v28 = vsel %vm2455_vm1, %v10439_v30, %v7010_v61  ;;  %v6430_v30 = vld [vmem:[%s14569_s0 + $0x210] sm:$0xff] }
 0x221   :  { %v7260_v27 = vunpack.i.l.bf16 %v14882_v40  ;;  %v2765_v6 = vsel %vm2715_vm5, %v2700_v19, %v7606_v8  ;;  %4345 = vst.msk [vmem:[#allocation2 + $0x18] sm:$0xff] %vm2390_vm0, %v14671_v34  ;;  %v2535_v36 = vsel %vm2520_vm2, %v2470_v28, %v7170_v23  ;;  %v2794_v20 = vsel %vm2780_vm6, %v2729_v51, %v7516_v0  ;;  %v6457_v0 = vld [vmem:[%s14569_s0 + $0x350] sm:$0xff] }
 0x222   :  { %v2830_v3 = vsel %vm2780_vm6, %v2765_v6, %v7611_v33  ;;  %4346 = vst.msk [vmem:[#allocation2 + $0x20] sm:$0xff] %vm2390_vm0, %v14671_v34  ;;  %v7101_v61 = vunpack.i.h.bf16 %v14880_v22  ;;  %v2506_v8 = vsel %vm2455_vm1, %v2441_v42, %v7100_v52  ;;  %v7525_v23 = vunpack.i.l.bf16 %v10203_v9  ;;  %v6521_v33 = vld [vmem:[%s14569_s0 + $0x351] sm:$0xff] }
 0x223   :  { %4348 = vst.msk [vmem:[#allocation2 + $0x30] sm:$0xff] %vm2390_vm0, %v14671_v34  ;;  %v7261_v19 = vunpack.i.h.bf16 %v14882_v40  ;;  %v7616_v22 = vunpack.i.h.bf16 %v10537_v13  ;;  %v2571_v38 = vsel %vm2520_vm2, %v2506_v8, %v7260_v27  ;;  %v7621_v55 = vunpack.i.h.bf16 %v10346_v7 }
 0x224   :  { %7843 = vrot.lane.b32.xlu2 %v7842_v63, %s8116_s26  ;;  %v2600_v63 = vsel %vm14738_vm3, %v2535_v36, %v7330_v26  ;;  %4349 = vst.msk [vmem:[#allocation2 + $0x38] sm:$0xff] %vm2390_vm0, %v14671_v34  ;;  %v7847_v27 = vpack.i.bf16 %v6457_v0, %v6430_v30  ;;  %v7331_v36 = vunpack.i.h.bf16 %v14881_v56  ;;  %v7521_v30 = vunpack.i.h.bf16 %v10205_v16 }
 0x225   :  { %7838 = vrot.lane.b32.xlu1 %v7837_v43, %s8113_s20  ;;  %7833 = vrot.lane.b32.xlu0 %v7832_v25, %s8114_s24  ;;  %v6494_v43 = vld [vmem:[%s14569_s0 + $0x211] sm:$0xff]  ;;  %v7171_v25 = vunpack.i.h.bf16 %v14878_v47  ;;  %v2665_v26 = vsel %vm2650_vm4, %v2600_v63, %v7520_v14  ;;  %v8058_v47 = vld [vmem:[%s14569_s0 + $0x202] sm:$0xff]  ;;  %4351 = vst.msk [vmem:[#allocation2 + $0x48] sm:$0xff] %vm2390_vm0, %v14671_v34  ;;  %v7530_v14 = vunpack.i.l.bf16 %v10057_v59  ;;  %v2471_v63 = vsel %vm2455_vm1, %v10557_v35, %v7011_v60 }
 0x226   :  { %3110 = vmatmul.f32.gmra.mxu0 %v2794_v20  ;;  %3218 = vmatmul.f32.gmra.mxu3 %v2830_v3  ;;  %v7857_v28 = vpack.i.bf16 %v8059_v50, %v8058_v47  ;;  %v7852_v6 = vpack.i.bf16 %v6521_v33, %v6494_v43  ;;  %4352 = vst.msk [vmem:[#allocation2 + $0x50] sm:$0xff] %vm2390_vm0, %v14671_v34  ;;  %v10652_v43 = vpop.permute.xlu2 %7678  ;;  %v7636_v16 = vunpack.i.h.bf16 %v10400_v5  ;;  %v6431_v60 = vld [vmem:[%s14569_s0 + $0x218] sm:$0xff]  ;;  %v14885_v50 = vld [vmem:[#allocation65_spill] sm:$0xff] }
 0x227   :  { %v7629_v52 = vpop.permute.xlu1 %7628  ;;  %v10619_v51 = vpop.permute.xlu0 %7623  ;;  %v2730_v3 = vsel %vm2715_vm5, %v2665_v26, %v7525_v23  ;;  %4354 = vst.msk [vmem:[#allocation2 + $0x60] sm:$0xff] %vm2390_vm0, %v14671_v34  ;;  %v2507_v47 = vsel %vm2455_vm1, %v2442_v2, %v7101_v61  ;;  %v2536_v56 = vsel %vm2520_vm2, %v2471_v63, %v7171_v25  ;;  %v7526_v61 = vunpack.i.h.bf16 %v10203_v9  ;;  %v6432_v25 = vld [vmem:[%s14569_s0 + $0x228] sm:$0xff]  ;;  %v14883_v9 = vld [vmem:[#allocation33_spill] sm:$0xff] }
 0x228   :  { %v7630_v42 = vunpack.i.l.bf16 %v7629_v52  ;;  %v7626_v40 = vunpack.i.h.bf16 %v10619_v51  ;;  %v7631_v20 = vunpack.i.h.bf16 %v7629_v52  ;;  %4355 = vst.msk [vmem:[#allocation2 + $0x68] sm:$0xff] %vm2390_vm0, %v14671_v34  ;;  %v2572_v23 = vsel %vm2520_vm2, %v2507_v47, %v7261_v19  ;;  %v6496_v52 = vld [vmem:[%s14569_s0 + $0x229] sm:$0xff] }
 0x229   :  { %4357 = vst.msk [vmem:[#allocation2 + $0x78] sm:$0xff] %vm2390_vm0, %v14671_v34  ;;  %v2795_v35 = vsel %vm2780_vm6, %v2730_v3, %v7530_v14  ;;  %v2601_v19 = vsel %vm14738_vm3, %v2536_v56, %v7331_v36  ;;  %v8061_v63 = vld [vmem:[%s14569_s0 + $0x22a] sm:$0xff] }
 0x22a   :  { %v2636_v8 = vsel %vm14738_vm3, %v2571_v38, %v7630_v42  ;;  %4358 = vst.msk [vmem:[#allocation2 + $0x80] sm:$0xff] %vm2390_vm0, %v14671_v34  ;;  %v2637_v26 = vsel %vm14738_vm3, %v2572_v23, %v7631_v20  ;;  %v7015_v38 = vunpack.i.l.bf16 %v14883_v9  ;;  %v7531_v20 = vunpack.i.h.bf16 %v10057_v59  ;;  %v14887_v23 = vld [vmem:[#allocation88_spill] sm:$0xff] }
 0x22b   :  { %v2701_v0 = vsel %vm2650_vm4, %v2636_v8, %v7616_v22  ;;  %v6495_v22 = vld [vmem:[%s14569_s0 + $0x219] sm:$0xff]  ;;  %4360 = vst.msk [vmem:[#allocation2 + $0x90] sm:$0xff] %vm2390_vm0, %v14671_v34  ;;  %v2702_v59 = vsel %vm2650_vm4, %v2637_v26, %v7636_v16  ;;  %v7540_v26 = vunpack.i.l.bf16 %v10248_v58 }
 0x22c   :  { %7858 = vrot.lane.b32.xlu2 %v7857_v28, %s8116_s26  ;;  %v2766_v33 = vsel %vm2715_vm5, %v2701_v0, %v7621_v55  ;;  %v14884_v55 = vld [vmem:[#allocation49_spill] sm:$0xff]  ;;  %v7175_v28 = vunpack.i.l.bf16 %v14885_v50  ;;  %4361 = vst.msk [vmem:[#allocation2 + $0x98] sm:$0xff] %vm2390_vm0, %v14671_v34  ;;  %v7862_v0 = vpack.i.bf16 %v6432_v25, %v6431_v60  ;;  %v7867_v56 = vpack.i.bf16 %v6496_v52, %v6495_v22  ;;  %v6433_v52 = vld [vmem:[%s14569_s0 + $0x230] sm:$0xff] }
 0x22d   :  { %7848 = vrot.lane.b32.xlu0 %v7847_v27, %s8115_s25  ;;  %7853 = vrot.lane.b32.xlu1 %v7852_v6, %s8114_s24  ;;  %v2831_v2 = vsel %vm2780_vm6, %v2766_v33, %v7626_v40  ;;  %v7105_v42 = vunpack.i.l.bf16 %v14884_v55  ;;  %v2666_v27 = vsel %vm2650_vm4, %v2601_v19, %v7521_v30  ;;  %v14886_v6 = vld [vmem:[#allocation86_spill] sm:$0xff]  ;;  %v8060_v8 = vld [vmem:[%s14569_s0 + $0x21a] sm:$0xff]  ;;  %4363 = vst.msk [vmem:[#allocation2 + $0xa8] sm:$0xff] %vm2390_vm0, %v14671_v34  ;;  %v7335_v33 = vunpack.i.l.bf16 %v14887_v23 }
 0x22e   :  { %3113 = vmatmul.f32.gmra.mxu0 %v2795_v35  ;;  %3221 = vmatmul.f32.gmra.mxu3 %v2831_v2  ;;  %v7265_v36 = vunpack.i.l.bf16 %v14886_v6  ;;  %v7872_v47 = vpack.i.bf16 %v8061_v63, %v8060_v8  ;;  %4364 = vst.msk [vmem:[#allocation2 + $0xb0] sm:$0xff] %vm2390_vm0, %v14671_v34  ;;  %v7665_v35 = vunpack.i.l.bf16 %v10561_v44  ;;  %v2731_v2 = vsel %vm2715_vm5, %v2666_v27, %v7526_v61  ;;  %v6497_v27 = vld [vmem:[%s14569_s0 + $0x231] sm:$0xff] }
 0x22f   :  { %v10685_v14 = vpop.permute.xlu1 %7643  ;;  %v10687_v40 = vpop.permute.xlu0 %7638  ;;  %4366 = vst.msk [vmem:[#allocation2 + $0xc0] sm:$0xff] %vm2390_vm0, %v14671_v34  ;;  %v6856_v8 = vunpack.i.h.bf16 %v14864_v32  ;;  %v2472_v60 = vsel %vm2455_vm1, %v10429_v41, %v7015_v38  ;;  %v2508_v16 = vsel %vm2455_vm1, %v10570_v24, %v7105_v42  ;;  %v7535_v25 = vunpack.i.l.bf16 %v10250_v39  ;;  %v6434_v42 = vld [vmem:[%s14569_s0 + $0x240] sm:$0xff] }
 0x230   :  { %v7641_v3 = vunpack.i.h.bf16 %v10687_v40  ;;  %v7646_v30 = vunpack.i.h.bf16 %v10685_v14  ;;  %4367 = vst.msk [vmem:[#allocation2 + $0xc8] sm:$0xff] %vm2390_vm0, %v14671_v34  ;;  %v2537_v61 = vsel %vm2520_vm2, %v2472_v60, %v7175_v28  ;;  %v2573_v22 = vsel %vm2520_vm2, %v2508_v16, %v7265_v36  ;;  %v10737_v38 = vpop.permute.xlu2 %7693  ;;  %v6498_v36 = vld [vmem:[%s14569_s0 + $0x241] sm:$0xff] }
 0x231   :  { %4369 = vst.msk [vmem:[#allocation2 + $0xd8] sm:$0xff] %vm2390_vm0, %v14671_v34  ;;  %v7651_v32 = vunpack.i.h.bf16 %v10492_v1  ;;  %v2796_v41 = vsel %vm2780_vm6, %v2731_v2, %v7531_v20  ;;  %v2602_v28 = vsel %vm14738_vm3, %v2537_v61, %v7335_v33  ;;  %v2638_v20 = vsel %vm14738_vm3, %v2573_v22, %v7665_v35  ;;  %v8064_v2 = vld [vmem:[%s14569_s0 + $0x242] sm:$0xff] }
 0x232   :  { %v2767_v19 = vsel %vm2715_vm5, %v2702_v59, %v7641_v3  ;;  %4370 = vst.msk [vmem:[#allocation2 + $0xe0] sm:$0xff] %vm2390_vm0, %v14671_v34  ;;  %v8062_v3 = vld [vmem:[%s14569_s0 + $0xc8] sm:$0xff]  ;;  %v7176_v59 = vunpack.i.h.bf16 %v14885_v50  ;;  %v7545_v33 = vunpack.i.l.bf16 %v10101_v15  ;;  %v7877_v50 = vpack.i.bf16 %v6434_v42, %v6433_v52 }
 0x233   :  { %v2832_v24 = vsel %vm2780_vm6, %v2767_v19, %v7646_v30  ;;  %4372 = vst.msk [vmem:[#allocation2 + $0xf0] sm:$0xff] %vm2390_vm0, %v14671_v34  ;;  %v2408_v63 = vsel %vm2390_vm0, %v8062_v3, %v6856_v8  ;;  %v7882_v60 = vpack.i.bf16 %v6498_v36, %v6497_v27  ;;  %v2703_v16 = vsel %vm2650_vm4, %v2638_v20, %v7651_v32  ;;  %v6436_v36 = vld [vmem:[%s14569_s0 + $0x258] sm:$0xff]  ;;  %v14888_v3 = vld [vmem:[#allocation11_spill] sm:$0xff] }
 0x234   :  { %7873 = vrot.lane.b32.xlu2 %v7872_v47, %s8116_s26  ;;  %v7016_v47 = vunpack.i.h.bf16 %v14883_v9  ;;  %4373 = vst.msk [vmem:[#allocation2 + $0xf8] sm:$0xff] %vm2390_vm0, %v14671_v34  ;;  %v8063_v9 = vld [vmem:[%s14569_s0 + $0x232] sm:$0xff]  ;;  %v7336_v61 = vunpack.i.h.bf16 %v14887_v23  ;;  %v7536_v52 = vunpack.i.h.bf16 %v10250_v39  ;;  %v7266_v23 = vunpack.i.h.bf16 %v14886_v6  ;;  %v8065_v6 = vld [vmem:[%s14569_s0 + $0x2a8] sm:$0xff] }
 0x235   :  { %7863 = vrot.lane.b32.xlu0 %v7862_v0, %s8115_s25  ;;  %7868 = vrot.lane.b32.xlu1 %v7867_v56, %s8114_s24  ;;  %v2667_v56 = vsel %vm2650_vm4, %v2602_v28, %v7535_v25  ;;  %4375 = vst.msk [vmem:[#allocation2 + $0x108] sm:$0xff] %vm2390_vm0, %v14671_v34  ;;  %v7887_v19 = vpack.i.bf16 %v8064_v2, %v8063_v9  ;;  %v6946_v25 = vunpack.i.h.bf16 %v14875_v57  ;;  %v7106_v28 = vunpack.i.h.bf16 %v14884_v55 }
 0x236   :  { %3116 = vmatmul.f32.gmra.mxu0 %v2796_v41  ;;  %3224 = vmatmul.f32.gmra.mxu3 %v2832_v24  ;;  %4376 = vst.msk [vmem:[#allocation2 + $0x110] sm:$0xff] %vm2390_vm0, %v14671_v34  ;;  %v2732_v22 = vsel %vm2715_vm5, %v2667_v56, %v7540_v26  ;;  %v2473_v24 = vsel %vm2455_vm1, %v2408_v63, %v7016_v47  ;;  %v7666_v32 = vunpack.i.h.bf16 %v10561_v44  ;;  %v7541_v27 = vunpack.i.h.bf16 %v10248_v58  ;;  %v6435_v44 = vld [vmem:[%s14569_s0 + $0x248] sm:$0xff]  ;;  %v14889_v47 = vld [vmem:[#allocation27_spill] sm:$0xff] }
 0x237   :  { %v10757_v30 = vpop.permute.xlu1 %7658  ;;  %v10759_v0 = vpop.permute.xlu0 %7653  ;;  %4378 = vst.msk [vmem:[#allocation2 + $0x120] sm:$0xff] %vm2390_vm0, %v14671_v34  ;;  %v2538_v57 = vsel %vm2520_vm2, %v2473_v24, %v7176_v59  ;;  %v2797_v39 = vsel %vm2780_vm6, %v2732_v22, %v7545_v33  ;;  %v2444_v26 = vsel %vm2390_vm0, %v8065_v6, %v6946_v25  ;;  %v6860_v63 = vunpack.i.l.bf16 %v14888_v3  ;;  %v14891_v24 = vld [vmem:[#allocation101_spill] sm:$0xff] }
 0x238   :  { %v7656_v35 = vunpack.i.h.bf16 %v10759_v0  ;;  %v7661_v8 = vunpack.i.h.bf16 %v10757_v30  ;;  %4379 = vst.msk [vmem:[#allocation2 + $0x128] sm:$0xff] %vm2390_vm0, %v14671_v34  ;;  %v2603_v20 = vsel %vm14738_vm3, %v2538_v57, %v7336_v61  ;;  %v7020_v56 = vunpack.i.l.bf16 %v14889_v47  ;;  %v6500_v61 = vld [vmem:[%s14569_s0 + $0x259] sm:$0xff] }
 0x239   :  { %4381 = vst.msk [vmem:[#allocation2 + $0x138] sm:$0xff] %vm2390_vm0, %v14671_v34  ;;  %v2509_v58 = vsel %vm2455_vm1, %v2444_v26, %v7106_v28  ;;  %v7681_v2 = vunpack.i.h.bf16 %v10652_v43  ;;  %v7546_v25 = vunpack.i.h.bf16 %v10101_v15  ;;  %v7892_v22 = vpack.i.bf16 %v6436_v36, %v6435_v44  ;;  %v6499_v15 = vld [vmem:[%s14569_s0 + $0x249] sm:$0xff] }
 0x23a   :  { %v2768_v41 = vsel %vm2715_vm5, %v2703_v16, %v7656_v35  ;;  %4382 = vst.msk [vmem:[#allocation2 + $0x140] sm:$0xff] %vm2390_vm0, %v14671_v34  ;;  %v2668_v35 = vsel %vm2650_vm4, %v2603_v20, %v7536_v52  ;;  %v2574_v9 = vsel %vm2520_vm2, %v2509_v58, %v7266_v23  ;;  %v7340_v28 = vunpack.i.l.bf16 %v14891_v24  ;;  %v8066_v23 = vld [vmem:[%s14569_s0 + $0xd8] sm:$0xff] }
 0x23b   :  { %v10788_v42 = vpop.f32.mrf.mxu0  ;;  %v2833_v55 = vsel %vm2780_vm6, %v2768_v41, %v7661_v8  ;;  %4384 = vst.msk [vmem:[#allocation2 + $0x150] sm:$0xff] %vm2390_vm0, %v14671_v34  ;;  %v2639_v41 = vsel %vm14738_vm3, %v2574_v9, %v7666_v32  ;;  %v2733_v52 = vsel %vm2715_vm5, %v2668_v35, %v7541_v27  ;;  %v7550_v32 = vunpack.i.l.bf16 %v10302_v31 }
 0x23c   :  { %7888 = vrot.lane.b32.xlu2 %v7887_v19, %s8116_s26  ;;  %4385 = vst.msk [vmem:[#allocation2 + $0x158] sm:$0xff] %vm2390_vm0, %v14671_v34  ;;  %v10830_v19 = vpop.permute.xlu2 %7708  ;;  %v2798_v36 = vsel %vm2780_vm6, %v2733_v52, %v7546_v25  ;;  %v7555_v20 = vunpack.i.l.bf16 %v10300_v18  ;;  %v6437_v52 = vld [vmem:[%s14569_s0 + $0x260] sm:$0xff] }
 0x23d   :  { %7878 = vrot.lane.b32.xlu0 %v7877_v50, %s8115_s25  ;;  %7883 = vrot.lane.b32.xlu1 %v7882_v60, %s8114_s24  ;;  %4387 = vst.msk [vmem:[#allocation2 + $0x168] sm:$0xff] %vm2390_vm0, %v14671_v34  ;;  %v14890_v60 = vld [vmem:[#allocation64_spill] sm:$0xff] }
 0x23e   :  { %3119 = vmatmul.f32.gmra.mxu0 %v2797_v39  ;;  %3227 = vmatmul.f32.gmra.mxu3 %v2833_v55  ;;  %v7180_v16 = vunpack.i.l.bf16 %v14890_v60  ;;  %4388 = vst.msk [vmem:[#allocation2 + $0x170] sm:$0xff] %vm2390_vm0, %v14671_v34  ;;  %v2409_v39 = vsel %vm2390_vm0, %v8066_v23, %v6860_v63  ;;  %v14893_v23 = vld [vmem:[#allocation26_spill] sm:$0xff] }
 0x23f   :  { %v10823_v59 = vpop.permute.xlu1 %7673  ;;  %v10825_v33 = vpop.permute.xlu0 %7668  ;;  %4390 = vst.msk [vmem:[#allocation2 + $0x180] sm:$0xff] %vm2390_vm0, %v14671_v34  ;;  %v2474_v26 = vsel %vm2455_vm1, %v2409_v39, %v7020_v56  ;;  %v6861_v56 = vunpack.i.h.bf16 %v14888_v3  ;;  %v6501_v3 = vld [vmem:[%s14569_s0 + $0x261] sm:$0xff]  ;;  %v6951_v39 = vunpack.i.h.bf16 %v14893_v23 }
 0x240   :  { %v7676_v8 = vunpack.i.h.bf16 %v10823_v59  ;;  %v7671_v50 = vunpack.i.h.bf16 %v10825_v33  ;;  %4391 = vst.msk [vmem:[#allocation2 + $0x188] sm:$0xff] %vm2390_vm0, %v14671_v34  ;;  %v2539_v44 = vsel %vm2520_vm2, %v2474_v26, %v7180_v16  ;;  %v8067_v16 = vld [vmem:[%s14569_s0 + $0x24a] sm:$0xff] }
 0x241   :  { %4393 = vst.msk [vmem:[#allocation2 + $0x198] sm:$0xff] %vm2390_vm0, %v14671_v34  ;;  %v2604_v63 = vsel %vm14738_vm3, %v2539_v44, %v7340_v28 }
 0x242   :  { %v2704_v57 = vsel %vm2650_vm4, %v2639_v41, %v7671_v50  ;;  %4394 = vst.msk [vmem:[#allocation2 + $0x1a0] sm:$0xff] %vm2390_vm0, %v14671_v34  ;;  %v2669_v9 = vsel %vm2650_vm4, %v2604_v63, %v7550_v32  ;;  %v7560_v50 = vunpack.i.l.bf16 %v10143_v12  ;;  %v7551_v32 = vunpack.i.h.bf16 %v10302_v31 }
 0x243   :  { %v10859_v55 = vpop.f32.mrf.mxu0  ;;  %v2769_v6 = vsel %vm2715_vm5, %v2704_v57, %v7676_v8  ;;  %4396 = vst.msk [vmem:[#allocation2 + $0x1b0] sm:$0xff] %vm2390_vm0, %v14671_v34  ;;  %v7181_v8 = vunpack.i.h.bf16 %v14890_v60  ;;  %v2734_v28 = vsel %vm2715_vm5, %v2669_v9, %v7555_v20  ;;  %v8070_v20 = vld [vmem:[%s14569_s0 + $0xf0] sm:$0xff] }
 0x244   :  { %2282 = vrot.lane.b32.xlu2 %v6500_v61, %s8114_s24  ;;  %v2834_v27 = vsel %vm2780_vm6, %v2769_v6, %v7681_v2  ;;  %4397 = vst.msk [vmem:[#allocation2 + $0x1b8] sm:$0xff] %vm2390_vm0, %v14671_v34  ;;  %v7021_v2 = vunpack.i.h.bf16 %v14889_v47  ;;  %v8068_v47 = vld [vmem:[%s14569_s0 + $0x25a] sm:$0xff]  ;;  %v14892_v61 = vld [vmem:[#allocation10_spill] sm:$0xff]  ;;  %v10905_v41 = vpop.permute.xlu2 %7723  ;;  %v2799_v31 = vsel %vm2780_vm6, %v2734_v28, %v7560_v50 }
 0x245   :  { %7893 = vrot.lane.b32.xlu0 %v7892_v22, %s8115_s25  ;;  %2280 = vrot.lane.b32.xlu1 %v6499_v15, %s8114_s24  ;;  %4399 = vst.msk [vmem:[#allocation2 + $0x1c8] sm:$0xff] %vm2390_vm0, %v14671_v34  ;;  %v7897_v25 = vpack.i.bf16 %v8068_v47, %v8067_v16  ;;  %v6865_v60 = vunpack.i.l.bf16 %v14892_v61  ;;  %v7341_v22 = vunpack.i.h.bf16 %v14891_v24  ;;  %v8069_v15 = vld [vmem:[%s14569_s0 + $0xe0] sm:$0xff]  ;;  %v6950_v24 = vunpack.i.l.bf16 %v14893_v23  ;;  %v8071_v50 = vld [vmem:[%s14569_s0 + $0x2b8] sm:$0xff] }
 0x246   :  { %3122 = vmatmul.f32.gmra.mxu0 %v2798_v36  ;;  %3230 = vmatmul.f32.gmra.mxu3 %v2834_v27  ;;  %4400 = vst.msk [vmem:[#allocation2 + $0x1d0] sm:$0xff] %vm2390_vm0, %v14671_v34  ;;  %v2410_v57 = vsel %vm2390_vm0, %v8069_v15, %v6861_v56  ;;  %v14894_v27 = vld [vmem:[#allocation41_spill] sm:$0xff]  ;;  %v6866_v53 = vunpack.i.h.bf16 %v14892_v61 }
 0x247   :  { %v10880_v58 = vpop.permute.xlu1 %7688  ;;  %v10882_v35 = vpop.permute.xlu0 %7683  ;;  %4402 = vst.msk [vmem:[#allocation2 + $0x1e0] sm:$0xff] %vm2390_vm0, %v14671_v34  ;;  %v2475_v26 = vsel %vm2455_vm1, %v2410_v57, %v7021_v2  ;;  %v7110_v44 = vunpack.i.l.bf16 %v14894_v27  ;;  %v2411_v63 = vsel %vm2390_vm0, %v8070_v20, %v6865_v60  ;;  %v14895_v56 = vld [vmem:[#allocation85_spill] sm:$0xff]  ;;  %v7556_v2 = vunpack.i.h.bf16 %v10300_v18  ;;  %v14897_v57 = vld [vmem:[#allocation55_spill] sm:$0xff] }
 0x248   :  { %4403 = vst.msk [vmem:[#allocation2 + $0x1e8] sm:$0xff] %vm2390_vm0, %v14671_v34  ;;  %v2540_v36 = vsel %vm2520_vm2, %v2475_v26, %v7181_v8  ;;  %v7270_v9 = vunpack.i.l.bf16 %v14895_v56  ;;  %v8072_v16 = vld [vmem:[%s14569_s0 + $0x2c0] sm:$0xff]  ;;  %v7185_v23 = vunpack.i.l.bf16 %v14897_v57  ;;  %v7561_v26 = vunpack.i.h.bf16 %v10143_v12 }
 0x249   :  { %4405 = vst.msk [vmem:[#allocation2 + $0x1f8] sm:$0xff] %vm2390_vm0, %v14671_v34  ;;  %v2605_v8 = vsel %vm14738_vm3, %v2540_v36, %v7341_v22  ;;  %v2446_v47 = vsel %vm2390_vm0, %v8072_v16, %v6951_v39  ;;  %v7686_v39 = vunpack.i.h.bf16 %v10882_v35  ;;  %v7696_v20 = vunpack.i.h.bf16 %v10737_v38 }
 0x24a   :  { %4406 = vst.msk [vmem:[#allocation2 + $0x200] sm:$0xff] %vm2390_vm0, %v14671_v34  ;;  %v2670_v28 = vsel %vm2650_vm4, %v2605_v8, %v7551_v32  ;;  %v7691_v32 = vunpack.i.h.bf16 %v10880_v58  ;;  %v6502_v8 = vld [vmem:[%s14569_s0 + $0x271] sm:$0xff] }
 0x24b   :  { %v10920_v6 = vpop.f32.mrf.mxu0  ;;  %4408 = vst.msk [vmem:[#allocation2 + $0x210] sm:$0xff] %vm2390_vm0, %v14671_v34  ;;  %v2735_v12 = vsel %vm2715_vm5, %v2670_v28, %v7556_v2 }
 0x24c   :  { %2284 = vrot.lane.b32.xlu2 %v6501_v3, %s8114_s24  ;;  %v2445_v3 = vsel %vm2390_vm0, %v8071_v50, %v6950_v24  ;;  %4409 = vst.msk [vmem:[#allocation2 + $0x218] sm:$0xff] %vm2390_vm0, %v14671_v34  ;;  %v7271_v24 = vunpack.i.h.bf16 %v14895_v56  ;;  %v6438_v56 = vld [vmem:[%s14569_s0 + $0x270] sm:$0xff]  ;;  %v2800_v61 = vsel %vm2780_vm6, %v2735_v12, %v7561_v26  ;;  %v7711_v12 = vunpack.i.h.bf16 %v10830_v19 }
 0x24d   :  { %7898 = vrot.lane.b32.xlu0 %v7897_v25, %s8116_s26  ;;  %2028 = vrot.lane.b32.xlu1 %v6437_v52, %s8115_s25  ;;  %v14896_v25 = vld [vmem:[#allocation37_spill] sm:$0xff]  ;;  %v7111_v52 = vunpack.i.h.bf16 %v14894_v27  ;;  %v2510_v15 = vsel %vm2455_vm1, %v2445_v3, %v7110_v44  ;;  %4411 = vst.msk [vmem:[#allocation2 + $0x228] sm:$0xff] %vm2390_vm0, %v14671_v34  ;;  %v14898_v44 = vld [vmem:[#allocation100_spill] sm:$0xff] }
 0x24e   :  { %3125 = vmatmul.f32.gmra.mxu0 %v2799_v31  ;;  %v7025_v18 = vunpack.i.l.bf16 %v14896_v25  ;;  %4412 = vst.msk [vmem:[#allocation2 + $0x230] sm:$0xff] %vm2390_vm0, %v14671_v34  ;;  %v2575_v27 = vsel %vm2520_vm2, %v2510_v15, %v7270_v9  ;;  %v7345_v31 = vunpack.i.l.bf16 %v14898_v44  ;;  %v7565_v9 = vunpack.i.l.bf16 %v10365_v21  ;;  %v8073_v21 = vld [vmem:[%s14569_s0 + $0x262] sm:$0xff] }
 0x24f   :  { %v10953_v60 = vpop.permute.xlu1 %7703  ;;  %v7699_v22 = vpop.permute.xlu0 %7698  ;;  %4414 = vst.msk [vmem:[#allocation2 + $0x240] sm:$0xff] %vm2390_vm0, %v14671_v34  ;;  %v2511_v2 = vsel %vm2455_vm1, %v2446_v47, %v7111_v52  ;;  %v7570_v52 = vunpack.i.l.bf16 %v10363_v49 }
 0x250   :  { %v7700_v36 = vunpack.i.l.bf16 %v7699_v22  ;;  %v2476_v50 = vsel %vm2455_vm1, %v2411_v63, %v7025_v18  ;;  %4415 = vst.msk [vmem:[#allocation2 + $0x248] sm:$0xff] %vm2390_vm0, %v14671_v34  ;;  %v7701_v3 = vunpack.i.h.bf16 %v7699_v22  ;;  %v10991_v63 = vpop.permute.xlu2 %7738  ;;  %v2576_v22 = vsel %vm2520_vm2, %v2511_v2, %v7271_v24 }
 0x251   :  { %v2541_v28 = vsel %vm2520_vm2, %v2476_v50, %v7185_v23  ;;  %4417 = vst.msk [vmem:[#allocation2 + $0x258] sm:$0xff] %vm2390_vm0, %v14671_v34  ;;  %v7706_v23 = vunpack.i.h.bf16 %v10953_v60  ;;  %v6439_v50 = vld [vmem:[%s14569_s0 + $0x278] sm:$0xff]  ;;  %v7580_v2 = vunpack.i.l.bf16 %v10410_v54 }
 0x252   :  { %v2640_v15 = vsel %vm14738_vm3, %v2575_v27, %v7700_v36  ;;  %4418 = vst.msk [vmem:[#allocation2 + $0x260] sm:$0xff] %vm2390_vm0, %v14671_v34  ;;  %v2606_v24 = vsel %vm14738_vm3, %v2541_v28, %v7345_v31  ;;  %v7026_v36 = vunpack.i.h.bf16 %v14896_v25  ;;  %v2641_v27 = vsel %vm14738_vm3, %v2576_v22, %v7701_v3  ;;  %v8074_v25 = vld [vmem:[%s14569_s0 + $0xf8] sm:$0xff]  ;;  %v14899_v3 = vld [vmem:[#allocation25_spill] sm:$0xff] }
 0x253   :  { %v10983_v16 = vpop.f32.mrf.mxu0  ;;  %v2705_v18 = vsel %vm2650_vm4, %v2640_v15, %v7686_v39  ;;  %4420 = vst.msk [vmem:[#allocation2 + $0x270] sm:$0xff] %vm2390_vm0, %v14671_v34  ;;  %v2671_v49 = vsel %vm2650_vm4, %v2606_v24, %v7565_v9  ;;  %v2412_v31 = vsel %vm2390_vm0, %v8074_v25, %v6866_v53  ;;  %v2706_v9 = vsel %vm2650_vm4, %v2641_v27, %v7706_v23 }
 0x254   :  { %1776 = vrot.lane.b32.xlu2 %v8073_v21, %s8116_s26  ;;  %v2770_v47 = vsel %vm2715_vm5, %v2705_v18, %v7691_v32  ;;  %4421 = vst.msk [vmem:[#allocation2 + $0x278] sm:$0xff] %vm2390_vm0, %v14671_v34  ;;  %v2736_v53 = vsel %vm2715_vm5, %v2671_v49, %v7570_v52  ;;  %v6955_v15 = vunpack.i.l.bf16 %v14899_v3  ;;  %v14900_v21 = vld [vmem:[#allocation54_spill] sm:$0xff]  ;;  %v2771_v23 = vsel %vm2715_vm5, %v2706_v9, %v7711_v12 }
 0x255   :  { %2030 = vrot.lane.b32.xlu0 %v6438_v56, %s8115_s25  ;;  %2286 = vrot.lane.b32.xlu1 %v6502_v8, %s8114_s24  ;;  %v2835_v39 = vsel %vm2780_vm6, %v2770_v47, %v7696_v20  ;;  %v7186_v56 = vunpack.i.h.bf16 %v14897_v57  ;;  %4423 = vst.msk [vmem:[#allocation2 + $0x288] sm:$0xff] %vm2390_vm0, %v14671_v34  ;;  %v7575_v20 = vunpack.i.l.bf16 %v10188_v17  ;;  %v7346_v8 = vunpack.i.h.bf16 %v14898_v44  ;;  %v6503_v17 = vld [vmem:[%s14569_s0 + $0x279] sm:$0xff]  ;;  %v14901_v47 = vld [vmem:[#allocation74_spill] sm:$0xff] }
 0x256   :  { %3128 = vmatmul.f32.gmra.mxu0 %v2800_v61  ;;  %3233 = vmatmul.f32.gmra.mxu3 %v2835_v39  ;;  %4424 = vst.msk [vmem:[#allocation2 + $0x290] sm:$0xff] %vm2390_vm0, %v14671_v34  ;;  %v2477_v44 = vsel %vm2455_vm1, %v2412_v31, %v7026_v36  ;;  %v7115_v18 = vunpack.i.l.bf16 %v14900_v21  ;;  %v8075_v61 = vld [vmem:[%s14569_s0 + $0x272] sm:$0xff]  ;;  %v7275_v54 = vunpack.i.l.bf16 %v14901_v47  ;;  %v7585_v36 = vunpack.i.l.bf16 %v10408_v45 }
 0x257   :  { %v11014_v26 = vpop.permute.xlu1 %7718  ;;  %v11016_v32 = vpop.permute.xlu0 %7713  ;;  %4426 = vst.msk [vmem:[#allocation2 + $0x2a0] sm:$0xff] %vm2390_vm0, %v14671_v34  ;;  %v2542_v22 = vsel %vm2520_vm2, %v2477_v44, %v7186_v56  ;;  %v2801_v52 = vsel %vm2780_vm6, %v2736_v53, %v7575_v20  ;;  %v14902_v39 = vld [vmem:[#allocation4_spill] sm:$0xff]  ;;  %v6956_v25 = vunpack.i.h.bf16 %v14899_v3  ;;  %v8076_v31 = vld [vmem:[%s14569_s0 + $0x2d0] sm:$0xff] }
 0x258   :  { %v7716_v57 = vunpack.i.h.bf16 %v11016_v32  ;;  %4427 = vst.msk [vmem:[#allocation2 + $0x2a8] sm:$0xff] %vm2390_vm0, %v14671_v34  ;;  %v6870_v24 = vunpack.i.l.bf16 %v14902_v39  ;;  %v11069_v49 = vpop.permute.xlu2 %7753  ;;  %v2607_v56 = vsel %vm14738_vm3, %v2542_v22, %v7346_v8  ;;  %v2447_v20 = vsel %vm2390_vm0, %v8076_v31, %v6955_v15 }
 0x259   :  { %4429 = vst.msk [vmem:[#allocation2 + $0x2b8] sm:$0xff] %vm2390_vm0, %v14671_v34  ;;  %v7721_v45 = vunpack.i.h.bf16 %v11014_v26  ;;  %v7116_v8 = vunpack.i.h.bf16 %v14900_v21  ;;  %v2512_v53 = vsel %vm2455_vm1, %v2447_v20, %v7115_v18  ;;  %v7590_v15 = vunpack.i.l.bf16 %v10231_v11  ;;  %v6440_v18 = vld [vmem:[%s14569_s0 + $0x288] sm:$0xff] }
 0x25a   :  { %4430 = vst.msk [vmem:[#allocation2 + $0x2c0] sm:$0xff] %vm2390_vm0, %v14671_v34  ;;  %v2836_v27 = vsel %vm2780_vm6, %v2771_v23, %v7716_v57  ;;  %v2672_v57 = vsel %vm2650_vm4, %v2607_v56, %v7580_v2  ;;  %v2577_v3 = vsel %vm2520_vm2, %v2512_v53, %v7275_v54  ;;  %v14903_v2 = vld [vmem:[#allocation36_spill] sm:$0xff]  ;;  %v7276_v21 = vunpack.i.h.bf16 %v14901_v47  ;;  %v6504_v11 = vld [vmem:[%s14569_s0 + $0x289] sm:$0xff]  ;;  %v14904_v23 = vld [vmem:[#allocation69_spill] sm:$0xff] }
 0x25b   :  { %v11048_v28 = vpop.f32.mrf.mxu0  ;;  %4432 = vst.msk [vmem:[#allocation2 + $0x2d0] sm:$0xff] %vm2390_vm0, %v14671_v34  ;;  %v7030_v22 = vunpack.i.l.bf16 %v14903_v2  ;;  %v8078_v20 = vld [vmem:[%s14569_s0 + $0x108] sm:$0xff] }
 0x25c   :  { %1778 = vrot.lane.b32.xlu2 %v8075_v61, %s8116_s26  ;;  %4433 = vst.msk [vmem:[#allocation2 + $0x2d8] sm:$0xff] %vm2390_vm0, %v14671_v34  ;;  %v2737_v61 = vsel %vm2715_vm5, %v2672_v57, %v7585_v36  ;;  %v2413_v57 = vsel %vm2390_vm0, %v8078_v20, %v6870_v24 }
 0x25d   :  { %2032 = vrot.lane.b32.xlu0 %v6439_v50, %s8115_s25  ;;  %2288 = vrot.lane.b32.xlu1 %v6503_v17, %s8114_s24  ;;  %4435 = vst.msk [vmem:[#allocation2 + $0x2e8] sm:$0xff] %vm2390_vm0, %v14671_v34  ;;  %v7726_v17 = vunpack.i.h.bf16 %v10905_v41 }
 0x25e   :  { %3131 = vmatmul.f32.gmra.mxu0 %v2801_v52  ;;  %3236 = vmatmul.f32.gmra.mxu3 %v2836_v27  ;;  %4436 = vst.msk [vmem:[#allocation2 + $0x2f0] sm:$0xff] %vm2390_vm0, %v14671_v34  ;;  %v8077_v52 = vld [vmem:[%s14569_s0 + $0x2d8] sm:$0xff]  ;;  %v7190_v27 = vunpack.i.l.bf16 %v14904_v23 }
 0x25f   :  { %v7734_v12 = vpop.permute.xlu1 %7733  ;;  %v11081_v50 = vpop.permute.xlu0 %7728  ;;  %4438 = vst.msk [vmem:[#allocation2 + $0x300] sm:$0xff] %vm2390_vm0, %v14671_v34  ;;  %v2448_v47 = vsel %vm2390_vm0, %v8077_v52, %v6956_v25  ;;  %v7741_v52 = vunpack.i.h.bf16 %v10991_v63 }
 0x260   :  { %v7735_v9 = vunpack.i.l.bf16 %v7734_v12  ;;  %v7731_v44 = vunpack.i.h.bf16 %v11081_v50  ;;  %4439 = vst.msk [vmem:[#allocation2 + $0x308] sm:$0xff] %vm2390_vm0, %v14671_v34  ;;  %v7736_v56 = vunpack.i.h.bf16 %v7734_v12  ;;  %v2513_v53 = vsel %vm2455_vm1, %v2448_v47, %v7116_v8 }
 0x261   :  { %4441 = vst.msk [vmem:[#allocation2 + $0x318] sm:$0xff] %vm2390_vm0, %v14671_v34  ;;  %v7600_v12 = vunpack.i.l.bf16 %v10487_v48  ;;  %v2478_v8 = vsel %vm2455_vm1, %v2413_v57, %v7030_v22  ;;  %v7610_v57 = vunpack.i.l.bf16 %v10539_v46  ;;  %v8079_v46 = vld [vmem:[%s14569_s0 + $0x2e8] sm:$0xff] }
 0x262   :  { %v2642_v54 = vsel %vm14738_vm3, %v2577_v3, %v7735_v9  ;;  %v14905_v9 = vld [vmem:[#allocation91_spill] sm:$0xff]  ;;  %4442 = vst.msk [vmem:[#allocation2 + $0x320] sm:$0xff] %vm2390_vm0, %v14671_v34  ;;  %v2543_v48 = vsel %vm2520_vm2, %v2478_v8, %v7190_v27  ;;  %v14907_v27 = vld [vmem:[#allocation53_spill] sm:$0xff]  ;;  %v7191_v8 = vunpack.i.h.bf16 %v14904_v23 }
 0x263   :  { %v11113_v31 = vpop.f32.mrf.mxu0  ;;  %v2707_v36 = vsel %vm2650_vm4, %v2642_v54, %v7721_v45  ;;  %v7350_v25 = vunpack.i.l.bf16 %v14905_v9  ;;  %v2802_v45 = vsel %vm2780_vm6, %v2737_v61, %v7590_v15  ;;  %v2578_v54 = vsel %vm2520_vm2, %v2513_v53, %v7276_v21  ;;  %v8080_v23 = vld [vmem:[%s14569_s0 + $0x110] sm:$0xff] }
 0x264   :  { %v2772_v3 = vsel %vm2715_vm5, %v2707_v36, %v7726_v17  ;;  %v2643_v15 = vsel %vm14738_vm3, %v2578_v54, %v7736_v56  ;;  %v6871_v36 = vunpack.i.h.bf16 %v14902_v39  ;;  %v7120_v20 = vunpack.i.l.bf16 %v14907_v27 }
 0x265   :  { %2034 = vrot.lane.b32.xlu0 %v6440_v18, %s8115_s25  ;;  %2290 = vrot.lane.b32.xlu1 %v6504_v11, %s8114_s24  ;;  %v2837_v24 = vsel %vm2780_vm6, %v2772_v3, %v7731_v44  ;;  %v14906_v18 = vld [vmem:[#allocation17_spill] sm:$0xff]  ;;  %v7605_v44 = vunpack.i.l.bf16 %v10285_v4  ;;  %v11143_v11 = vpop.permute.xlu2 %7768  ;;  %v2608_v21 = vsel %vm14738_vm3, %v2543_v48, %v7350_v25  ;;  %v7031_v56 = vunpack.i.h.bf16 %v14903_v2  ;;  %v14908_v3 = vld [vmem:[#allocation90_spill] sm:$0xff] }
 0x266   :  { %3134 = vmatmul.f32.gmra.mxu0 %v2802_v45  ;;  %3239 = vmatmul.f32.gmra.mxu3 %v2837_v24  ;;  %v6960_v61 = vunpack.i.l.bf16 %v14906_v18  ;;  %v2673_v53 = vsel %vm2650_vm4, %v2608_v21, %v7600_v12  ;;  %v7280_v45 = vunpack.i.l.bf16 %v14908_v3  ;;  %v2708_v24 = vsel %vm2650_vm4, %v2643_v15, %v7741_v52 }
 0x267   :  { %v11136_v17 = vpop.permute.xlu1 %7748  ;;  %v11138_v47 = vpop.permute.xlu0 %7743  ;;  %v7770_v25 = vunpack.i.l.bf16 %v11143_v11  ;;  %v7351_v12 = vunpack.i.h.bf16 %v14905_v9  ;;  %v2738_v48 = vsel %vm2715_vm5, %v2673_v53, %v7605_v44  ;;  %v2414_v52 = vsel %vm2390_vm0, %v8080_v23, %v6871_v36 }
 0x268   :  { %v7746_v22 = vunpack.i.h.bf16 %v11138_v47  ;;  %v7751_v4 = vunpack.i.h.bf16 %v11136_v17  ;;  %v2449_v2 = vsel %vm2390_vm0, %v8079_v46, %v6960_v61  ;;  %v2803_v21 = vsel %vm2780_vm6, %v2738_v48, %v7610_v57 }
 0x269   :  { %v2514_v15 = vsel %vm2455_vm1, %v2449_v2, %v7120_v20  ;;  %v7756_v9 = vunpack.i.h.bf16 %v11069_v49  ;;  %v14909_v20 = vld [vmem:[#allocation13_spill] sm:$0xff]  ;;  %v6961_v48 = vunpack.i.h.bf16 %v14906_v18 }
 0x26a   :  { %v2773_v39 = vsel %vm2715_vm5, %v2708_v24, %v7746_v22  ;;  %v7615_v22 = vunpack.i.l.bf16 %v10537_v13  ;;  %v2479_v24 = vsel %vm2455_vm1, %v2414_v52, %v7031_v56  ;;  %v2579_v61 = vsel %vm2520_vm2, %v2514_v15, %v7280_v45 }
 0x26b   :  { %v11157_v54 = vpop.f32.mrf.mxu0  ;;  %v2838_v44 = vsel %vm2780_vm6, %v2773_v39, %v7751_v4  ;;  %v2544_v53 = vsel %vm2520_vm2, %v2479_v24, %v7191_v8  ;;  %v2644_v13 = vsel %vm14738_vm3, %v2579_v61, %v7770_v25  ;;  %v6875_v57 = vunpack.i.l.bf16 %v14909_v20  ;;  %v14910_v39 = vld [vmem:[#allocation30_spill] sm:$0xff] }
 0x26c   :  { %v7620_v56 = vunpack.i.l.bf16 %v10346_v7  ;;  %v2609_v2 = vsel %vm14738_vm3, %v2544_v53, %v7351_v12  ;;  %v7625_v4 = vunpack.i.l.bf16 %v10619_v51  ;;  %v7035_v23 = vunpack.i.l.bf16 %v14910_v39  ;;  %v8081_v51 = vld [vmem:[%s14569_s0 + $0x120] sm:$0xff] }
 0x26d   :  { %v2674_v8 = vsel %vm2650_vm4, %v2609_v2, %v7615_v22  ;;  %v7121_v52 = vunpack.i.h.bf16 %v14907_v27  ;;  %v2709_v15 = vsel %vm2650_vm4, %v2644_v13, %v7756_v9  ;;  %v7281_v24 = vunpack.i.h.bf16 %v14908_v3  ;;  %v14912_v22 = vld [vmem:[#allocation105_spill] sm:$0xff]  ;;  %v8082_v3 = vld [vmem:[%s14569_s0 + $0x2f0] sm:$0xff] }
 0x26e   :  { %3137 = vmatmul.f32.gmra.mxu0 %v2803_v21  ;;  %3242 = vmatmul.f32.gmra.mxu3 %v2838_v44  ;;  %v14911_v21 = vld [vmem:[#allocation68_spill] sm:$0xff]  ;;  %v2415_v12 = vsel %vm2390_vm0, %v8081_v51, %v6875_v57  ;;  %v7355_v27 = vunpack.i.l.bf16 %v14912_v22  ;;  %v11204_v44 = vpop.permute.xlu2 %7783  ;;  %v2739_v9 = vsel %vm2715_vm5, %v2674_v8, %v7620_v56  ;;  %v2450_v53 = vsel %vm2390_vm0, %v8082_v3, %v6961_v48 }
 0x26f   :  { %v11178_v46 = vpop.permute.xlu1 %7763  ;;  %v11180_v36 = vpop.permute.xlu0 %7758  ;;  %v7195_v7 = vunpack.i.l.bf16 %v14911_v21  ;;  %v7635_v13 = vunpack.i.l.bf16 %v10400_v5  ;;  %v2804_v2 = vsel %vm2780_vm6, %v2739_v9, %v7625_v4  ;;  %v2480_v57 = vsel %vm2455_vm1, %v2415_v12, %v7035_v23 }
 0x270   :  { %v7761_v45 = vunpack.i.h.bf16 %v11180_v36  ;;  %v7766_v25 = vunpack.i.h.bf16 %v11178_v46  ;;  %v7640_v51 = vunpack.i.l.bf16 %v10687_v40  ;;  %v7786_v4 = vunpack.i.h.bf16 %v11204_v44 }
 0x271   :  { %v2545_v8 = vsel %vm2520_vm2, %v2480_v57, %v7195_v7  ;;  %v7196_v9 = vunpack.i.h.bf16 %v14911_v21 }
 0x272   :  { %v2774_v18 = vsel %vm2715_vm5, %v2709_v15, %v7761_v45  ;;  %v7771_v45 = vunpack.i.h.bf16 %v11143_v11  ;;  %v2515_v15 = vsel %vm2455_vm1, %v2450_v53, %v7121_v52  ;;  %v2610_v11 = vsel %vm14738_vm3, %v2545_v8, %v7355_v27 }
 0x273   :  { %v11196_v61 = vpop.f32.mrf.mxu0  ;;  %v2839_v56 = vsel %vm2780_vm6, %v2774_v18, %v7766_v25  ;;  %v2580_v34 = vsel %vm2520_vm2, %v2515_v15, %v7281_v24  ;;  %v6876_v52 = vunpack.i.h.bf16 %v14909_v20  ;;  %v7645_v25 = vunpack.i.l.bf16 %v10685_v14 }
 0x274   :  { %v2675_v7 = vsel %vm2650_vm4, %v2610_v11, %v7635_v13  ;;  %v2645_v24 = vsel %vm14738_vm3, %v2580_v34, %v7771_v45  ;;  %v7036_v18 = vunpack.i.h.bf16 %v14910_v39  ;;  %v7356_v20 = vunpack.i.h.bf16 %v14912_v22  ;;  %v8083_v34 = vld [vmem:[%s14569_s0 + $0x128] sm:$0xff]  ;;  %v14913_v22 = vld [vmem:[#allocation12_spill] sm:$0xff] }
 0x275   :  { %v2740_v12 = vsel %vm2715_vm5, %v2675_v7, %v7640_v51  ;;  %v2416_v39 = vsel %vm2390_vm0, %v8083_v34, %v6876_v52  ;;  %v7650_v13 = vunpack.i.l.bf16 %v10492_v1  ;;  %v6880_v15 = vunpack.i.l.bf16 %v14913_v22  ;;  %v14914_v11 = vld [vmem:[#allocation40_spill] sm:$0xff] }
 0x276   :  { %3140 = vmatmul.f32.gmra.mxu0 %v2804_v2  ;;  %3245 = vmatmul.f32.gmra.mxu3 %v2839_v56  ;;  %v2805_v45 = vsel %vm2780_vm6, %v2740_v12, %v7645_v25  ;;  %v2481_v21 = vsel %vm2455_vm1, %v2416_v39, %v7036_v18  ;;  %v7655_v2 = vunpack.i.l.bf16 %v10759_v0  ;;  %v11249_v57 = vpop.permute.xlu2 %7798  ;;  %v7040_v1 = vunpack.i.l.bf16 %v14914_v11  ;;  %v14916_v7 = vld [vmem:[#allocation104_spill] sm:$0xff] }
 0x277   :  { %v11220_v48 = vpop.permute.xlu1 %7778  ;;  %v11222_v5 = vpop.permute.xlu0 %7773  ;;  %v2546_v51 = vsel %vm2520_vm2, %v2481_v21, %v7196_v9  ;;  %v7660_v0 = vunpack.i.l.bf16 %v10757_v30  ;;  %v6881_v25 = vunpack.i.h.bf16 %v14913_v22  ;;  %v8084_v12 = vld [vmem:[%s14569_s0 + $0x138] sm:$0xff]  ;;  %v14917_v9 = vld [vmem:[#allocation29_spill] sm:$0xff] }
 0x278   :  { %v7781_v23 = vunpack.i.h.bf16 %v11220_v48  ;;  %v7776_v40 = vunpack.i.h.bf16 %v11222_v5  ;;  %v14919_v34 = vld [vmem:[#allocation44_spill] sm:$0xff]  ;;  %v8085_v21 = vld [vmem:[%s14569_s0 + $0x140] sm:$0xff] }
 0x279   :  { %v7125_v39 = vunpack.i.l.bf16 %v14919_v34  ;;  %v14920_v22 = vld [vmem:[#allocation89_spill] sm:$0xff] }
 0x27a   :  { %v2710_v27 = vsel %vm2650_vm4, %v2645_v24, %v7776_v40  ;;  %v7360_v24 = vunpack.i.l.bf16 %v14916_v7 }
 0x27b   :  { %v11236_v3 = vpop.f32.mrf.mxu0  ;;  %v2775_v53 = vsel %vm2715_vm5, %v2710_v27, %v7781_v23  ;;  %v14915_v23 = vld [vmem:[#allocation58_spill] sm:$0xff]  ;;  %v2417_v27 = vsel %vm2390_vm0, %v8084_v12, %v6880_v15  ;;  %v7285_v15 = vunpack.i.l.bf16 %v14920_v22 }
 0x27c   :  { %v2840_v14 = vsel %vm2780_vm6, %v2775_v53, %v7786_v4  ;;  %v2611_v4 = vsel %vm14738_vm3, %v2546_v51, %v7356_v20  ;;  %v7200_v40 = vunpack.i.l.bf16 %v14915_v23  ;;  %v6965_v53 = vunpack.i.l.bf16 %v14917_v9 }
 0x27d   :  { %v2676_v52 = vsel %vm2650_vm4, %v2611_v4, %v7650_v13  ;;  %v7670_v20 = vunpack.i.l.bf16 %v10825_v33  ;;  %v2482_v30 = vsel %vm2455_vm1, %v2417_v27, %v7040_v1  ;;  %v7675_v51 = vunpack.i.l.bf16 %v10823_v59  ;;  %v8086_v4 = vld [vmem:[%s14569_s0 + $0x300] sm:$0xff] }
 0x27e   :  { %3143 = vmatmul.f32.gmra.mxu0 %v2805_v45  ;;  %3248 = vmatmul.f32.gmra.mxu3 %v2840_v14  ;;  %v2741_v18 = vsel %vm2715_vm5, %v2676_v52, %v7655_v2  ;;  %v2547_v13 = vsel %vm2520_vm2, %v2482_v30, %v7200_v40  ;;  %v2418_v2 = vsel %vm2390_vm0, %v8085_v21, %v6881_v25  ;;  %v6966_v1 = vunpack.i.h.bf16 %v14917_v9 }
 0x27f   :  { %v11253_v56 = vpop.permute.xlu1 %7793  ;;  %v11255_v8 = vpop.permute.xlu0 %7788  ;;  %v2806_v45 = vsel %vm2780_vm6, %v2741_v18, %v7660_v0  ;;  %v2612_v33 = vsel %vm14738_vm3, %v2547_v13, %v7360_v24  ;;  %v2451_v40 = vsel %vm2390_vm0, %v8086_v4, %v6965_v53  ;;  %v7041_v0 = vunpack.i.h.bf16 %v14914_v11 }
 0x280   :  { %v2677_v18 = vsel %vm2650_vm4, %v2612_v33, %v7670_v20  ;;  %v7126_v24 = vunpack.i.h.bf16 %v14919_v34  ;;  %v2516_v59 = vsel %vm2455_vm1, %v2451_v40, %v7125_v39  ;;  %v7201_v12 = vunpack.i.h.bf16 %v14915_v23  ;;  %v11299_v53 = vpop.permute.xlu2 %7813  ;;  %v8087_v23 = vld [vmem:[%s14569_s0 + $0x308] sm:$0xff] }
 0x281   :  { %v7791_v27 = vunpack.i.h.bf16 %v11255_v8  ;;  %v7286_v9 = vunpack.i.h.bf16 %v14920_v22  ;;  %v7680_v30 = vunpack.i.l.bf16 %v10652_v43  ;;  %v7796_v11 = vunpack.i.h.bf16 %v11253_v56 }
 0x282   :  { %v7361_v20 = vunpack.i.h.bf16 %v14916_v7  ;;  %v7801_v34 = vunpack.i.h.bf16 %v11249_v57  ;;  %v2742_v39 = vsel %vm2715_vm5, %v2677_v18, %v7675_v51  ;;  %v2452_v21 = vsel %vm2390_vm0, %v8087_v23, %v6966_v1 }
 0x283   :  { %v11271_v14 = vpop.f32.mrf.mxu0  ;;  %v7685_v43 = vunpack.i.l.bf16 %v10882_v35  ;;  %v2517_v7 = vsel %vm2455_vm1, %v2452_v21, %v7126_v24 }
 0x284   :  { %14918 = vst [vmem:[#allocation112_spill] sm:$0xff] %v11271_v14  ;;  %v2582_v18 = vsel %vm2520_vm2, %v2517_v7, %v7286_v9  ;;  %v14922_v9 = vld [vmem:[#allocation5_spill] sm:$0xff] }
 0x285   :  { %v14926_v7 = vld [vmem:[#allocation73_spill] sm:$0xff] }
 0x286   :  { %3146 = vmatmul.f32.gmra.mxu0 %v2806_v45  ;;  %v2581_v45 = vsel %vm2520_vm2, %v2516_v59, %v7285_v15  ;;  %v2483_v15 = vsel %vm2455_vm1, %v2418_v2, %v7041_v0  ;;  %v2807_v59 = vsel %vm2780_vm6, %v2742_v39, %v7680_v30  ;;  %v6885_v30 = vunpack.i.l.bf16 %v14922_v9  ;;  %v14924_v39 = vld [vmem:[#allocation39_spill] sm:$0xff] }
 0x287   :  { %v11290_v52 = vpop.permute.xlu1 %7808  ;;  %v7804_v25 = vpop.permute.xlu0 %7803  ;;  %v2548_v51 = vsel %vm2520_vm2, %v2483_v15, %v7201_v12  ;;  %v7045_v23 = vunpack.i.l.bf16 %v14924_v39  ;;  %v14925_v15 = vld [vmem:[#allocation57_spill] sm:$0xff] }
 0x288   :  { %v7805_v13 = vunpack.i.l.bf16 %v7804_v25  ;;  %v7806_v22 = vunpack.i.h.bf16 %v7804_v25  ;;  %v2613_v35 = vsel %vm14738_vm3, %v2548_v51, %v7361_v20  ;;  %v7690_v25 = vunpack.i.l.bf16 %v10880_v58 }
 0x289   :  { %v2678_v12 = vsel %vm2650_vm4, %v2613_v35, %v7685_v43  ;;  %v7695_v58 = vunpack.i.l.bf16 %v10737_v38  ;;  %v7816_v20 = vunpack.i.h.bf16 %v11299_v53  ;;  %v7130_v43 = vunpack.i.l.bf16 %v14925_v15 }
 0x28a   :  { %v2646_v4 = vsel %vm14738_vm3, %v2581_v45, %v7805_v13  ;;  %v7811_v13 = vunpack.i.h.bf16 %v11290_v52  ;;  %v2743_v21 = vsel %vm2715_vm5, %v2678_v12, %v7690_v25  ;;  %v6886_v38 = vunpack.i.h.bf16 %v14922_v9  ;;  %v14929_v25 = vld [vmem:[#allocation78_spill] sm:$0xff]  ;;  %v8089_v9 = vld [vmem:[%s14569_s0 + $0x318] sm:$0xff] }
 0x28b   :  { %v11311_v33 = vpop.f32.mrf.mxu0  ;;  %v2711_v40 = vsel %vm2650_vm4, %v2646_v4, %v7791_v27  ;;  %v2647_v27 = vsel %vm14738_vm3, %v2582_v18, %v7806_v22  ;;  %v7205_v22 = vunpack.i.l.bf16 %v14926_v7  ;;  %v8088_v18 = vld [vmem:[%s14569_s0 + $0x150] sm:$0xff]  ;;  %v2808_v12 = vsel %vm2780_vm6, %v2743_v21, %v7695_v58 }
 0x28c   :  { %14921 = vst [vmem:[#allocation3_spill] sm:$0xff] %v11311_v33  ;;  %v2776_v1 = vsel %vm2715_vm5, %v2711_v40, %v7796_v11  ;;  %v14923_v11 = vld [vmem:[#allocation28_spill] sm:$0xff]  ;;  %v2712_v4 = vsel %vm2650_vm4, %v2647_v27, %v7811_v13  ;;  %v11341_v40 = vpop.permute.xlu2 %7828  ;;  %v7290_v13 = vunpack.i.l.bf16 %v14929_v25  ;;  %v7131_v14 = vunpack.i.h.bf16 %v14925_v15 }
 0x28d   :  { %v2841_v2 = vsel %vm2780_vm6, %v2776_v1, %v7801_v34  ;;  %v6970_v45 = vunpack.i.l.bf16 %v14923_v11  ;;  %v14928_v1 = vld [vmem:[#allocation93_spill] sm:$0xff]  ;;  %v2777_v27 = vsel %vm2715_vm5, %v2712_v4, %v7816_v20  ;;  %v7715_v15 = vunpack.i.l.bf16 %v11016_v32 }
 0x28e   :  { %3149 = vmatmul.f32.gmra.mxu0 %v2807_v59  ;;  %3251 = vmatmul.f32.gmra.mxu3 %v2841_v2  ;;  %v2419_v59 = vsel %vm2390_vm0, %v8088_v18, %v6885_v30  ;;  %v7365_v35 = vunpack.i.l.bf16 %v14928_v1  ;;  %v7705_v2 = vunpack.i.l.bf16 %v10953_v60 }
 0x28f   :  { %v11325_v0 = vpop.permute.xlu1 %7823  ;;  %v11327_v24 = vpop.permute.xlu0 %7818  ;;  %v2453_v33 = vsel %vm2390_vm0, %v8089_v9, %v6970_v45  ;;  %v2484_v30 = vsel %vm2455_vm1, %v2419_v59, %v7045_v23  ;;  %v7710_v45 = vunpack.i.l.bf16 %v10830_v19  ;;  %v7831_v23 = vunpack.i.h.bf16 %v11341_v40  ;;  %v8090_v19 = vld [vmem:[%s14569_s0 + $0x158] sm:$0xff] }
 0x290   :  { %v7821_v34 = vunpack.i.h.bf16 %v11327_v24  ;;  %v2518_v60 = vsel %vm2455_vm1, %v2453_v33, %v7130_v43  ;;  %v2549_v58 = vsel %vm2520_vm2, %v2484_v30, %v7205_v22  ;;  %v7826_v20 = vunpack.i.h.bf16 %v11325_v0 }
 0x291   :  { %v2614_v4 = vsel %vm14738_vm3, %v2549_v58, %v7365_v35  ;;  %v7046_v22 = vunpack.i.h.bf16 %v14924_v39  ;;  %v2420_v35 = vsel %vm2390_vm0, %v8090_v19, %v6886_v38  ;;  %v8091_v39 = vld [vmem:[%s14569_s0 + $0x320] sm:$0xff] }
 0x292   :  { %v2842_v18 = vsel %vm2780_vm6, %v2777_v27, %v7821_v34  ;;  %v2583_v34 = vsel %vm2520_vm2, %v2518_v60, %v7290_v13  ;;  %v2679_v43 = vsel %vm2650_vm4, %v2614_v4, %v7705_v2  ;;  %v7206_v13 = vunpack.i.h.bf16 %v14926_v7 }
 0x293   :  { %v11343_v51 = vpop.f32.mrf.mxu0  ;;  %v7366_v2 = vunpack.i.h.bf16 %v14928_v1  ;;  %v7720_v7 = vunpack.i.l.bf16 %v11014_v26  ;;  %v2485_v4 = vsel %vm2455_vm1, %v2420_v35, %v7046_v22  ;;  %v7730_v22 = vunpack.i.l.bf16 %v11081_v50  ;;  %v8092_v50 = vld [vmem:[%s14569_s0 + $0x168] sm:$0xff] }
 0x294   :  { %14927 = vst [vmem:[#allocation7_spill] sm:$0xff] %v11343_v51  ;;  %v6971_v51 = vunpack.i.h.bf16 %v14923_v11  ;;  %v11395_v58 = vpop.permute.xlu2 %7843 }
 0x295   :  { %v7846_v1 = vunpack.i.h.bf16 %v11395_v58 }
 0x296   :  { %3152 = vmatmul.f32.gmra.mxu0 %v2808_v12  ;;  %3254 = vmatmul.f32.gmra.mxu3 %v2842_v18  ;;  %v7291_v12 = vunpack.i.h.bf16 %v14929_v25  ;;  %v2454_v25 = vsel %vm2390_vm0, %v8091_v39, %v6971_v51  ;;  %v2744_v18 = vsel %vm2715_vm5, %v2679_v43, %v7710_v45  ;;  %v2550_v45 = vsel %vm2520_vm2, %v2485_v4, %v7206_v13 }
 0x297   :  { %v7839_v11 = vpop.permute.xlu1 %7838  ;;  %v11366_v21 = vpop.permute.xlu0 %7833  ;;  %v2519_v38 = vsel %vm2455_vm1, %v2454_v25, %v7131_v14  ;;  %v14933_v25 = vld [vmem:[#allocation107_spill] sm:$0xff] }
 0x298   :  { %v7840_v59 = vunpack.i.l.bf16 %v7839_v11  ;;  %v7836_v33 = vunpack.i.h.bf16 %v11366_v21  ;;  %v7841_v9 = vunpack.i.h.bf16 %v7839_v11  ;;  %v2584_v51 = vsel %vm2520_vm2, %v2519_v38, %v7291_v12 }
 0x299   :  { %v7740_v38 = vunpack.i.l.bf16 %v10991_v63 }
 0x29a   :  { %v2648_v27 = vsel %vm14738_vm3, %v2583_v34, %v7840_v59  ;;  %v2649_v26 = vsel %vm14738_vm3, %v2584_v51, %v7841_v9  ;;  %v2615_v59 = vsel %vm14738_vm3, %v2550_v45, %v7366_v2  ;;  %v7725_v34 = vunpack.i.l.bf16 %v10905_v41 }
 0x29b   :  { %v11383_v32 = vpop.f32.mrf.mxu0  ;;  %v2713_v30 = vsel %vm2650_vm4, %v2648_v27, %v7826_v20  ;;  %v2809_v20 = vsel %vm2780_vm6, %v2744_v18, %v7715_v15  ;;  %v2680_v12 = vsel %vm2650_vm4, %v2615_v59, %v7720_v7  ;;  %v14931_v27 = vld [vmem:[#allocation31_spill] sm:$0xff]  ;;  %v2714_v13 = vsel %vm2650_vm4, %v2649_v26, %v7846_v1 }
 0x29c   :  { %v2778_v60 = vsel %vm2715_vm5, %v2713_v30, %v7831_v23  ;;  %v7050_v19 = vunpack.i.l.bf16 %v14931_v27  ;;  %v14932_v30 = vld [vmem:[#allocation72_spill] sm:$0xff]  ;;  %v7370_v2 = vunpack.i.l.bf16 %v14933_v25  ;;  %v2745_v18 = vsel %vm2715_vm5, %v2680_v12, %v7725_v34 }
 0x29d   :  { %v2843_v11 = vsel %vm2780_vm6, %v2778_v60, %v7836_v33  ;;  %v14930_v33 = vld [vmem:[#allocation16_spill] sm:$0xff]  ;;  %v7210_v9 = vunpack.i.l.bf16 %v14932_v30  ;;  %v2810_v7 = vsel %vm2780_vm6, %v2745_v18, %v7730_v22  ;;  %v7750_v26 = vunpack.i.l.bf16 %v11136_v17  ;;  %v8093_v17 = vld [vmem:[%s14569_s0 + $0x170] sm:$0xff] }
 0x29e   :  { %3155 = vmatmul.f32.gmra.mxu0 %v2809_v20  ;;  %3257 = vmatmul.f32.gmra.mxu3 %v2843_v11  ;;  %v6890_v43 = vunpack.i.l.bf16 %v14930_v33  ;;  %v7745_v11 = vunpack.i.l.bf16 %v11138_v47  ;;  %v6891_v45 = vunpack.i.h.bf16 %v14930_v33  ;;  %v7051_v59 = vunpack.i.h.bf16 %v14931_v27  ;;  %v6573_v33 = vld [vmem:[%s14569_s0 + $0x2c2] sm:$0xff] }
 0x29f   :  { %v11403_v23 = vpop.permute.xlu0 %7848  ;;  %v11405_v14 = vpop.permute.xlu1 %7853  ;;  %v7211_v47 = vunpack.i.h.bf16 %v14932_v30  ;;  %v7371_v22 = vunpack.i.h.bf16 %v14933_v25  ;;  %v7755_v27 = vunpack.i.l.bf16 %v11069_v49  ;;  %v14935_v30 = vld [vmem:[#allocation15_spill] sm:$0xff] }
 0x2a0   :  { %v7851_v15 = vunpack.i.h.bf16 %v11403_v23  ;;  %v7856_v35 = vunpack.i.h.bf16 %v11405_v14  ;;  %v2421_v60 = vsel %vm2390_vm0, %v8092_v50, %v6890_v43  ;;  %v2422_v12 = vsel %vm2390_vm0, %v8093_v17, %v6891_v45  ;;  %v52_v25 = vld [vmem:[%s14569_s0 + $0x1b0] sm:$0xff]  ;;  %v14937_v50 = vld [vmem:[#allocation60_spill] sm:$0xff] }
 0x2a1   :  { %v2486_v20 = vsel %vm2455_vm1, %v2421_v60, %v7050_v19  ;;  %v7215_v60 = vunpack.i.l.bf16 %v14937_v50 }
 0x2a2   :  { %v2779_v41 = vsel %vm2715_vm5, %v2714_v13, %v7851_v15  ;;  %v2551_v51 = vsel %vm2520_vm2, %v2486_v20, %v7210_v9  ;;  %v11440_v15 = vpop.f32.mrf.mxu3  ;;  %v7760_v13 = vunpack.i.l.bf16 %v11180_v36  ;;  %v6895_v9 = vunpack.i.l.bf16 %v14935_v30 }
 0x2a3   :  { %v11418_v39 = vpop.f32.mrf.mxu0  ;;  %v2844_v4 = vsel %vm2780_vm6, %v2779_v41, %v7856_v35  ;;  %v2616_v1 = vsel %vm14738_vm3, %v2551_v51, %v7370_v2  ;;  %14934 = vst [vmem:[#allocation8_spill] sm:$0xff] %v11440_v15  ;;  %v2487_v35 = vsel %vm2455_vm1, %v2422_v12, %v7051_v59  ;;  %v14936_v2 = vld [vmem:[#allocation43_spill] sm:$0xff]  ;;  %v7775_v51 = vunpack.i.l.bf16 %v11222_v5 }
 0x2a4   :  { %v2681_v63 = vsel %vm2650_vm4, %v2616_v1, %v7740_v38  ;;  %v2552_v41 = vsel %vm2520_vm2, %v2487_v35, %v7211_v47  ;;  %v7055_v18 = vunpack.i.l.bf16 %v14936_v2  ;;  %v7765_v38 = vunpack.i.l.bf16 %v11178_v46  ;;  %v6574_v46 = vld [vmem:[%s14569_s0 + $0x2d2] sm:$0xff] }
 0x2a5   :  { %v2746_v34 = vsel %vm2715_vm5, %v2681_v63, %v7745_v11  ;;  %v2617_v49 = vsel %vm14738_vm3, %v2552_v41, %v7371_v22  ;;  %v7780_v47 = vunpack.i.l.bf16 %v11220_v48  ;;  %v6896_v5 = vunpack.i.h.bf16 %v14935_v30  ;;  %v6575_v41 = vld [vmem:[%s14569_s0 + $0x2da] sm:$0xff] }
 0x2a6   :  { %3158 = vmatmul.f32.gmra.mxu0 %v2810_v7  ;;  %3260 = vmatmul.f32.gmra.mxu3 %v2844_v4  ;;  %v2811_v19 = vsel %vm2780_vm6, %v2746_v34, %v7750_v26  ;;  %v2682_v36 = vsel %vm2650_vm4, %v2617_v49, %v7755_v27  ;;  %v14938_v7 = vld [vmem:[#allocation106_spill] sm:$0xff]  ;;  %v2423_v4 = vsel %vm2390_vm0, %v52_v25, %v6895_v9  ;;  %v7056_v17 = vunpack.i.h.bf16 %v14936_v2 }
 0x2a7   :  { %v7375_v20 = vunpack.i.l.bf16 %v14938_v7  ;;  %v2747_v11 = vsel %vm2715_vm5, %v2682_v36, %v7760_v13  ;;  %v2488_v26 = vsel %vm2455_vm1, %v2423_v4, %v7055_v18  ;;  %v7216_v12 = vunpack.i.h.bf16 %v14937_v50  ;;  %v14941_v50 = vld [vmem:[#allocation6_spill] sm:$0xff] }
 0x2a8   :  { %v2553_v63 = vsel %vm2520_vm2, %v2488_v26, %v7215_v60  ;;  %v2812_v59 = vsel %vm2780_vm6, %v2747_v11, %v7765_v38  ;;  %v7785_v27 = vunpack.i.l.bf16 %v11204_v44  ;;  %v7790_v13 = vunpack.i.l.bf16 %v11255_v8  ;;  %v14942_v36 = vld [vmem:[#allocation42_spill] sm:$0xff]  ;;  %v14943_v11 = vld [vmem:[#allocation76_spill] sm:$0xff]  ;;  %v14944_v26 = vld [vmem:[#allocation95_spill] sm:$0xff] }
 0x2a9   :  { %v2618_v34 = vsel %vm14738_vm3, %v2553_v63, %v7375_v20  ;;  %v7795_v49 = vunpack.i.l.bf16 %v11253_v56  ;;  %v6900_v60 = vunpack.i.l.bf16 %v14941_v50  ;;  %v7800_v38 = vunpack.i.l.bf16 %v11249_v57  ;;  %v6576_v56 = vld [vmem:[%s14569_s0 + $0x2ea] sm:$0xff] }
 0x2aa   :  { %v11471_v1 = vpop.f32.mrf.mxu3  ;;  %v2683_v22 = vsel %vm2650_vm4, %v2618_v34, %v7775_v51  ;;  %v7220_v4 = vunpack.i.l.bf16 %v14943_v11  ;;  %v8094_v63 = vld [vmem:[%s14569_s0 + $0x1c8] sm:$0xff] }
 0x2ab   :  { %v11442_v43 = vpop.f32.mrf.mxu0  ;;  %14939 = vst [vmem:[#allocation116_spill] sm:$0xff] %v11471_v1  ;;  %v2748_v48 = vsel %vm2715_vm5, %v2683_v22, %v7780_v47  ;;  %v2425_v57 = vsel %vm2390_vm0, %v8094_v63, %v6900_v60  ;;  %v7830_v60 = vunpack.i.l.bf16 %v11341_v40 }
 0x2ac   :  { %v2813_v44 = vsel %vm2780_vm6, %v2748_v48, %v7785_v27  ;;  %v6901_v27 = vunpack.i.h.bf16 %v14941_v50  ;;  %v7061_v48 = vunpack.i.h.bf16 %v14942_v36 }
 0x2ae   :  { %3161 = vmatmul.f32.gmra.mxu0 %v2811_v19  ;;  %6637 = vmatmul.msk.f32.vlgmr.msrb.gmra.mxu3 %vm2390_vm0, %v6573_v33  ;;  %v53_v33 = vld [vmem:[%s14569_s0 + $0x1b8] sm:$0xff]  ;;  %v7376_v19 = vunpack.i.h.bf16 %v14938_v7  ;;  %v7060_v7 = vunpack.i.l.bf16 %v14942_v36 }
 0x2af   :  { %v2424_v35 = vsel %vm2390_vm0, %v53_v33, %v6896_v5 }
 0x2b0   :  { %v2489_v9 = vsel %vm2455_vm1, %v2424_v35, %v7056_v17  ;;  %v2490_v47 = vsel %vm2455_vm1, %v2425_v57, %v7060_v7  ;;  %v11533_v17 = vpop.f32.mrf.mxu1  ;;  %v7221_v35 = vunpack.i.h.bf16 %v14943_v11  ;;  %v7835_v7 = vunpack.i.l.bf16 %v11366_v21  ;;  %v14948_v11 = vld [vmem:[#allocation32_spill] sm:$0xff]  ;;  %v14950_v57 = vld [vmem:[#allocation110_spill] sm:$0xff] }
 0x2b1   :  { %v2554_v25 = vsel %vm2520_vm2, %v2489_v9, %v7216_v12  ;;  %v2555_v5 = vsel %vm2520_vm2, %v2490_v47, %v7220_v4  ;;  %v7815_v12 = vunpack.i.l.bf16 %v11299_v53  ;;  %v7381_v9 = vunpack.i.h.bf16 %v14944_v26  ;;  %v6577_v53 = vld [vmem:[%s14569_s0 + $0x2f2] sm:$0xff]  ;;  %v6578_v21 = vld [vmem:[%s14569_s0 + $0x302] sm:$0xff] }
 0x2b2   :  { %v11503_v2 = vpop.f32.mrf.mxu3  ;;  %v2619_v18 = vsel %vm14738_vm3, %v2554_v25, %v7376_v19  ;;  %v7065_v4 = vunpack.i.l.bf16 %v14948_v11 }
 0x2b3   :  { %v11473_v45 = vpop.f32.mrf.mxu0  ;;  %14940 = vst [vmem:[#allocation23_spill] sm:$0xff] %v11503_v2  ;;  %v2684_v8 = vsel %vm2650_vm4, %v2619_v18, %v7790_v13 }
 0x2b4   :  { %v2749_v20 = vsel %vm2715_vm5, %v2684_v8, %v7795_v49 }
 0x2b5   :  { %v2814_v34 = vsel %vm2780_vm6, %v2749_v20, %v7800_v38  ;;  %v14946_v38 = vld [vmem:[#allocation19_spill] sm:$0xff] }
 0x2b6   :  { %3164 = vmatmul.f32.gmra.mxu0 %v2812_v59  ;;  %6638 = vmatmul.msk.f32.gmra.mxu3 %vm2390_vm0, %v6574_v46  ;;  %v7380_v46 = vunpack.i.l.bf16 %v14944_v26  ;;  %v7810_v59 = vunpack.i.l.bf16 %v11290_v52  ;;  %v7820_v52 = vunpack.i.l.bf16 %v11327_v24  ;;  %v8095_v24 = vld [vmem:[%s14569_s0 + $0x1d0] sm:$0xff]  ;;  %v6905_v36 = vunpack.i.l.bf16 %v14946_v38 }
 0x2b7   :  { %v2426_v25 = vsel %vm2390_vm0, %v8095_v24, %v6901_v27  ;;  %v7850_v27 = vunpack.i.l.bf16 %v11403_v23 }
 0x2b8   :  { %v2620_v33 = vsel %vm14738_vm3, %v2555_v5, %v7380_v46  ;;  %v2491_v49 = vsel %vm2455_vm1, %v2426_v25, %v7061_v48  ;;  %v11565_v26 = vpop.f32.mrf.mxu1  ;;  %v14949_v46 = vld [vmem:[#allocation75_spill] sm:$0xff]  ;;  %v7845_v5 = vunpack.i.l.bf16 %v11395_v58  ;;  %v6906_v48 = vunpack.i.h.bf16 %v14946_v38 }
 0x2b9   :  { %v2685_v19 = vsel %vm2650_vm4, %v2620_v33, %v7810_v59  ;;  %v2556_v8 = vsel %vm2520_vm2, %v2491_v49, %v7221_v35  ;;  %v7385_v59 = vunpack.i.l.bf16 %v14950_v57  ;;  %v7855_v35 = vunpack.i.l.bf16 %v11405_v14  ;;  %v6579_v14 = vld [vmem:[%s14569_s0 + $0x30a] sm:$0xff] }
 0x2ba   :  { %v11529_v22 = vpop.f32.mrf.mxu3  ;;  %v2621_v50 = vsel %vm14738_vm3, %v2556_v8, %v7381_v9  ;;  %v7066_v58 = vunpack.i.h.bf16 %v14948_v11  ;;  %v7226_v23 = vunpack.i.h.bf16 %v14949_v46  ;;  %v8097_v8 = vld [vmem:[%s14569_s0 + $0x1e8] sm:$0xff] }
 0x2bb   :  { %v11496_v30 = vpop.f32.mrf.mxu0  ;;  %14945 = vst [vmem:[#allocation24_spill] sm:$0xff] %v11529_v22 }
 0x2be   :  { %3167 = vmatmul.f32.gmra.mxu0 %v2813_v44  ;;  %6639 = vmatmul.msk.f32.gmra.mxu3 %vm2390_vm0, %v6575_v41  ;;  %v2750_v41 = vsel %vm2715_vm5, %v2685_v19, %v7815_v12  ;;  %v7825_v44 = vunpack.i.l.bf16 %v11325_v0 }
 0x2bf   :  { %v2815_v18 = vsel %vm2780_vm6, %v2750_v41, %v7820_v52  ;;  %v7859_v41 = vpop.permute.xlu2 %7858 }
 0x2c0   :  { %v2686_v0 = vsel %vm2650_vm4, %v2621_v50, %v7825_v44  ;;  %v11597_v49 = vpop.f32.mrf.mxu1  ;;  %v2428_v50 = vsel %vm2390_vm0, %v8097_v8, %v6906_v48 }
 0x2c1   :  { %v2751_v40 = vsel %vm2715_vm5, %v2686_v0, %v7830_v60  ;;  %v7860_v60 = vunpack.i.l.bf16 %v7859_v41  ;;  %v7869_v0 = vpop.permute.xlu1 %7868 }
 0x2c2   :  { %v11561_v20 = vpop.f32.mrf.mxu3  ;;  %v2816_v33 = vsel %vm2780_vm6, %v2751_v40, %v7835_v7  ;;  %v14953_v40 = vld [vmem:[#allocation46_spill] sm:$0xff] }
 0x2c3   :  { %v11515_v51 = vpop.f32.mrf.mxu0  ;;  %14947 = vst [vmem:[#allocation61_spill] sm:$0xff] %v11561_v20 }
 0x2c6   :  { %3170 = vmatmul.f32.gmra.mxu0 %v2814_v34  ;;  %6640 = vmatmul.msk.f32.gmra.mxu3 %vm2390_vm0, %v6576_v56  ;;  %v7225_v56 = vunpack.i.l.bf16 %v14949_v46  ;;  %v8096_v34 = vld [vmem:[%s14569_s0 + $0x1e0] sm:$0xff]  ;;  %v14952_v46 = vld [vmem:[#allocation18_spill] sm:$0xff] }
 0x2c7   :  { %v2427_v47 = vsel %vm2390_vm0, %v8096_v34, %v6905_v36  ;;  %v2493_v36 = vsel %vm2455_vm1, %v2428_v50, %v7066_v58  ;;  %v6911_v50 = vunpack.i.h.bf16 %v14952_v46 }
 0x2c8   :  { %v2492_v12 = vsel %vm2455_vm1, %v2427_v47, %v7065_v4  ;;  %v2558_v11 = vsel %vm2520_vm2, %v2493_v36, %v7226_v23  ;;  %v14954_v47 = vld [vmem:[#allocation63_spill] sm:$0xff]  ;;  %v11630_v23 = vpop.f32.mrf.mxu1  ;;  %v7874_v36 = vpop.permute.xlu2 %7873 }
 0x2c9   :  { %v2557_v52 = vsel %vm2520_vm2, %v2492_v12, %v7225_v56  ;;  %v6910_v56 = vunpack.i.l.bf16 %v14952_v46  ;;  %v14955_v12 = vld [vmem:[#allocation109_spill] sm:$0xff] }
 0x2ca   :  { %v2622_v19 = vsel %vm14738_vm3, %v2557_v52, %v7385_v59  ;;  %v11592_v25 = vpop.f32.mrf.mxu3  ;;  %v6580_v52 = vld [vmem:[%s14569_s0 + $0x31a] sm:$0xff] }
 0x2cb   :  { %v11541_v13 = vpop.f32.mrf.mxu0  ;;  %v2687_v9 = vsel %vm2650_vm4, %v2622_v19, %v7845_v5  ;;  %14951 = vst [vmem:[#allocation38_spill] sm:$0xff] %v11592_v25  ;;  %v7230_v5 = vunpack.i.l.bf16 %v14954_v47  ;;  %v8098_v19 = vld [vmem:[%s14569_s0 + $0x1f8] sm:$0xff] }
 0x2cc   :  { %v2752_v24 = vsel %vm2715_vm5, %v2687_v9, %v7850_v27  ;;  %v7390_v27 = vunpack.i.l.bf16 %v14955_v12  ;;  %v2429_v48 = vsel %vm2390_vm0, %v8098_v19, %v6910_v56  ;;  %v7391_v56 = vunpack.i.h.bf16 %v14955_v12  ;;  %v14958_v19 = vld [vmem:[#allocation9_spill] sm:$0xff] }
 0x2cd   :  { %v2817_v38 = vsel %vm2780_vm6, %v2752_v24, %v7855_v35  ;;  %v7861_v35 = vunpack.i.h.bf16 %v7859_v41 }
 0x2ce   :  { %3173 = vmatmul.f32.gmra.mxu0 %v2815_v18  ;;  %6641 = vmatmul.msk.f32.gmra.mxu3 %vm2390_vm0, %v6577_v53  ;;  %v7864_v53 = vpop.permute.xlu0 %7863  ;;  %v7386_v18 = vunpack.i.h.bf16 %v14950_v57  ;;  %v7870_v57 = vunpack.i.l.bf16 %v7869_v0 }
 0x2cf   :  { %v7865_v7 = vunpack.i.l.bf16 %v7864_v53 }
 0x2d0   :  { %v2623_v4 = vsel %vm14738_vm3, %v2558_v11, %v7386_v18  ;;  %v7866_v18 = vunpack.i.h.bf16 %v7864_v53  ;;  %v7231_v11 = vunpack.i.h.bf16 %v14954_v47 }
 0x2d1   :  { %v2688_v59 = vsel %vm2650_vm4, %v2623_v4, %v7860_v60  ;;  %v7871_v60 = vunpack.i.h.bf16 %v7869_v0  ;;  %v8099_v0 = vld [vmem:[%s14569_s0 + $0x200] sm:$0xff] }
 0x2d2   :  { %v2753_v34 = vsel %vm2715_vm5, %v2688_v59, %v7865_v7  ;;  %v11626_v9 = vpop.f32.mrf.mxu3  ;;  %v2430_v46 = vsel %vm2390_vm0, %v8099_v0, %v6911_v50  ;;  %v7875_v59 = vunpack.i.l.bf16 %v7874_v36 }
 0x2d3   :  { %v11568_v63 = vpop.f32.mrf.mxu0  ;;  %14956 = vst [vmem:[#allocation97_spill] sm:$0xff] %v11626_v9  ;;  %v2818_v58 = vsel %vm2780_vm6, %v2753_v34, %v7870_v57  ;;  %v6581_v57 = vld [vmem:[%s14569_s0 + $0x322] sm:$0xff] }
 0x2d6   :  { %3176 = vmatmul.f32.gmra.mxu0 %v2816_v33  ;;  %6642 = vmatmul.msk.f32.gmra.mxu3 %vm2390_vm0, %v6578_v21  ;;  %v7070_v21 = vunpack.i.l.bf16 %v14953_v40  ;;  %v7879_v53 = vpop.permute.xlu0 %7878 }
 0x2d7   :  { %v7880_v47 = vunpack.i.l.bf16 %v7879_v53 }
 0x2d8   :  { %v2494_v24 = vsel %vm2455_vm1, %v2429_v48, %v7070_v21  ;;  %v6915_v48 = vunpack.i.l.bf16 %v14958_v19 }
 0x2db   :  { %v11594_v44 = vpop.f32.mrf.mxu0 }
 0x2de   :  { %3179 = vmatmul.f32.gmra.mxu0 %v2817_v38  ;;  %6643 = vmatmul.msk.f32.gmra.mxu3 %vm2390_vm0, %v6579_v14  ;;  %v2559_v14 = vsel %vm2520_vm2, %v2494_v24, %v7230_v5  ;;  %v7071_v38 = vunpack.i.h.bf16 %v14953_v40  ;;  %v11650_v40 = vpop.f32.mrf.mxu3  ;;  %v7884_v5 = vpop.permute.xlu1 %7883  ;;  %v14959_v24 = vld [vmem:[#allocation45_spill] sm:$0xff] }
 0x2df   :  { %v2624_v8 = vsel %vm14738_vm3, %v2559_v14, %v7390_v27  ;;  %14957 = vst [vmem:[#allocation82_spill] sm:$0xff] %v11650_v40 }
 0x2e0   :  { %v2689_v41 = vsel %vm2650_vm4, %v2624_v8, %v7861_v35  ;;  %v2495_v34 = vsel %vm2455_vm1, %v2430_v46, %v7071_v38  ;;  %v7885_v35 = vunpack.i.l.bf16 %v7884_v5  ;;  %v14960_v8 = vld [vmem:[#allocation80_spill] sm:$0xff] }
 0x2e1   :  { %v2754_v7 = vsel %vm2715_vm5, %v2689_v41, %v7866_v18  ;;  %v2560_v12 = vsel %vm2520_vm2, %v2495_v34, %v7231_v11  ;;  %v7075_v18 = vunpack.i.l.bf16 %v14959_v24  ;;  %v7235_v50 = vunpack.i.l.bf16 %v14960_v8  ;;  %v14961_v41 = vld [vmem:[#allocation99_spill] sm:$0xff] }
 0x2e2   :  { %v2819_v21 = vsel %vm2780_vm6, %v2754_v7, %v7871_v60  ;;  %v2625_v27 = vsel %vm14738_vm3, %v2560_v12, %v7391_v56  ;;  %v7395_v38 = vunpack.i.l.bf16 %v14961_v41  ;;  %v6582_v7 = vld [vmem:[%s14569_s0 + $0x332] sm:$0xff]  ;;  %v6916_v12 = vunpack.i.h.bf16 %v14958_v19 }
 0x2e3   :  { %v11616_v33 = vpop.f32.mrf.mxu0  ;;  %v8100_v11 = vld [vmem:[%s14569_s0 + $0x210] sm:$0xff]  ;;  %v8101_v19 = vld [vmem:[%s14569_s0 + $0x218] sm:$0xff] }
 0x2e4   :  { %v2431_v56 = vsel %vm2390_vm0, %v8100_v11, %v6915_v48 }
 0x2e5   :  { %v2496_v46 = vsel %vm2455_vm1, %v2431_v56, %v7075_v18  ;;  %v7236_v18 = vunpack.i.h.bf16 %v14960_v8 }
 0x2e6   :  { %3182 = vmatmul.f32.gmra.mxu0 %v2818_v58  ;;  %6644 = vmatmul.msk.f32.gmra.mxu3 %vm2390_vm0, %v6580_v52  ;;  %v11657_v52 = vpop.f32.mrf.mxu1  ;;  %v2690_v58 = vsel %vm2650_vm4, %v2625_v27, %v7875_v59  ;;  %v7881_v59 = vunpack.i.h.bf16 %v7879_v53  ;;  %v11677_v34 = vpop.f32.mrf.mxu3  ;;  %v7886_v27 = vunpack.i.h.bf16 %v7884_v5  ;;  %v6583_v5 = vld [vmem:[%s14569_s0 + $0x33a] sm:$0xff] }
 0x2e7   :  { %v2755_v14 = vsel %vm2715_vm5, %v2690_v58, %v7880_v47  ;;  %14962 = vst [vmem:[#allocation14_spill] sm:$0xff] %v11677_v34  ;;  %v7889_v58 = vpop.permute.xlu2 %7888 }
 0x2e8   :  { %v2820_v0 = vsel %vm2780_vm6, %v2755_v14, %v7885_v35  ;;  %v7894_v14 = vpop.permute.xlu0 %7893 }
 0x2e9   :  { %v7895_v56 = vunpack.i.l.bf16 %v7894_v14 }
 0x2eb   :  { %v11640_v4 = vpop.f32.mrf.mxu0 }
 0x2ee   :  { %3185 = vmatmul.f32.gmra.mxu0 %v2819_v21  ;;  %6645 = vmatmul.msk.f32.gmra.mxu3 %vm2390_vm0, %v6581_v57  ;;  %v7876_v57 = vunpack.i.h.bf16 %v7874_v36  ;;  %v2561_v21 = vsel %vm2520_vm2, %v2496_v46, %v7235_v50  ;;  %v7076_v36 = vunpack.i.h.bf16 %v14959_v24  ;;  %v11684_v35 = vpop.f32.mrf.mxu1  ;;  %v2432_v24 = vsel %vm2390_vm0, %v8101_v19, %v6916_v12 }
 0x2ef   :  { %v2626_v47 = vsel %vm14738_vm3, %v2561_v21, %v7395_v38  ;;  %v7890_v38 = vunpack.i.l.bf16 %v7889_v58 }
 0x2f0   :  { %v2691_v48 = vsel %vm2650_vm4, %v2626_v47, %v7876_v57  ;;  %v2497_v8 = vsel %vm2455_vm1, %v2432_v24, %v7076_v36  ;;  %v14965_v47 = vld [vmem:[#allocation35_spill] sm:$0xff] }
 0x2f1   :  { %v2756_v53 = vsel %vm2715_vm5, %v2691_v48, %v7881_v59  ;;  %v2562_v57 = vsel %vm2520_vm2, %v2497_v8, %v7236_v18  ;;  %v11704_v59 = vpop.f32.mrf.mxu3  ;;  %v7080_v12 = vunpack.i.l.bf16 %v14965_v47  ;;  %v2281_v48 = vpop.permute.xlu1 %2280  ;;  %v14966_v36 = vld [vmem:[#allocation79_spill] sm:$0xff]  ;;  %v14967_v18 = vld [vmem:[#allocation114_spill] sm:$0xff]  ;;  %v7891_v8 = vunpack.i.h.bf16 %v7889_v58 }
 0x2f2   :  { %v2821_v11 = vsel %vm2780_vm6, %v2756_v53, %v7886_v27  ;;  %14964 = vst [vmem:[#allocation22_spill] sm:$0xff] %v11704_v59  ;;  %v7240_v53 = vunpack.i.l.bf16 %v14966_v36  ;;  %v7400_v24 = vunpack.i.l.bf16 %v14967_v18  ;;  %v7081_v34 = vunpack.i.h.bf16 %v14965_v47 }
 0x2f3   :  { %v11664_v60 = vpop.f32.mrf.mxu0  ;;  %v7241_v58 = vunpack.i.h.bf16 %v14966_v36 }
 0x2f6   :  { %3188 = vmatmul.f32.gmra.mxu0 %v2820_v0  ;;  %6646 = vmatmul.msk.f32.gmra.mxu3 %vm2390_vm0, %v6582_v7  ;;  %v7396_v7 = vunpack.i.h.bf16 %v14961_v41  ;;  %v14963_v0 = vld [vmem:[#allocation21_spill] sm:$0xff] }
 0x2f7   :  { %v6920_v46 = vunpack.i.l.bf16 %v14963_v0 }
 0x2f8   :  { %v2627_v41 = vsel %vm14738_vm3, %v2562_v57, %v7396_v7  ;;  %v6584_v7 = vld [vmem:[%s14569_s0 + $0x34a] sm:$0xff] }
 0x2f9   :  { %v2692_v21 = vsel %vm2650_vm4, %v2627_v41, %v7890_v38  ;;  %v7896_v41 = vunpack.i.h.bf16 %v7894_v14  ;;  %v11737_v47 = vpop.f32.mrf.mxu3  ;;  %v2029_v36 = vpop.permute.xlu1 %2028 }
 0x2fa   :  { %v2757_v27 = vsel %vm2715_vm5, %v2692_v21, %v7895_v56  ;;  %v6921_v21 = vunpack.i.h.bf16 %v14963_v0  ;;  %v8103_v0 = vld [vmem:[%s14569_s0 + $0x230] sm:$0xff]  ;;  %14968 = vst [vmem:[#allocation34_spill] sm:$0xff] %v11737_v47 }
 0x2fb   :  { %v11688_v50 = vpop.f32.mrf.mxu0  ;;  %v2822_v56 = vsel %vm2780_vm6, %v2757_v27, %v2281_v48 }
 0x2fc   :  { %v2434_v27 = vsel %vm2390_vm0, %v8103_v0, %v6921_v21 }
 0x2fe   :  { %3191 = vmatmul.f32.gmra.mxu0 %v2821_v11  ;;  %6647 = vmatmul.msk.f32.gmra.mxu3 %vm2390_vm0, %v6583_v5  ;;  %v8102_v5 = vld [vmem:[%s14569_s0 + $0x228] sm:$0xff]  ;;  %v11720_v11 = vpop.f32.mrf.mxu1 }
 0x2ff   :  { %v2433_v38 = vsel %vm2390_vm0, %v8102_v5, %v6920_v46  ;;  %v2283_v46 = vpop.permute.xlu2 %2282  ;;  %v7899_v5 = vpop.permute.xlu0 %7898 }
 0x300   :  { %v2498_v57 = vsel %vm2455_vm1, %v2433_v38, %v7080_v12  ;;  %v7401_v12 = vunpack.i.h.bf16 %v14967_v18 }
 0x301   :  { %v2563_v59 = vsel %vm2520_vm2, %v2498_v57, %v7240_v53  ;;  %v7900_v53 = vunpack.i.l.bf16 %v7899_v5  ;;  %v14969_v57 = vld [vmem:[#allocation20_spill] sm:$0xff] }
 0x302   :  { %v2628_v40 = vsel %vm14738_vm3, %v2563_v59, %v7400_v24  ;;  %v2499_v24 = vsel %vm2455_vm1, %v2434_v27, %v7081_v34  ;;  %v6925_v34 = vunpack.i.l.bf16 %v14969_v57  ;;  %v14971_v27 = vld [vmem:[#allocation67_spill] sm:$0xff]  ;;  %v6926_v25 = vunpack.i.h.bf16 %v14969_v57 }
 0x303   :  { %v11710_v19 = vpop.f32.mrf.mxu0  ;;  %v2693_v48 = vsel %vm2650_vm4, %v2628_v40, %v7891_v8  ;;  %v6585_v40 = vld [vmem:[%s14569_s0 + $0x352] sm:$0xff]  ;;  %v2564_v18 = vsel %vm2520_vm2, %v2499_v24, %v7241_v58  ;;  %v7245_v58 = vunpack.i.l.bf16 %v14971_v27 }
 0x304   :  { %v2758_v14 = vsel %vm2715_vm5, %v2693_v48, %v7896_v41  ;;  %v2629_v38 = vsel %vm14738_vm3, %v2564_v18, %v7401_v12  ;;  %v14970_v41 = vld [vmem:[#allocation47_spill] sm:$0xff]  ;;  %v14972_v12 = vld [vmem:[#allocation113_spill] sm:$0xff]  ;;  %v7901_v18 = vunpack.i.h.bf16 %v7899_v5 }
 0x305   :  { %v7085_v21 = vunpack.i.l.bf16 %v14970_v41  ;;  %v7086_v5 = vunpack.i.h.bf16 %v14970_v41 }
 0x306   :  { %3194 = vmatmul.f32.gmra.mxu0 %v2822_v56  ;;  %6648 = vmatmul.msk.f32.gmra.mxu3 %vm2390_vm0, %v6584_v7  ;;  %v2823_v7 = vsel %vm2780_vm6, %v2758_v14, %v2283_v46  ;;  %v11748_v8 = vpop.f32.mrf.mxu1  ;;  %v2694_v56 = vsel %vm2650_vm4, %v2629_v38, %v7900_v53  ;;  %v7405_v14 = vunpack.i.l.bf16 %v14972_v12  ;;  %v8104_v53 = vld [vmem:[%s14569_s0 + $0x240] sm:$0xff] }
 0x307   :  { %v2285_v48 = vpop.permute.xlu2 %2284  ;;  %v2759_v0 = vsel %vm2715_vm5, %v2694_v56, %v2029_v36  ;;  %v2031_v24 = vpop.permute.xlu0 %2030 }
 0x308   :  { %v2824_v38 = vsel %vm2780_vm6, %v2759_v0, %v2285_v48  ;;  %v2287_v56 = vpop.permute.xlu1 %2286  ;;  %v7246_v48 = vunpack.i.h.bf16 %v14971_v27 }
 0x30b   :  { %v11739_v59 = vpop.f32.mrf.mxu0 }
 0x30e   :  { %3197 = vmatmul.f32.gmra.mxu0 %v2823_v7  ;;  %6649 = vmatmul.msk.f32.gmra.mxu3 %vm2390_vm0, %v6585_v40  ;;  %v2435_v40 = vsel %vm2390_vm0, %v8104_v53, %v6925_v34  ;;  %v11763_v7 = vpop.f32.mrf.mxu3  ;;  %v11770_v20 = vpop.f32.mrf.mxu1 }
 0x30f   :  { %14973 = vst [vmem:[#allocation52_spill] sm:$0xff] %v11763_v7  ;;  %v2500_v36 = vsel %vm2455_vm1, %v2435_v40, %v7085_v21  ;;  %v7406_v21 = vunpack.i.h.bf16 %v14972_v12  ;;  %v1777_v53 = vpop.permute.xlu2 %1776  ;;  %v14992_v7 = vld [vmem:[#allocation71_spill] sm:$0xff] }
 0x310   :  { %v2565_v47 = vsel %vm2520_vm2, %v2500_v36, %v7245_v58  ;;  %v2033_v58 = vpop.permute.xlu0 %2032  ;;  %v2289_v12 = vpop.permute.xlu1 %2288 }
 0x311   :  { %v2630_v9 = vsel %vm14738_vm3, %v2565_v47, %v7405_v14  ;;  %v8105_v47 = vld [vmem:[%s14569_s0 + $0x248] sm:$0xff]  ;;  %v6930_v14 = vunpack.i.l.bf16 %v8633_v10 }
 0x312   :  { %v2695_v22 = vsel %vm2650_vm4, %v2630_v9, %v7901_v18  ;;  %v2436_v57 = vsel %vm2390_vm0, %v8105_v47, %v6926_v25  ;;  %v7090_v18 = vunpack.i.l.bf16 %v9091_v62 }
 0x313   :  { %v11756_v46 = vpop.f32.mrf.mxu0  ;;  %v2760_v34 = vsel %vm2715_vm5, %v2695_v22, %v2031_v24  ;;  %v2501_v41 = vsel %vm2455_vm1, %v2436_v57, %v7086_v5  ;;  %v7410_v5 = vunpack.i.l.bf16 %v14862_v29 }
 0x314   :  { %v2825_v9 = vsel %vm2780_vm6, %v2760_v34, %v2287_v56  ;;  %v2566_v22 = vsel %vm2520_vm2, %v2501_v41, %v7246_v48  ;;  %v8106_v34 = vld [vmem:[%s14569_s0 + $0x258] sm:$0xff] }
 0x315   :  { %v2631_v24 = vsel %vm14738_vm3, %v2566_v22, %v7406_v21  ;;  %v2437_v10 = vsel %vm2390_vm0, %v8106_v34, %v6930_v14 }
 0x316   :  { %3200 = vmatmul.f32.gmra.mxu0 %v2824_v38  ;;  %v11786_v27 = vpop.f32.mrf.mxu3  ;;  %v2696_v40 = vsel %vm2650_vm4, %v2631_v24, %v1777_v53  ;;  %v7250_v38 = vunpack.i.l.bf16 %v14860_v37  ;;  %v11794_v36 = vpop.f32.mrf.mxu1  ;;  %v2502_v62 = vsel %vm2455_vm1, %v2437_v10, %v7090_v18 }
 0x317   :  { %14974 = vst [vmem:[#allocation50_spill] sm:$0xff] %v11786_v27  ;;  %v2761_v25 = vsel %vm2715_vm5, %v2696_v40, %v2033_v58  ;;  %v1779_v21 = vpop.permute.xlu2 %1778 }
 0x318   :  { %v2826_v48 = vsel %vm2780_vm6, %v2761_v25, %v2289_v12  ;;  %v2567_v37 = vsel %vm2520_vm2, %v2502_v62, %v7250_v38  ;;  %v2035_v53 = vpop.permute.xlu0 %2034  ;;  %v14979_v62 = vld [vmem:[#allocation51_spill] sm:$0xff] }
 0x319   :  { %v2632_v57 = vsel %vm14738_vm3, %v2567_v37, %v7410_v5  ;;  %v14981_v37 = vld [vmem:[#allocation48_spill] sm:$0xff] }
 0x31a   :  { %v2697_v29 = vsel %vm2650_vm4, %v2632_v57, %v1779_v21  ;;  %v11838_v21 = vadd.f32 %v14979_v62, %v10859_v55  ;;  %v14983_v57 = vld [vmem:[#allocation56_spill] sm:$0xff] }
 0x31b   :  { %v11776_v0 = vpop.f32.mrf.mxu0  ;;  %v2762_v58 = vsel %vm2715_vm5, %v2697_v29, %v2035_v53  ;;  %v11842_v53 = vadd.f32 %v14981_v37, %v10788_v42  ;;  %v11846_v29 = vadd.f32 %v14983_v57, %v10920_v6  ;;  %v14988_v6 = vld [vmem:[#allocation62_spill] sm:$0xff] }
 0x31c   :  { %14980 = vst [vmem:[#allocation65_spill] sm:$0xff] %v11838_v21  ;;  %v3474_v42 = vsel %vm2390_vm0, %v11838_v21, 0.0  ;;  %v11864_v37 = vadd.f32 %v14988_v6, %v11048_v28 }
 0x31d   :  { %14982 = vst [vmem:[#allocation86_spill] sm:$0xff] %v11842_v53  ;;  %v3607_v55 = vmul.f32 %v11842_v53, %v11842_v53  ;;  %v3609_v62 = vmul.f32 %v11846_v29, %v11846_v29  ;;  %v3473_v57 = vsel %vm2390_vm0, %v11842_v53, 0.0 }
 0x31e   :  { %3203 = vmatmul.f32.gmra.mxu0 %v2825_v9  ;;  %v11806_v47 = vpop.f32.mrf.mxu3  ;;  %v2291_v9 = vpop.permute.xlu1 %2290  ;;  %14984 = vst [vmem:[#allocation88_spill] sm:$0xff] %v11846_v29  ;;  %v3475_v6 = vadd.f32 %v3474_v42, %v3473_v57 }
 0x31f   :  { %14975 = vst [vmem:[#allocation96_spill] sm:$0xff] %v11806_v47  ;;  %v11813_v22 = vpop.f32.mrf.mxu1  ;;  %v2827_v24 = vsel %vm2780_vm6, %v2762_v58, %v2291_v9  ;;  %v3608_v9 = vmul.f32 %v11838_v21, %v11838_v21  ;;  %v3671_v28 = vsel %vm2390_vm0, %v3607_v55, 0.0  ;;  %v3674_v53 = vsel %vm2390_vm0, %v3609_v62, 0.0  ;;  %v14994_v62 = vld [vmem:[#allocation77_spill] sm:$0xff] }
 0x320   :  { %14989 = vst [vmem:[#allocation64_spill] sm:$0xff] %v11864_v37  ;;  %v3480_v55 = vsel %vm2390_vm0, %v11864_v37, 0.0  ;;  %v11898_v57 = vadd.f32 %v14994_v62, %v11196_v61 }
 0x322   :  { %14995 = vst [vmem:[#allocation26_spill] sm:$0xff] %v11898_v57 }
 0x323   :  { %v11796_v56 = vpop.f32.mrf.mxu0 }
 0x326   :  { %3206 = vmatmul.f32.gmra.mxu0 %v2826_v48  ;;  %v11816_v12 = vpop.f32.mrf.mxu3 }
 0x327   :  { %14976 = vst [vmem:[#allocation70_spill] sm:$0xff] %v11816_v12  ;;  %v11820_v40 = vpop.f32.mrf.mxu1  ;;  %v14990_v12 = vld [vmem:[#allocation66_spill] sm:$0xff] }
 0x328   :  { %v11877_v47 = vadd.f32 %v14990_v12, %v11113_v31 }
 0x32a   :  { %14991 = vst [vmem:[#allocation101_spill] sm:$0xff] %v11877_v47  ;;  %v3612_v42 = vmul.f32 %v11877_v47, %v11877_v47 }
 0x32b   :  { %v11811_v41 = vpop.f32.mrf.mxu0 }
 0x32e   :  { %3209 = vmatmul.f32.gmra.mxu0 %v2827_v24  ;;  %v11822_v18 = vpop.f32.mrf.mxu3  ;;  %v14986_v24 = vld [vmem:[#allocation59_spill] sm:$0xff] }
 0x32f   :  { %14977 = vst [vmem:[#allocation33_spill] sm:$0xff] %v11822_v18  ;;  %v11826_v38 = vpop.f32.mrf.mxu1 }
 0x333   :  { %v11818_v14 = vpop.f32.mrf.mxu0 }
 0x336   :  { %v11830_v34 = vpop.f32.mrf.mxu3 }
 0x337   :  { %14978 = vst [vmem:[#allocation49_spill] sm:$0xff] %v11830_v34  ;;  %v11832_v10 = vpop.f32.mrf.mxu1  ;;  %v11854_v34 = vadd.f32 %v14986_v24, %v10983_v16  ;;  %v3672_v16 = vsel %vm2390_vm0, %v3608_v9, 0.0  ;;  %v3476_v24 = vsel %vm2390_vm0, %v11846_v29, 0.0  ;;  %v3611_v29 = vmul.f32 %v11864_v37, %v11864_v37 }
 0x338   :  { %v3673_v2 = vadd.f32 %v3672_v16, %v3671_v28  ;;  %v3477_v31 = vadd.f32 %v3476_v24, %v3475_v6  ;;  %v14997_v16 = vld [vmem:[#allocation81_spill] sm:$0xff] }
 0x339   :  { %14987 = vst [vmem:[#allocation27_spill] sm:$0xff] %v11854_v34  ;;  %v3610_v21 = vmul.f32 %v11854_v34, %v11854_v34  ;;  %v3478_v9 = vsel %vm2390_vm0, %v11854_v34, 0.0  ;;  %v11909_v24 = vadd.f32 %v14997_v16, %v11236_v3 }
 0x33a   :  { %v3675_v34 = vadd.f32 %v3674_v53, %v3673_v2  ;;  %v3479_v1 = vadd.f32 %v3478_v9, %v3477_v31  ;;  %v3680_v2 = vsel %vm2390_vm0, %v3612_v42, 0.0  ;;  %v14999_v9 = vld [vmem:[#allocation112_spill] sm:$0xff] }
 0x33b   :  { %v11824_v25 = vpop.f32.mrf.mxu0  ;;  %v3676_v12 = vsel %vm2390_vm0, %v3610_v21, 0.0  ;;  %14998 = vst [vmem:[#allocation85_spill] sm:$0xff] %v11909_v24  ;;  %v15000_v31 = vld [vmem:[#allocation84_spill] sm:$0xff] }
 0x33c   :  { %v3677_v28 = vadd.f32 %v3676_v12, %v3675_v34  ;;  %v3481_v6 = vadd.f32 %v3480_v55, %v3479_v1  ;;  %v11920_v62 = vadd.f32 %v15000_v31, %v14999_v9  ;;  %v3486_v1 = vsel %vm2390_vm0, %v11898_v57, 0.0  ;;  %v15002_v12 = vld [vmem:[#allocation3_spill] sm:$0xff] }
 0x33d   :  { %v3615_v34 = vmul.f32 %v11909_v24, %v11909_v24  ;;  %v15003_v55 = vld [vmem:[#allocation87_spill] sm:$0xff] }
 0x33e   :  { %v11848_v58 = vpop.f32.mrf.mxu3  ;;  %15001 = vst [vmem:[#allocation37_spill] sm:$0xff] %v11920_v62  ;;  %v11929_v42 = vadd.f32 %v15003_v55, %v15002_v12 }
 0x33f   :  { %14985 = vst [vmem:[#allocation11_spill] sm:$0xff] %v11848_v58  ;;  %v11880_v27 = vpop.f32.mrf.mxu1  ;;  %v11889_v58 = vadd.f32 %v14992_v7, %v11157_v54  ;;  %v3678_v54 = vsel %vm2390_vm0, %v3611_v29, 0.0  ;;  %v3482_v7 = vsel %vm2390_vm0, %v11877_v47, 0.0  ;;  %v3614_v29 = vmul.f32 %v11898_v57, %v11898_v57 }
 0x340   :  { %v3679_v47 = vadd.f32 %v3678_v54, %v3677_v28  ;;  %v3483_v37 = vadd.f32 %v3482_v7, %v3481_v6  ;;  %15004 = vst [vmem:[#allocation55_spill] sm:$0xff] %v11929_v42  ;;  %v3488_v54 = vsel %vm2390_vm0, %v11909_v24, 0.0  ;;  %v3616_v7 = vmul.f32 %v11920_v62, %v11920_v62  ;;  %v15006_v28 = vld [vmem:[#allocation92_spill] sm:$0xff] }
 0x341   :  { %14993 = vst [vmem:[#allocation10_spill] sm:$0xff] %v11889_v58  ;;  %v3613_v21 = vmul.f32 %v11889_v58, %v11889_v58  ;;  %v3484_v53 = vsel %vm2390_vm0, %v11889_v58, 0.0  ;;  %v3684_v9 = vsel %vm2390_vm0, %v3614_v29, 0.0  ;;  %v3686_v12 = vsel %vm2390_vm0, %v3615_v34, 0.0  ;;  %v15008_v34 = vld [vmem:[#allocation98_spill] sm:$0xff] }
 0x342   :  { %v3681_v16 = vadd.f32 %v3680_v2, %v3679_v47  ;;  %v3490_v47 = vsel %vm2390_vm0, %v11920_v62, 0.0  ;;  %v15007_v2 = vld [vmem:[#allocation94_spill] sm:$0xff] }
 0x343   :  { %v11828_v5 = vpop.f32.mrf.mxu0  ;;  %v3682_v3 = vsel %vm2390_vm0, %v3613_v21, 0.0  ;;  %v15005_v21 = vld [vmem:[#allocation7_spill] sm:$0xff] }
 0x344   :  { %v11940_v6 = vadd.f32 %v15006_v28, %v15005_v21  ;;  %v3683_v31 = vadd.f32 %v3682_v3, %v3681_v16  ;;  %v3492_v3 = vsel %vm2390_vm0, %v11929_v42, 0.0  ;;  %v11962_v16 = vadd.f32 %v15008_v34, %v11418_v39 }
 0x346   :  { %v11900_v15 = vpop.f32.mrf.mxu3  ;;  %v3685_v29 = vadd.f32 %v3684_v9, %v3683_v31  ;;  %15009 = vst [vmem:[#allocation100_spill] sm:$0xff] %v11962_v16  ;;  %v3494_v9 = vsel %vm2390_vm0, %v11940_v6, 0.0 }
 0x347   :  { %14996 = vst [vmem:[#allocation41_spill] sm:$0xff] %v11900_v15  ;;  %v11931_v58 = vpop.f32.mrf.mxu1  ;;  %v3485_v15 = vadd.f32 %v3484_v53, %v3483_v37  ;;  %v3617_v37 = vmul.f32 %v11929_v42, %v11929_v42  ;;  %v11949_v53 = vadd.f32 %v15007_v2, %v11383_v32 }
 0x348   :  { %v3687_v32 = vadd.f32 %v3686_v12, %v3685_v29  ;;  %v3620_v12 = vmul.f32 %v11962_v16, %v11962_v16 }
 0x349   :  { %v3487_v57 = vadd.f32 %v3486_v1, %v3485_v15  ;;  %v3688_v15 = vsel %vm2390_vm0, %v3616_v7, 0.0  ;;  %v3618_v1 = vmul.f32 %v11940_v6, %v11940_v6  ;;  %v15010_v7 = vld [vmem:[#allocation102_spill] sm:$0xff]  ;;  %v3496_v39 = vsel %vm2390_vm0, %v11949_v53, 0.0 }
 0x34a   :  { %v11971_v31 = vadd.f32 %v15010_v7, %v11442_v43  ;;  %v3689_v2 = vadd.f32 %v3688_v15, %v3687_v32  ;;  %v3498_v15 = vsel %vm2390_vm0, %v11962_v16, 0.0 }
 0x34b   :  { %v11834_v48 = vpop.f32.mrf.mxu0  ;;  %v3489_v55 = vadd.f32 %v3488_v54, %v3487_v57  ;;  %v3690_v57 = vsel %vm2390_vm0, %v3617_v37, 0.0  ;;  %v3619_v54 = vmul.f32 %v11949_v53, %v11949_v53  ;;  %v3692_v62 = vsel %vm2390_vm0, %v3618_v1, 0.0  ;;  %v15014_v1 = vld [vmem:[#allocation111_spill] sm:$0xff] }
 0x34c   :  { %15011 = vst [vmem:[#allocation25_spill] sm:$0xff] %v11971_v31  ;;  %v11991_v32 = vadd.f32 %v15014_v1, %v11496_v30 }
 0x34d   :  { %v3491_v28 = vadd.f32 %v3490_v47, %v3489_v55  ;;  %v15012_v47 = vld [vmem:[#allocation108_spill] sm:$0xff]  ;;  %v3691_v55 = vadd.f32 %v3690_v57, %v3689_v2  ;;  %v3694_v43 = vsel %vm2390_vm0, %v3619_v54, 0.0 }
 0x34e   :  { %v11951_v24 = vpop.f32.mrf.mxu3  ;;  %v11980_v37 = vadd.f32 %v15012_v47, %v11473_v45  ;;  %v3696_v47 = vsel %vm2390_vm0, %v3620_v12, 0.0  ;;  %v3623_v12 = vmul.f32 %v11991_v32, %v11991_v32 }
 0x34f   :  { %v3493_v42 = vadd.f32 %v3492_v3, %v3491_v28  ;;  %v11982_v29 = vpop.f32.mrf.mxu1  ;;  %v3621_v3 = vmul.f32 %v11971_v31, %v11971_v31  ;;  %v3693_v28 = vadd.f32 %v3692_v62, %v3691_v55  ;;  %v15017_v55 = vld [vmem:[#allocation117_spill] sm:$0xff] }
 0x350   :  { %15013 = vst [vmem:[#allocation54_spill] sm:$0xff] %v11980_v37  ;;  %v3622_v57 = vmul.f32 %v11980_v37, %v11980_v37 }
 0x351   :  { %v3495_v34 = vadd.f32 %v3494_v9, %v3493_v42  ;;  %v3500_v42 = vsel %vm2390_vm0, %v11971_v31, 0.0  ;;  %v15015_v9 = vld [vmem:[#allocation115_spill] sm:$0xff]  ;;  %v3695_v2 = vadd.f32 %v3694_v43, %v3693_v28  ;;  %v3698_v62 = vsel %vm2390_vm0, %v3621_v3, 0.0  ;;  %v15019_v3 = vld [vmem:[#allocation118_spill] sm:$0xff] }
 0x352   :  { %v12002_v54 = vadd.f32 %v15015_v9, %v11515_v51  ;;  %v3700_v51 = vsel %vm2390_vm0, %v3622_v57, 0.0  ;;  %v3504_v43 = vsel %vm2390_vm0, %v11991_v32, 0.0  ;;  %v12022_v28 = vadd.f32 %v15019_v3, %v11568_v63 }
 0x353   :  { %v11868_v18 = vpop.f32.mrf.mxu0  ;;  %v3497_v7 = vadd.f32 %v3496_v39, %v3495_v34  ;;  %v3502_v39 = vsel %vm2390_vm0, %v11980_v37, 0.0  ;;  %v12013_v34 = vadd.f32 %v15017_v55, %v11541_v13  ;;  %v3697_v1 = vadd.f32 %v3696_v47, %v3695_v2  ;;  %v15020_v47 = vld [vmem:[#allocation119_spill] sm:$0xff] }
 0x354   :  { %15016 = vst [vmem:[#allocation74_spill] sm:$0xff] %v12002_v54  ;;  %v3702_v37 = vsel %vm2390_vm0, %v3623_v12, 0.0  ;;  %v3506_v13 = vsel %vm2390_vm0, %v12002_v54, 0.0  ;;  %v15022_v12 = vld [vmem:[#allocation120_spill] sm:$0xff] }
 0x355   :  { %v3499_v16 = vadd.f32 %v3498_v15, %v3497_v7  ;;  %15018 = vst [vmem:[#allocation4_spill] sm:$0xff] %v12013_v34  ;;  %v3624_v15 = vmul.f32 %v12002_v54, %v12002_v54  ;;  %v3699_v7 = vadd.f32 %v3698_v62, %v3697_v1  ;;  %v3508_v62 = vsel %vm2390_vm0, %v12013_v34, 0.0 }
 0x356   :  { %v12004_v30 = vpop.f32.mrf.mxu3  ;;  %v12044_v1 = vadd.f32 %v15022_v12, %v11616_v33 }
 0x357   :  { %v3501_v31 = vadd.f32 %v3500_v42, %v3499_v16  ;;  %v3625_v16 = vmul.f32 %v12013_v34, %v12013_v34  ;;  %v12031_v42 = vadd.f32 %v15020_v47, %v11594_v44  ;;  %v12033_v57 = vpop.f32.mrf.mxu1  ;;  %v3701_v2 = vadd.f32 %v3700_v51, %v3699_v7 }
 0x358   :  { %v3510_v51 = vsel %vm2390_vm0, %v12022_v28, 0.0 }
 0x359   :  { %v3503_v9 = vadd.f32 %v3502_v39, %v3501_v31  ;;  %15021 = vst [vmem:[#allocation36_spill] sm:$0xff] %v12031_v42  ;;  %v3704_v31 = vsel %vm2390_vm0, %v3624_v15, 0.0  ;;  %v3626_v39 = vmul.f32 %v12022_v28, %v12022_v28  ;;  %v3703_v44 = vadd.f32 %v3702_v37, %v3701_v2  ;;  %v15023_v15 = vld [vmem:[#allocation121_spill] sm:$0xff] }
 0x35a   :  { %v3706_v47 = vsel %vm2390_vm0, %v3625_v16, 0.0  ;;  %v12053_v7 = vadd.f32 %v15023_v15, %v11640_v4  ;;  %v3512_v37 = vsel %vm2390_vm0, %v12031_v42, 0.0  ;;  %v15025_v16 = vld [vmem:[#allocation122_spill] sm:$0xff] }
 0x35b   :  { %v11911_v61 = vpop.f32.mrf.mxu0  ;;  %v3505_v55 = vadd.f32 %v3504_v43, %v3503_v9  ;;  %v3627_v43 = vmul.f32 %v12031_v42, %v12031_v42  ;;  %v3705_v9 = vadd.f32 %v3704_v31, %v3703_v44  ;;  %v3708_v33 = vsel %vm2390_vm0, %v3626_v39, 0.0  ;;  %v15026_v39 = vld [vmem:[#allocation123_spill] sm:$0xff] }
 0x35c   :  { %15024 = vst [vmem:[#allocation69_spill] sm:$0xff] %v12053_v7  ;;  %v12064_v2 = vadd.f32 %v15025_v16, %v11664_v60  ;;  %v3514_v31 = vsel %vm2390_vm0, %v12044_v1, 0.0  ;;  %v12073_v44 = vadd.f32 %v15026_v39, %v11688_v50 }
 0x35d   :  { %v3507_v3 = vadd.f32 %v3506_v13, %v3505_v55  ;;  %v3628_v13 = vmul.f32 %v12044_v1, %v12044_v1  ;;  %v3707_v55 = vadd.f32 %v3706_v47, %v3705_v9  ;;  %v3710_v4 = vsel %vm2390_vm0, %v3627_v43, 0.0 }
 0x35e   :  { %v12055_v54 = vpop.f32.mrf.mxu3  ;;  %v3630_v47 = vmul.f32 %v12064_v2, %v12064_v2 }
 0x35f   :  { %v3509_v34 = vadd.f32 %v3508_v62, %v3507_v3  ;;  %v3629_v62 = vmul.f32 %v12053_v7, %v12053_v7  ;;  %v3709_v3 = vadd.f32 %v3708_v33, %v3707_v55  ;;  %v3712_v60 = vsel %vm2390_vm0, %v3628_v13, 0.0  ;;  %v12086_v9 = vpop.f32.mrf.mxu1  ;;  %v15028_v55 = vld [vmem:[#allocation103_spill] sm:$0xff] }
 0x360   :  { %v3631_v13 = vmul.f32 %v12073_v44, %v12073_v44 }
 0x361   :  { %v3511_v12 = vadd.f32 %v3510_v51, %v3509_v34  ;;  %v3516_v34 = vsel %vm2390_vm0, %v12053_v7, 0.0  ;;  %v15027_v51 = vld [vmem:[#allocation83_spill] sm:$0xff]  ;;  %v3711_v50 = vadd.f32 %v3710_v4, %v3709_v3  ;;  %v3714_v33 = vsel %vm2390_vm0, %v3629_v62, 0.0 }
 0x362   :  { %v12084_v43 = vadd.f32 %v15027_v51, %v11710_v19  ;;  %v3716_v19 = vsel %vm2390_vm0, %v3630_v47, 0.0  ;;  %v3520_v4 = vsel %vm2390_vm0, %v12073_v44, 0.0  ;;  %v12104_v62 = vadd.f32 %v11533_v17, %v11756_v46 }
 0x363   :  { %v11953_v21 = vpop.f32.mrf.mxu0  ;;  %v3513_v15 = vadd.f32 %v3512_v37, %v3511_v12  ;;  %v3518_v37 = vsel %vm2390_vm0, %v12064_v2, 0.0  ;;  %v12095_v12 = vadd.f32 %v15028_v55, %v11739_v59  ;;  %v3713_v39 = vadd.f32 %v3712_v60, %v3711_v50 }
 0x364   :  { %v3718_v59 = vsel %vm2390_vm0, %v3631_v13, 0.0  ;;  %v3522_v60 = vsel %vm2390_vm0, %v12084_v43, 0.0  ;;  %v12115_v47 = vadd.f32 %v11565_v26, %v11776_v0  ;;  %v3526_v0 = vsel %vm2390_vm0, %v12104_v62, 0.0 }
 0x365   :  { %v3515_v16 = vadd.f32 %v3514_v31, %v3513_v15  ;;  %v3632_v31 = vmul.f32 %v12084_v43, %v12084_v43  ;;  %v3715_v3 = vadd.f32 %v3714_v33, %v3713_v39  ;;  %v3634_v33 = vmul.f32 %v12104_v62, %v12104_v62 }
 0x366   :  { %v12106_v51 = vpop.f32.mrf.mxu3  ;;  %v3635_v39 = vmul.f32 %v12115_v47, %v12115_v47 }
 0x367   :  { %v3517_v7 = vadd.f32 %v3516_v34, %v3515_v16  ;;  %v3633_v34 = vmul.f32 %v12095_v12, %v12095_v12  ;;  %v3717_v50 = vadd.f32 %v3716_v19, %v3715_v3  ;;  %v3720_v46 = vsel %vm2390_vm0, %v3632_v31, 0.0 }
 0x368   :  { %v12135_v19 = vadd.f32 %v11630_v23, %v11811_v41  ;;  %v3726_v23 = vsel %vm2390_vm0, %v3635_v39, 0.0 }
 0x369   :  { %v3519_v15 = vadd.f32 %v3518_v37, %v3517_v7  ;;  %v3524_v7 = vsel %vm2390_vm0, %v12095_v12, 0.0  ;;  %v12126_v37 = vadd.f32 %v11597_v49, %v11796_v56  ;;  %v3719_v13 = vadd.f32 %v3718_v59, %v3717_v50 }
 0x36a   :  { %v3722_v26 = vsel %vm2390_vm0, %v3633_v34, 0.0  ;;  %v3724_v49 = vsel %vm2390_vm0, %v3634_v33, 0.0  ;;  %v3528_v56 = vsel %vm2390_vm0, %v12115_v47, 0.0  ;;  %v12146_v59 = vadd.f32 %v11657_v52, %v11818_v14 }
 0x36b   :  { %v11993_v45 = vpop.f32.mrf.mxu0  ;;  %v3521_v16 = vadd.f32 %v3520_v4, %v3519_v15  ;;  %v12137_v4 = vpop.f32.mrf.mxu1  ;;  %v3721_v31 = vadd.f32 %v3720_v46, %v3719_v13  ;;  %v3636_v15 = vmul.f32 %v12126_v37, %v12126_v37  ;;  %v3530_v41 = vsel %vm2390_vm0, %v12126_v37, 0.0 }
 0x36c   :  { %v3637_v50 = vmul.f32 %v12135_v19, %v12135_v19  ;;  %v3532_v13 = vsel %vm2390_vm0, %v12135_v19, 0.0  ;;  %v3534_v39 = vsel %vm2390_vm0, %v12146_v59, 0.0 }
 0x36d   :  { %v3523_v55 = vadd.f32 %v3522_v60, %v3521_v16  ;;  %v3723_v60 = vadd.f32 %v3722_v26, %v3721_v31  ;;  %v12155_v16 = vadd.f32 %v11684_v35, %v11824_v25  ;;  %v3728_v14 = vsel %vm2390_vm0, %v3636_v15, 0.0 }
 0x36e   :  { %v12157_v33 = vpop.f32.mrf.mxu3  ;;  %v12168_v26 = vadd.f32 %v11720_v11, %v11828_v5 }
 0x36f   :  { %v3525_v3 = vadd.f32 %v3524_v7, %v3523_v55  ;;  %v3725_v46 = vadd.f32 %v3724_v49, %v3723_v60  ;;  %v3638_v55 = vmul.f32 %v12146_v59, %v12146_v59  ;;  %v3639_v31 = vmul.f32 %v12155_v16, %v12155_v16 }
 0x370   :  { %v3536_v11 = vsel %vm2390_vm0, %v12155_v16, 0.0  ;;  %v3640_v5 = vmul.f32 %v12168_v26, %v12168_v26  ;;  %v12186_v60 = vadd.f32 %v11770_v20, %v11868_v18 }
 0x371   :  { %v3527_v34 = vadd.f32 %v3526_v0, %v3525_v3  ;;  %v3727_v35 = vadd.f32 %v3726_v23, %v3725_v46  ;;  %v3730_v0 = vsel %vm2390_vm0, %v3637_v50, 0.0  ;;  %v12177_v3 = vadd.f32 %v11748_v8, %v11834_v48 }
 0x372   :  { %v3732_v15 = vsel %vm2390_vm0, %v3638_v55, 0.0  ;;  %v3734_v8 = vsel %vm2390_vm0, %v3639_v31, 0.0  ;;  %v3538_v48 = vsel %vm2390_vm0, %v12168_v26, 0.0  ;;  %v12197_v46 = vadd.f32 %v11794_v36, %v11911_v61 }
 0x373   :  { %v12035_v63 = vpop.f32.mrf.mxu0  ;;  %v3529_v7 = vadd.f32 %v3528_v56, %v3527_v34  ;;  %v3729_v49 = vadd.f32 %v3728_v14, %v3727_v35  ;;  %v12188_v34 = vpop.f32.mrf.mxu1  ;;  %v3641_v50 = vmul.f32 %v12177_v3, %v12177_v3  ;;  %v3736_v18 = vsel %vm2390_vm0, %v3640_v5, 0.0 }
 0x374   :  { %v3642_v55 = vmul.f32 %v12186_v60, %v12186_v60  ;;  %v12206_v35 = vadd.f32 %v11813_v22, %v11953_v21  ;;  %v3542_v61 = vsel %vm2390_vm0, %v12186_v60, 0.0  ;;  %v3643_v31 = vmul.f32 %v12197_v46, %v12197_v46 }
 0x375   :  { %v3531_v25 = vadd.f32 %v3530_v41, %v3529_v7  ;;  %v3731_v23 = vadd.f32 %v3730_v0, %v3729_v49  ;;  %v3738_v36 = vsel %vm2390_vm0, %v3641_v50, 0.0  ;;  %v12217_v49 = vadd.f32 %v11820_v40, %v11993_v45 }
 0x376   :  { %v3740_v22 = vsel %vm2390_vm0, %v3642_v55, 0.0  ;;  %v3544_v21 = vsel %vm2390_vm0, %v12197_v46, 0.0  ;;  %v12226_v5 = vadd.f32 %v11826_v38, %v12035_v63  ;;  %v3742_v40 = vsel %vm2390_vm0, %v3643_v31, 0.0 }
 0x377   :  { %v3533_v56 = vadd.f32 %v3532_v13, %v3531_v25  ;;  %v3733_v7 = vadd.f32 %v3732_v15, %v3731_v23  ;;  %v3540_v13 = vsel %vm2390_vm0, %v12177_v3, 0.0  ;;  %v3546_v45 = vsel %vm2390_vm0, %v12206_v35, 0.0 }
 0x378   :  { %v3548_v63 = vsel %vm2390_vm0, %v12217_v49, 0.0 }
 0x379   :  { %v3535_v41 = vadd.f32 %v3534_v39, %v3533_v56  ;;  %v3735_v25 = vadd.f32 %v3734_v8, %v3733_v7  ;;  %v12208_v39 = vpop.f32.mrf.mxu3 }
 0x37b   :  { %v12075_v42 = vpop.f32.mrf.mxu0  ;;  %v3537_v14 = vadd.f32 %v3536_v11, %v3535_v41  ;;  %v3737_v56 = vadd.f32 %v3736_v18, %v3735_v25  ;;  %v3644_v11 = vmul.f32 %v12206_v35, %v12206_v35  ;;  %v3425_v23 = vpop.f32.mrf.mxu1 }
 0x37c   :  { %v12235_v50 = vadd.f32 %v11832_v10, %v12075_v42  ;;  %v3550_v42 = vsel %vm2390_vm0, %v12226_v5, 0.0 }
 0x37d   :  { %v3539_v0 = vadd.f32 %v3538_v48, %v3537_v14  ;;  %v3739_v41 = vadd.f32 %v3738_v36, %v3737_v56  ;;  %v3645_v48 = vmul.f32 %v12217_v49, %v12217_v49  ;;  %v3744_v38 = vsel %vm2390_vm0, %v3644_v11, 0.0 }
 0x37e   :  { %v3647_v36 = vmul.f32 %v12235_v50, %v12235_v50 }
 0x37f   :  { %v3541_v15 = vadd.f32 %v3540_v13, %v3539_v0  ;;  %v3741_v7 = vadd.f32 %v3740_v22, %v3739_v41  ;;  %v3646_v13 = vmul.f32 %v12226_v5, %v12226_v5  ;;  %v3746_v10 = vsel %vm2390_vm0, %v3645_v48, 0.0 }
 0x381   :  { %v3543_v8 = vadd.f32 %v3542_v61, %v3541_v15  ;;  %v3743_v25 = vadd.f32 %v3742_v40, %v3741_v7  ;;  %v12255_v15 = vpop.f32.mrf.mxu3 }
 0x383   :  { %v12117_v17 = vpop.f32.mrf.mxu0  ;;  %v3545_v14 = vadd.f32 %v3544_v21, %v3543_v8  ;;  %v3745_v31 = vadd.f32 %v3744_v38, %v3743_v25 }
 0x384   :  { %v12244_v55 = vadd.f32 %v11880_v27, %v12117_v17  ;;  %v3748_v27 = vsel %vm2390_vm0, %v3646_v13, 0.0  ;;  %v3552_v17 = vsel %vm2390_vm0, %v12235_v50, 0.0 }
 0x385   :  { %v3547_v0 = vadd.f32 %v3546_v45, %v3545_v14  ;;  %v3747_v11 = vadd.f32 %v3746_v10, %v3745_v31  ;;  %v3428_v45 = vpop.f32.mrf.mxu1 }
 0x386   :  { %v3648_v22 = vmul.f32 %v12244_v55, %v12244_v55 }
 0x387   :  { %v3549_v56 = vadd.f32 %v3548_v63, %v3547_v0  ;;  %v3749_v48 = vadd.f32 %v3748_v27, %v3747_v11 }
 0x389   :  { %v3551_v41 = vadd.f32 %v3550_v42, %v3549_v56  ;;  %v12291_v56 = vpop.f32.mrf.mxu3 }
 0x38b   :  { %v12159_v52 = vpop.f32.mrf.mxu0  ;;  %v3553_v7 = vadd.f32 %v3552_v17, %v3551_v41 }
 0x38c   :  { %v12253_v61 = vadd.f32 %v11931_v58, %v12159_v52  ;;  %v3750_v58 = vsel %vm2390_vm0, %v3647_v36, 0.0  ;;  %v3554_v52 = vsel %vm2390_vm0, %v12244_v55, 0.0 }
 0x38d   :  { %v3751_v13 = vadd.f32 %v3750_v58, %v3749_v48  ;;  %v3555_v25 = vadd.f32 %v3554_v52, %v3553_v7  ;;  %v15030_v7 = vld [vmem:[#allocation116_spill] sm:$0xff] }
 0x38e   :  { %v3649_v8 = vmul.f32 %v12253_v61, %v12253_v61 }
 0x393   :  { %v3201_v20 = vpop.f32.mrf.mxu0 }
 0x394   :  { %v12263_v21 = vadd.f32 %v11982_v29, %v3201_v20  ;;  %v3752_v29 = vsel %vm2390_vm0, %v3648_v22, 0.0  ;;  %v3556_v20 = vsel %vm2390_vm0, %v12253_v61, 0.0  ;;  %v15029_v22 = vld [vmem:[#allocation8_spill] sm:$0xff] }
 0x395   :  { %v3753_v10 = vadd.f32 %v3752_v29, %v3751_v13  ;;  %v3557_v42 = vadd.f32 %v3556_v20, %v3555_v25  ;;  %v12295_v11 = vadd.f32 %v12188_v34, %v15029_v22 }
 0x396   :  { %v3650_v38 = vmul.f32 %v12263_v21, %v12263_v21 }
 0x397   :  { %v3654_v25 = vmul.f32 %v12295_v11, %v12295_v11 }
 0x398   :  { %v3756_v36 = vsel %vm2390_vm0, %v3650_v38, 0.0  ;;  %v3431_v38 = vpop.f32.mrf.mxu1 }
 0x399   :  { %v3764_v22 = vsel %vm2390_vm0, %v3654_v25, 0.0 }
 0x39b   :  { %v3204_v18 = vpop.f32.mrf.mxu0 }
 0x39c   :  { %v12271_v40 = vadd.f32 %v12033_v57, %v3204_v18  ;;  %v3754_v57 = vsel %vm2390_vm0, %v3649_v8, 0.0  ;;  %v3558_v18 = vsel %vm2390_vm0, %v12263_v21, 0.0 }
 0x39d   :  { %v3755_v27 = vadd.f32 %v3754_v57, %v3753_v10  ;;  %v3559_v17 = vadd.f32 %v3558_v18, %v3557_v42  ;;  %v15031_v57 = vld [vmem:[#allocation23_spill] sm:$0xff] }
 0x39e   :  { %v3651_v0 = vmul.f32 %v12271_v40, %v12271_v40  ;;  %v3560_v31 = vsel %vm2390_vm0, %v12271_v40, 0.0  ;;  %v12310_v18 = vadd.f32 %v3428_v45, %v15031_v57  ;;  %v15035_v57 = vld [vmem:[#allocation38_spill] sm:$0xff] }
 0x39f   :  { %v3757_v52 = vadd.f32 %v3756_v36, %v3755_v27  ;;  %v3561_v8 = vadd.f32 %v3560_v31, %v3559_v17  ;;  %v15032_v31 = vld [vmem:[#allocation24_spill] sm:$0xff] }
 0x3a0   :  { %v3758_v41 = vsel %vm2390_vm0, %v3651_v0, 0.0 }
 0x3a1   :  { %v3759_v13 = vadd.f32 %v3758_v41, %v3757_v52  ;;  %v15033_v52 = vld [vmem:[#allocation61_spill] sm:$0xff] }
 0x3a3   :  { %v3207_v14 = vpop.f32.mrf.mxu0 }
 0x3a4   :  { %v12279_v63 = vadd.f32 %v12086_v9, %v3207_v14  ;;  %v12301_v14 = vadd.f32 %v3425_v23, %v15030_v7  ;;  %v3464_v7 = vpop.f32.mrf.mxu3 }
 0x3a6   :  { %v3652_v9 = vmul.f32 %v12279_v63, %v12279_v63  ;;  %v3562_v58 = vsel %vm2390_vm0, %v12279_v63, 0.0  ;;  %v3655_v36 = vmul.f32 %v12301_v14, %v12301_v14  ;;  %v3568_v41 = vsel %vm2390_vm0, %v12301_v14, 0.0 }
 0x3a7   :  { %v3563_v34 = vadd.f32 %v3562_v58, %v3561_v8  ;;  %v3656_v58 = vmul.f32 %v12310_v18, %v12310_v18  ;;  %v15034_v8 = vld [vmem:[#allocation11_spill] sm:$0xff] }
 0x3a8   :  { %v3760_v29 = vsel %vm2390_vm0, %v3652_v9, 0.0  ;;  %v12321_v9 = vadd.f32 %v3431_v38, %v15032_v31 }
 0x3a9   :  { %v3761_v10 = vadd.f32 %v3760_v29, %v3759_v13  ;;  %v3766_v13 = vsel %vm2390_vm0, %v3655_v36, 0.0 }
 0x3aa   :  { %v3657_v25 = vmul.f32 %v12321_v9, %v12321_v9  ;;  %v3572_v31 = vsel %vm2390_vm0, %v12321_v9, 0.0 }
 0x3ab   :  { %v3210_v48 = vpop.f32.mrf.mxu0 }
 0x3ac   :  { %v12305_v20 = vadd.f32 %v12137_v4, %v3210_v48  ;;  %v3566_v4 = vsel %vm2390_vm0, %v12295_v11, 0.0  ;;  %v12331_v48 = vadd.f32 %v15034_v8, %v15033_v52  ;;  %v15038_v8 = vld [vmem:[#allocation82_spill] sm:$0xff] }
 0x3ae   :  { %v3564_v0 = vsel %vm2390_vm0, %v12305_v20, 0.0  ;;  %v3653_v23 = vmul.f32 %v12305_v20, %v12305_v20  ;;  %v3658_v36 = vmul.f32 %v12331_v48, %v12331_v48  ;;  %v3574_v52 = vsel %vm2390_vm0, %v12331_v48, 0.0 }
 0x3af   :  { %v3565_v42 = vadd.f32 %v3564_v0, %v3563_v34  ;;  %v3570_v34 = vsel %vm2390_vm0, %v12310_v18, 0.0  ;;  %v15036_v0 = vld [vmem:[#allocation41_spill] sm:$0xff] }
 0x3b0   :  { %v3762_v45 = vsel %vm2390_vm0, %v3653_v23, 0.0  ;;  %v12340_v23 = vadd.f32 %v15036_v0, %v15035_v57  ;;  %v15039_v57 = vld [vmem:[#allocation14_spill] sm:$0xff] }
 0x3b1   :  { %v3567_v27 = vadd.f32 %v3566_v4, %v3565_v42  ;;  %v3763_v17 = vadd.f32 %v3762_v45, %v3761_v10  ;;  %v3768_v4 = vsel %vm2390_vm0, %v3656_v58, 0.0  ;;  %v15037_v45 = vld [vmem:[#allocation97_spill] sm:$0xff]  ;;  %v12367_v0 = vadd.f32 %v12055_v54, %v15039_v57  ;;  %v15042_v57 = vld [vmem:[#allocation52_spill] sm:$0xff] }
 0x3b2   :  { %v3659_v58 = vmul.f32 %v12340_v23, %v12340_v23 }
 0x3b3   :  { %v3569_v29 = vadd.f32 %v3568_v41, %v3567_v27  ;;  %v3765_v38 = vadd.f32 %v3764_v22, %v3763_v17  ;;  %v12349_v27 = vadd.f32 %v11951_v24, %v15037_v45  ;;  %v3770_v41 = vsel %vm2390_vm0, %v3657_v25, 0.0 }
 0x3b4   :  { %v3576_v24 = vsel %vm2390_vm0, %v12340_v23, 0.0 }
 0x3b5   :  { %v3571_v10 = vadd.f32 %v3570_v34, %v3569_v29  ;;  %v3767_v42 = vadd.f32 %v3766_v13, %v3765_v38  ;;  %v12358_v29 = vadd.f32 %v12004_v30, %v15038_v8  ;;  %v3772_v34 = vsel %vm2390_vm0, %v3658_v36, 0.0  ;;  %v15040_v36 = vld [vmem:[#allocation22_spill] sm:$0xff] }
 0x3b6   :  { %v3660_v25 = vmul.f32 %v12349_v27, %v12349_v27  ;;  %v3578_v30 = vsel %vm2390_vm0, %v12349_v27, 0.0  ;;  %v12376_v45 = vadd.f32 %v12106_v51, %v15040_v36  ;;  %v15041_v8 = vld [vmem:[#allocation34_spill] sm:$0xff] }
 0x3b7   :  { %v3573_v17 = vadd.f32 %v3572_v31, %v3571_v10  ;;  %v3769_v22 = vadd.f32 %v3768_v4, %v3767_v42  ;;  %v3774_v4 = vsel %vm2390_vm0, %v3659_v58, 0.0  ;;  %v3661_v31 = vmul.f32 %v12358_v29, %v12358_v29  ;;  %v15044_v36 = vld [vmem:[#allocation50_spill] sm:$0xff] }
 0x3b8   :  { %v3776_v54 = vsel %vm2390_vm0, %v3660_v25, 0.0  ;;  %v3662_v58 = vmul.f32 %v12367_v0, %v12367_v0  ;;  %v3663_v25 = vmul.f32 %v12376_v45, %v12376_v45 }
 0x3b9   :  { %v3575_v38 = vadd.f32 %v3574_v52, %v3573_v17  ;;  %v3771_v13 = vadd.f32 %v3770_v41, %v3769_v22  ;;  %v3467_v17 = vpop.f32.mrf.mxu3  ;;  %v3580_v52 = vsel %vm2390_vm0, %v12358_v29, 0.0  ;;  %v3778_v51 = vsel %vm2390_vm0, %v3661_v31, 0.0 }
 0x3bb   :  { %v3577_v10 = vadd.f32 %v3576_v24, %v3575_v38  ;;  %v3773_v42 = vadd.f32 %v3772_v34, %v3771_v13  ;;  %v12385_v38 = vadd.f32 %v12157_v33, %v15041_v8  ;;  %v3582_v24 = vsel %vm2390_vm0, %v12367_v0, 0.0  ;;  %v15046_v8 = vld [vmem:[#allocation96_spill] sm:$0xff] }
 0x3bc   :  { %v3584_v33 = vsel %vm2390_vm0, %v12376_v45, 0.0 }
 0x3bd   :  { %v3579_v22 = vadd.f32 %v3578_v30, %v3577_v10  ;;  %v3775_v41 = vadd.f32 %v3774_v4, %v3773_v42  ;;  %v12394_v10 = vadd.f32 %v12208_v39, %v15042_v57  ;;  %v3780_v30 = vsel %vm2390_vm0, %v3662_v58, 0.0  ;;  %v15048_v57 = vld [vmem:[#allocation70_spill] sm:$0xff] }
 0x3be   :  { %v3664_v31 = vmul.f32 %v12385_v38, %v12385_v38  ;;  %v3586_v39 = vsel %vm2390_vm0, %v12385_v38, 0.0 }
 0x3bf   :  { %v3581_v13 = vadd.f32 %v3580_v52, %v3579_v22  ;;  %v3777_v34 = vadd.f32 %v3776_v54, %v3775_v41  ;;  %15043 = vst [vmem:[#allocation91_spill] sm:$0xff] %v12394_v10  ;;  %v12403_v22 = vadd.f32 %v12255_v15, %v15044_v36  ;;  %v3782_v52 = vsel %vm2390_vm0, %v3663_v25, 0.0 }
 0x3c0   :  { %v3665_v58 = vmul.f32 %v12394_v10, %v12394_v10  ;;  %v3588_v15 = vsel %vm2390_vm0, %v12394_v10, 0.0 }
 0x3c1   :  { %v3583_v42 = vadd.f32 %v3582_v24, %v3581_v13  ;;  %v3779_v4 = vadd.f32 %v3778_v51, %v3777_v34  ;;  %15045 = vst [vmem:[#allocation17_spill] sm:$0xff] %v12403_v22  ;;  %v12412_v13 = vadd.f32 %v12291_v56, %v15046_v8  ;;  %v3784_v24 = vsel %vm2390_vm0, %v3664_v31, 0.0 }
 0x3c2   :  { %v3666_v25 = vmul.f32 %v12403_v22, %v12403_v22  ;;  %v3786_v36 = vsel %vm2390_vm0, %v3665_v58, 0.0  ;;  %v3590_v56 = vsel %vm2390_vm0, %v12403_v22, 0.0  ;;  %v15052_v58 = vld [vmem:[#allocation49_spill] sm:$0xff] }
 0x3c3   :  { %v3585_v41 = vadd.f32 %v3584_v33, %v3583_v42  ;;  %v3781_v54 = vadd.f32 %v3780_v30, %v3779_v4  ;;  %15047 = vst [vmem:[#allocation53_spill] sm:$0xff] %v12412_v13  ;;  %v12420_v42 = vadd.f32 %v3464_v7, %v15048_v57  ;;  %v3470_v4 = vpop.f32.mrf.mxu3  ;;  %v3667_v31 = vmul.f32 %v12412_v13, %v12412_v13 }
 0x3c4   :  { %v3788_v8 = vsel %vm2390_vm0, %v3666_v25, 0.0  ;;  %v3592_v7 = vsel %vm2390_vm0, %v12412_v13, 0.0 }
 0x3c5   :  { %v3587_v34 = vadd.f32 %v3586_v39, %v3585_v41  ;;  %v3783_v51 = vadd.f32 %v3782_v52, %v3781_v54  ;;  %15049 = vst [vmem:[#allocation90_spill] sm:$0xff] %v12420_v42  ;;  %v15050_v41 = vld [vmem:[#allocation33_spill] sm:$0xff]  ;;  %v3790_v57 = vsel %vm2390_vm0, %v3667_v31, 0.0 }
 0x3c6   :  { %v12428_v54 = vadd.f32 %v3467_v17, %v15050_v41  ;;  %v3594_v17 = vsel %vm2390_vm0, %v12420_v42, 0.0 }
 0x3c7   :  { %v3589_v30 = vadd.f32 %v3588_v15, %v3587_v34  ;;  %v3785_v33 = vadd.f32 %v3784_v24, %v3783_v51  ;;  %v3668_v34 = vmul.f32 %v12420_v42, %v12420_v42  ;;  %v12436_v51 = vadd.f32 %v3470_v4, %v15052_v58 }
 0x3c8   :  { %15051 = vst [vmem:[#allocation13_spill] sm:$0xff] %v12428_v54 }
 0x3c9   :  { %v3591_v52 = vadd.f32 %v3590_v56, %v3589_v30  ;;  %v3787_v39 = vadd.f32 %v3786_v36, %v3785_v33  ;;  %15053 = vst [vmem:[#allocation30_spill] sm:$0xff] %v12436_v51  ;;  %v3669_v30 = vmul.f32 %v12428_v54, %v12428_v54  ;;  %v3792_v36 = vsel %vm2390_vm0, %v3668_v34, 0.0 }
 0x3ca   :  { %v3596_v56 = vsel %vm2390_vm0, %v12428_v54, 0.0  ;;  %v3670_v4 = vmul.f32 %v12436_v51, %v12436_v51 }
 0x3cb   :  { %v3593_v24 = vadd.f32 %v3592_v7, %v3591_v52  ;;  %v3789_v15 = vadd.f32 %v3788_v8, %v3787_v39  ;;  %v3794_v31 = vsel %vm2390_vm0, %v3669_v30, 0.0  ;;  %v3598_v39 = vsel %vm2390_vm0, %v12436_v51, 0.0 }
 0x3cc   :  { %v3796_v58 = vsel %vm2390_vm0, %v3670_v4, 0.0 }
 0x3cd   :  { %v3595_v25 = vadd.f32 %v3594_v17, %v3593_v24  ;;  %v3791_v33 = vadd.f32 %v3790_v57, %v3789_v15 }
 0x3cf   :  { %v3597_v41 = vadd.f32 %v3596_v56, %v3595_v25  ;;  %v3793_v52 = vadd.f32 %v3792_v36, %v3791_v33 }
 0x3d1   :  { %v3599_v8 = vadd.f32 %v3598_v39, %v3597_v41  ;;  %v3795_v7 = vadd.f32 %v3794_v31, %v3793_v52 }
 0x3d3   :  { %v3600_v24 = vrot.slane %v3599_v8, 4  ;;  %v3797_v15 = vadd.f32 %v3796_v58, %v3795_v7  ;;  %v3807_v58 = vld [vmem:[%s14571_s2] sm:$0x1] }
 0x3d5   :  { %v3601_v34 = vadd.f32 %v3600_v24, %v3599_v8  ;;  %v3798_v57 = vrot.slane %v3797_v15, 4 }
 0x3d7   :  { %v3602_v17 = vrot.slane %v3601_v34, 2  ;;  %v3799_v54 = vadd.f32 %v3798_v57, %v3797_v15 }
 0x3d9   :  { %v3603_v42 = vadd.f32 %v3602_v17, %v3601_v34  ;;  %v3800_v13 = vrot.slane %v3799_v54, 2  ;;  %v15054_v34 = vld [vmem:[#allocation86_spill] sm:$0xff]  ;;  %v15055_v17 = vld [vmem:[#allocation65_spill] sm:$0xff] }
 0x3db   :  { %v3604_v22 = vrot.slane %v3603_v42, 1  ;;  %v3801_v25 = vadd.f32 %v3800_v13, %v3799_v54 }
 0x3dd   :  { %v3605_v33 = vadd.f32 %v3604_v22, %v3603_v42  ;;  %v3802_v36 = vrot.slane %v3801_v25, 1 }
 0x3df   :  { %v3606_v30 = vmul.f32 0.001953125, %v3605_v33  ;;  %v3803_v56 = vadd.f32 %v3802_v36, %v3801_v25  ;;  %v15056_v36 = vld [vmem:[#allocation27_spill] sm:$0xff] }
 0x3e1   :  { %v3804_v10 = vmul.f32 0.001953125, %v3803_v56  ;;  %v3805_v51 = vmul.f32 %v3606_v30, %v3606_v30 }
 0x3e3   :  { %v3806_v41 = vsub.f32 %v3804_v10, %v3805_v51  ;;  %v3820_v10 = vld [vmem:[%s14572_s3] sm:$0x1] }
 0x3e5   :  { %v3808_v52 = vadd.f32 1e-05, %v3806_v41 }
 0x3e7   :  { %7902 = vrsqrt.f32 %v3808_v52  ;;  %vm3815_vm8 = vweird.f32 %v3808_v52 }
 0x3ed   :  { %v7903_v4 = vpop.eup %7902 }
 0x3ee   :  { %v3810_v31 = vmul.f32 %v7903_v4, %v3808_v52  ;;  %vm3816_vm7 = vweird.f32 %v7903_v4  ;;  %v15058_v52 = vld [vmem:[#allocation101_spill] sm:$0xff] }
 0x3ef   :  { %vm3817_vm9 = vmor %vm3815_vm8, %vm3816_vm7 }
 0x3f0   :  { %v3811_v39 = vmul.f32 %v7903_v4, %v3810_v31 }
 0x3f2   :  { %v3812_v8 = vmul.f32 0.5, %v3811_v39  ;;  %v15060_v39 = vld [vmem:[#allocation26_spill] sm:$0xff] }
 0x3f4   :  { %v3813_v7 = vsub.f32 1.5, %v3812_v8 }
 0x3f6   :  { %v3814_v13 = vmul.f32 %v7903_v4, %v3813_v7  ;;  %v15061_v7 = vld [vmem:[#allocation85_spill] sm:$0xff] }
 0x3f8   :  { %v3818_v22 = vsel %vm3817_vm9, %v7903_v4, %v3814_v13  ;;  %v15059_v4 = vld [vmem:[#allocation10_spill] sm:$0xff]  ;;  %v15062_v13 = vld [vmem:[#allocation37_spill] sm:$0xff] }
 0x3f9   :  { %v3819_v42 = vmul.f32 %v3818_v22, %v3807_v58 }
 0x3fb   :  { %v3821_v54 = vmul.f32 %v3819_v42, %v3606_v30  ;;  %v12458_v51 = vperm.slane %v3819_v42, 0  ;;  %v15057_v30 = vld [vmem:[#allocation64_spill] sm:$0xff] }
 0x3fd   :  { %v3822_v24 = vsub.f32 %v3820_v10, %v3821_v54  ;;  %v3872_v15 = vmul.f32 %v12458_v51, %v12305_v20  ;;  %v12464_v57 = vmul.f32 %v12458_v51, %v15054_v34  ;;  %v12468_v25 = vmul.f32 %v12458_v51, %v15055_v17  ;;  %v15063_v10 = vld [vmem:[#allocation55_spill] sm:$0xff]  ;;  %v15064_v17 = vld [vmem:[#allocation100_spill] sm:$0xff] }
 0x3fe   :  { %v12474_v56 = vmul.f32 %v12458_v51, %v15056_v36  ;;  %v12478_v41 = vmul.f32 %v12458_v51, %v15057_v30  ;;  %v12482_v20 = vmul.f32 %v12458_v51, %v15058_v52  ;;  %v12486_v31 = vmul.f32 %v12458_v51, %v15059_v4  ;;  %v15065_v30 = vld [vmem:[#allocation25_spill] sm:$0xff]  ;;  %v15066_v52 = vld [vmem:[#allocation54_spill] sm:$0xff] }
 0x3ff   :  { %v12470_v33 = vperm.slane %v3822_v24, 0  ;;  %v12490_v8 = vmul.f32 %v12458_v51, %v15060_v39  ;;  %v12494_v58 = vmul.f32 %v12458_v51, %v15061_v7  ;;  %v12498_v22 = vmul.f32 %v12458_v51, %v15062_v13  ;;  %v15069_v13 = vld [vmem:[#allocation4_spill] sm:$0xff] }
 0x400   :  { %v12505_v54 = vmul.f32 %v12458_v51, %v15063_v10  ;;  %v12509_v24 = vmul.f32 %v12458_v51, %v11940_v6  ;;  %v12513_v34 = vmul.f32 %v12458_v51, %v11949_v53  ;;  %v12517_v36 = vmul.f32 %v12458_v51, %v15064_v17  ;;  %v15068_v53 = vld [vmem:[#allocation74_spill] sm:$0xff] }
 0x401   :  { %v12501_v42 = vadd.f32 %v12470_v33, %v3872_v15  ;;  %v12521_v15 = vmul.f32 %v12458_v51, %v15065_v30  ;;  %v12525_v4 = vmul.f32 %v12458_v51, %v15066_v52  ;;  %v12529_v6 = vmul.f32 %v12458_v51, %v11991_v32  ;;  %v15071_v30 = vld [vmem:[#allocation36_spill] sm:$0xff] }
 0x402   :  { %v12534_v7 = vmul.f32 %v12458_v51, %v15068_v53  ;;  %v12538_v10 = vmul.f32 %v12458_v51, %v15069_v13  ;;  %v12542_v17 = vmul.f32 %v12458_v51, %v12022_v28  ;;  %v12546_v52 = vmul.f32 %v12458_v51, %v15071_v30 }
 0x403   :  { %15067 = vst [vmem:[#allocation68_spill] sm:$0xff] %v12529_v6  ;;  %v4067_v39 = vmin.f32 %v12501_v42, 0.0  ;;  %v12550_v32 = vmul.f32 %v12458_v51, %v12044_v1  ;;  %v15072_v6 = vld [vmem:[#allocation69_spill] sm:$0xff]  ;;  %v12558_v13 = vmul.f32 %v12458_v51, %v12064_v2  ;;  %v12562_v28 = vmul.f32 %v12458_v51, %v12073_v44 }
 0x404   :  { %15070 = vst [vmem:[#allocation105_spill] sm:$0xff] %v12538_v10  ;;  %v12554_v53 = vmul.f32 %v12458_v51, %v15072_v6  ;;  %v12566_v30 = vmul.f32 %v12458_v51, %v12084_v43  ;;  %v12570_v1 = vmul.f32 %v12458_v51, %v12095_v12  ;;  %v12574_v6 = vmul.f32 %v12458_v51, %v12104_v62 }
 0x405   :  { %v4177_v10 = vmul.f32 1.442695, %v4067_v39  ;;  %v12578_v2 = vmul.f32 %v12458_v51, %v12115_v47  ;;  %v12582_v44 = vmul.f32 %v12458_v51, %v12126_v37  ;;  %v12586_v43 = vmul.f32 %v12458_v51, %v12135_v19 }
 0x406   :  { %vm4003_vm10 = vcmp.gt.f32.partialorder %v12501_v42, 0.0  ;;  %v12591_v12 = vmul.f32 %v12458_v51, %v12146_v59  ;;  %v12595_v62 = vmul.f32 %v12458_v51, %v12155_v16  ;;  %v12599_v47 = vmul.f32 %v12458_v51, %v12168_v26 }
 0x407   :  { %7904 = vpow2.f32 %v4177_v10  ;;  %v12603_v37 = vmul.f32 %v12458_v51, %v12177_v3  ;;  %v12607_v19 = vmul.f32 %v12458_v51, %v12186_v60  ;;  %v12611_v59 = vmul.f32 %v12458_v51, %v12197_v46  ;;  %v15078_v10 = vld [vmem:[#allocation91_spill] sm:$0xff] }
 0x408   :  { %v12615_v16 = vmul.f32 %v12458_v51, %v12206_v35  ;;  %v12619_v26 = vmul.f32 %v12458_v51, %v12217_v49  ;;  %v12623_v3 = vmul.f32 %v12458_v51, %v12226_v5  ;;  %v12627_v60 = vmul.f32 %v12458_v51, %v12235_v50 }
 0x409   :  { %v12631_v46 = vmul.f32 %v12458_v51, %v12244_v55  ;;  %v12635_v35 = vmul.f32 %v12458_v51, %v12253_v61  ;;  %v12639_v49 = vmul.f32 %v12458_v51, %v12263_v21  ;;  %v12643_v5 = vmul.f32 %v12458_v51, %v12271_v40 }
 0x40a   :  { %v12647_v50 = vmul.f32 %v12458_v51, %v12279_v63  ;;  %v12651_v55 = vmul.f32 %v12458_v51, %v12295_v11  ;;  %v12655_v61 = vmul.f32 %v12458_v51, %v12301_v14  ;;  %v12659_v21 = vmul.f32 %v12458_v51, %v12310_v18 }
 0x40b   :  { %v12663_v40 = vmul.f32 %v12458_v51, %v12321_v9  ;;  %v12667_v63 = vmul.f32 %v12458_v51, %v12331_v48  ;;  %v12671_v11 = vmul.f32 %v12458_v51, %v12340_v23  ;;  %v12675_v14 = vmul.f32 %v12458_v51, %v12349_v27 }
 0x40c   :  { %v12679_v18 = vmul.f32 %v12458_v51, %v12358_v29  ;;  %v12683_v9 = vmul.f32 %v12458_v51, %v12367_v0  ;;  %v12687_v48 = vmul.f32 %v12458_v51, %v12376_v45  ;;  %v12691_v23 = vmul.f32 %v12458_v51, %v12385_v38  ;;  %v15079_v29 = vld [vmem:[#allocation17_spill] sm:$0xff] }
 0x40d   :  { %15073 = vst [vmem:[#allocation12_spill] sm:$0xff] %v12671_v11  ;;  %v7905_v39 = vpop.eup %7904  ;;  %v12695_v27 = vmul.f32 %v12458_v51, %v15078_v10  ;;  %v15080_v11 = vld [vmem:[#allocation53_spill] sm:$0xff]  ;;  %v12715_v10 = vadd.f32 %v12470_v33, %v12478_v41  ;;  %v12734_v41 = vadd.f32 %v12470_v33, %v12482_v20  ;;  %v12752_v20 = vadd.f32 %v12470_v33, %v12494_v58 }
 0x40e   :  { %15074 = vst [vmem:[#allocation40_spill] sm:$0xff] %v12675_v14  ;;  %v6696_v14 = vadd.f32 -1.0, %v7905_v39  ;;  %v12703_v0 = vmul.f32 %v12458_v51, %v15080_v11  ;;  %v12719_v39 = vadd.f32 %v12470_v33, %v12464_v57  ;;  %v12723_v11 = vadd.f32 %v12470_v33, %v12468_v25 }
 0x40f   :  { %15075 = vst [vmem:[#allocation58_spill] sm:$0xff] %v12679_v18  ;;  %v12699_v18 = vmul.f32 %v12458_v51, %v15079_v29  ;;  %v15084_v29 = vld [vmem:[#allocation30_spill] sm:$0xff]  ;;  %v12738_v57 = vadd.f32 %v12470_v33, %v12486_v31  ;;  %v4025_v25 = vmin.f32 %v12715_v10, 0.0  ;;  %v12756_v31 = vadd.f32 %v12470_v33, %v12498_v22 }
 0x410   :  { %15076 = vst [vmem:[#allocation104_spill] sm:$0xff] %v12683_v9  ;;  %v15081_v9 = vld [vmem:[#allocation90_spill] sm:$0xff]  ;;  %v12772_v58 = vadd.f32 %v12470_v33, %v12517_v36  ;;  %v12776_v22 = vadd.f32 %v12470_v33, %v12521_v15  ;;  %v12796_v15 = vadd.f32 %v12470_v33, %v12542_v17  ;;  %vm3961_vm11 = vcmp.gt.f32.partialorder %v12715_v10, 0.0 }
 0x411   :  { %15077 = vst [vmem:[#allocation29_spill] sm:$0xff] %v12687_v48  ;;  %v12707_v45 = vmul.f32 %v12458_v51, %v15081_v9  ;;  %v15082_v48 = vld [vmem:[#allocation13_spill] sm:$0xff]  ;;  %v4323_v9 = vsel %vm4003_vm10, %v12501_v42, %v6696_v14  ;;  %v12748_v42 = vadd.f32 %v12470_v33, %v12490_v8  ;;  %v12760_v14 = vadd.f32 %v12470_v33, %v12505_v54 }
 0x412   :  { %v12711_v38 = vmul.f32 %v12458_v51, %v15082_v48  ;;  %15083 = vst [vmem:[#allocation44_spill] sm:$0xff] %v12723_v11  ;;  %v12730_v48 = vmul.f32 %v12458_v51, %v15084_v29  ;;  %v12744_v11 = vadd.f32 %v12470_v33, %v12474_v56  ;;  %v12764_v56 = vadd.f32 %v12470_v33, %v12509_v24  ;;  %v15090_v29 = vld [vmem:[#allocation68_spill] sm:$0xff] }
 0x413   :  { %4490 = vst.msk [vmem:[#allocation2 + $0x240] sm:$0xff] %vm2390_vm0, %v4323_v9  ;;  %v12768_v8 = vadd.f32 %v12470_v33, %v12513_v34  ;;  %v4093_v9 = vmul.f32 1.442695, %v4025_v25  ;;  %v12780_v54 = vadd.f32 %v12470_v33, %v12525_v4  ;;  %v12784_v24 = vadd.f32 %v12470_v33, %v15090_v29  ;;  %v15091_v25 = vld [vmem:[#allocation105_spill] sm:$0xff] }
 0x414   :  { %15085 = vst [vmem:[#allocation89_spill] sm:$0xff] %v12756_v31  ;;  %v12788_v34 = vadd.f32 %v12470_v33, %v12534_v7  ;;  %v12792_v36 = vadd.f32 %v12470_v33, %v15091_v25  ;;  %v12801_v4 = vadd.f32 %v12470_v33, %v12546_v52  ;;  %v12805_v29 = vadd.f32 %v12470_v33, %v12550_v32 }
 0x415   :  { %15086 = vst [vmem:[#allocation5_spill] sm:$0xff] %v12760_v14  ;;  %7906 = vpow2.f32 %v4093_v9  ;;  %v12809_v7 = vadd.f32 %v12470_v33, %v12554_v53  ;;  %v12813_v25 = vadd.f32 %v12470_v33, %v12558_v13  ;;  %v12817_v17 = vadd.f32 %v12470_v33, %v12562_v28 }
 0x416   :  { %15087 = vst [vmem:[#allocation28_spill] sm:$0xff] %v12768_v8  ;;  %v12821_v52 = vadd.f32 %v12470_v33, %v12566_v30  ;;  %v12825_v32 = vadd.f32 %v12470_v33, %v12570_v1  ;;  %v12829_v53 = vadd.f32 %v12470_v33, %v12574_v6  ;;  %v12833_v13 = vadd.f32 %v12470_v33, %v12578_v2 }
 0x417   :  { %15088 = vst [vmem:[#allocation39_spill] sm:$0xff] %v12772_v58  ;;  %v12837_v28 = vadd.f32 %v12470_v33, %v12582_v44  ;;  %v12841_v30 = vadd.f32 %v12470_v33, %v12586_v43  ;;  %v12845_v1 = vadd.f32 %v12470_v33, %v12591_v12  ;;  %v12849_v6 = vadd.f32 %v12470_v33, %v12595_v62 }
 0x418   :  { %15089 = vst [vmem:[#allocation57_spill] sm:$0xff] %v12776_v22  ;;  %v12853_v2 = vadd.f32 %v12470_v33, %v12599_v47  ;;  %v12857_v44 = vadd.f32 %v12470_v33, %v12603_v37  ;;  %v12861_v43 = vadd.f32 %v12470_v33, %v12607_v19  ;;  %v12865_v12 = vadd.f32 %v12470_v33, %v12611_v59 }
 0x419   :  { %v12869_v62 = vadd.f32 %v12470_v33, %v12615_v16  ;;  %v12873_v47 = vadd.f32 %v12470_v33, %v12619_v26  ;;  %v12877_v37 = vadd.f32 %v12470_v33, %v12623_v3  ;;  %v12881_v19 = vadd.f32 %v12470_v33, %v12627_v60 }
 0x41a   :  { %15092 = vst [vmem:[#allocation73_spill] sm:$0xff] %v12865_v12  ;;  %v12885_v59 = vadd.f32 %v12470_v33, %v12631_v46  ;;  %v12889_v16 = vadd.f32 %v12470_v33, %v12635_v35  ;;  %v12893_v26 = vadd.f32 %v12470_v33, %v12639_v49  ;;  %v12897_v3 = vadd.f32 %v12470_v33, %v12643_v5 }
 0x41b   :  { %v7907_v9 = vpop.eup %7906  ;;  %v12901_v60 = vadd.f32 %v12470_v33, %v12647_v50  ;;  %v12905_v46 = vadd.f32 %v12470_v33, %v12651_v55  ;;  %v12909_v35 = vadd.f32 %v12470_v33, %v12655_v61  ;;  %v12913_v49 = vadd.f32 %v12470_v33, %v12659_v21 }
 0x41c   :  { %15093 = vst [vmem:[#allocation93_spill] sm:$0xff] %v12885_v59  ;;  %v6654_v59 = vadd.f32 -1.0, %v7907_v9  ;;  %v12917_v5 = vadd.f32 %v12470_v33, %v12663_v40  ;;  %v12921_v50 = vadd.f32 %v12470_v33, %v12667_v63  ;;  %v15103_v9 = vld [vmem:[#allocation40_spill] sm:$0xff]  ;;  %vm3960_vm12 = vcmp.gt.f32.partialorder %v12744_v11, 0.0 }
 0x41d   :  { %15094 = vst [vmem:[#allocation78_spill] sm:$0xff] %v12893_v26  ;;  %v12929_v61 = vadd.f32 %v12470_v33, %v15103_v9  ;;  %v12948_v9 = vadd.f32 %v12470_v33, %v12691_v23  ;;  %v12969_v23 = vadd.f32 %v12470_v33, %v12711_v38  ;;  %vm3964_vm14 = vcmp.gt.f32.partialorder %v12748_v42, 0.0 }
 0x41e   :  { %15095 = vst [vmem:[#allocation16_spill] sm:$0xff] %v12897_v3  ;;  %v4281_v40 = vsel %vm3961_vm11, %v12715_v10, %v6654_v59  ;;  %v12957_v10 = vadd.f32 %v12470_v33, %v12699_v18  ;;  %v12961_v59 = vadd.f32 %v12470_v33, %v12703_v0  ;;  %vm3963_vm15 = vcmp.gt.f32.partialorder %v12738_v57, 0.0 }
 0x41f   :  { %15096 = vst [vmem:[#allocation31_spill] sm:$0xff] %v12901_v60  ;;  %v15101_v60 = vld [vmem:[#allocation12_spill] sm:$0xff]  ;;  %vm3957_vm4 = vcmp.gt.f32.partialorder %v12719_v39, 0.0  ;;  %vm3962_vm5 = vcmp.gt.f32.partialorder %v12734_v41, 0.0  ;;  %vm3965_vm7 = vcmp.gt.f32.partialorder %v12752_v20, 0.0  ;;  %vm3968_vm10 = vcmp.gt.f32.partialorder %v12764_v56, 0.0 }
 0x420   :  { %15097 = vst [vmem:[#allocation72_spill] sm:$0xff] %v12909_v35  ;;  %v12925_v55 = vadd.f32 %v12470_v33, %v15101_v60  ;;  %v15105_v35 = vld [vmem:[#allocation58_spill] sm:$0xff]  ;;  %vm3974_vm3 = vcmp.gt.f32.partialorder %v12788_v34, 0.0 }
 0x421   :  { %15098 = vst [vmem:[#allocation107_spill] sm:$0xff] %v12913_v49  ;;  %v12933_v21 = vadd.f32 %v12470_v33, %v15105_v35  ;;  %v12953_v35 = vadd.f32 %v12470_v33, %v12695_v27  ;;  %v12973_v27 = vadd.f32 %v12470_v33, %v12730_v48 }
 0x422   :  { %15099 = vst [vmem:[#allocation15_spill] sm:$0xff] %v12917_v5  ;;  %v15107_v5 = vld [vmem:[#allocation104_spill] sm:$0xff] }
 0x423   :  { %15100 = vst [vmem:[#allocation43_spill] sm:$0xff] %v12921_v50  ;;  %v12940_v63 = vadd.f32 %v12470_v33, %v15107_v5  ;;  %v15109_v50 = vld [vmem:[#allocation29_spill] sm:$0xff]  ;;  %v12965_v5 = vadd.f32 %v12470_v33, %v12707_v45 }
 0x424   :  { %15102 = vst [vmem:[#allocation60_spill] sm:$0xff] %v12925_v55  ;;  %v12944_v60 = vadd.f32 %v12470_v33, %v15109_v50  ;;  %v4024_v50 = vmin.f32 %v12744_v11, 0.0 }
 0x425   :  { %15104 = vst [vmem:[#allocation106_spill] sm:$0xff] %v12929_v61  ;;  %v15144_v61 = vmin.f32 %v12809_v7, 0.0 }
 0x426   :  { %15106 = vst [vmem:[#allocation6_spill] sm:$0xff] %v12933_v21  ;;  %v4091_v18 = vmul.f32 1.442695, %v4024_v50  ;;  %v15139_v21 = vmov %v12768_v8 }
 0x427   :  { %15108 = vst [vmem:[#allocation42_spill] sm:$0xff] %v12940_v63  ;;  %vm3969_vm11 = vcmp.gt.f32.partialorder %v15139_v21, 0.0  ;;  %v4129_v55 = vmul.f32 1.442695, %v15144_v61 }
 0x428   :  { %15110 = vst [vmem:[#allocation76_spill] sm:$0xff] %v12944_v60  ;;  %7908 = vpow2.f32 %v4091_v18 }
 0x429   :  { %15111 = vst [vmem:[#allocation95_spill] sm:$0xff] %v12948_v9 }
 0x42a   :  { %4448 = vst.msk [vmem:[#allocation2 + $0x30] sm:$0xff] %vm2390_vm0, %v4281_v40 }
 0x42b   :  { %15112 = vst [vmem:[#allocation19_spill] sm:$0xff] %v12953_v35 }
 0x42c   :  { %15113 = vst [vmem:[#allocation32_spill] sm:$0xff] %v12957_v10 }
 0x42d   :  { %15114 = vst [vmem:[#allocation75_spill] sm:$0xff] %v12961_v59 }
 0x42e   :  { %15115 = vst [vmem:[#allocation110_spill] sm:$0xff] %v12965_v5  ;;  %v7909_v0 = vpop.eup %7908 }
 0x42f   :  { %15116 = vst [vmem:[#allocation18_spill] sm:$0xff] %v12969_v23  ;;  %v6653_v59 = vadd.f32 -1.0, %v7909_v0  ;;  %v15118_v23 = vld [vmem:[#allocation88_spill] sm:$0xff] }
 0x430   :  { %15117 = vst [vmem:[#allocation46_spill] sm:$0xff] %v12973_v27  ;;  %v3828_v48 = vmul.f32 %v12458_v51, %v15118_v23  ;;  %v4028_v27 = vmin.f32 %v12748_v42, 0.0  ;;  %v4021_v51 = vmin.f32 %v12719_v39, 0.0 }
 0x431   :  { %v4575_v40 = vld [vmem:[#allocation2 + $0x30] sm:$0xff]  ;;  %v4280_v45 = vsel %vm3960_vm12, %v12744_v11, %v6653_v59 }
 0x432   :  { %4833 = vrot.lane.b32.xlu1 %v4575_v40, %s8110_s30  ;;  %4447 = vst.msk [vmem:[#allocation2 + $0x20] sm:$0xff] %vm2390_vm0, %v4280_v45  ;;  %v3895_v50 = vadd.f32 %v12470_v33, %v3828_v48  ;;  %v4099_v0 = vmul.f32 1.442695, %v4028_v27  ;;  %v15119_v33 = vld [vmem:[#allocation44_spill] sm:$0xff]  ;;  %v4026_v48 = vmin.f32 %v12734_v41, 0.0  ;;  %v4029_v27 = vmin.f32 %v12752_v20, 0.0 }
 0x433   :  { %v4022_v23 = vmin.f32 %v15119_v33, 0.0  ;;  %v4085_v35 = vmul.f32 1.442695, %v4021_v51  ;;  %vm3958_vm6 = vcmp.gt.f32.partialorder %v15119_v33, 0.0 }
 0x434   :  { %v4023_v18 = vmin.f32 %v3895_v50, 0.0  ;;  %vm3959_vm13 = vcmp.gt.f32.partialorder %v3895_v50, 0.0 }
 0x435   :  { %v4087_v9 = vmul.f32 1.442695, %v4022_v23  ;;  %v15146_v23 = vmin.f32 %v12817_v17, 0.0 }
 0x436   :  { %v4089_v40 = vmul.f32 1.442695, %v4023_v18 }
 0x438   :  { %7910 = vpow2.f32 %v4089_v40  ;;  %v4033_v40 = vmin.f32 %v12768_v8, 0.0 }
 0x439   :  { %v4574_v38 = vld [vmem:[#allocation2 + $0x20] sm:$0xff]  ;;  %7912 = vpow2.f32 %v4099_v0  ;;  %v4034_v0 = vmin.f32 %v12772_v58, 0.0  ;;  %v15121_v58 = vld [vmem:[#allocation31_spill] sm:$0xff] }
 0x43a   :  { %4831 = vrot.lane.b32.xlu0 %v4574_v38, %s8110_s30  ;;  %v4027_v38 = vmin.f32 %v12738_v57, 0.0  ;;  %v4109_v3 = vmul.f32 1.442695, %v4033_v40 }
 0x43e   :  { %v7911_v5 = vpop.eup %7910 }
 0x43f   :  { %v6652_v10 = vadd.f32 -1.0, %v7911_v5  ;;  %v7913_v11 = vpop.eup %7912  ;;  %v4030_v5 = vmin.f32 %v12756_v31, 0.0 }
 0x440   :  { %v6657_v45 = vadd.f32 -1.0, %v7913_v11  ;;  %v4035_v11 = vmin.f32 %v12776_v22, 0.0 }
 0x441   :  { %v4279_v59 = vsel %vm3959_vm13, %v3895_v50, %v6652_v10  ;;  %v4031_v10 = vmin.f32 %v12760_v14, 0.0  ;;  %v4032_v50 = vmin.f32 %v12764_v56, 0.0  ;;  %v4097_v14 = vmul.f32 1.442695, %v4027_v38 }
 0x442   :  { %4446 = vst.msk [vmem:[#allocation2 + $0x18] sm:$0xff] %vm2390_vm0, %v4279_v59  ;;  %v4284_v18 = vsel %vm3964_vm14, %v12748_v42, %v6657_v45  ;;  %v4095_v59 = vmul.f32 1.442695, %v4026_v48  ;;  %v4103_v12 = vmul.f32 1.442695, %v4030_v5  ;;  %v15131_v5 = vmin.f32 %v12788_v34, 0.0 }
 0x443   :  { %4451 = vst.msk [vmem:[#allocation2 + $0x50] sm:$0xff] %vm2390_vm0, %v4284_v18  ;;  %7914 = vpow2.f32 %v4097_v14  ;;  %v4101_v18 = vmul.f32 1.442695, %v4029_v27  ;;  %v4105_v22 = vmul.f32 1.442695, %v4031_v10  ;;  %v15122_v14 = vld [vmem:[#allocation72_spill] sm:$0xff] }
 0x444   :  { %7916 = vpow2.f32 %v4085_v35  ;;  %v4107_v31 = vmul.f32 1.442695, %v4032_v50  ;;  %v4111_v48 = vmul.f32 1.442695, %v4034_v0  ;;  %v4113_v10 = vmul.f32 1.442695, %v4035_v11 }
 0x445   :  { %7918 = vpow2.f32 %v4087_v9  ;;  %v15127_v11 = vmin.f32 %v12784_v24, 0.0  ;;  %v15128_v9 = vld [vmem:[#allocation89_spill] sm:$0xff]  ;;  %v4119_v26 = vmul.f32 1.442695, %v15131_v5  ;;  %vm3972_vm14 = vcmp.gt.f32.partialorder %v12780_v54, 0.0 }
 0x446   :  { %7920 = vpow2.f32 %v4095_v59  ;;  %v15125_v59 = vmin.f32 %v12780_v54, 0.0  ;;  %vm3966_vm8 = vcmp.gt.f32.partialorder %v15128_v9, 0.0 }
 0x447   :  { %7922 = vpow2.f32 %v4101_v18 }
 0x448   :  { %7924 = vpow2.f32 %v4103_v12  ;;  %v4115_v18 = vmul.f32 1.442695, %v15125_v59 }
 0x449   :  { %v4573_v45 = vld [vmem:[#allocation2 + $0x18] sm:$0xff]  ;;  %7926 = vpow2.f32 %v4105_v22 }
 0x44a   :  { %4829 = vrot.lane.b32.xlu2 %v4573_v45, %s8110_s30  ;;  %v4578_v42 = vld [vmem:[#allocation2 + $0x50] sm:$0xff]  ;;  %v7915_v45 = vpop.eup %7914  ;;  %7928 = vpow2.f32 %v4107_v31  ;;  %v13088_v38 = vld [vmem:[#allocation2 + $0x19] sm:$0xff] }
 0x44b   :  { %4839 = vrot.lane.b32.xlu1 %v4578_v42, %s8110_s30  ;;  %v6656_v51 = vadd.f32 -1.0, %v7915_v45  ;;  %v7917_v27 = vpop.eup %7916  ;;  %v4117_v45 = vmul.f32 1.442695, %v15127_v11  ;;  %7930 = vpow2.f32 %v4109_v3  ;;  %v15132_v11 = vld [vmem:[#allocation5_spill] sm:$0xff]  ;;  %v15141_v3 = vld [vmem:[#allocation39_spill] sm:$0xff]  ;;  %v15142_v42 = vmin.f32 %v12805_v29, 0.0 }
 0x44c   :  { %v7919_v0 = vpop.eup %7918  ;;  %7932 = vpow2.f32 %v4111_v48  ;;  %vm3967_vm9 = vcmp.gt.f32.partialorder %v15132_v11, 0.0  ;;  %vm3970_vm12 = vcmp.gt.f32.partialorder %v15141_v3, 0.0 }
 0x44d   :  { %v4283_v50 = vsel %vm3963_vm15, %v12738_v57, %v6656_v51  ;;  %v7921_v40 = vpop.eup %7920  ;;  %v15135_v51 = vmin.f32 %v12792_v36, 0.0  ;;  %7934 = vpow2.f32 %v4113_v10  ;;  %v15140_v57 = vmin.f32 %v12801_v4, 0.0 }
 0x44e   :  { %4450 = vst.msk [vmem:[#allocation2 + $0x48] sm:$0xff] %vm2390_vm0, %v4283_v50  ;;  %v7923_v12 = vpop.eup %7922  ;;  %v15138_v50 = vmin.f32 %v12796_v15, 0.0  ;;  %7936 = vpow2.f32 %v4115_v18  ;;  %v6655_v10 = vadd.f32 -1.0, %v7921_v40  ;;  %v4127_v35 = vmul.f32 1.442695, %v15142_v42  ;;  %v15143_v18 = vld [vmem:[#allocation57_spill] sm:$0xff] }
 0x44f   :  { %v4121_v60 = vmul.f32 1.442695, %v15135_v51  ;;  %v7925_v31 = vpop.eup %7924  ;;  %v4125_v8 = vmul.f32 1.442695, %v15140_v57  ;;  %7938 = vpow2.f32 %v4117_v45  ;;  %v6650_v51 = vadd.f32 -1.0, %v7917_v27 }
 0x450   :  { %v4123_v59 = vmul.f32 1.442695, %v15138_v50  ;;  %v7927_v63 = vpop.eup %7926  ;;  %7940 = vpow2.f32 %v4119_v26  ;;  %v6651_v48 = vadd.f32 -1.0, %v7919_v0  ;;  %v6658_v5 = vadd.f32 -1.0, %v7923_v12 }
 0x451   :  { %v7929_v22 = vpop.eup %7928  ;;  %vm3971_vm13 = vcmp.gt.f32.partialorder %v15143_v18, 0.0  ;;  %v15145_v57 = vmin.f32 %v12813_v25, 0.0  ;;  %7942 = vpow2.f32 %v4121_v60  ;;  %v6659_v27 = vadd.f32 -1.0, %v7925_v31 }
 0x452   :  { %v7931_v50 = vpop.eup %7930  ;;  %v4133_v42 = vmul.f32 1.442695, %v15146_v23  ;;  %v15147_v26 = vmin.f32 %v12821_v52, 0.0  ;;  %7944 = vpow2.f32 %v4123_v59  ;;  %v6660_v12 = vadd.f32 -1.0, %v7927_v63 }
 0x453   :  { %v4131_v45 = vmul.f32 1.442695, %v15145_v57  ;;  %v7933_v40 = vpop.eup %7932  ;;  %vm3973_vm15 = vcmp.gt.f32.partialorder %v12784_v24, 0.0  ;;  %7946 = vpow2.f32 %v4125_v8  ;;  %v6661_v60 = vadd.f32 -1.0, %v7929_v22  ;;  %5341 = vrot.lane.b32.xlu1 %v13088_v38, %s8112_s28 }
 0x454   :  { %v4135_v0 = vmul.f32 1.442695, %v15147_v26  ;;  %v7935_v49 = vpop.eup %7934  ;;  %v4282_v31 = vsel %vm3962_vm5, %v12734_v41, %v6655_v10  ;;  %v4277_v23 = vsel %vm3957_vm4, %v12719_v39, %v6650_v51  ;;  %7948 = vpow2.f32 %v4127_v35 }
 0x455   :  { %v4577_v61 = vld [vmem:[#allocation2 + $0x48] sm:$0xff]  ;;  %v7937_v63 = vpop.eup %7936  ;;  %v6662_v8 = vadd.f32 -1.0, %v7931_v50  ;;  %4449 = vst.msk [vmem:[#allocation2 + $0x38] sm:$0xff] %vm2390_vm0, %v4282_v31  ;;  %v4278_v41 = vsel %vm3958_vm6, %v15119_v33, %v6651_v48  ;;  %v4285_v39 = vsel %vm3965_vm7, %v12752_v20, %v6658_v5  ;;  %vm3975_vm4 = vcmp.gt.f32.partialorder %v12792_v36, 0.0 }
 0x456   :  { %4837 = vrot.lane.b32.xlu0 %v4577_v61, %s8110_s30  ;;  %v7939_v22 = vpop.eup %7938  ;;  %v15148_v59 = vmin.f32 %v12825_v32, 0.0  ;;  %7950 = vpow2.f32 %v4129_v55  ;;  %v6663_v35 = vadd.f32 -1.0, %v7933_v40  ;;  %v4286_v10 = vsel %vm3966_vm8, %v15128_v9, %v6659_v27  ;;  %4444 = vst.msk [vmem:[#allocation2] sm:$0xff] %vm2390_vm0, %v4277_v23 }
 0x457   :  { %v7941_v50 = vpop.eup %7940  ;;  %vm3976_vm5 = vcmp.gt.f32.partialorder %v12796_v15, 0.0  ;;  %v15149_v33 = vmin.f32 %v12829_v53, 0.0  ;;  %7952 = vpow2.f32 %v4131_v45  ;;  %v6664_v5 = vadd.f32 -1.0, %v7935_v49  ;;  %4445 = vst.msk [vmem:[#allocation2 + $0x8] sm:$0xff] %vm2390_vm0, %v4278_v41 }
 0x458   :  { %v4137_v51 = vmul.f32 1.442695, %v15148_v59  ;;  %v4287_v48 = vsel %vm3967_vm9, %v15132_v11, %v6660_v12  ;;  %v7943_v55 = vpop.eup %7942  ;;  %vm3977_vm6 = vcmp.gt.f32.partialorder %v12801_v4, 0.0  ;;  %v15150_v9 = vmin.f32 %v12833_v13, 0.0  ;;  %4452 = vst.msk [vmem:[#allocation2 + $0x60] sm:$0xff] %vm2390_vm0, %v4285_v39 }
 0x459   :  { %v4139_v20 = vmul.f32 1.442695, %v15149_v33  ;;  %7954 = vpow2.f32 %v4133_v42  ;;  %v6665_v27 = vadd.f32 -1.0, %v7937_v63  ;;  %v4288_v40 = vsel %vm3968_vm10, %v12764_v56, %v6661_v60  ;;  %v7945_v49 = vpop.eup %7944  ;;  %4453 = vst.msk [vmem:[#allocation2 + $0x68] sm:$0xff] %vm2390_vm0, %v4286_v10 }
 0x45a   :  { %v4141_v57 = vmul.f32 1.442695, %v15150_v9  ;;  %vm3978_vm7 = vcmp.gt.f32.partialorder %v12805_v29, 0.0  ;;  %v15151_v11 = vmin.f32 %v12837_v28, 0.0  ;;  %7956 = vpow2.f32 %v4135_v0  ;;  %v7947_v42 = vpop.eup %7946  ;;  %4454 = vst.msk [vmem:[#allocation2 + $0x78] sm:$0xff] %vm2390_vm0, %v4287_v48 }
 0x45b   :  { %v6666_v26 = vadd.f32 -1.0, %v7939_v22  ;;  %v4289_v12 = vsel %vm3969_vm11, %v15139_v21, %v6662_v8  ;;  %vm3979_vm8 = vcmp.gt.f32.partialorder %v12809_v7, 0.0  ;;  %v15152_v56 = vmin.f32 %v12841_v30, 0.0  ;;  %v7949_v0 = vpop.eup %7948  ;;  %4455 = vst.msk [vmem:[#allocation2 + $0x80] sm:$0xff] %vm2390_vm0, %v4288_v40 }
 0x45c   :  { %v4143_v45 = vmul.f32 1.442695, %v15151_v11  ;;  %7958 = vpow2.f32 %v4137_v51  ;;  %v6667_v60 = vadd.f32 -1.0, %v7941_v50  ;;  %v4290_v31 = vsel %vm3970_vm12, %v15141_v3, %v6663_v35  ;;  %v7951_v41 = vpop.eup %7950  ;;  %v13153_v59 = vld [vmem:[#allocation2 + $0x38] sm:$0xff]  ;;  %4456 = vst.msk [vmem:[#allocation2 + $0x90] sm:$0xff] %vm2390_vm0, %v4289_v12 }
 0x45d   :  { %v4145_v61 = vmul.f32 1.442695, %v15152_v56  ;;  %vm3980_vm9 = vcmp.gt.f32.partialorder %v12813_v25, 0.0  ;;  %v15153_v21 = vmin.f32 %v12845_v1, 0.0  ;;  %7960 = vpow2.f32 %v4139_v20  ;;  %v7953_v35 = vpop.eup %7952  ;;  %4835 = vrot.lane.b32.xlu2 %v13153_v59, %s8110_s30  ;;  %4457 = vst.msk [vmem:[#allocation2 + $0x98] sm:$0xff] %vm2390_vm0, %v4290_v31 }
 0x45e   :  { %v6668_v63 = vadd.f32 -1.0, %v7943_v55  ;;  %v4291_v8 = vsel %vm3971_vm13, %v15143_v18, %v6664_v5  ;;  %vm3981_vm10 = vcmp.gt.f32.partialorder %v12817_v17, 0.0  ;;  %v15154_v3 = vmin.f32 %v12849_v6, 0.0 }
 0x45f   :  { %v4147_v23 = vmul.f32 1.442695, %v15153_v21  ;;  %7962 = vpow2.f32 %v4141_v57  ;;  %v6669_v22 = vadd.f32 -1.0, %v7945_v49  ;;  %v4292_v51 = vsel %vm3972_vm14, %v12780_v54, %v6665_v27  ;;  %v7955_v54 = vpop.eup %7954  ;;  %4458 = vst.msk [vmem:[#allocation2 + $0xa8] sm:$0xff] %vm2390_vm0, %v4291_v8 }
 0x460   :  { %v4149_v39 = vmul.f32 1.442695, %v15154_v3  ;;  %vm3982_vm11 = vcmp.gt.f32.partialorder %v12821_v52, 0.0  ;;  %v15155_v18 = vmin.f32 %v12853_v2, 0.0  ;;  %7964 = vpow2.f32 %v4143_v45  ;;  %v7957_v9 = vpop.eup %7956  ;;  %4459 = vst.msk [vmem:[#allocation2 + $0xb0] sm:$0xff] %vm2390_vm0, %v4292_v51 }
 0x461   :  { %v6670_v50 = vadd.f32 -1.0, %v7947_v42  ;;  %v4293_v33 = vsel %vm3973_vm15, %v12784_v24, %v6666_v26  ;;  %vm3983_vm12 = vcmp.gt.f32.partialorder %v12825_v32, 0.0  ;;  %v15156_v20 = vmin.f32 %v12857_v44, 0.0 }
 0x462   :  { %v4151_v10 = vmul.f32 1.442695, %v15155_v18  ;;  %7966 = vpow2.f32 %v4145_v61  ;;  %v6671_v48 = vadd.f32 -1.0, %v7949_v0  ;;  %v4294_v55 = vsel %vm3974_vm3, %v12788_v34, %v6667_v60  ;;  %v7959_v49 = vpop.eup %7958  ;;  %v15158_v34 = vld [vmem:[#allocation73_spill] sm:$0xff]  ;;  %4460 = vst.msk [vmem:[#allocation2 + $0xc0] sm:$0xff] %vm2390_vm0, %v4293_v33 }
 0x463   :  { %v4153_v5 = vmul.f32 1.442695, %v15156_v20  ;;  %vm3984_vm13 = vcmp.gt.f32.partialorder %v12829_v53, 0.0  ;;  %v15157_v24 = vmin.f32 %v12861_v43, 0.0  ;;  %7968 = vpow2.f32 %v4147_v23  ;;  %v7961_v42 = vpop.eup %7960  ;;  %4461 = vst.msk [vmem:[#allocation2 + $0xc8] sm:$0xff] %vm2390_vm0, %v4294_v55 }
 0x464   :  { %v6672_v27 = vadd.f32 -1.0, %v7951_v41  ;;  %v4295_v40 = vsel %vm3975_vm4, %v12792_v36, %v6668_v63  ;;  %vm3985_vm14 = vcmp.gt.f32.partialorder %v12833_v13, 0.0  ;;  %v15159_v11 = vmin.f32 %v15158_v34, 0.0 }
 0x465   :  { %v4155_v57 = vmul.f32 1.442695, %v15157_v24  ;;  %7970 = vpow2.f32 %v4149_v39  ;;  %v6673_v26 = vadd.f32 -1.0, %v7953_v35  ;;  %v4296_v12 = vsel %vm3976_vm5, %v12796_v15, %v6669_v22  ;;  %v7963_v31 = vpop.eup %7962  ;;  %4462 = vst.msk [vmem:[#allocation2 + $0xd8] sm:$0xff] %vm2390_vm0, %v4295_v40 }
 0x466   :  { %v4157_v45 = vmul.f32 1.442695, %v15159_v11  ;;  %vm3986_vm3 = vcmp.gt.f32.partialorder %v12837_v28, 0.0  ;;  %v15160_v36 = vmin.f32 %v12869_v62, 0.0  ;;  %7972 = vpow2.f32 %v4151_v10  ;;  %v7965_v63 = vpop.eup %7964  ;;  %4463 = vst.msk [vmem:[#allocation2 + $0xe0] sm:$0xff] %vm2390_vm0, %v4296_v12 }
 0x467   :  { %v6674_v61 = vadd.f32 -1.0, %v7955_v54  ;;  %v4297_v60 = vsel %vm3977_vm6, %v12801_v4, %v6670_v50  ;;  %vm3987_vm15 = vcmp.gt.f32.partialorder %v12841_v30, 0.0  ;;  %v15161_v15 = vmin.f32 %v12873_v47, 0.0 }
 0x468   :  { %v4159_v56 = vmul.f32 1.442695, %v15160_v36  ;;  %7974 = vpow2.f32 %v4153_v5  ;;  %v6675_v21 = vadd.f32 -1.0, %v7957_v9  ;;  %v4298_v23 = vsel %vm3978_vm7, %v12805_v29, %v6671_v48  ;;  %v7967_v39 = vpop.eup %7966  ;;  %4464 = vst.msk [vmem:[#allocation2 + $0xf0] sm:$0xff] %vm2390_vm0, %v4297_v60 }
 0x469   :  { %v4161_v0 = vmul.f32 1.442695, %v15161_v15  ;;  %vm3988_vm4 = vcmp.gt.f32.partialorder %v12845_v1, 0.0  ;;  %v15162_v4 = vmin.f32 %v12877_v37, 0.0  ;;  %7976 = vpow2.f32 %v4155_v57  ;;  %v7969_v18 = vpop.eup %7968  ;;  %4465 = vst.msk [vmem:[#allocation2 + $0xf8] sm:$0xff] %vm2390_vm0, %v4298_v23 }
 0x46a   :  { %v6676_v41 = vadd.f32 -1.0, %v7959_v49  ;;  %v4299_v3 = vsel %vm3979_vm8, %v12809_v7, %v6672_v27  ;;  %vm3989_vm5 = vcmp.gt.f32.partialorder %v12849_v6, 0.0  ;;  %v15163_v29 = vmin.f32 %v12881_v19, 0.0  ;;  %v15164_v7 = vld [vmem:[#allocation93_spill] sm:$0xff] }
 0x46b   :  { %v4163_v8 = vmul.f32 1.442695, %v15162_v4  ;;  %7978 = vpow2.f32 %v4157_v45  ;;  %v6677_v51 = vadd.f32 -1.0, %v7961_v42  ;;  %v4300_v35 = vsel %vm3980_vm9, %v12813_v25, %v6673_v26  ;;  %v7971_v20 = vpop.eup %7970  ;;  %4466 = vst.msk [vmem:[#allocation2 + $0x108] sm:$0xff] %vm2390_vm0, %v4299_v3 }
 0x46c   :  { %v4165_v22 = vmul.f32 1.442695, %v15163_v29  ;;  %vm3990_vm6 = vcmp.gt.f32.partialorder %v12853_v2, 0.0  ;;  %v15165_v10 = vmin.f32 %v15164_v7, 0.0  ;;  %7980 = vpow2.f32 %v4159_v56  ;;  %v7973_v9 = vpop.eup %7972  ;;  %4467 = vst.msk [vmem:[#allocation2 + $0x110] sm:$0xff] %vm2390_vm0, %v4300_v35 }
 0x46d   :  { %v6678_v33 = vadd.f32 -1.0, %v7963_v31  ;;  %v4301_v54 = vsel %vm3981_vm10, %v12817_v17, %v6674_v61  ;;  %vm3991_vm7 = vcmp.gt.f32.partialorder %v12857_v44, 0.0  ;;  %v15166_v25 = vmin.f32 %v12889_v16, 0.0  ;;  %v15167_v17 = vld [vmem:[#allocation78_spill] sm:$0xff] }
 0x46e   :  { %v4167_v50 = vmul.f32 1.442695, %v15165_v10  ;;  %7982 = vpow2.f32 %v4161_v0  ;;  %v6679_v48 = vadd.f32 -1.0, %v7965_v63  ;;  %v4302_v55 = vsel %vm3982_vm11, %v12821_v52, %v6675_v21  ;;  %v7975_v49 = vpop.eup %7974  ;;  %v15169_v52 = vld [vmem:[#allocation16_spill] sm:$0xff]  ;;  %4468 = vst.msk [vmem:[#allocation2 + $0x120] sm:$0xff] %vm2390_vm0, %v4301_v54 }
 0x46f   :  { %v4169_v5 = vmul.f32 1.442695, %v15166_v25  ;;  %vm3992_vm8 = vcmp.gt.f32.partialorder %v12861_v43, 0.0  ;;  %v15168_v24 = vmin.f32 %v15167_v17, 0.0  ;;  %7984 = vpow2.f32 %v4163_v8  ;;  %v7977_v42 = vpop.eup %7976  ;;  %4469 = vst.msk [vmem:[#allocation2 + $0x128] sm:$0xff] %vm2390_vm0, %v4302_v55  ;;  %v15180_v55 = vld [vmem:[#allocation60_spill] sm:$0xff] }
 0x470   :  { %v6680_v27 = vadd.f32 -1.0, %v7967_v39  ;;  %v4303_v40 = vsel %vm3983_vm12, %v12825_v32, %v6676_v41  ;;  %vm3993_vm9 = vcmp.gt.f32.partialorder %v15158_v34, 0.0  ;;  %v15170_v11 = vmin.f32 %v15169_v52, 0.0 }
 0x471   :  { %v4171_v57 = vmul.f32 1.442695, %v15168_v24  ;;  %7986 = vpow2.f32 %v4165_v22  ;;  %v6681_v26 = vadd.f32 -1.0, %v7969_v18  ;;  %v4304_v12 = vsel %vm3984_vm13, %v12829_v53, %v6677_v51  ;;  %v7979_v60 = vpop.eup %7978  ;;  %4470 = vst.msk [vmem:[#allocation2 + $0x138] sm:$0xff] %vm2390_vm0, %v4303_v40 }
 0x472   :  { %v4173_v45 = vmul.f32 1.442695, %v15170_v11  ;;  %vm3994_vm10 = vcmp.gt.f32.partialorder %v12869_v62, 0.0  ;;  %v15171_v32 = vmin.f32 %v15121_v58, 0.0  ;;  %7988 = vpow2.f32 %v4167_v50  ;;  %v7981_v21 = vpop.eup %7980  ;;  %4471 = vst.msk [vmem:[#allocation2 + $0x140] sm:$0xff] %vm2390_vm0, %v4304_v12 }
 0x473   :  { %v6682_v56 = vadd.f32 -1.0, %v7971_v20  ;;  %v4305_v61 = vsel %vm3985_vm14, %v12833_v13, %v6678_v33  ;;  %vm3995_vm11 = vcmp.gt.f32.partialorder %v12873_v47, 0.0  ;;  %v15172_v53 = vmin.f32 %v12905_v46, 0.0 }
 0x474   :  { %v4175_v36 = vmul.f32 1.442695, %v15171_v32  ;;  %7990 = vpow2.f32 %v4169_v5  ;;  %v6683_v15 = vadd.f32 -1.0, %v7973_v9  ;;  %v4306_v0 = vsel %vm3986_vm3, %v12837_v28, %v6679_v48  ;;  %v7983_v8 = vpop.eup %7982  ;;  %v15174_v28 = vld [vmem:[#allocation107_spill] sm:$0xff]  ;;  %4472 = vst.msk [vmem:[#allocation2 + $0x150] sm:$0xff] %vm2390_vm0, %v4305_v61  ;;  %v13287_v5 = vld [vmem:[#allocation2 + $0x60] sm:$0xff] }
 0x475   :  { %v4179_v31 = vmul.f32 1.442695, %v15172_v53  ;;  %vm3996_vm12 = vcmp.gt.f32.partialorder %v12877_v37, 0.0  ;;  %v15173_v13 = vmin.f32 %v15122_v14, 0.0  ;;  %7992 = vpow2.f32 %v4171_v57  ;;  %v7985_v22 = vpop.eup %7984  ;;  %4473 = vst.msk [vmem:[#allocation2 + $0x158] sm:$0xff] %vm2390_vm0, %v4306_v0  ;;  %v4637_v48 = vld [vmem:[#allocation2 + $0x1] sm:$0xff]  ;;  %4841 = vrot.lane.b32.xlu2 %v13287_v5, %s8110_s30 }
 0x476   :  { %v6684_v63 = vadd.f32 -1.0, %v7975_v49  ;;  %v4307_v4 = vsel %vm3987_vm15, %v12841_v30, %v6680_v27  ;;  %vm3997_vm13 = vcmp.gt.f32.partialorder %v12881_v19, 0.0  ;;  %v15175_v41 = vmin.f32 %v15174_v28, 0.0  ;;  %v15176_v30 = vld [vmem:[#allocation15_spill] sm:$0xff]  ;;  %5085 = vrot.lane.b32.xlu0 %v4637_v48, %s8111_s6  ;;  %v15182_v49 = vld [vmem:[#allocation106_spill] sm:$0xff] }
 0x477   :  { %v4181_v23 = vmul.f32 1.442695, %v15173_v13  ;;  %7994 = vpow2.f32 %v4173_v45  ;;  %v6685_v39 = vadd.f32 -1.0, %v7977_v42  ;;  %v4308_v29 = vsel %vm3988_vm4, %v12845_v1, %v6681_v26  ;;  %v7987_v50 = vpop.eup %7986  ;;  %v15178_v1 = vld [vmem:[#allocation43_spill] sm:$0xff]  ;;  %4474 = vst.msk [vmem:[#allocation2 + $0x168] sm:$0xff] %vm2390_vm0, %v4307_v4  ;;  %v15184_v42 = vld [vmem:[#allocation6_spill] sm:$0xff] }
 0x478   :  { %v4183_v3 = vmul.f32 1.442695, %v15175_v41  ;;  %vm3998_vm14 = vcmp.gt.f32.partialorder %v15164_v7, 0.0  ;;  %v15177_v51 = vmin.f32 %v15176_v30, 0.0  ;;  %7996 = vpow2.f32 %v4175_v36  ;;  %4475 = vst.msk [vmem:[#allocation2 + $0x170] sm:$0xff] %vm2390_vm0, %v4308_v29  ;;  %v15188_v13 = vld [vmem:[#allocation76_spill] sm:$0xff] }
 0x479   :  { %v6686_v18 = vadd.f32 -1.0, %v7979_v60  ;;  %v4309_v10 = vsel %vm3989_vm5, %v12849_v6, %v6682_v56  ;;  %vm3999_vm3 = vcmp.gt.f32.partialorder %v12889_v16, 0.0  ;;  %v15179_v33 = vmin.f32 %v15178_v1, 0.0  ;;  %v7989_v6 = vpop.eup %7988  ;;  %v15186_v60 = vld [vmem:[#allocation42_spill] sm:$0xff]  ;;  %v15190_v41 = vld [vmem:[#allocation95_spill] sm:$0xff] }
 0x47a   :  { %v4185_v35 = vmul.f32 1.442695, %v15177_v51  ;;  %7998 = vpow2.f32 %v4179_v31  ;;  %v6687_v20 = vadd.f32 -1.0, %v7981_v21  ;;  %v4310_v25 = vsel %vm3990_vm6, %v12853_v2, %v6683_v15  ;;  %v13299_v2 = vld [vmem:[#allocation2 + $0x68] sm:$0xff]  ;;  %v7991_v40 = vpop.eup %7990  ;;  %4476 = vst.msk [vmem:[#allocation2 + $0x198] sm:$0xff] %vm2390_vm0, %v4309_v10  ;;  %v15192_v51 = vld [vmem:[#allocation19_spill] sm:$0xff] }
 0x47b   :  { %v4187_v54 = vmul.f32 1.442695, %v15179_v33  ;;  %vm4000_vm15 = vcmp.gt.f32.partialorder %v15167_v17, 0.0  ;;  %v15181_v9 = vmin.f32 %v15180_v55, 0.0  ;;  %8000 = vpow2.f32 %v4181_v23  ;;  %4843 = vrot.lane.b32.xlu1 %v13299_v2, %s8110_s30  ;;  %v7993_v12 = vpop.eup %7992  ;;  %4477 = vst.msk [vmem:[#allocation2 + $0x1a0] sm:$0xff] %vm2390_vm0, %v4310_v25  ;;  %v15194_v33 = vld [vmem:[#allocation32_spill] sm:$0xff] }
 0x47c   :  { %v6688_v57 = vadd.f32 -1.0, %v7983_v8  ;;  %v4311_v27 = vsel %vm3991_vm7, %v12857_v44, %v6684_v63  ;;  %vm4001_vm4 = vcmp.gt.f32.partialorder %v15169_v52, 0.0  ;;  %v15183_v11 = vmin.f32 %v15182_v49, 0.0 }
 0x47d   :  { %v4189_v24 = vmul.f32 1.442695, %v15181_v9  ;;  %8002 = vpow2.f32 %v4183_v3  ;;  %v6689_v26 = vadd.f32 -1.0, %v7985_v22  ;;  %v4312_v44 = vsel %vm3992_vm8, %v12861_v43, %v6685_v39  ;;  %v7995_v43 = vpop.eup %7994  ;;  %4478 = vst.msk [vmem:[#allocation2 + $0x1b0] sm:$0xff] %vm2390_vm0, %v4311_v27 }
 0x47e   :  { %v4191_v45 = vmul.f32 1.442695, %v15183_v11  ;;  %vm4002_vm5 = vcmp.gt.f32.partialorder %v15121_v58, 0.0  ;;  %v15185_v32 = vmin.f32 %v15184_v42, 0.0  ;;  %8004 = vpow2.f32 %v4185_v35  ;;  %v7997_v21 = vpop.eup %7996  ;;  %4479 = vst.msk [vmem:[#allocation2 + $0x1b8] sm:$0xff] %vm2390_vm0, %v4312_v44 }
 0x47f   :  { %v6690_v56 = vadd.f32 -1.0, %v7987_v50  ;;  %v4313_v61 = vsel %vm3993_vm9, %v15158_v34, %v6686_v18  ;;  %vm4004_vm6 = vcmp.gt.f32.partialorder %v12905_v46, 0.0  ;;  %v15187_v53 = vmin.f32 %v15186_v60, 0.0 }
 0x480   :  { %v4193_v36 = vmul.f32 1.442695, %v15185_v32  ;;  %8006 = vpow2.f32 %v4187_v54  ;;  %v6691_v15 = vadd.f32 -1.0, %v7989_v6  ;;  %v4314_v0 = vsel %vm3994_vm10, %v12869_v62, %v6687_v20  ;;  %v7999_v8 = vpop.eup %7998  ;;  %4480 = vst.msk [vmem:[#allocation2 + $0x1c8] sm:$0xff] %vm2390_vm0, %v4313_v61  ;;  %v15196_v6 = vld [vmem:[#allocation75_spill] sm:$0xff] }
 0x481   :  { %v4195_v31 = vmul.f32 1.442695, %v15187_v53  ;;  %v15189_v23 = vmin.f32 %v15188_v13, 0.0  ;;  %8008 = vpow2.f32 %v4189_v24  ;;  %v6692_v63 = vadd.f32 -1.0, %v7991_v40  ;;  %v8001_v22 = vpop.eup %8000  ;;  %4481 = vst.msk [vmem:[#allocation2 + $0x1d0] sm:$0xff] %vm2390_vm0, %v4314_v0  ;;  %v15198_v40 = vld [vmem:[#allocation110_spill] sm:$0xff] }
 0x482   :  { %v4315_v4 = vsel %vm3995_vm11, %v12873_v47, %v6688_v57  ;;  %v15191_v3 = vmin.f32 %v15190_v41, 0.0  ;;  %8010 = vpow2.f32 %v4191_v45  ;;  %v6693_v62 = vadd.f32 -1.0, %v7993_v12  ;;  %v15200_v12 = vld [vmem:[#allocation18_spill] sm:$0xff] }
 0x483   :  { %v4197_v34 = vmul.f32 1.442695, %v15189_v23  ;;  %v4316_v29 = vsel %vm3996_vm12, %v12877_v37, %v6689_v26  ;;  %v15193_v35 = vmin.f32 %v15192_v51, 0.0  ;;  %8012 = vpow2.f32 %v4193_v36  ;;  %v8003_v50 = vpop.eup %8002  ;;  %4482 = vst.msk [vmem:[#allocation2 + $0x1e0] sm:$0xff] %vm2390_vm0, %v4315_v4 }
 0x484   :  { %v4199_v39 = vmul.f32 1.442695, %v15191_v3  ;;  %v6694_v47 = vadd.f32 -1.0, %v7995_v43  ;;  %v4317_v10 = vsel %vm3997_vm13, %v12881_v19, %v6690_v56  ;;  %v15195_v54 = vmin.f32 %v15194_v33, 0.0  ;;  %v8005_v48 = vpop.eup %8004  ;;  %4483 = vst.msk [vmem:[#allocation2 + $0x1e8] sm:$0xff] %vm2390_vm0, %v4316_v29  ;;  %v15202_v43 = vld [vmem:[#allocation46_spill] sm:$0xff] }
 0x485   :  { %v4201_v18 = vmul.f32 1.442695, %v15193_v35  ;;  %8014 = vpow2.f32 %v4195_v31  ;;  %v6695_v37 = vadd.f32 -1.0, %v7997_v21  ;;  %v4318_v25 = vsel %vm3998_vm14, %v15164_v7, %v6691_v15  ;;  %4484 = vst.msk [vmem:[#allocation2 + $0x1f8] sm:$0xff] %vm2390_vm0, %v4317_v10 }
 0x486   :  { %v4203_v20 = vmul.f32 1.442695, %v15195_v54  ;;  %v15197_v9 = vmin.f32 %v15196_v6, 0.0  ;;  %8016 = vpow2.f32 %v4197_v34  ;;  %v6697_v19 = vadd.f32 -1.0, %v7999_v8  ;;  %v8007_v27 = vpop.eup %8006  ;;  %4485 = vst.msk [vmem:[#allocation2 + $0x200] sm:$0xff] %vm2390_vm0, %v4318_v25 }
 0x487   :  { %v4319_v57 = vsel %vm3999_vm3, %v12889_v16, %v6692_v63  ;;  %v15199_v11 = vmin.f32 %v15198_v40, 0.0  ;;  %8018 = vpow2.f32 %v4199_v39  ;;  %v6698_v7 = vadd.f32 -1.0, %v8001_v22  ;;  %v8009_v44 = vpop.eup %8008 }
 0x488   :  { %v4205_v24 = vmul.f32 1.442695, %v15197_v9  ;;  %v4320_v26 = vsel %vm4000_vm15, %v15167_v17, %v6693_v62  ;;  %v15201_v32 = vmin.f32 %v15200_v12, 0.0  ;;  %8020 = vpow2.f32 %v4201_v18  ;;  %v8011_v61 = vpop.eup %8010  ;;  %4486 = vst.msk [vmem:[#allocation2 + $0x210] sm:$0xff] %vm2390_vm0, %v4319_v57  ;;  %v13431_v57 = vld [vmem:[#allocation2 + $0x78] sm:$0xff] }
 0x489   :  { %v4207_v45 = vmul.f32 1.442695, %v15199_v11  ;;  %v6699_v16 = vadd.f32 -1.0, %v8003_v50  ;;  %v4321_v56 = vsel %vm4001_vm4, %v15169_v52, %v6694_v47  ;;  %v15203_v53 = vmin.f32 %v15202_v43, 0.0  ;;  %v8013_v0 = vpop.eup %8012  ;;  %4487 = vst.msk [vmem:[#allocation2 + $0x218] sm:$0xff] %vm2390_vm0, %v4320_v26  ;;  %4845 = vrot.lane.b32.xlu1 %v13431_v57, %s8110_s30  ;;  %v4703_v11 = vld [vmem:[#allocation2 + $0x31] sm:$0xff] }
 0x48a   :  { %v4209_v36 = vmul.f32 1.442695, %v15201_v32  ;;  %8022 = vpow2.f32 %v4203_v20  ;;  %v6700_v17 = vadd.f32 -1.0, %v8005_v48  ;;  %v4322_v15 = vsel %vm4002_vm5, %v15121_v58, %v6695_v37  ;;  %4488 = vst.msk [vmem:[#allocation2 + $0x228] sm:$0xff] %vm2390_vm0, %v4321_v56  ;;  %v4709_v32 = vld [vmem:[#allocation2 + $0x79] sm:$0xff] }
 0x48b   :  { %v4211_v31 = vmul.f32 1.442695, %v15203_v53  ;;  %vm4005_vm7 = vcmp.gt.f32.partialorder %v15122_v14, 0.0  ;;  %8024 = vpow2.f32 %v4205_v24  ;;  %v6701_v21 = vadd.f32 -1.0, %v8007_v27  ;;  %v8015_v23 = vpop.eup %8014  ;;  %4489 = vst.msk [vmem:[#allocation2 + $0x230] sm:$0xff] %vm2390_vm0, %v4322_v15  ;;  %v13524_v56 = vld [vmem:[#allocation2 + $0x98] sm:$0xff] }
 0x48c   :  { %v4324_v52 = vsel %vm4004_vm6, %v12905_v46, %v6697_v19  ;;  %vm4006_vm8 = vcmp.gt.f32.partialorder %v15174_v28, 0.0  ;;  %8026 = vpow2.f32 %v4207_v45  ;;  %v6702_v34 = vadd.f32 -1.0, %v8009_v44  ;;  %v8017_v63 = vpop.eup %8016  ;;  %v13538_v53 = vld [vmem:[#allocation2 + $0xc0] sm:$0xff]  ;;  %v5732_v15 = vld [vmem:[%s14573_s4 + $0x38] sm:$0xff] }
 0x48d   :  { %v4325_v58 = vsel %vm4005_vm7, %v15122_v14, %v6698_v7  ;;  %vm4007_vm9 = vcmp.gt.f32.partialorder %v15176_v30, 0.0  ;;  %8028 = vpow2.f32 %v4209_v36  ;;  %v6703_v4 = vadd.f32 -1.0, %v8011_v61  ;;  %v8019_v46 = vpop.eup %8018  ;;  %4491 = vst.msk [vmem:[#allocation2 + $0x248] sm:$0xff] %vm2390_vm0, %v4324_v52  ;;  %v13508_v7 = vld [vmem:[#allocation2 + $0x80] sm:$0xff]  ;;  %v13529_v61 = vld [vmem:[#allocation2 + $0xb0] sm:$0xff]  ;;  %5933 = vmatpush.msra.mxu2 %v5732_v15  ;;  %6796 = vmatpush.msra.mxu3 %v5732_v15  ;;  %v13632_v15 = vld [vmem:[#allocation2 + $0xf8] sm:$0xff] }
 0x48e   :  { %v4326_v8 = vsel %vm4006_vm8, %v15174_v28, %v6699_v16  ;;  %vm4008_vm10 = vcmp.gt.f32.partialorder %v15178_v1, 0.0  ;;  %8030 = vpow2.f32 %v4211_v31  ;;  %v6704_v3 = vadd.f32 -1.0, %v8013_v0  ;;  %v8021_v14 = vpop.eup %8020  ;;  %4492 = vst.msk [vmem:[#allocation2 + $0x258] sm:$0xff] %vm2390_vm0, %v4325_v58  ;;  %v4707_v36 = vld [vmem:[#allocation2 + $0x61] sm:$0xff]  ;;  %v5731_v0 = vld [vmem:[%s14573_s4 + $0x30] sm:$0xff] }
 0x48f   :  { %v4327_v39 = vsel %vm4007_vm9, %v15176_v30, %v6700_v17  ;;  %vm4009_vm11 = vcmp.gt.f32.partialorder %v15180_v55, 0.0  ;;  %v6705_v62 = vadd.f32 -1.0, %v8015_v23  ;;  %v4328_v29 = vsel %vm4008_vm10, %v15178_v1, %v6701_v21  ;;  %4493 = vst.msk [vmem:[#allocation2 + $0x260] sm:$0xff] %vm2390_vm0, %v4326_v8  ;;  %5934 = vmatpush.msra.mxu2 %v5731_v0  ;;  %6797 = vmatpush.msra.mxu3 %v5731_v0  ;;  %v4711_v52 = vld [vmem:[#allocation2 + $0x91] sm:$0xff]  ;;  %v4511_v0 = vld [vmem:[#allocation2 + $0x20] sm:$0xff] }
 0x490   :  { %v8023_v28 = vpop.eup %8022  ;;  %vm4010_vm12 = vcmp.gt.f32.partialorder %v15182_v49, 0.0  ;;  %v6706_v22 = vadd.f32 -1.0, %v8017_v63  ;;  %v4329_v35 = vsel %vm4009_vm11, %v15180_v55, %v6702_v34  ;;  %vm4011_vm13 = vcmp.gt.f32.partialorder %v15184_v42, 0.0  ;;  %4494 = vst.msk [vmem:[#allocation2 + $0x270] sm:$0xff] %vm2390_vm0, %v4327_v39  ;;  %v5730_v34 = vld [vmem:[%s14573_s4 + $0x28] sm:$0xff]  ;;  %v5728_v8 = vld [vmem:[%s14573_s4 + $0x18] sm:$0xff] }
 0x491   :  { %v8025_v18 = vpop.eup %8024  ;;  %v6707_v30 = vadd.f32 -1.0, %v8019_v46  ;;  %v4330_v47 = vsel %vm4010_vm12, %v15182_v49, %v6703_v4  ;;  %vm4012_vm14 = vcmp.gt.f32.partialorder %v15186_v60, 0.0  ;;  %v6708_v1 = vadd.f32 -1.0, %v8021_v14  ;;  %4495 = vst.msk [vmem:[#allocation2 + $0x278] sm:$0xff] %vm2390_vm0, %v4328_v29  ;;  %5093 = vrot.lane.b32.xlu1 %v4703_v11, %s8111_s6  ;;  %5935 = vmatpush.msra.mxu2 %v5730_v34  ;;  %v5729_v4 = vld [vmem:[%s14573_s4 + $0x20] sm:$0xff]  ;;  %v5727_v46 = vld [vmem:[%s14573_s4 + $0x10] sm:$0xff] }
 0x492   :  { %v8027_v10 = vpop.eup %8026  ;;  %v4331_v50 = vsel %vm4011_vm13, %v15184_v42, %v6704_v3  ;;  %vm4013_vm3 = vcmp.gt.f32.partialorder %v15188_v13, 0.0  ;;  %v6709_v55 = vadd.f32 -1.0, %v8023_v28  ;;  %v4332_v20 = vsel %vm4012_vm14, %v15186_v60, %v6705_v62  ;;  %4496 = vst.msk [vmem:[#allocation2 + $0x288] sm:$0xff] %vm2390_vm0, %v4329_v35  ;;  %6798 = vmatpush.msra.mxu3 %v5730_v34  ;;  %v4713_v39 = vld [vmem:[#allocation2 + $0xa9] sm:$0xff]  ;;  %v4508_v62 = vld [vmem:[#allocation2] sm:$0xff] }
 0x493   :  { %v8029_v54 = vpop.eup %8028  ;;  %vm4014_vm15 = vcmp.gt.f32.partialorder %v15190_v41, 0.0  ;;  %v6710_v49 = vadd.f32 -1.0, %v8025_v18  ;;  %v4333_v25 = vsel %vm4013_vm3, %v15188_v13, %v6706_v22  ;;  %4497 = vst.msk [vmem:[#allocation2 + $0x290] sm:$0xff] %vm2390_vm0, %v4330_v47  ;;  %vm4015_vm4 = vcmp.gt.f32.partialorder %v15192_v51, 0.0  ;;  %5936 = vmatpush.msra.mxu2 %v5729_v4  ;;  %v5726_v14 = vld [vmem:[%s14573_s4 + $0x8] sm:$0xff]  ;;  %v5725_v35 = vld [vmem:[%s14573_s4] sm:$0xff] }
 0x494   :  { %v8031_v37 = vpop.eup %8030  ;;  %v6711_v42 = vadd.f32 -1.0, %v8027_v10  ;;  %v4334_v48 = vsel %vm4014_vm15, %v15190_v41, %v6707_v30  ;;  %4498 = vst.msk [vmem:[#allocation2 + $0x2a0] sm:$0xff] %vm2390_vm0, %v4331_v50  ;;  %vm4016_vm5 = vcmp.gt.f32.partialorder %v15194_v33, 0.0  ;;  %v6712_v60 = vadd.f32 -1.0, %v8029_v54  ;;  %6799 = vmatpush.msra.mxu3 %v5729_v4  ;;  %v4717_v50 = vld [vmem:[#allocation2 + $0xd9] sm:$0xff] }
 0x495   :  { %v4335_v9 = vsel %vm4015_vm4, %v15192_v51, %v6708_v1  ;;  %4499 = vst.msk [vmem:[#allocation2 + $0x2a8] sm:$0xff] %vm2390_vm0, %v4332_v20  ;;  %vm4017_vm6 = vcmp.gt.f32.partialorder %v15196_v6, 0.0  ;;  %v6713_v24 = vadd.f32 -1.0, %v8031_v37  ;;  %v4336_v13 = vsel %vm4016_vm5, %v15194_v33, %v6709_v55  ;;  %5937 = vmatpush.msra.mxu2 %v5728_v8  ;;  %v13592_v1 = vld [vmem:[#allocation2 + $0xc8] sm:$0xff]  ;;  %v13598_v20 = vld [vmem:[#allocation2 + $0xd8] sm:$0xff] }
 0x496   :  { %4500 = vst.msk [vmem:[#allocation2 + $0x2b8] sm:$0xff] %vm2390_vm0, %v4333_v25  ;;  %vm4018_vm7 = vcmp.gt.f32.partialorder %v15198_v40, 0.0  ;;  %v4337_v41 = vsel %vm4017_vm6, %v15196_v6, %v6710_v49  ;;  %vm4019_vm8 = vcmp.gt.f32.partialorder %v15200_v12, 0.0  ;;  %vm4020_vm9 = vcmp.gt.f32.partialorder %v15202_v43, 0.0  ;;  %6800 = vmatpush.msra.mxu3 %v5728_v8  ;;  %v4715_v55 = vld [vmem:[#allocation2 + $0xc1] sm:$0xff] }
 0x497   :  { %4501 = vst.msk [vmem:[#allocation2 + $0x2c0] sm:$0xff] %vm2390_vm0, %v4334_v48  ;;  %v4338_v19 = vsel %vm4018_vm7, %v15198_v40, %v6711_v42  ;;  %v4339_v51 = vsel %vm4019_vm8, %v15200_v12, %v6712_v60  ;;  %v4340_v33 = vsel %vm4020_vm9, %v15202_v43, %v6713_v24  ;;  %vm4343_vm10 = vcmask 122880   ;;  %v13516_v12 = vld [vmem:[#allocation2 + $0x90] sm:$0xff]  ;;  %v13533_v43 = vld [vmem:[#allocation2 + $0xa8] sm:$0xff]  ;;  %5938 = vmatpush.msra.mxu2 %v5727_v46 }
 0x498   :  { %4502 = vst.msk [vmem:[#allocation2 + $0x2d0] sm:$0xff] %vm2390_vm0, %v4335_v9  ;;  %v15204_v6 = vmov 0.0   ;;  %6801 = vmatpush.msra.mxu3 %v5727_v46  ;;  %vm15205_vm11 = vcmask 523264   ;;  %v4719_v48 = vld [vmem:[#allocation2 + $0xf1] sm:$0xff]  ;;  %v4509_v24 = vld [vmem:[#allocation2 + $0x8] sm:$0xff] }
 0x499   :  { %4503 = vst.msk [vmem:[#allocation2 + $0x2d8] sm:$0xff] %vm2390_vm0, %v4336_v13  ;;  %5939 = vmatpush.msra.mxu2 %v5726_v14  ;;  %v13610_v13 = vld [vmem:[#allocation2 + $0xe0] sm:$0xff]  ;;  %vm15206_vm12 = vmmov %vm15205_vm11  ;;  %v4512_v46 = vld [vmem:[#allocation2 + $0x30] sm:$0xff] }
 0x49a   :  { %4504 = vst.msk [vmem:[#allocation2 + $0x2e8] sm:$0xff] %vm2390_vm0, %v4337_v41  ;;  %6802 = vmatpush.msra.mxu3 %v5726_v14  ;;  %vm15207_vm13 = vmmov %vm15205_vm11 }
 0x49b   :  { %4505 = vst.msk [vmem:[#allocation2 + $0x2f0] sm:$0xff] %vm2390_vm0, %v4338_v19  ;;  %5940 = vmatpush.msra.mxu2 %v5725_v35  ;;  %vm15208_vm14 = vmmov %vm15205_vm11 }
 0x49c   :  { %4506 = vst.msk [vmem:[#allocation2 + $0x300] sm:$0xff] %vm2390_vm0, %v4339_v51  ;;  %6803 = vmatpush.msra.mxu3 %v5725_v35  ;;  %vm15209_vm3 = vmmov %vm15205_vm11 }
 0x49d   :  { %4507 = vst.msk [vmem:[#allocation2 + $0x308] sm:$0xff] %vm2390_vm0, %v4340_v33  ;;  %vm15210_vm15 = vmmov %vm15209_vm3 }
 0x49e   :  { %4344 = vst.msk [vmem:[#allocation2 + $0x10] sm:$0x1] %vm4343_vm10, %v15204_v6  ;;  %vm15211_vm4 = vmmov %vm15209_vm3 }
 0x49f   :  { %4347 = vst.msk [vmem:[#allocation2 + $0x28] sm:$0x1] %vm4343_vm10, %v15204_v6  ;;  %vm15212_vm5 = vmmov %vm15209_vm3 }
 0x4a0   :  { %4350 = vst.msk [vmem:[#allocation2 + $0x40] sm:$0x1] %vm4343_vm10, %v15204_v6  ;;  %vm15213_vm6 = vmmov %vm15209_vm3 }
 0x4a1   :  { %4353 = vst.msk [vmem:[#allocation2 + $0x58] sm:$0x1] %vm4343_vm10, %v15204_v6  ;;  %vm15214_vm7 = vmmov %vm15209_vm3 }
 0x4a2   :  { %4356 = vst.msk [vmem:[#allocation2 + $0x70] sm:$0x1] %vm4343_vm10, %v15204_v6  ;;  %vm15215_vm8 = vmmov %vm15209_vm3 }
 0x4a3   :  { %4359 = vst.msk [vmem:[#allocation2 + $0x88] sm:$0x1] %vm4343_vm10, %v15204_v6  ;;  %vm15216_vm9 = vmmov %vm15209_vm3 }
 0x4a4   :  { %4362 = vst.msk [vmem:[#allocation2 + $0xa0] sm:$0x1] %vm4343_vm10, %v15204_v6  ;;  %v13540_v31 = vpop.permute.xlu1 %4833  ;;  %v4830_v21 = vpop.permute.xlu2 %4829 }
 0x4a5   :  { %v4638_v27 = vld [vmem:[#allocation2 + $0x9] sm:$0xff]  ;;  %4365 = vst.msk [vmem:[#allocation2 + $0xb8] sm:$0x1] %vm4343_vm10, %v15204_v6  ;;  %v5533_v28 = vsel %vm2390_vm0, %v4508_v62, %v4830_v21  ;;  %v4723_v62 = vld [vmem:[#allocation2 + $0x121] sm:$0xff] }
 0x4a6   :  { %5087 = vrot.lane.b32.xlu2 %v4638_v27, %s8111_s6  ;;  %4368 = vst.msk [vmem:[#allocation2 + $0xd0] sm:$0x1] %vm4343_vm10, %v15204_v6  ;;  %v4702_v40 = vld [vmem:[#allocation2 + $0x21] sm:$0xff] }
 0x4a7   :  { %4371 = vst.msk [vmem:[#allocation2 + $0xe8] sm:$0x1] %vm4343_vm10, %v15204_v6  ;;  %5343 = vrot.lane.b32.xlu0 %v4702_v40, %s8112_s28  ;;  %v4704_v45 = vld [vmem:[#allocation2 + $0x39] sm:$0xff] }
 0x4a8   :  { %4374 = vst.msk [vmem:[#allocation2 + $0x100] sm:$0x1] %vm4343_vm10, %v15204_v6  ;;  %5095 = vrot.lane.b32.xlu1 %v4704_v45, %s8111_s6  ;;  %v4706_v44 = vld [vmem:[#allocation2 + $0x51] sm:$0xff] }
 0x4a9   :  { %4377 = vst.msk [vmem:[#allocation2 + $0x118] sm:$0x1] %vm4343_vm10, %v15204_v6  ;;  %v4708_v26 = vld [vmem:[#allocation2 + $0x69] sm:$0xff] }
 0x4aa   :  { %4380 = vst.msk [vmem:[#allocation2 + $0x130] sm:$0x1] %vm4343_vm10, %v15204_v6  ;;  %v4710_v16 = vld [vmem:[#allocation2 + $0x81] sm:$0xff] }
 0x4ab   :  { %4383 = vst.msk [vmem:[#allocation2 + $0x148] sm:$0x1] %vm4343_vm10, %v15204_v6  ;;  %v4712_v23 = vld [vmem:[#allocation2 + $0x99] sm:$0xff] }
 0x4ac   :  { %4386 = vst.msk [vmem:[#allocation2 + $0x160] sm:$0x1] %vm4343_vm10, %v15204_v6  ;;  %v13542_v17 = vpop.permute.xlu0 %4831  ;;  %v4714_v10 = vld [vmem:[#allocation2 + $0xb1] sm:$0xff] }
 0x4ad   :  { %4389 = vst.msk [vmem:[#allocation2 + $0x178] sm:$0x1] %vm4343_vm10, %v15204_v6  ;;  %v4716_v42 = vld [vmem:[#allocation2 + $0xc9] sm:$0xff]  ;;  %v5534_v41 = vsel %vm2390_vm0, %v4509_v24, %v13542_v17 }
 0x4ae   :  { %4392 = vst.msk [vmem:[#allocation2 + $0x190] sm:$0x1] %vm4343_vm10, %v15204_v6  ;;  %5089 = vrot.lane.b32.xlu2 %v13088_v38, %s8111_s6  ;;  %v4705_v38 = vld [vmem:[#allocation2 + $0x49] sm:$0xff]  ;;  %v4718_v37 = vld [vmem:[#allocation2 + $0xe1] sm:$0xff] }
 0x4af   :  { %4395 = vst.msk [vmem:[#allocation2 + $0x1a8] sm:$0x1] %vm4343_vm10, %v15204_v6  ;;  %5345 = vrot.lane.b32.xlu0 %v4703_v11, %s8112_s28  ;;  %v4720_v19 = vld [vmem:[#allocation2 + $0xf9] sm:$0xff]  ;;  %v13621_v11 = vld [vmem:[#allocation2 + $0xf0] sm:$0xff] }
 0x4b0   :  { %4398 = vst.msk [vmem:[#allocation2 + $0x1c0] sm:$0x1] %vm4343_vm10, %v15204_v6  ;;  %5097 = vrot.lane.b32.xlu1 %v4705_v38, %s8111_s6 }
 0x4b1   :  { %4401 = vst.msk [vmem:[#allocation2 + $0x1d8] sm:$0x1] %vm4343_vm10, %v15204_v6 }
 0x4b2   :  { %4404 = vst.msk [vmem:[#allocation2 + $0x1f0] sm:$0x1] %vm4343_vm10, %v15204_v6 }
 0x4b3   :  { %4407 = vst.msk [vmem:[#allocation2 + $0x208] sm:$0x1] %vm4343_vm10, %v15204_v6 }
 0x4b4   :  { %4410 = vst.msk [vmem:[#allocation2 + $0x220] sm:$0x1] %vm4343_vm10, %v15204_v6 }
 0x4b5   :  { %4413 = vst.msk [vmem:[#allocation2 + $0x238] sm:$0x1] %vm4343_vm10, %v15204_v6 }
 0x4b6   :  { %4416 = vst.msk [vmem:[#allocation2 + $0x250] sm:$0x1] %vm4343_vm10, %v15204_v6  ;;  %5091 = vrot.lane.b32.xlu2 %v4702_v40, %s8111_s6 }
 0x4b7   :  { %4419 = vst.msk [vmem:[#allocation2 + $0x268] sm:$0x1] %vm4343_vm10, %v15204_v6  ;;  %5347 = vrot.lane.b32.xlu0 %v4704_v45, %s8112_s28  ;;  %v13571_v3 = vpop.permute.xlu2 %4835  ;;  %v4721_v45 = vld [vmem:[#allocation2 + $0x109] sm:$0xff] }
 0x4b8   :  { %4422 = vst.msk [vmem:[#allocation2 + $0x280] sm:$0x1] %vm4343_vm10, %v15204_v6  ;;  %5355 = vrot.lane.b32.xlu1 %v4708_v26, %s8112_s28  ;;  %v5536_v21 = vsel %vm2390_vm0, %v4511_v0, %v13571_v3 }
 0x4b9   :  { %4425 = vst.msk [vmem:[#allocation2 + $0x298] sm:$0x1] %vm4343_vm10, %v15204_v6 }
 0x4ba   :  { %4428 = vst.msk [vmem:[#allocation2 + $0x2b0] sm:$0x1] %vm4343_vm10, %v15204_v6 }
 0x4bb   :  { %4431 = vst.msk [vmem:[#allocation2 + $0x2c8] sm:$0x1] %vm4343_vm10, %v15204_v6 }
 0x4bc   :  { %4434 = vst.msk [vmem:[#allocation2 + $0x2e0] sm:$0x1] %vm4343_vm10, %v15204_v6 }
 0x4bd   :  { %4437 = vst.msk [vmem:[#allocation2 + $0x2f8] sm:$0x1] %vm4343_vm10, %v15204_v6  ;;  %v13557_v58 = vpop.permute.xlu1 %4839 }
 0x4be   :  { %4440 = vst.msk [vmem:[#allocation2 + $0x310] sm:$0x1] %vm4343_vm10, %v15204_v6  ;;  %5349 = vrot.lane.b32.xlu2 %v4705_v38, %s8112_s28  ;;  %v8107_v38 = vld [vmem:[#allocation2 + $0x18] sm:$0xff] }
 0x4bf   :  { %4443 = vst.msk [vmem:[#allocation2 + $0x328] sm:$0x1] %vm4343_vm10, %v15204_v6  ;;  %4847 = vrot.lane.b32.xlu0 %v13508_v7, %s8110_s30  ;;  %vm15217_vm10 = vmmov %vm15209_vm3 }
 0x4c0   :  { %5357 = vrot.lane.b32.xlu1 %v4709_v32, %s8112_s28 }
 0x4c5   :  { %v5342_v29 = vpop.permute.xlu1 %5341 }
 0x4c6   :  { %5351 = vrot.lane.b32.xlu2 %v4706_v44, %s8112_s28 }
 0x4c7   :  { %4849 = vrot.lane.b32.xlu0 %v13516_v12, %s8110_s30 }
 0x4c8   :  { %5359 = vrot.lane.b32.xlu1 %v4710_v16, %s8112_s28  ;;  %v13559_v63 = vpop.permute.xlu0 %4837 }
 0x4c9   :  { %v5537_v14 = vsel %vm2390_vm0, %v4512_v46, %v13559_v63  ;;  %v5538_v63 = vsel %vm2390_vm0, %v13153_v59, %v13557_v58  ;;  %v8108_v59 = vld [vmem:[#allocation2 + $0x48] sm:$0xff]  ;;  %v13719_v46 = vld [vmem:[#allocation2 + $0x150] sm:$0xff] }
 0x4ce   :  { %5353 = vrot.lane.b32.xlu2 %v4707_v36, %s8112_s28 }
 0x4cf   :  { %5099 = vrot.lane.b32.xlu0 %v4706_v44, %s8111_s6  ;;  %v13587_v47 = vpop.permute.xlu2 %4841 }
 0x4d0   :  { %4855 = vrot.lane.b32.xlu1 %v13529_v61, %s8110_s30  ;;  %v5539_v58 = vsel %vm2390_vm0, %v8108_v59, %v13587_v47  ;;  %v8109_v47 = vld [vmem:[#allocation2 + $0x50] sm:$0xff] }
 0x4d6   :  { %4851 = vrot.lane.b32.xlu2 %v13524_v56, %s8110_s30 }
 0x4d7   :  { %5101 = vrot.lane.b32.xlu0 %v4707_v36, %s8111_s6 }
 0x4d8   :  { %4857 = vrot.lane.b32.xlu1 %v13538_v53, %s8110_s30 }
 0x4de   :  { %4853 = vrot.lane.b32.xlu2 %v13533_v43, %s8110_s30 }
 0x4df   :  { %5103 = vrot.lane.b32.xlu0 %v4708_v26, %s8111_s6  ;;  %v5535_v26 = vsel %vm2390_vm0, %v8107_v38, %v13540_v31  ;;  %v4722_v31 = vld [vmem:[#allocation2 + $0x111] sm:$0xff] }
 0x4e0   :  { %5111 = vrot.lane.b32.xlu1 %v4712_v23, %s8111_s6 }
 0x4e6   :  { %5105 = vrot.lane.b32.xlu2 %v4709_v32, %s8111_s6 }
 0x4e7   :  { %5361 = vrot.lane.b32.xlu0 %v4711_v52, %s8112_s28 }
 0x4e8   :  { %5113 = vrot.lane.b32.xlu1 %v4713_v39, %s8111_s6  ;;  %v5086_v22 = vpop.permute.xlu0 %5085 }
 0x4e9   :  { %v5597_v18 = vsel %vm2455_vm1, %v5533_v28, %v5086_v22 }
 0x4ea   :  { %v5661_v30 = vsel %vm2520_vm2, %v5597_v18, %v5342_v29  ;;  %v13656_v18 = vld [vmem:[#allocation2 + $0x110] sm:$0xff] }
 0x4eb   :  { %6714 = vmatmul.msk.f32.vlgmr.msra.gmra.mxu2 %vm15205_vm11, %v5661_v30  ;;  %vm15218_vm11 = vmmov %vm15209_vm3 }
 0x4ed   :  { %v13603_v25 = vpop.permute.xlu1 %4843 }
 0x4ee   :  { %5107 = vrot.lane.b32.xlu2 %v4710_v16, %s8111_s6 }
 0x4ef   :  { %5363 = vrot.lane.b32.xlu0 %v4712_v23, %s8112_s28 }
 0x4f0   :  { %5115 = vrot.lane.b32.xlu1 %v4714_v10, %s8111_s6 }
 0x4f6   :  { %5109 = vrot.lane.b32.xlu2 %v4711_v52, %s8111_s6 }
 0x4f7   :  { %5365 = vrot.lane.b32.xlu0 %v4713_v39, %s8112_s28  ;;  %v13643_v39 = vld [vmem:[#allocation2 + $0x108] sm:$0xff] }
 0x4f8   :  { %5373 = vrot.lane.b32.xlu1 %v4717_v50, %s8112_s28 }
 0x4fb   :  { %v13608_v9 = vpop.permute.xlu1 %4845 }
 0x4fe   :  { %5367 = vrot.lane.b32.xlu2 %v4714_v10, %s8112_s28  ;;  %v4724_v10 = vld [vmem:[#allocation2 + $0x129] sm:$0xff] }
 0x4ff   :  { %4859 = vrot.lane.b32.xlu0 %v13592_v1, %s8110_s30 }
 0x500   :  { %v5088_v54 = vpop.permute.xlu2 %5087  ;;  %5375 = vrot.lane.b32.xlu1 %v4718_v37, %s8112_s28 }
 0x501   :  { %v5598_v33 = vsel %vm2455_vm1, %v5534_v41, %v5088_v54 }
 0x503   :  { %v5094_v40 = vpop.permute.xlu1 %5093 }
 0x504   :  { %v5601_v3 = vsel %vm2455_vm1, %v5537_v14, %v5094_v40 }
 0x506   :  { %5369 = vrot.lane.b32.xlu2 %v4715_v55, %s8112_s28 }
 0x507   :  { %4861 = vrot.lane.b32.xlu0 %v13598_v20, %s8110_s30 }
 0x508   :  { %v5090_v49 = vpop.permute.xlu2 %5089  ;;  %5377 = vrot.lane.b32.xlu1 %v4719_v48, %s8112_s28 }
 0x509   :  { %v5599_v32 = vsel %vm2455_vm1, %v5535_v26, %v5090_v49  ;;  %v13670_v49 = vld [vmem:[#allocation2 + $0x120] sm:$0xff] }
 0x50e   :  { %5371 = vrot.lane.b32.xlu2 %v4716_v42, %s8112_s28 }
 0x50f   :  { %5117 = vrot.lane.b32.xlu0 %v4715_v55, %s8111_s6 }
 0x510   :  { %v5092_v60 = vpop.permute.xlu2 %5091  ;;  %5379 = vrot.lane.b32.xlu1 %v4720_v19, %s8112_s28 }
 0x511   :  { %v5600_v23 = vsel %vm2455_vm1, %v5536_v21, %v5092_v60  ;;  %v13708_v21 = vld [vmem:[#allocation2 + $0x140] sm:$0xff] }
 0x516   :  { %4863 = vrot.lane.b32.xlu2 %v13610_v13, %s8110_s30 }
 0x517   :  { %5119 = vrot.lane.b32.xlu0 %v4716_v42, %s8111_s6 }
 0x518   :  { %v5350_v51 = vpop.permute.xlu2 %5349  ;;  %5381 = vrot.lane.b32.xlu1 %v4721_v45, %s8112_s28 }
 0x519   :  { %v5344_v6 = vpop.permute.xlu0 %5343  ;;  %v5665_v22 = vsel %vm2520_vm2, %v5601_v3, %v5350_v51  ;;  %v13681_v51 = vld [vmem:[#allocation2 + $0x128] sm:$0xff] }
 0x51a   :  { %v5662_v27 = vsel %vm2520_vm2, %v5598_v33, %v5344_v6  ;;  %v5096_v17 = vpop.permute.xlu1 %5095  ;;  %v5540_v33 = vsel %vm2390_vm0, %v8109_v47, %v13603_v25  ;;  %v5541_v25 = vsel %vm2390_vm0, %v13287_v5, %v13608_v9  ;;  %v4732_v47 = vld [vmem:[#allocation2 + $0x189] sm:$0xff] }
 0x51b   :  { %6715 = vmatmul.msk.f32.gmra.mxu2 %vm15206_vm12, %v5662_v27  ;;  %v5602_v30 = vsel %vm2455_vm1, %v5538_v63, %v5096_v17  ;;  %v4726_v27 = vld [vmem:[#allocation2 + $0x141] sm:$0xff]  ;;  %v13730_v63 = vld [vmem:[#allocation2 + $0x158] sm:$0xff]  ;;  %vm15219_vm12 = vmmov %vm15209_vm3 }
 0x51e   :  { %4865 = vrot.lane.b32.xlu2 %v13621_v11, %s8110_s30 }
 0x51f   :  { %5121 = vrot.lane.b32.xlu0 %v4717_v50, %s8111_s6 }
 0x520   :  { %v5352_v44 = vpop.permute.xlu2 %5351  ;;  %5383 = vrot.lane.b32.xlu1 %v4722_v31, %s8112_s28 }
 0x521   :  { %v5346_v36 = vpop.permute.xlu0 %5345  ;;  %v5666_v55 = vsel %vm2520_vm2, %v5602_v30, %v5352_v44  ;;  %v13694_v44 = vld [vmem:[#allocation2 + $0x138] sm:$0xff] }
 0x522   :  { %v5663_v16 = vsel %vm2520_vm2, %v5599_v32, %v5346_v36  ;;  %v5098_v8 = vpop.permute.xlu1 %5097  ;;  %v4727_v36 = vld [vmem:[#allocation2 + $0x151] sm:$0xff] }
 0x523   :  { %6716 = vmatmul.msk.f32.gmra.mxu2 %vm15207_vm13, %v5663_v16  ;;  %v5603_v42 = vsel %vm2455_vm1, %v5539_v58, %v5098_v8  ;;  %v4730_v30 = vld [vmem:[#allocation2 + $0x171] sm:$0xff]  ;;  %v13742_v58 = vld [vmem:[#allocation2 + $0x168] sm:$0xff]  ;;  %vm15220_vm13 = vmmov %vm15209_vm3 }
 0x526   :  { %4867 = vrot.lane.b32.xlu2 %v13632_v15, %s8110_s30 }
 0x527   :  { %5123 = vrot.lane.b32.xlu0 %v4718_v37, %s8111_s6 }
 0x528   :  { %v5354_v52 = vpop.permute.xlu2 %5353  ;;  %5385 = vrot.lane.b32.xlu1 %v4723_v62, %s8112_s28 }
 0x529   :  { %v5348_v34 = vpop.permute.xlu0 %5347  ;;  %v5667_v41 = vsel %vm2520_vm2, %v5603_v42, %v5354_v52  ;;  %v4728_v52 = vld [vmem:[#allocation2 + $0x159] sm:$0xff]  ;;  %v4731_v42 = vld [vmem:[#allocation2 + $0x181] sm:$0xff] }
 0x52a   :  { %v5664_v4 = vsel %vm2520_vm2, %v5600_v23, %v5348_v34  ;;  %v5356_v35 = vpop.permute.xlu1 %5355 }
 0x52b   :  { %6717 = vmatmul.msk.f32.gmra.mxu2 %vm15208_vm14, %v5664_v4  ;;  %vm15221_vm14 = vmmov %vm15209_vm3 }
 0x52e   :  { %4869 = vrot.lane.b32.xlu2 %v13643_v39, %s8110_s30 }
 0x52f   :  { %5125 = vrot.lane.b32.xlu0 %v4719_v48, %s8111_s6  ;;  %v4725_v48 = vld [vmem:[#allocation2 + $0x139] sm:$0xff] }
 0x530   :  { %v13651_v29 = vpop.permute.xlu2 %4851  ;;  %5387 = vrot.lane.b32.xlu1 %v4724_v10, %s8112_s28 }
 0x531   :  { %v4848_v28 = vpop.permute.xlu0 %4847 }
 0x532   :  { %v5358_v37 = vpop.permute.xlu1 %5357  ;;  %v5542_v5 = vsel %vm2390_vm0, %v13299_v2, %v4848_v28  ;;  %v4729_v2 = vld [vmem:[#allocation2 + $0x169] sm:$0xff] }
 0x533   :  { %6718 = vmatmul.msk.f32.gmra.mxu2 %vm15209_vm3, %v5665_v22 }
 0x536   :  { %4871 = vrot.lane.b32.xlu2 %v13656_v18, %s8110_s30 }
 0x537   :  { %5127 = vrot.lane.b32.xlu0 %v4720_v19, %s8111_s6 }
 0x538   :  { %v13665_v50 = vpop.permute.xlu2 %4853  ;;  %5389 = vrot.lane.b32.xlu1 %v4725_v48, %s8112_s28 }
 0x539   :  { %v4850_v54 = vpop.permute.xlu0 %4849 }
 0x53a   :  { %v5360_v19 = vpop.permute.xlu1 %5359  ;;  %v5543_v14 = vsel %vm2390_vm0, %v13431_v57, %v4850_v54  ;;  %v5544_v57 = vsel %vm2390_vm0, %v13508_v7, %v13651_v29  ;;  %v5545_v7 = vsel %vm2390_vm0, %v13516_v12, %v13665_v50 }
 0x53b   :  { %6719 = vmatmul.msk.f32.gmra.mxu2 %vm15210_vm15, %v5666_v55  ;;  %vm15222_vm15 = vmmov %vm15209_vm3 }
 0x53e   :  { %4873 = vrot.lane.b32.xlu2 %v13670_v49, %s8110_s30 }
 0x53f   :  { %5129 = vrot.lane.b32.xlu0 %v4721_v45, %s8111_s6 }
 0x540   :  { %v5106_v60 = vpop.permute.xlu2 %5105  ;;  %5391 = vrot.lane.b32.xlu1 %v4726_v27, %s8112_s28 }
 0x541   :  { %v5100_v24 = vpop.permute.xlu0 %5099 }
 0x542   :  { %v5604_v6 = vsel %vm2455_vm1, %v5540_v33, %v5100_v24  ;;  %v13691_v26 = vpop.permute.xlu1 %4855 }
 0x543   :  { %6720 = vmatmul.msk.f32.gmra.mxu2 %vm15211_vm4, %v5667_v41  ;;  %v5668_v38 = vsel %vm2520_vm2, %v5604_v6, %v5356_v35  ;;  %v5546_v33 = vsel %vm2390_vm0, %v13524_v56, %v13691_v26  ;;  %vm15223_vm4 = vmmov %vm15209_vm3 }
 0x546   :  { %4875 = vrot.lane.b32.xlu2 %v13681_v51, %s8110_s30 }
 0x547   :  { %5131 = vrot.lane.b32.xlu0 %v4722_v31, %s8111_s6 }
 0x548   :  { %v5108_v40 = vpop.permute.xlu2 %5107  ;;  %5393 = vrot.lane.b32.xlu1 %v4727_v36, %s8112_s28 }
 0x549   :  { %v5102_v45 = vpop.permute.xlu0 %5101  ;;  %v5608_v54 = vsel %vm2455_vm1, %v5544_v57, %v5108_v40  ;;  %v13808_v57 = vld [vmem:[#allocation2 + $0x279] sm:$0xff] }
 0x54a   :  { %v5605_v32 = vsel %vm2455_vm1, %v5541_v25, %v5102_v45  ;;  %v13705_v31 = vpop.permute.xlu1 %4857  ;;  %v4603_v45 = vld [vmem:[#allocation2 + $0x180] sm:$0xff]  ;;  %v4733_v25 = vld [vmem:[#allocation2 + $0x1b1] sm:$0xff] }
 0x54b   :  { %6721 = vmatmul.msk.f32.gmra.mxu2 %vm15212_vm5, %v5668_v38  ;;  %v5669_v0 = vsel %vm2520_vm2, %v5605_v32, %v5358_v37  ;;  %v5547_v38 = vsel %vm2390_vm0, %v13533_v43, %v13705_v31  ;;  %vm15224_vm5 = vmmov %vm15209_vm3 }
 0x54e   :  { %4877 = vrot.lane.b32.xlu2 %v13694_v44, %s8110_s30 }
 0x54f   :  { %5133 = vrot.lane.b32.xlu0 %v4723_v62, %s8111_s6  ;;  %v5607_v62 = vsel %vm2455_vm1, %v5543_v14, %v5106_v60 }
 0x550   :  { %v5110_v16 = vpop.permute.xlu2 %5109  ;;  %5395 = vrot.lane.b32.xlu1 %v4728_v52, %s8112_s28 }
 0x551   :  { %v5104_v17 = vpop.permute.xlu0 %5103 }
 0x552   :  { %v5606_v9 = vsel %vm2455_vm1, %v5542_v5, %v5104_v17  ;;  %v5112_v8 = vpop.permute.xlu1 %5111  ;;  %v4734_v5 = vld [vmem:[#allocation2 + $0x1b9] sm:$0xff] }
 0x553   :  { %6722 = vmatmul.msk.f32.gmra.mxu2 %vm15213_vm6, %v5669_v0  ;;  %v5670_v4 = vsel %vm2520_vm2, %v5606_v9, %v5360_v19  ;;  %v13754_v19 = vld [vmem:[#allocation2 + $0x170] sm:$0xff]  ;;  %v5610_v12 = vsel %vm2455_vm1, %v5546_v33, %v5112_v8  ;;  %v4604_v0 = vld [vmem:[#allocation2 + $0x188] sm:$0xff]  ;;  %v4669_v8 = vld [vmem:[#allocation2 + $0x199] sm:$0xff] }
 0x554   :  { %v4735_v33 = vld [vmem:[#allocation2 + $0x1c9] sm:$0xff]  ;;  %vm15225_vm6 = vmmov %vm15209_vm3 }
 0x556   :  { %4879 = vrot.lane.b32.xlu2 %v13708_v21, %s8110_s30 }
 0x557   :  { %5135 = vrot.lane.b32.xlu0 %v4724_v10, %s8111_s6 }
 0x558   :  { %v5368_v23 = vpop.permute.xlu2 %5367  ;;  %5397 = vrot.lane.b32.xlu1 %v4729_v2, %s8112_s28 }
 0x559   :  { %v5362_v34 = vpop.permute.xlu0 %5361  ;;  %v5674_v40 = vsel %vm2520_vm2, %v5610_v12, %v5368_v23 }
 0x55a   :  { %v5671_v22 = vsel %vm2520_vm2, %v5607_v62, %v5362_v34  ;;  %v5114_v35 = vpop.permute.xlu1 %5113 }
 0x55b   :  { %6723 = vmatmul.msk.f32.gmra.mxu2 %vm15214_vm7, %v5670_v4  ;;  %v5611_v26 = vsel %vm2455_vm1, %v5547_v38, %v5114_v35  ;;  %v13787_v4 = vld [vmem:[#allocation2 + $0x1b0] sm:$0xff]  ;;  %v4670_v35 = vld [vmem:[#allocation2 + $0x1a1] sm:$0xff]  ;;  %vm15226_vm7 = vmmov %vm15209_vm3 }
 0x55e   :  { %4881 = vrot.lane.b32.xlu2 %v13719_v46, %s8110_s30 }
 0x55f   :  { %5137 = vrot.lane.b32.xlu0 %v4725_v48, %s8111_s6  ;;  %v5609_v48 = vsel %vm2455_vm1, %v5545_v7, %v5110_v16 }
 0x560   :  { %v5370_v3 = vpop.permute.xlu2 %5369  ;;  %5399 = vrot.lane.b32.xlu1 %v4730_v30, %s8112_s28 }
 0x561   :  { %v5364_v28 = vpop.permute.xlu0 %5363  ;;  %v5675_v16 = vsel %vm2520_vm2, %v5611_v26, %v5370_v3  ;;  %v13862_v26 = vld [vmem:[#allocation2 + $0x288] sm:$0xff] }
 0x562   :  { %v5672_v37 = vsel %vm2520_vm2, %v5608_v54, %v5364_v28  ;;  %v5116_v59 = vpop.permute.xlu1 %5115 }
 0x563   :  { %6724 = vmatmul.msk.f32.gmra.mxu2 %vm15215_vm8, %v5671_v22  ;;  %v13800_v22 = vld [vmem:[#allocation2 + $0x1b8] sm:$0xff]  ;;  %vm15227_vm8 = vmmov %vm15209_vm3 }
 0x566   :  { %4883 = vrot.lane.b32.xlu2 %v13730_v63, %s8110_s30 }
 0x567   :  { %5139 = vrot.lane.b32.xlu0 %v4726_v27, %s8111_s6 }
 0x568   :  { %v5372_v10 = vpop.permute.xlu2 %5371  ;;  %5401 = vrot.lane.b32.xlu1 %v4731_v42, %s8112_s28  ;;  %v13822_v42 = vld [vmem:[#allocation2 + $0x278] sm:$0xff] }
 0x569   :  { %v5366_v55 = vpop.permute.xlu0 %5365 }
 0x56a   :  { %v5673_v24 = vsel %vm2520_vm2, %v5609_v48, %v5366_v55  ;;  %v5374_v41 = vpop.permute.xlu1 %5373 }
 0x56b   :  { %6725 = vmatmul.msk.f32.gmra.mxu2 %vm15216_vm9, %v5672_v37  ;;  %vm15228_vm9 = vmmov %vm15209_vm3 }
 0x56e   :  { %4885 = vrot.lane.b32.xlu2 %v13742_v58, %s8110_s30  ;;  %v5942_v50 = vpop.f32.mrf.mxu2 }
 0x56f   :  { %5141 = vrot.lane.b32.xlu0 %v4727_v36, %s8111_s6  ;;  %6134 = vst.msk [vmem:[%s14574_s5] sm:$0xff] %vm2520_vm2, %v5942_v50 }
 0x570   :  { %v4864_v29 = vpop.permute.xlu2 %4863  ;;  %5403 = vrot.lane.b32.xlu1 %v4732_v47, %s8112_s28 }
 0x571   :  { %v4860_v60 = vpop.permute.xlu0 %4859 }
 0x572   :  { %v5376_v56 = vpop.permute.xlu1 %5375  ;;  %v5548_v43 = vsel %vm2390_vm0, %v13529_v61, %v4860_v60 }
 0x573   :  { %6726 = vmatmul.msk.f32.gmra.mxu2 %vm15217_vm10, %v5673_v24  ;;  %v5612_v31 = vsel %vm2455_vm1, %v5548_v43, %v5116_v59  ;;  %vm15229_vm10 = vmmov %vm15209_vm3 }
 0x574   :  { %v5676_v23 = vsel %vm2520_vm2, %v5612_v31, %v5372_v10  ;;  %v4736_v31 = vld [vmem:[#allocation2 + $0x1d1] sm:$0xff] }
 0x576   :  { %4887 = vrot.lane.b32.xlu2 %v13754_v19, %s8110_s30 }
 0x577   :  { %5143 = vrot.lane.b32.xlu0 %v4728_v52, %s8111_s6 }
 0x578   :  { %v4866_v6 = vpop.permute.xlu2 %4865  ;;  %5405 = vrot.lane.b32.xlu1 %v4733_v25, %s8112_s28 }
 0x579   :  { %v4862_v27 = vpop.permute.xlu0 %4861  ;;  %v5551_v59 = vsel %vm2390_vm0, %v13598_v20, %v4866_v6  ;;  %v13848_v6 = vld [vmem:[#allocation2 + $0x289] sm:$0xff] }
 0x57a   :  { %v5378_v17 = vpop.permute.xlu1 %5377  ;;  %v5549_v61 = vsel %vm2390_vm0, %v13538_v53, %v4862_v27  ;;  %v5550_v53 = vsel %vm2390_vm0, %v13592_v1, %v4864_v29  ;;  %v13816_v1 = vld [vmem:[#allocation2 + $0x1c8] sm:$0xff] }
 0x57b   :  { %6727 = vmatmul.msk.f32.gmra.mxu2 %vm15218_vm11, %v5674_v40  ;;  %vm15230_vm11 = vmmov %vm15209_vm3 }
 0x57e   :  { %4889 = vrot.lane.b32.xlu2 %v4603_v45, %s8110_s30  ;;  %v13856_v45 = vld [vmem:[#allocation2 + $0x1d0] sm:$0xff] }
 0x57f   :  { %5145 = vrot.lane.b32.xlu0 %v4729_v2, %s8111_s6 }
 0x580   :  { %v4868_v32 = vpop.permute.xlu2 %4867  ;;  %5407 = vrot.lane.b32.xlu1 %v4734_v5, %s8112_s28 }
 0x581   :  { %v5118_v36 = vpop.permute.xlu0 %5117  ;;  %v5552_v47 = vsel %vm2390_vm0, %v13610_v13, %v4868_v32 }
 0x582   :  { %v5380_v34 = vpop.permute.xlu1 %5379  ;;  %v5613_v2 = vsel %vm2455_vm1, %v5549_v61, %v5118_v36 }
 0x583   :  { %6728 = vmatmul.msk.f32.gmra.mxu2 %vm15219_vm12, %v5675_v16  ;;  %v5677_v62 = vsel %vm2520_vm2, %v5613_v2, %v5374_v41  ;;  %v13836_v41 = vld [vmem:[#allocation2 + $0x261] sm:$0xff]  ;;  %vm15231_vm12 = vmmov %vm15209_vm3 }
 0x586   :  { %4891 = vrot.lane.b32.xlu2 %v4604_v0, %s8110_s30  ;;  %v13876_v0 = vld [vmem:[#allocation2 + $0x271] sm:$0xff] }
 0x587   :  { %5147 = vrot.lane.b32.xlu0 %v4730_v30, %s8111_s6 }
 0x588   :  { %v4870_v9 = vpop.permute.xlu2 %4869  ;;  %5153 = vrot.lane.b32.xlu1 %v4733_v25, %s8111_s6 }
 0x589   :  { %v5120_v52 = vpop.permute.xlu0 %5119  ;;  %v5553_v38 = vsel %vm2390_vm0, %v13621_v11, %v4870_v9 }
 0x58a   :  { %v5382_v28 = vpop.permute.xlu1 %5381  ;;  %v5614_v30 = vsel %vm2455_vm1, %v5550_v53, %v5120_v52  ;;  %v13889_v52 = vld [vmem:[#allocation2 + $0x291] sm:$0xff] }
 0x58b   :  { %6729 = vmatmul.msk.f32.gmra.mxu2 %vm15220_vm13, %v5676_v23  ;;  %v5678_v55 = vsel %vm2520_vm2, %v5614_v30, %v5376_v56  ;;  %vm15232_vm13 = vmmov %vm15209_vm3 }
 0x58e   :  { %4893 = vrot.lane.b32.xlu2 %v13787_v4, %s8110_s30 }
 0x58f   :  { %5149 = vrot.lane.b32.xlu0 %v4669_v8, %s8111_s6  ;;  %v13897_v8 = vld [vmem:[#allocation2 + $0x1e0] sm:$0xff] }
 0x590   :  { %v13795_v14 = vpop.permute.xlu2 %4871  ;;  %5439 = vrot.lane.b32.xlu1 %v13808_v57, %s8112_s28 }
 0x591   :  { %v5122_v3 = vpop.permute.xlu0 %5121  ;;  %v5554_v43 = vsel %vm2390_vm0, %v13632_v15, %v13795_v14  ;;  %v13904_v14 = vld [vmem:[#allocation2 + $0x290] sm:$0xff] }
 0x592   :  { %v5384_v37 = vpop.permute.xlu1 %5383  ;;  %v5615_v29 = vsel %vm2455_vm1, %v5551_v59, %v5122_v3 }
 0x593   :  { %6730 = vmatmul.msk.f32.gmra.mxu2 %vm15221_vm14, %v5677_v62  ;;  %v5679_v60 = vsel %vm2520_vm2, %v5615_v29, %v5378_v17  ;;  %v13937_v29 = vld [vmem:[#allocation2 + $0x1e8] sm:$0xff]  ;;  %vm15233_vm14 = vmmov %vm15209_vm3 }
 0x596   :  { %4895 = vrot.lane.b32.xlu2 %v13800_v22, %s8110_s30 }
 0x597   :  { %5151 = vrot.lane.b32.xlu0 %v4670_v35, %s8111_s6 }
 0x598   :  { %v13810_v10 = vpop.permute.xlu2 %4873  ;;  %5155 = vrot.lane.b32.xlu1 %v4734_v5, %s8111_s6 }
 0x599   :  { %v5124_v54 = vpop.permute.xlu0 %5123  ;;  %v5555_v2 = vsel %vm2390_vm0, %v13643_v39, %v13810_v10  ;;  %v4737_v10 = vld [vmem:[#allocation2 + $0x1e1] sm:$0xff] }
 0x59a   :  { %v5386_v24 = vpop.permute.xlu1 %5385  ;;  %v5616_v50 = vsel %vm2455_vm1, %v5552_v47, %v5124_v54 }
 0x59b   :  { %6731 = vmatmul.msk.f32.gmra.mxu2 %vm15209_vm3, %v5678_v55  ;;  %v5680_v40 = vsel %vm2520_vm2, %v5616_v50, %v5380_v34 }
 0x59e   :  { %4897 = vrot.lane.b32.xlu2 %v13816_v1, %s8110_s30  ;;  %v5945_v7 = vpop.f32.mrf.mxu2 }
 0x59f   :  { %4927 = vrot.lane.b32.xlu0 %v13822_v42, %s8110_s30  ;;  %6135 = vst.msk [vmem:[%s14574_s5 + $0x8] sm:$0xff] %vm2520_vm2, %v5945_v7 }
 0x5a0   :  { %v13831_v48 = vpop.permute.xlu2 %4875  ;;  %5441 = vrot.lane.b32.xlu1 %v13848_v6, %s8112_s28 }
 0x5a1   :  { %v5126_v20 = vpop.permute.xlu0 %5125  ;;  %v5556_v30 = vsel %vm2390_vm0, %v13656_v18, %v13831_v48 }
 0x5a2   :  { %v5388_v56 = vpop.permute.xlu1 %5387  ;;  %v5617_v32 = vsel %vm2455_vm1, %v5553_v38, %v5126_v20  ;;  %v13944_v20 = vld [vmem:[#allocation2 + $0x2a0] sm:$0xff] }
 0x5a3   :  { %6732 = vmatmul.msk.f32.gmra.mxu2 %vm15222_vm15, %v5679_v60  ;;  %v5681_v16 = vsel %vm2520_vm2, %v5617_v32, %v5382_v28  ;;  %v13977_v32 = vld [vmem:[#allocation2 + $0x1f8] sm:$0xff]  ;;  %vm15234_vm15 = vmmov %vm15209_vm3 }
 0x5a6   :  { %5183 = vrot.lane.b32.xlu2 %v13836_v41, %s8111_s6  ;;  %v5948_v12 = vpop.f32.mrf.mxu2 }
 0x5a7   :  { %5409 = vrot.lane.b32.xlu0 %v4735_v33, %s8112_s28  ;;  %6136 = vst.msk [vmem:[%s14574_s5 + $0x10] sm:$0xff] %vm2520_vm2, %v5948_v12 }
 0x5a8   :  { %v13850_v27 = vpop.permute.xlu2 %4877  ;;  %5157 = vrot.lane.b32.xlu1 %v4735_v33, %s8111_s6 }
 0x5a9   :  { %v5128_v13 = vpop.permute.xlu0 %5127  ;;  %v5557_v48 = vsel %vm2390_vm0, %v13670_v49, %v13850_v27  ;;  %v4738_v27 = vld [vmem:[#allocation2 + $0x1e9] sm:$0xff] }
 0x5aa   :  { %v5390_v17 = vpop.permute.xlu1 %5389  ;;  %v5618_v9 = vsel %vm2455_vm1, %v5554_v43, %v5128_v13 }
 0x5ab   :  { %6733 = vmatmul.msk.f32.gmra.mxu2 %vm15223_vm4, %v5680_v40  ;;  %v5682_v34 = vsel %vm2520_vm2, %v5618_v9, %v5384_v37  ;;  %v13929_v37 = vld [vmem:[#allocation2 + $0x2a1] sm:$0xff]  ;;  %vm15235_vm4 = vmmov %vm15209_vm3 }
 0x5ae   :  { %4899 = vrot.lane.b32.xlu2 %v13856_v45, %s8110_s30  ;;  %v5951_v25 = vpop.f32.mrf.mxu2 }
 0x5af   :  { %4929 = vrot.lane.b32.xlu0 %v13862_v26, %s8110_s30  ;;  %6137 = vst.msk [vmem:[%s14574_s5 + $0x18] sm:$0xff] %vm2520_vm2, %v5951_v25 }
 0x5b0   :  { %v13871_v36 = vpop.permute.xlu2 %4879  ;;  %5443 = vrot.lane.b32.xlu1 %v13889_v52, %s8112_s28 }
 0x5b1   :  { %v5130_v11 = vpop.permute.xlu0 %5129  ;;  %v5558_v50 = vsel %vm2390_vm0, %v13681_v51, %v13871_v36 }
 0x5b2   :  { %v5392_v61 = vpop.permute.xlu1 %5391  ;;  %v5619_v62 = vsel %vm2455_vm1, %v5555_v2, %v5130_v11  ;;  %v13984_v11 = vld [vmem:[#allocation2 + $0x2a8] sm:$0xff] }
 0x5b3   :  { %6734 = vmatmul.msk.f32.gmra.mxu2 %vm15224_vm5, %v5681_v16  ;;  %v5683_v53 = vsel %vm2520_vm2, %v5619_v62, %v5386_v24  ;;  %v14017_v62 = vld [vmem:[#allocation2 + $0x200] sm:$0xff]  ;;  %vm15236_vm5 = vmmov %vm15209_vm3 }
 0x5b6   :  { %5185 = vrot.lane.b32.xlu2 %v13876_v0, %s8111_s6  ;;  %v5954_v5 = vpop.f32.mrf.mxu2 }
 0x5b7   :  { %5411 = vrot.lane.b32.xlu0 %v4736_v31, %s8112_s28  ;;  %6138 = vst.msk [vmem:[%s14574_s5 + $0x20] sm:$0xff] %vm2520_vm2, %v5954_v5 }
 0x5b8   :  { %v13891_v23 = vpop.permute.xlu2 %4881  ;;  %5159 = vrot.lane.b32.xlu1 %v4736_v31, %s8111_s6 }
 0x5b9   :  { %v5132_v15 = vpop.permute.xlu0 %5131  ;;  %v5559_v36 = vsel %vm2390_vm0, %v13694_v44, %v13891_v23  ;;  %v4739_v23 = vld [vmem:[#allocation2 + $0x1f9] sm:$0xff] }
 0x5ba   :  { %v5394_v35 = vpop.permute.xlu1 %5393  ;;  %v5620_v55 = vsel %vm2455_vm1, %v5556_v30, %v5132_v15 }
 0x5bb   :  { %6735 = vmatmul.msk.f32.gmra.mxu2 %vm15225_vm6, %v5682_v34  ;;  %vm15237_vm6 = vmmov %vm15209_vm3 }
 0x5be   :  { %4901 = vrot.lane.b32.xlu2 %v13897_v8, %s8110_s30  ;;  %v5957_v3 = vpop.f32.mrf.mxu2 }
 0x5bf   :  { %4931 = vrot.lane.b32.xlu0 %v13904_v14, %s8110_s30  ;;  %6139 = vst.msk [vmem:[%s14574_s5 + $0x28] sm:$0xff] %vm2520_vm2, %v5957_v3 }
 0x5c0   :  { %v13913_v28 = vpop.permute.xlu2 %4883  ;;  %5445 = vrot.lane.b32.xlu1 %v13929_v37, %s8112_s28 }
 0x5c1   :  { %v5134_v39 = vpop.permute.xlu0 %5133  ;;  %v5560_v9 = vsel %vm2390_vm0, %v13708_v21, %v13913_v28 }
 0x5c2   :  { %v5396_v7 = vpop.permute.xlu1 %5395  ;;  %v5621_v24 = vsel %vm2455_vm1, %v5557_v48, %v5134_v39  ;;  %v14024_v39 = vld [vmem:[#allocation2 + $0x2b8] sm:$0xff] }
 0x5c3   :  { %6736 = vmatmul.msk.f32.gmra.mxu2 %vm15226_vm7, %v5683_v53  ;;  %v5685_v33 = vsel %vm2520_vm2, %v5621_v24, %v5390_v17  ;;  %v14059_v24 = vld [vmem:[#allocation2 + $0x210] sm:$0xff]  ;;  %vm15238_vm7 = vmmov %vm15209_vm3 }
 0x5c6   :  { %5187 = vrot.lane.b32.xlu2 %v13808_v57, %s8111_s6  ;;  %v5960_v54 = vpop.f32.mrf.mxu2  ;;  %v5684_v57 = vsel %vm2520_vm2, %v5620_v55, %v5388_v56  ;;  %v13969_v56 = vld [vmem:[#allocation2 + $0x2a9] sm:$0xff] }
 0x5c7   :  { %5413 = vrot.lane.b32.xlu0 %v4737_v10, %s8112_s28  ;;  %6140 = vst.msk [vmem:[%s14574_s5 + $0x30] sm:$0xff] %vm2520_vm2, %v5960_v54 }
 0x5c8   :  { %v13931_v59 = vpop.permute.xlu2 %4885  ;;  %5161 = vrot.lane.b32.xlu1 %v4737_v10, %s8111_s6 }
 0x5c9   :  { %v5136_v18 = vpop.permute.xlu0 %5135  ;;  %v5561_v28 = vsel %vm2390_vm0, %v13719_v46, %v13931_v59  ;;  %v4740_v59 = vld [vmem:[#allocation2 + $0x201] sm:$0xff] }
 0x5ca   :  { %v5398_v12 = vpop.permute.xlu1 %5397  ;;  %v5622_v40 = vsel %vm2455_vm1, %v5558_v50, %v5136_v18 }
 0x5cb   :  { %6737 = vmatmul.msk.f32.gmra.mxu2 %vm15227_vm8, %v5684_v57  ;;  %vm15239_vm8 = vmmov %vm15209_vm3 }
 0x5ce   :  { %4903 = vrot.lane.b32.xlu2 %v13937_v29, %s8110_s30  ;;  %v5963_v60 = vpop.f32.mrf.mxu2 }
 0x5cf   :  { %4933 = vrot.lane.b32.xlu0 %v13944_v20, %s8110_s30  ;;  %6141 = vst.msk [vmem:[%s14574_s5 + $0x38] sm:$0xff] %vm2520_vm2, %v5963_v60 }
 0x5d0   :  { %v13953_v47 = vpop.permute.xlu2 %4887  ;;  %5447 = vrot.lane.b32.xlu1 %v13969_v56, %s8112_s28 }
 0x5d1   :  { %v5138_v49 = vpop.permute.xlu0 %5137  ;;  %v5562_v55 = vsel %vm2390_vm0, %v13730_v63, %v13953_v47 }
 0x5d2   :  { %v5400_v25 = vpop.permute.xlu1 %5399  ;;  %v5623_v17 = vsel %vm2455_vm1, %v5559_v36, %v5138_v49  ;;  %v14066_v49 = vld [vmem:[#allocation2 + $0x2c0] sm:$0xff] }
 0x5d3   :  { %6738 = vmatmul.msk.f32.gmra.mxu2 %vm15228_vm9, %v5685_v33  ;;  %v5687_v31 = vsel %vm2520_vm2, %v5623_v17, %v5394_v35  ;;  %v4540_v17 = vld [vmem:[#allocation2 + $0x198] sm:$0xff]  ;;  %vm15240_vm9 = vmmov %vm15209_vm3 }
 0x5d6   :  { %5189 = vrot.lane.b32.xlu2 %v13848_v6, %s8111_s6  ;;  %v5966_v13 = vpop.f32.mrf.mxu2  ;;  %v5686_v6 = vsel %vm2520_vm2, %v5622_v40, %v5392_v61  ;;  %v14009_v61 = vld [vmem:[#allocation2 + $0x2b9] sm:$0xff] }
 0x5d7   :  { %5415 = vrot.lane.b32.xlu0 %v4738_v27, %s8112_s28  ;;  %6142 = vst.msk [vmem:[%s14574_s5 + $0x40] sm:$0xff] %vm2520_vm2, %v5966_v13 }
 0x5d8   :  { %v13971_v38 = vpop.permute.xlu2 %4889  ;;  %5163 = vrot.lane.b32.xlu1 %v4738_v27, %s8111_s6 }
 0x5d9   :  { %v5140_v51 = vpop.permute.xlu0 %5139  ;;  %v5563_v47 = vsel %vm2390_vm0, %v13742_v58, %v13971_v38  ;;  %v4741_v38 = vld [vmem:[#allocation2 + $0x211] sm:$0xff] }
 0x5da   :  { %v5402_v5 = vpop.permute.xlu1 %5401  ;;  %v5624_v34 = vsel %vm2455_vm1, %v5560_v9, %v5140_v51 }
 0x5db   :  { %6739 = vmatmul.msk.f32.gmra.mxu2 %vm15229_vm10, %v5686_v6  ;;  %vm15241_vm10 = vmmov %vm15209_vm3 }
 0x5de   :  { %4905 = vrot.lane.b32.xlu2 %v13977_v32, %s8110_s30  ;;  %v5969_v16 = vpop.f32.mrf.mxu2 }
 0x5df   :  { %4935 = vrot.lane.b32.xlu0 %v13984_v11, %s8110_s30  ;;  %6143 = vst.msk [vmem:[%s14574_s5 + $0x48] sm:$0xff] %vm2520_vm2, %v5969_v16 }
 0x5e0   :  { %v13993_v43 = vpop.permute.xlu2 %4891  ;;  %5449 = vrot.lane.b32.xlu1 %v14009_v61, %s8112_s28 }
 0x5e1   :  { %v5142_v44 = vpop.permute.xlu0 %5141  ;;  %v5564_v40 = vsel %vm2390_vm0, %v13754_v19, %v13993_v43  ;;  %v14097_v43 = vld [vmem:[#allocation2 + $0x218] sm:$0xff] }
 0x5e2   :  { %v5404_v3 = vpop.permute.xlu1 %5403  ;;  %v5625_v35 = vsel %vm2455_vm1, %v5561_v28, %v5142_v44 }
 0x5e3   :  { %6740 = vmatmul.msk.f32.gmra.mxu2 %vm15230_vm11, %v5687_v31  ;;  %v5689_v10 = vsel %vm2520_vm2, %v5625_v35, %v5398_v12  ;;  %v14103_v31 = vld [vmem:[#allocation2 + $0x2d0] sm:$0xff]  ;;  %vm15242_vm11 = vmmov %vm15209_vm3 }
 0x5e6   :  { %5191 = vrot.lane.b32.xlu2 %v13889_v52, %s8111_s6  ;;  %v5972_v15 = vpop.f32.mrf.mxu2  ;;  %v5688_v52 = vsel %vm2520_vm2, %v5624_v34, %v5396_v7  ;;  %v14049_v7 = vld [vmem:[#allocation2 + $0x2c1] sm:$0xff] }
 0x5e7   :  { %5417 = vrot.lane.b32.xlu0 %v4739_v23, %s8112_s28  ;;  %6144 = vst.msk [vmem:[%s14574_s5 + $0x50] sm:$0xff] %vm2520_vm2, %v5972_v15  ;;  %v14113_v15 = vld [vmem:[#allocation2 + $0x260] sm:$0xff] }
 0x5e8   :  { %v14011_v2 = vpop.permute.xlu2 %4893  ;;  %5165 = vrot.lane.b32.xlu1 %v4739_v23, %s8111_s6 }
 0x5e9   :  { %v5144_v21 = vpop.permute.xlu0 %5143  ;;  %v5565_v44 = vsel %vm2390_vm0, %v4540_v17, %v14011_v2 }
 0x5ea   :  { %v5406_v54 = vpop.permute.xlu1 %5405  ;;  %v5626_v57 = vsel %vm2455_vm1, %v5562_v55, %v5144_v21  ;;  %v14132_v55 = vld [vmem:[#allocation2 + $0x2d9] sm:$0xff] }
 0x5eb   :  { %6741 = vmatmul.msk.f32.gmra.mxu2 %vm15231_vm12, %v5688_v52  ;;  %vm15243_vm12 = vmmov %vm15209_vm3 }
 0x5ee   :  { %4907 = vrot.lane.b32.xlu2 %v14017_v62, %s8110_s30  ;;  %v5975_v53 = vpop.f32.mrf.mxu2 }
 0x5ef   :  { %4937 = vrot.lane.b32.xlu0 %v14024_v39, %s8110_s30  ;;  %6145 = vst.msk [vmem:[%s14574_s5 + $0x58] sm:$0xff] %vm2520_vm2, %v5975_v53  ;;  %v4541_v53 = vld [vmem:[#allocation2 + $0x1a0] sm:$0xff] }
 0x5f0   :  { %v14033_v30 = vpop.permute.xlu2 %4895  ;;  %5451 = vrot.lane.b32.xlu1 %v14049_v7, %s8112_s28 }
 0x5f1   :  { %v5146_v46 = vpop.permute.xlu0 %5145  ;;  %v5566_v35 = vsel %vm2390_vm0, %v4541_v53, %v14033_v30 }
 0x5f2   :  { %v14056_v60 = vpop.permute.xlu1 %5407  ;;  %v5627_v12 = vsel %vm2455_vm1, %v5563_v47, %v5146_v46  ;;  %v4742_v46 = vld [vmem:[#allocation2 + $0x219] sm:$0xff] }
 0x5f3   :  { %6742 = vmatmul.msk.f32.gmra.mxu2 %vm15232_vm13, %v5689_v10  ;;  %v5691_v27 = vsel %vm2520_vm2, %v5627_v12, %v5402_v5  ;;  %v14156_v12 = vld [vmem:[#allocation2 + $0x270] sm:$0xff]  ;;  %vm15244_vm13 = vmmov %vm15209_vm3 }
 0x5f6   :  { %5193 = vrot.lane.b32.xlu2 %v13929_v37, %s8111_s6  ;;  %v5978_v18 = vpop.f32.mrf.mxu2  ;;  %v5690_v37 = vsel %vm2520_vm2, %v5626_v57, %v5400_v25  ;;  %v14089_v25 = vld [vmem:[#allocation2 + $0x2d1] sm:$0xff]  ;;  %v14139_v57 = vld [vmem:[#allocation2 + $0x228] sm:$0xff] }
 0x5f7   :  { %5419 = vrot.lane.b32.xlu0 %v4740_v59, %s8112_s28  ;;  %6146 = vst.msk [vmem:[%s14574_s5 + $0x60] sm:$0xff] %vm2520_vm2, %v5978_v18 }
 0x5f8   :  { %v14051_v48 = vpop.permute.xlu2 %4897  ;;  %5167 = vrot.lane.b32.xlu1 %v4740_v59, %s8111_s6 }
 0x5f9   :  { %v5148_v63 = vpop.permute.xlu0 %5147 }
 0x5fa   :  { %v5154_v13 = vpop.permute.xlu1 %5153  ;;  %v5628_v6 = vsel %vm2455_vm1, %v5564_v40, %v5148_v63  ;;  %v14143_v63 = vld [vmem:[#allocation2 + $0x2d8] sm:$0xff] }
 0x5fb   :  { %6743 = vmatmul.msk.f32.gmra.mxu2 %vm15233_vm14, %v5690_v37  ;;  %vm15245_vm14 = vmmov %vm15209_vm3 }
 0x5fe   :  { %4909 = vrot.lane.b32.xlu2 %v14059_v24, %s8110_s30  ;;  %v5981_v33 = vpop.f32.mrf.mxu2 }
 0x5ff   :  { %4939 = vrot.lane.b32.xlu0 %v14066_v49, %s8110_s30  ;;  %6147 = vst.msk [vmem:[%s14574_s5 + $0x68] sm:$0xff] %vm2520_vm2, %v5981_v33 }
 0x600   :  { %v5184_v50 = vpop.permute.xlu2 %5183  ;;  %5453 = vrot.lane.b32.xlu1 %v14089_v25, %s8112_s28 }
 0x601   :  { %v5150_v58 = vpop.permute.xlu0 %5149 }
 0x602   :  { %v5440_v16 = vpop.permute.xlu1 %5439  ;;  %v5629_v9 = vsel %vm2455_vm1, %v5565_v44, %v5150_v58  ;;  %v14182_v44 = vld [vmem:[#allocation2 + $0x230] sm:$0xff] }
 0x603   :  { %6744 = vmatmul.msk.f32.gmra.mxu2 %vm15209_vm3, %v5691_v27  ;;  %v5693_v21 = vsel %vm2520_vm2, %v5629_v9, %v5406_v54 }
 0x606   :  { %5195 = vrot.lane.b32.xlu2 %v13969_v56, %s8111_s6  ;;  %v5984_v51 = vpop.f32.mrf.mxu2  ;;  %v5692_v56 = vsel %vm2520_vm2, %v5628_v6, %v5404_v3 }
 0x607   :  { %5421 = vrot.lane.b32.xlu0 %v4741_v38, %s8112_s28  ;;  %6148 = vst.msk [vmem:[%s14574_s5 + $0x70] sm:$0xff] %vm2520_vm2, %v5984_v51  ;;  %v14172_v51 = vld [vmem:[#allocation2 + $0x2e9] sm:$0xff] }
 0x608   :  { %v14091_v36 = vpop.permute.xlu2 %4899  ;;  %5169 = vrot.lane.b32.xlu1 %v4741_v38, %s8111_s6 }
 0x609   :  { %v5152_v19 = vpop.permute.xlu0 %5151  ;;  %v5568_v6 = vsel %vm2390_vm0, %v13800_v22, %v14091_v36 }
 0x60a   :  { %v5156_v52 = vpop.permute.xlu1 %5155  ;;  %v5630_v54 = vsel %vm2455_vm1, %v5566_v35, %v5152_v19 }
 0x60b   :  { %6745 = vmatmul.msk.f32.gmra.mxu2 %vm15234_vm15, %v5692_v56  ;;  %vm15246_vm15 = vmmov %vm15209_vm3 }
 0x60e   :  { %4911 = vrot.lane.b32.xlu2 %v14097_v43, %s8110_s30  ;;  %v5987_v5 = vpop.f32.mrf.mxu2 }
 0x60f   :  { %4941 = vrot.lane.b32.xlu0 %v14103_v31, %s8110_s30  ;;  %6149 = vst.msk [vmem:[%s14574_s5 + $0x78] sm:$0xff] %vm2520_vm2, %v5987_v5  ;;  %v14186_v5 = vld [vmem:[#allocation2 + $0x2e8] sm:$0xff] }
 0x610   :  { %v5186_v23 = vpop.permute.xlu2 %5185  ;;  %5455 = vrot.lane.b32.xlu1 %v14132_v55, %s8112_s28 }
 0x611   :  { %v4928_v34 = vpop.permute.xlu0 %4927 }
 0x612   :  { %v5582_v2 = vsel %vm2390_vm0, %v14113_v15, %v4928_v34  ;;  %v5442_v18 = vpop.permute.xlu1 %5441 }
 0x613   :  { %6746 = vmatmul.msk.f32.gmra.mxu2 %vm15235_vm4, %v5693_v21  ;;  %v5646_v3 = vsel %vm2455_vm1, %v5582_v2, %v5184_v50  ;;  %vm15247_vm4 = vmmov %vm15209_vm3 }
 0x614   :  { %v5710_v28 = vsel %vm2520_vm2, %v5646_v3, %v5440_v16 }
 0x615   :  { %6763 = vmatmul.msk.f32.vlgmr.msra.gmra.mxu3 %vm15236_vm5, %v5710_v28  ;;  %vm15248_vm5 = vmmov %vm15209_vm3 }
 0x616   :  { %5197 = vrot.lane.b32.xlu2 %v14009_v61, %s8111_s6  ;;  %v5990_v10 = vpop.f32.mrf.mxu2  ;;  %v5694_v61 = vsel %vm2520_vm2, %v5630_v54, %v14056_v60  ;;  %v5567_v60 = vsel %vm2390_vm0, %v13787_v4, %v14051_v48  ;;  %v4743_v48 = vld [vmem:[#allocation2 + $0x229] sm:$0xff]  ;;  %v14216_v54 = vld [vmem:[#allocation2 + $0x240] sm:$0xff] }
 0x617   :  { %5423 = vrot.lane.b32.xlu0 %v4742_v46, %s8112_s28  ;;  %6150 = vst.msk [vmem:[%s14574_s5 + $0x80] sm:$0xff] %vm2520_vm2, %v5990_v10  ;;  %v5631_v33 = vsel %vm2455_vm1, %v5567_v60, %v5154_v13 }
 0x618   :  { %v4902_v59 = vpop.permute.xlu2 %4901  ;;  %5171 = vrot.lane.b32.xlu1 %v4742_v46, %s8111_s6 }
 0x619   :  { %v5410_v30 = vpop.permute.xlu0 %5409  ;;  %v5569_v28 = vsel %vm2390_vm0, %v13816_v1, %v4902_v59 }
 0x61a   :  { %v5695_v58 = vsel %vm2520_vm2, %v5631_v33, %v5410_v30  ;;  %v5158_v40 = vpop.permute.xlu1 %5157  ;;  %v14220_v30 = vld [vmem:[#allocation2 + $0x2f0] sm:$0xff]  ;;  %v4745_v33 = vld [vmem:[#allocation2 + $0x241] sm:$0xff] }
 0x61b   :  { %6747 = vmatmul.msk.f32.gmra.mxu2 %vm15237_vm6, %v5694_v61  ;;  %vm15249_vm6 = vmmov %vm15209_vm3 }
 0x61e   :  { %4913 = vrot.lane.b32.xlu2 %v14139_v57, %s8110_s30  ;;  %v5993_v37 = vpop.f32.mrf.mxu2 }
 0x61f   :  { %4943 = vrot.lane.b32.xlu0 %v14143_v63, %s8110_s30  ;;  %6151 = vst.msk [vmem:[%s14574_s5 + $0x88] sm:$0xff] %vm2520_vm2, %v5993_v37 }
 0x620   :  { %v5188_v47 = vpop.permute.xlu2 %5187  ;;  %5457 = vrot.lane.b32.xlu1 %v14172_v51, %s8112_s28 }
 0x621   :  { %v4930_v50 = vpop.permute.xlu0 %4929 }
 0x622   :  { %v5583_v27 = vsel %vm2390_vm0, %v14156_v12, %v4930_v50  ;;  %v5444_v17 = vpop.permute.xlu1 %5443 }
 0x623   :  { %6748 = vmatmul.msk.f32.gmra.mxu2 %vm15238_vm7, %v5695_v58  ;;  %v5647_v38 = vsel %vm2455_vm1, %v5583_v27, %v5186_v23  ;;  %vm15250_vm7 = vmmov %vm15209_vm3 }
 0x624   :  { %v5711_v4 = vsel %vm2520_vm2, %v5647_v38, %v5442_v18 }
 0x625   :  { %6764 = vmatmul.msk.f32.gmra.mxu3 %vm15239_vm8, %v5711_v4  ;;  %vm15251_vm8 = vmmov %vm15209_vm3 }
 0x626   :  { %5199 = vrot.lane.b32.xlu2 %v14049_v7, %s8111_s6  ;;  %v5996_v13 = vpop.f32.mrf.mxu2  ;;  %v5632_v7 = vsel %vm2455_vm1, %v5568_v6, %v5156_v52  ;;  %v4744_v52 = vld [vmem:[#allocation2 + $0x231] sm:$0xff] }
 0x627   :  { %5425 = vrot.lane.b32.xlu0 %v4743_v48, %s8112_s28  ;;  %6152 = vst.msk [vmem:[%s14574_s5 + $0x90] sm:$0xff] %vm2520_vm2, %v5996_v13  ;;  %v14254_v13 = vld [vmem:[#allocation2 + $0x300] sm:$0xff] }
 0x628   :  { %v4904_v19 = vpop.permute.xlu2 %4903  ;;  %5173 = vrot.lane.b32.xlu1 %v4743_v48, %s8111_s6  ;;  %v14250_v48 = vld [vmem:[#allocation2 + $0x248] sm:$0xff] }
 0x629   :  { %v5412_v56 = vpop.permute.xlu0 %5411  ;;  %v5570_v58 = vsel %vm2390_vm0, %v13856_v45, %v4904_v19 }
 0x62a   :  { %v5696_v16 = vsel %vm2520_vm2, %v5632_v7, %v5412_v56  ;;  %v5160_v34 = vpop.permute.xlu1 %5159 }
 0x62b   :  { %6749 = vmatmul.msk.f32.gmra.mxu2 %vm15240_vm9, %v5696_v16  ;;  %vm15252_vm9 = vmmov %vm15209_vm3 }
 0x62e   :  { %4915 = vrot.lane.b32.xlu2 %v14182_v44, %s8110_s30  ;;  %v5999_v22 = vpop.f32.mrf.mxu2 }
 0x62f   :  { %4945 = vrot.lane.b32.xlu0 %v14186_v5, %s8110_s30  ;;  %6153 = vst.msk [vmem:[%s14574_s5 + $0x98] sm:$0xff] %vm2520_vm2, %v5999_v22  ;;  %v4746_v22 = vld [vmem:[#allocation2 + $0x249] sm:$0xff] }
 0x630   :  { %v5190_v36 = vpop.permute.xlu2 %5189 }
 0x631   :  { %v4932_v9 = vpop.permute.xlu0 %4931 }
 0x632   :  { %v5584_v23 = vsel %vm2390_vm0, %v13822_v42, %v4932_v9  ;;  %v14207_v42 = vld [vmem:[#allocation2 + $0x2f1] sm:$0xff]  ;;  %v5446_v10 = vpop.permute.xlu1 %5445 }
 0x633   :  { %v5648_v2 = vsel %vm2455_vm1, %v5584_v23, %v5188_v47  ;;  %5459 = vrot.lane.b32.xlu1 %v14207_v42, %s8112_s28 }
 0x634   :  { %v5712_v21 = vsel %vm2520_vm2, %v5648_v2, %v5444_v17 }
 0x635   :  { %6765 = vmatmul.msk.f32.gmra.mxu3 %vm15241_vm10, %v5712_v21  ;;  %vm15253_vm10 = vmmov %vm15209_vm3 }
 0x636   :  { %5201 = vrot.lane.b32.xlu2 %v14089_v25, %s8111_s6  ;;  %v6002_v3 = vpop.f32.mrf.mxu2  ;;  %v5633_v25 = vsel %vm2455_vm1, %v5569_v28, %v5158_v40 }
 0x637   :  { %5427 = vrot.lane.b32.xlu0 %v4744_v52, %s8112_s28  ;;  %6154 = vst.msk [vmem:[%s14574_s5 + $0xa0] sm:$0xff] %vm2520_vm2, %v6002_v3  ;;  %v14288_v3 = vld [vmem:[#allocation2 + $0x308] sm:$0xff] }
 0x638   :  { %v4906_v53 = vpop.permute.xlu2 %4905 }
 0x639   :  { %v5414_v35 = vpop.permute.xlu0 %5413  ;;  %v5571_v9 = vsel %vm2390_vm0, %v13897_v8, %v4906_v53 }
 0x63a   :  { %v5697_v46 = vsel %vm2520_vm2, %v5633_v25, %v5414_v35  ;;  %v5162_v37 = vpop.permute.xlu1 %5161 }
 0x63b   :  { %6750 = vmatmul.msk.f32.gmra.mxu2 %vm15242_vm11, %v5697_v46  ;;  %5175 = vrot.lane.b32.xlu1 %v4744_v52, %s8111_s6  ;;  %v14284_v52 = vld [vmem:[#allocation2 + $0x258] sm:$0xff]  ;;  %vm15254_vm11 = vmmov %vm15209_vm3 }
 0x63e   :  { %4917 = vrot.lane.b32.xlu2 %v14216_v54, %s8110_s30  ;;  %v6005_v1 = vpop.f32.mrf.mxu2 }
 0x63f   :  { %4947 = vrot.lane.b32.xlu0 %v14220_v30, %s8110_s30  ;;  %6155 = vst.msk [vmem:[%s14574_s5 + $0xa8] sm:$0xff] %vm2520_vm2, %v6005_v1  ;;  %v4763_v1 = vld [vmem:[#allocation2 + $0x319] sm:$0xff] }
 0x640   :  { %v5192_v59 = vpop.permute.xlu2 %5191 }
 0x641   :  { %v4934_v61 = vpop.permute.xlu0 %4933 }
 0x642   :  { %v5585_v18 = vsel %vm2390_vm0, %v13862_v26, %v4934_v61  ;;  %v14241_v26 = vld [vmem:[#allocation2 + $0x301] sm:$0xff]  ;;  %v5448_v4 = vpop.permute.xlu1 %5447 }
 0x643   :  { %v5649_v60 = vsel %vm2455_vm1, %v5585_v18, %v5190_v36  ;;  %5461 = vrot.lane.b32.xlu1 %v14241_v26, %s8112_s28 }
 0x644   :  { %v5713_v47 = vsel %vm2520_vm2, %v5649_v60, %v5446_v10 }
 0x645   :  { %6766 = vmatmul.msk.f32.gmra.mxu3 %vm15243_vm12, %v5713_v47  ;;  %vm15255_vm12 = vmmov %vm15209_vm3 }
 0x646   :  { %5203 = vrot.lane.b32.xlu2 %v14132_v55, %s8111_s6  ;;  %v6008_v50 = vpop.f32.mrf.mxu2  ;;  %v5634_v55 = vsel %vm2455_vm1, %v5570_v58, %v5160_v34 }
 0x647   :  { %5429 = vrot.lane.b32.xlu0 %v4745_v33, %s8112_s28  ;;  %6156 = vst.msk [vmem:[%s14574_s5 + $0xb0] sm:$0xff] %vm2520_vm2, %v6008_v50 }
 0x648   :  { %v4908_v27 = vpop.permute.xlu2 %4907 }
 0x649   :  { %v5416_v40 = vpop.permute.xlu0 %5415 }
 0x64a   :  { %v5698_v38 = vsel %vm2520_vm2, %v5634_v55, %v5416_v40  ;;  %v5164_v56 = vpop.permute.xlu1 %5163 }
 0x64b   :  { %6751 = vmatmul.msk.f32.gmra.mxu2 %vm15244_vm13, %v5698_v38  ;;  %5177 = vrot.lane.b32.xlu1 %v4745_v33, %s8111_s6  ;;  %v4635_v33 = vld [vmem:[#allocation2 + $0x318] sm:$0xff]  ;;  %v4764_v38 = vld [vmem:[#allocation2 + $0x321] sm:$0xff]  ;;  %vm15256_vm13 = vmmov %vm15209_vm3 }
 0x64e   :  { %4919 = vrot.lane.b32.xlu2 %v14250_v48, %s8110_s30  ;;  %v6011_v45 = vpop.f32.mrf.mxu2 }
 0x64f   :  { %4949 = vrot.lane.b32.xlu0 %v14254_v13, %s8110_s30  ;;  %6157 = vst.msk [vmem:[%s14574_s5 + $0xb8] sm:$0xff] %vm2520_vm2, %v6011_v45 }
 0x650   :  { %v5194_v6 = vpop.permute.xlu2 %5193 }
 0x651   :  { %v4936_v19 = vpop.permute.xlu0 %4935 }
 0x652   :  { %v5586_v7 = vsel %vm2390_vm0, %v13904_v14, %v4936_v19  ;;  %v14275_v14 = vld [vmem:[#allocation2 + $0x309] sm:$0xff]  ;;  %v5450_v21 = vpop.permute.xlu1 %5449 }
 0x653   :  { %v5650_v16 = vsel %vm2455_vm1, %v5586_v7, %v5192_v59  ;;  %5463 = vrot.lane.b32.xlu1 %v14275_v14, %s8112_s28  ;;  %v4747_v59 = vld [vmem:[#allocation2 + $0x259] sm:$0xff] }
 0x654   :  { %v5714_v17 = vsel %vm2520_vm2, %v5650_v16, %v5448_v4 }
 0x655   :  { %6767 = vmatmul.msk.f32.gmra.mxu3 %vm15245_vm14, %v5714_v17  ;;  %vm15257_vm14 = vmmov %vm15209_vm3 }
 0x656   :  { %5205 = vrot.lane.b32.xlu2 %v14172_v51, %s8111_s6  ;;  %v6014_v36 = vpop.f32.mrf.mxu2  ;;  %v5635_v51 = vsel %vm2455_vm1, %v5571_v9, %v5162_v37 }
 0x657   :  { %5431 = vrot.lane.b32.xlu0 %v4746_v22, %s8112_s28  ;;  %6158 = vst.msk [vmem:[%s14574_s5 + $0xc0] sm:$0xff] %vm2520_vm2, %v6014_v36 }
 0x658   :  { %v4910_v23 = vpop.permute.xlu2 %4909 }
 0x659   :  { %v5418_v34 = vpop.permute.xlu0 %5417 }
 0x65a   :  { %v5699_v2 = vsel %vm2520_vm2, %v5635_v51, %v5418_v34  ;;  %v5166_v35 = vpop.permute.xlu1 %5165 }
 0x65b   :  { %6752 = vmatmul.msk.f32.gmra.mxu2 %vm15209_vm3, %v5699_v2  ;;  %5179 = vrot.lane.b32.xlu1 %v4746_v22, %s8111_s6 }
 0x65e   :  { %4921 = vrot.lane.b32.xlu2 %v14284_v52, %s8110_s30  ;;  %v6017_v8 = vpop.f32.mrf.mxu2 }
 0x65f   :  { %4951 = vrot.lane.b32.xlu0 %v14288_v3, %s8110_s30  ;;  %6159 = vst.msk [vmem:[%s14574_s5 + $0xc8] sm:$0xff] %vm2520_vm2, %v6017_v8 }
 0x660   :  { %v5196_v28 = vpop.permute.xlu2 %5195 }
 0x661   :  { %v4938_v53 = vpop.permute.xlu0 %4937 }
 0x662   :  { %v5587_v25 = vsel %vm2390_vm0, %v13944_v20, %v4938_v53  ;;  %v5572_v20 = vsel %vm2390_vm0, %v13937_v29, %v4908_v27  ;;  %v5452_v47 = vpop.permute.xlu1 %5451 }
 0x663   :  { %v5651_v46 = vsel %vm2455_vm1, %v5587_v25, %v5194_v6  ;;  %5465 = vrot.lane.b32.xlu1 %v4763_v1, %s8112_s28  ;;  %v5636_v37 = vsel %vm2455_vm1, %v5572_v20, %v5164_v56 }
 0x664   :  { %v5715_v10 = vsel %vm2520_vm2, %v5651_v46, %v5450_v21 }
 0x665   :  { %6768 = vmatmul.msk.f32.gmra.mxu3 %vm15246_vm15, %v5715_v10  ;;  %vm15258_vm15 = vmmov %vm15209_vm3 }
 0x666   :  { %5207 = vrot.lane.b32.xlu2 %v14207_v42, %s8111_s6  ;;  %v6020_v61 = vpop.f32.mrf.mxu2 }
 0x667   :  { %5433 = vrot.lane.b32.xlu0 %v4747_v59, %s8112_s28  ;;  %6160 = vst.msk [vmem:[%s14574_s5 + $0xd0] sm:$0xff] %vm2520_vm2, %v6020_v61 }
 0x668   :  { %v4912_v18 = vpop.permute.xlu2 %4911 }
 0x669   :  { %v5420_v60 = vpop.permute.xlu0 %5419 }
 0x66a   :  { %v5700_v42 = vsel %vm2520_vm2, %v5636_v37, %v5420_v60  ;;  %v5168_v55 = vpop.permute.xlu1 %5167 }
 0x66b   :  { %6753 = vmatmul.msk.f32.gmra.mxu2 %vm15247_vm4, %v5700_v42  ;;  %5181 = vrot.lane.b32.xlu1 %v4747_v59, %s8111_s6  ;;  %vm15259_vm4 = vmmov %vm15209_vm3 }
 0x66e   :  { %4923 = vrot.lane.b32.xlu2 %v14113_v15, %s8110_s30  ;;  %v6023_v50 = vpop.f32.mrf.mxu2 }
 0x66f   :  { %4953 = vrot.lane.b32.xlu0 %v4635_v33, %s8110_s30  ;;  %6161 = vst.msk [vmem:[%s14574_s5 + $0xd8] sm:$0xff] %vm2520_vm2, %v6023_v50 }
 0x670   :  { %v5198_v29 = vpop.permute.xlu2 %5197 }
 0x671   :  { %v4940_v58 = vpop.permute.xlu0 %4939 }
 0x672   :  { %v5588_v27 = vsel %vm2390_vm0, %v13984_v11, %v4940_v58  ;;  %v5573_v11 = vsel %vm2390_vm0, %v13977_v32, %v4910_v23  ;;  %v5454_v7 = vpop.permute.xlu1 %5453 }
 0x673   :  { %v5652_v40 = vsel %vm2455_vm1, %v5588_v27, %v5196_v28  ;;  %5467 = vrot.lane.b32.xlu1 %v4764_v38, %s8112_s28  ;;  %v5637_v6 = vsel %vm2455_vm1, %v5573_v11, %v5166_v35 }
 0x674   :  { %v5716_v15 = vsel %vm2520_vm2, %v5652_v40, %v5452_v47 }
 0x675   :  { %6769 = vmatmul.msk.f32.gmra.mxu3 %vm15248_vm5, %v5716_v15  ;;  %vm15260_vm5 = vmmov %vm15209_vm3 }
 0x676   :  { %5209 = vrot.lane.b32.xlu2 %v14241_v26, %s8111_s6  ;;  %v6026_v4 = vpop.f32.mrf.mxu2 }
 0x677   :  { %5435 = vrot.lane.b32.xlu0 %v13836_v41, %s8112_s28  ;;  %6162 = vst.msk [vmem:[%s14574_s5 + $0xe0] sm:$0xff] %vm2520_vm2, %v6026_v4  ;;  %v4636_v41 = vld [vmem:[#allocation2 + $0x320] sm:$0xff] }
 0x678   :  { %v4914_v45 = vpop.permute.xlu2 %4913 }
 0x679   :  { %v5422_v19 = vpop.permute.xlu0 %5421  ;;  %v5575_v46 = vsel %vm2390_vm0, %v14059_v24, %v4914_v45 }
 0x67a   :  { %v5701_v26 = vsel %vm2520_vm2, %v5637_v6, %v5422_v19  ;;  %v5170_v22 = vpop.permute.xlu1 %5169 }
 0x67b   :  { %6754 = vmatmul.msk.f32.gmra.mxu2 %vm15249_vm6, %v5701_v26  ;;  %vm15261_vm6 = vmmov %vm15209_vm3 }
 0x67e   :  { %4925 = vrot.lane.b32.xlu2 %v14156_v12, %s8110_s30  ;;  %v6029_v56 = vpop.f32.mrf.mxu2 }
 0x67f   :  { %4955 = vrot.lane.b32.xlu0 %v4636_v41, %s8110_s30  ;;  %6163 = vst.msk [vmem:[%s14574_s5 + $0xe8] sm:$0xff] %vm2520_vm2, %v6029_v56 }
 0x680   :  { %v5200_v32 = vpop.permute.xlu2 %5199 }
 0x681   :  { %v4942_v16 = vpop.permute.xlu0 %4941 }
 0x682   :  { %v5589_v17 = vsel %vm2390_vm0, %v14024_v39, %v4942_v16  ;;  %v5574_v39 = vsel %vm2390_vm0, %v14017_v62, %v4912_v18  ;;  %v5456_v21 = vpop.permute.xlu1 %5455 }
 0x683   :  { %v5653_v36 = vsel %vm2455_vm1, %v5589_v17, %v5198_v29  ;;  %v5638_v51 = vsel %vm2455_vm1, %v5574_v39, %v5168_v55 }
 0x684   :  { %v5717_v9 = vsel %vm2520_vm2, %v5653_v36, %v5454_v7 }
 0x685   :  { %6770 = vmatmul.msk.f32.gmra.mxu3 %vm15250_vm7, %v5717_v9  ;;  %vm15262_vm7 = vmmov %vm15209_vm3 }
 0x686   :  { %5211 = vrot.lane.b32.xlu2 %v14275_v14, %s8111_s6  ;;  %v6032_v12 = vpop.f32.mrf.mxu2 }
 0x687   :  { %5437 = vrot.lane.b32.xlu0 %v13876_v0, %s8112_s28  ;;  %6164 = vst.msk [vmem:[%s14574_s5 + $0xf0] sm:$0xff] %vm2520_vm2, %v6032_v12 }
 0x688   :  { %v4916_v23 = vpop.permute.xlu2 %4915 }
 0x689   :  { %v5424_v34 = vpop.permute.xlu0 %5423  ;;  %v5576_v29 = vsel %vm2390_vm0, %v14097_v43, %v4916_v23 }
 0x68a   :  { %v5702_v2 = vsel %vm2520_vm2, %v5638_v51, %v5424_v34  ;;  %v5172_v28 = vpop.permute.xlu1 %5171 }
 0x68b   :  { %6755 = vmatmul.msk.f32.gmra.mxu2 %vm15251_vm8, %v5702_v2  ;;  %v5640_v27 = vsel %vm2455_vm1, %v5576_v29, %v5172_v28  ;;  %vm15263_vm8 = vmmov %vm15209_vm3 }
 0x68e   :  { %v6035_v14 = vpop.f32.mrf.mxu2 }
 0x68f   :  { %6165 = vst.msk [vmem:[%s14574_s5 + $0xf8] sm:$0xff] %vm2520_vm2, %v6035_v14 }
 0x690   :  { %v5202_v0 = vpop.permute.xlu2 %5201 }
 0x691   :  { %v4944_v8 = vpop.permute.xlu0 %4943 }
 0x692   :  { %v5590_v62 = vsel %vm2390_vm0, %v14066_v49, %v4944_v8  ;;  %v5639_v49 = vsel %vm2455_vm1, %v5575_v46, %v5170_v22  ;;  %v5458_v20 = vpop.permute.xlu1 %5457 }
 0x693   :  { %v5654_v53 = vsel %vm2455_vm1, %v5590_v62, %v5200_v32 }
 0x694   :  { %v5718_v25 = vsel %vm2520_vm2, %v5654_v53, %v5456_v21 }
 0x695   :  { %6771 = vmatmul.msk.f32.gmra.mxu3 %vm15252_vm9, %v5718_v25  ;;  %vm15264_vm9 = vmmov %vm15209_vm3 }
 0x696   :  { %v6038_v35 = vpop.f32.mrf.mxu2 }
 0x697   :  { %6166 = vst.msk [vmem:[%s14574_s5 + $0x100] sm:$0xff] %vm2520_vm2, %v6038_v35 }
 0x698   :  { %v4918_v10 = vpop.permute.xlu2 %4917  ;;  %v6089_v1 = vpop.f32.mrf.mxu3 }
 0x699   :  { %v5426_v59 = vpop.permute.xlu0 %5425  ;;  %6183 = vst.msk [vmem:[%s14574_s5 + $0x188] sm:$0xff] %vm2520_vm2, %v6089_v1  ;;  %v5577_v26 = vsel %vm2390_vm0, %v14139_v57, %v4918_v10 }
 0x69a   :  { %v5703_v61 = vsel %vm2520_vm2, %v5639_v49, %v5426_v59  ;;  %v5174_v42 = vpop.permute.xlu1 %5173 }
 0x69b   :  { %6756 = vmatmul.msk.f32.gmra.mxu2 %vm15253_vm10, %v5703_v61  ;;  %v5641_v41 = vsel %vm2455_vm1, %v5577_v26, %v5174_v42 }
 0x69e   :  { %v6041_v18 = vpop.f32.mrf.mxu2 }
 0x69f   :  { %6167 = vst.msk [vmem:[%s14574_s5 + $0x108] sm:$0xff] %vm2520_vm2, %v6041_v18 }
 0x6a0   :  { %v5204_v37 = vpop.permute.xlu2 %5203 }
 0x6a1   :  { %v4946_v24 = vpop.permute.xlu0 %4945 }
 0x6a2   :  { %v5591_v60 = vsel %vm2390_vm0, %v14103_v31, %v4946_v24 }
 0x6a3   :  { %v5655_v47 = vsel %vm2455_vm1, %v5591_v60, %v5202_v0 }
 0x6a4   :  { %v5719_v33 = vsel %vm2520_vm2, %v5655_v47, %v5458_v20 }
 0x6a5   :  { %6772 = vmatmul.msk.f32.gmra.mxu3 %vm15254_vm11, %v5719_v33  ;;  %v5460_v40 = vpop.permute.xlu1 %5459 }
 0x6a6   :  { %v6044_v50 = vpop.f32.mrf.mxu2 }
 0x6a7   :  { %6168 = vst.msk [vmem:[%s14574_s5 + $0x110] sm:$0xff] %vm2520_vm2, %v6044_v50 }
 0x6a8   :  { %v6092_v58 = vpop.f32.mrf.mxu3  ;;  %v4920_v15 = vpop.permute.xlu2 %4919 }
 0x6a9   :  { %v5428_v31 = vpop.permute.xlu0 %5427  ;;  %6184 = vst.msk [vmem:[%s14574_s5 + $0x190] sm:$0xff] %vm2520_vm2, %v6092_v58  ;;  %v5578_v39 = vsel %vm2390_vm0, %v14182_v44, %v4920_v15 }
 0x6aa   :  { %v5704_v55 = vsel %vm2520_vm2, %v5640_v27, %v5428_v31 }
 0x6ab   :  { %6757 = vmatmul.msk.f32.gmra.mxu2 %vm15255_vm12, %v5704_v55 }
 0x6ad   :  { %v5176_v11 = vpop.permute.xlu1 %5175 }
 0x6ae   :  { %v6047_v38 = vpop.f32.mrf.mxu2  ;;  %v5642_v51 = vsel %vm2455_vm1, %v5578_v39, %v5176_v11 }
 0x6af   :  { %6169 = vst.msk [vmem:[%s14574_s5 + $0x118] sm:$0xff] %vm2520_vm2, %v6047_v38 }
 0x6b0   :  { %v5206_v19 = vpop.permute.xlu2 %5205 }
 0x6b1   :  { %v4948_v43 = vpop.permute.xlu0 %4947 }
 0x6b2   :  { %v5592_v4 = vsel %vm2390_vm0, %v14143_v63, %v4948_v43 }
 0x6b3   :  { %v5656_v45 = vsel %vm2455_vm1, %v5592_v4, %v5204_v37 }
 0x6b4   :  { %v5720_v6 = vsel %vm2520_vm2, %v5656_v45, %v5460_v40 }
 0x6b5   :  { %6773 = vmatmul.msk.f32.gmra.mxu3 %vm15256_vm13, %v5720_v6  ;;  %v5462_v32 = vpop.permute.xlu1 %5461 }
 0x6b8   :  { %v6095_v7 = vpop.f32.mrf.mxu3  ;;  %v4922_v57 = vpop.permute.xlu2 %4921 }
 0x6b9   :  { %v5430_v56 = vpop.permute.xlu0 %5429  ;;  %6185 = vst.msk [vmem:[%s14574_s5 + $0x198] sm:$0xff] %vm2520_vm2, %v6095_v7  ;;  %v5579_v25 = vsel %vm2390_vm0, %v14216_v54, %v4922_v57 }
 0x6ba   :  { %v5705_v63 = vsel %vm2520_vm2, %v5641_v41, %v5430_v56 }
 0x6bb   :  { %6758 = vmatmul.msk.f32.gmra.mxu2 %vm15257_vm14, %v5705_v63 }
 0x6bd   :  { %v5178_v36 = vpop.permute.xlu1 %5177 }
 0x6be   :  { %v6050_v16 = vpop.f32.mrf.mxu2  ;;  %v5643_v46 = vsel %vm2455_vm1, %v5579_v25, %v5178_v36 }
 0x6bf   :  { %6170 = vst.msk [vmem:[%s14574_s5 + $0x120] sm:$0xff] %vm2520_vm2, %v6050_v16 }
 0x6c1   :  { %v4950_v17 = vpop.permute.xlu0 %4949 }
 0x6c2   :  { %v5593_v22 = vsel %vm2390_vm0, %v14186_v5, %v4950_v17  ;;  %v5208_v5 = vpop.permute.xlu2 %5207 }
 0x6c3   :  { %v5657_v9 = vsel %vm2455_vm1, %v5593_v22, %v5206_v19 }
 0x6c4   :  { %v5721_v12 = vsel %vm2520_vm2, %v5657_v9, %v5462_v32 }
 0x6c5   :  { %6774 = vmatmul.msk.f32.gmra.mxu3 %vm15209_vm3, %v5721_v12  ;;  %v5464_v21 = vpop.permute.xlu1 %5463 }
 0x6c8   :  { %v6098_v23 = vpop.f32.mrf.mxu3 }
 0x6c9   :  { %v5432_v34 = vpop.permute.xlu0 %5431  ;;  %6186 = vst.msk [vmem:[%s14574_s5 + $0x1a0] sm:$0xff] %vm2520_vm2, %v6098_v23 }
 0x6ca   :  { %v5706_v2 = vsel %vm2520_vm2, %v5642_v51, %v5432_v34  ;;  %v4924_v28 = vpop.permute.xlu2 %4923 }
 0x6cb   :  { %6759 = vmatmul.msk.f32.gmra.mxu2 %vm15258_vm15, %v5706_v2  ;;  %v5580_v37 = vsel %vm2390_vm0, %v14250_v48, %v4924_v28 }
 0x6cd   :  { %v5180_v62 = vpop.permute.xlu1 %5179 }
 0x6ce   :  { %v6053_v14 = vpop.f32.mrf.mxu2  ;;  %v5644_v47 = vsel %vm2455_vm1, %v5580_v37, %v5180_v62 }
 0x6cf   :  { %6171 = vst.msk [vmem:[%s14574_s5 + $0x128] sm:$0xff] %vm2520_vm2, %v6053_v14 }
 0x6d1   :  { %v4952_v44 = vpop.permute.xlu0 %4951 }
 0x6d2   :  { %v5594_v0 = vsel %vm2390_vm0, %v14220_v30, %v4952_v44  ;;  %v5210_v49 = vpop.permute.xlu2 %5209 }
 0x6d3   :  { %v5658_v8 = vsel %vm2455_vm1, %v5594_v0, %v5208_v5 }
 0x6d4   :  { %v5722_v53 = vsel %vm2520_vm2, %v5658_v8, %v5464_v21 }
 0x6d5   :  { %6775 = vmatmul.msk.f32.gmra.mxu3 %vm15259_vm4, %v5722_v53  ;;  %v5466_v1 = vpop.permute.xlu1 %5465 }
 0x6d8   :  { %v6101_v35 = vpop.f32.mrf.mxu3 }
 0x6d9   :  { %v5434_v10 = vpop.permute.xlu0 %5433  ;;  %6187 = vst.msk [vmem:[%s14574_s5 + $0x1a8] sm:$0xff] %vm2520_vm2, %v6101_v35 }
 0x6da   :  { %v5707_v30 = vsel %vm2520_vm2, %v5643_v46, %v5434_v10  ;;  %v4926_v60 = vpop.permute.xlu2 %4925 }
 0x6db   :  { %6760 = vmatmul.msk.f32.gmra.mxu2 %vm15260_vm5, %v5707_v30  ;;  %v5581_v40 = vsel %vm2390_vm0, %v14284_v52, %v4926_v60 }
 0x6dd   :  { %v5182_v24 = vpop.permute.xlu1 %5181 }
 0x6de   :  { %v6056_v59 = vpop.f32.mrf.mxu2  ;;  %v5645_v38 = vsel %vm2455_vm1, %v5581_v40, %v5182_v24 }
 0x6df   :  { %6172 = vst.msk [vmem:[%s14574_s5 + $0x130] sm:$0xff] %vm2520_vm2, %v6056_v59 }
 0x6e1   :  { %v4954_v54 = vpop.permute.xlu0 %4953 }
 0x6e2   :  { %v5595_v61 = vsel %vm2390_vm0, %v14254_v13, %v4954_v54  ;;  %v5212_v58 = vpop.permute.xlu2 %5211 }
 0x6e3   :  { %v5659_v20 = vsel %vm2455_vm1, %v5595_v61, %v5210_v49 }
 0x6e4   :  { %v5723_v18 = vsel %vm2520_vm2, %v5659_v20, %v5466_v1 }
 0x6e5   :  { %6776 = vmatmul.msk.f32.gmra.mxu3 %vm15261_vm6, %v5723_v18  ;;  %v5468_v29 = vpop.permute.xlu1 %5467 }
 0x6e8   :  { %v6104_v42 = vpop.f32.mrf.mxu3 }
 0x6e9   :  { %v5436_v33 = vpop.permute.xlu0 %5435  ;;  %6188 = vst.msk [vmem:[%s14574_s5 + $0x1b0] sm:$0xff] %vm2520_vm2, %v6104_v42 }
 0x6ea   :  { %v5708_v13 = vsel %vm2520_vm2, %v5644_v47, %v5436_v33 }
 0x6eb   :  { %6761 = vmatmul.msk.f32.gmra.mxu2 %vm15262_vm7, %v5708_v13 }
 0x6ee   :  { %v6059_v50 = vpop.f32.mrf.mxu2 }
 0x6ef   :  { %6173 = vst.msk [vmem:[%s14574_s5 + $0x138] sm:$0xff] %vm2520_vm2, %v6059_v50 }
 0x6f1   :  { %v4956_v48 = vpop.permute.xlu0 %4955 }
 0x6f2   :  { %v5596_v27 = vsel %vm2390_vm0, %v14288_v3, %v4956_v48 }
 0x6f3   :  { %v5660_v31 = vsel %vm2455_vm1, %v5596_v27, %v5212_v58 }
 0x6f4   :  { %v5724_v55 = vsel %vm2520_vm2, %v5660_v31, %v5468_v29 }
 0x6f5   :  { %6777 = vmatmul.msk.f32.gmra.mxu3 %vm15263_vm8, %v5724_v55 }
 0x6f8   :  { %v6107_v15 = vpop.f32.mrf.mxu3 }
 0x6f9   :  { %v5438_v43 = vpop.permute.xlu0 %5437  ;;  %6189 = vst.msk [vmem:[%s14574_s5 + $0x1b8] sm:$0xff] %vm2520_vm2, %v6107_v15 }
 0x6fa   :  { %v5709_v3 = vsel %vm2520_vm2, %v5645_v38, %v5438_v43 }
 0x6fb   :  { %6762 = vmatmul.msk.f32.gmra.mxu2 %vm15264_vm9, %v5709_v3 }
 0x6fe   :  { %v6062_v4 = vpop.f32.mrf.mxu2 }
 0x6ff   :  { %6174 = vst.msk [vmem:[%s14574_s5 + $0x140] sm:$0xff] %vm2520_vm2, %v6062_v4 }
 0x708   :  { %v6110_v52 = vpop.f32.mrf.mxu3 }
 0x709   :  { %6190 = vst.msk [vmem:[%s14574_s5 + $0x1c0] sm:$0xff] %vm2520_vm2, %v6110_v52 }
 0x70e   :  { %v6065_v11 = vpop.f32.mrf.mxu2 }
 0x70f   :  { %6175 = vst.msk [vmem:[%s14574_s5 + $0x148] sm:$0xff] %vm2520_vm2, %v6065_v11 }
 0x718   :  { %v6113_v45 = vpop.f32.mrf.mxu3 }
 0x719   :  { %6191 = vst.msk [vmem:[%s14574_s5 + $0x1c8] sm:$0xff] %vm2520_vm2, %v6113_v45 }
 0x71e   :  { %v6068_v6 = vpop.f32.mrf.mxu2 }
 0x71f   :  { %6176 = vst.msk [vmem:[%s14574_s5 + $0x150] sm:$0xff] %vm2520_vm2, %v6068_v6 }
 0x728   :  { %v6116_v19 = vpop.f32.mrf.mxu3 }
 0x729   :  { %6192 = vst.msk [vmem:[%s14574_s5 + $0x1d0] sm:$0xff] %vm2520_vm2, %v6116_v19 }
 0x72e   :  { %v6071_v26 = vpop.f32.mrf.mxu2 }
 0x72f   :  { %6177 = vst.msk [vmem:[%s14574_s5 + $0x158] sm:$0xff] %vm2520_vm2, %v6071_v26 }
 0x738   :  { %v6119_v7 = vpop.f32.mrf.mxu3 }
 0x739   :  { %6193 = vst.msk [vmem:[%s14574_s5 + $0x1d8] sm:$0xff] %vm2520_vm2, %v6119_v7 }
 0x73e   :  { %v6074_v41 = vpop.f32.mrf.mxu2 }
 0x73f   :  { %6178 = vst.msk [vmem:[%s14574_s5 + $0x160] sm:$0xff] %vm2520_vm2, %v6074_v41 }
 0x748   :  { %v6122_v56 = vpop.f32.mrf.mxu3 }
 0x749   :  { %6194 = vst.msk [vmem:[%s14574_s5 + $0x1e0] sm:$0xff] %vm2520_vm2, %v6122_v56 }
 0x74e   :  { %v6077_v63 = vpop.f32.mrf.mxu2 }
 0x74f   :  { %6179 = vst.msk [vmem:[%s14574_s5 + $0x168] sm:$0xff] %vm2520_vm2, %v6077_v63 }
 0x758   :  { %v6125_v32 = vpop.f32.mrf.mxu3 }
 0x759   :  { %6195 = vst.msk [vmem:[%s14574_s5 + $0x1e8] sm:$0xff] %vm2520_vm2, %v6125_v32 }
 0x75e   :  { %v6080_v16 = vpop.f32.mrf.mxu2 }
 0x75f   :  { %6180 = vst.msk [vmem:[%s14574_s5 + $0x170] sm:$0xff] %vm2520_vm2, %v6080_v16 }
 0x768   :  { %v6128_v57 = vpop.f32.mrf.mxu3 }
 0x769   :  { %6196 = vst.msk [vmem:[%s14574_s5 + $0x1f0] sm:$0xff] %vm2520_vm2, %v6128_v57 }
 0x76e   :  { %v6083_v17 = vpop.f32.mrf.mxu2 }
 0x76f   :  { %6181 = vst.msk [vmem:[%s14574_s5 + $0x178] sm:$0xff] %vm2520_vm2, %v6083_v17 }
 0x778   :  { %v6131_v22 = vpop.f32.mrf.mxu3 }
 0x779   :  { %6197 = vst.msk [vmem:[%s14574_s5 + $0x1f8] sm:$0xff] %vm2520_vm2, %v6131_v22 }
 0x77e   :  { %v6086_v36 = vpop.f32.mrf.mxu2 }
 0x77f   :  { %6182 = vst.msk [vmem:[%s14574_s5 + $0x180] sm:$0xff] %vm2520_vm2, %v6086_v36 }

</bundles_post_ra>
